<compile_context>
chip_gen: v6e
topology: v6e:2x2x1
jax: 0.10.0
libtpu: 0.0.40
codegen_flags: <defaults>
</compile_context>

<pallas_src>
import functools

import jax
import jax.numpy as jnp
from jax.experimental import pallas as pl
from jax.experimental.pallas import tpu as pltpu

_BN_EPS = 1e-5


def _coord_channels(H, W):
    """AddCoords channels (2, H, W): xx varies along width, yy along height,
    both normalized to [-1, 1] (standard CoordConv convention, with_r=False)."""
    xx = jnp.broadcast_to(jnp.linspace(-1.0, 1.0, W)[None, :], (H, W))
    yy = jnp.broadcast_to(jnp.linspace(-1.0, 1.0, H)[:, None], (H, W))
    return jnp.stack([xx, yy], axis=0).astype(jnp.float32)


# ---------------------------------------------------------------------------
# Pallas kernel
# ---------------------------------------------------------------------------
def _conv3x3_bn(pad_ref, w_ref, bias_ref, relu):
    """'Same' 3x3 conv over a zero-padded (H+2, W+2, Cin) f32 scratch as nine
    shifted (H*W, Cin) @ (Cin, Cout) MXU matmuls with f32 accumulation.  The
    eval-mode BN scale is pre-folded into w_ref; bias_ref already contains the
    conv bias + CoordConv coordinate contribution + BN shift."""
    Hp, Wp, Cin = pad_ref.shape
    H, W = Hp - 2, Wp - 2
    Cout = w_ref.shape[-1]
    acc = jnp.zeros((H * W, Cout), jnp.float32)
    for kh in range(3):
        for kw in range(3):
            tap = pad_ref[pl.ds(kh, H), pl.ds(kw, W), :]        # (H, W, Cin) f32
            tap = tap.reshape(H * W, Cin).astype(jnp.bfloat16)  # bf16 into the MXU
            acc = acc + jnp.dot(tap, w_ref[kh * 3 + kw],
                                preferred_element_type=jnp.float32)
    y = acc.reshape(H, W, Cout) + bias_ref[...]
    if relu:
        y = jnp.maximum(y, 0.0)
    return y


def _coordnet_kernel(H, W, x_ref,
                     w0_ref, b0_ref, w1_ref, b1_ref, w2_ref, b2_ref,
                     out_ref, pad0, pad1, pad2):
    # Zero the padded scratch every step (cheap vs. the matmuls, and safe under
    # megacore sharding of the "parallel" batch axis, unlike program_id==0 init).
    pad0[...] = jnp.zeros_like(pad0)
    pad1[...] = jnp.zeros_like(pad1)
    pad2[...] = jnp.zeros_like(pad2)

    # Layer 0: CoordConv(C0 -> 32) + BN + ReLU.  Input arrives bf16 (halved HBM
    # traffic); widen to f32 in VMEM for robust slicing, re-cast to bf16 at the dot.
    pad0[pl.ds(1, H), pl.ds(1, W), :] = x_ref[0].astype(jnp.float32)
    a0 = _conv3x3_bn(pad0, w0_ref, b0_ref, relu=True)

    # Layer 1: CoordConv(32 -> 64) + BN + ReLU.
    pad1[pl.ds(1, H), pl.ds(1, W), :] = a0
    a1 = _conv3x3_bn(pad1, w1_ref, b1_ref, relu=True)

    # Layer 2: CoordConv(64 -> 128) + BN (no ReLU on the last block).
    pad2[pl.ds(1, H), pl.ds(1, W), :] = a1
    a2 = _conv3x3_bn(pad2, w2_ref, b2_ref, relu=False)

    out_ref[0] = a2.astype(out_ref.dtype)


# ---------------------------------------------------------------------------
# Parameter preparation (wrapper-side, pure JAX/XLA)
# ---------------------------------------------------------------------------
def _prepare_kernel_params(params, H, W):
    """Fold CoordConv coordinate channels, conv bias and eval-mode BN into
    per-layer (9, Cin, Cout) bf16 weights and an (H, W, Cout) f32 bias map."""
    coords = _coord_channels(H, W)[None]                      # (1, 2, H, W)
    prepared = []
    for p in params:
        w = p["w"]                                            # (Cout, Cin+2, 3, 3)
        Cout, Cin2 = w.shape[0], w.shape[1]
        Cin = Cin2 - 2
        w_img, w_coord = w[:, :Cin], w[:, Cin:]
        s = p["gamma"] / jnp.sqrt(p["var"] + _BN_EPS)         # BN scale (Cout,)
        shift = p["beta"] - s * p["mean"]                     # BN shift (Cout,)
        # Input-independent contribution of the two coordinate channels.
        cmap = jax.lax.conv_general_dilated(
            coords, w_coord, window_strides=(1, 1), padding=((1, 1), (1, 1)),
            dimension_numbers=("NCHW", "OIHW", "NCHW"))[0]    # (Cout, H, W)
        bias_map = (s[:, None, None] * (cmap + p["b"][:, None, None])
                    + shift[:, None, None])                   # (Cout, H, W)
        bias_map = jnp.transpose(bias_map, (1, 2, 0)).astype(jnp.float32)
        # (3,3,Cin,Cout) with the BN scale folded in, flattened to (9,Cin,Cout).
        w_eff = jnp.transpose(w_img, (2, 3, 1, 0)) * s[None, None, None, :]
        w_eff = w_eff.reshape(9, Cin, Cout).astype(jnp.bfloat16)
        prepared.append((w_eff, bias_map))
    return prepared


# ---------------------------------------------------------------------------
# Forward wrapper
# ---------------------------------------------------------------------------
@jax.jit
def coordnet_forward(x, params):
    """x: (B, C_in, H, W) float32 (NCHW, like PyTorch). Returns (B, 128, H, W) f32."""
    B, C0, H, W = x.shape
    (w0, b0), (w1, b1), (w2, b2) = _prepare_kernel_params(params, H, W)
    c1, c2, c3 = w0.shape[-1], w1.shape[-1], w2.shape[-1]

    x_nhwc = jnp.transpose(x, (0, 2, 3, 1)).astype(jnp.bfloat16)   # (B, H, W, C0)

    kernel = functools.partial(_coordnet_kernel, H, W)
    const = lambda i: (0, 0, 0)      # weights / bias maps stay VMEM-resident

    out_nhwc = pl.pallas_call(
        kernel,
        out_shape=jax.ShapeDtypeStruct((B, H, W, c3), jnp.float32),
        grid=(B,),
        in_specs=[
            pl.BlockSpec((1, H, W, C0), lambda i: (i, 0, 0, 0)),
            pl.BlockSpec(w0.shape, const), pl.BlockSpec(b0.shape, const),
            pl.BlockSpec(w1.shape, const), pl.BlockSpec(b1.shape, const),
            pl.BlockSpec(w2.shape, const), pl.BlockSpec(b2.shape, const),
        ],
        out_specs=pl.BlockSpec((1, H, W, c3), lambda i: (i, 0, 0, 0)),
        scratch_shapes=[
            pltpu.VMEM((H + 2, W + 2, C0), jnp.float32),
            pltpu.VMEM((H + 2, W + 2, c1), jnp.float32),
            pltpu.VMEM((H + 2, W + 2, c2), jnp.float32),
        ],
        compiler_params=pltpu.CompilerParams(
            dimension_semantics=("parallel",)),
    )(x_nhwc, w0, b0, w1, b1, w2, b2)

    return jnp.transpose(out_nhwc, (0, 3, 1, 2))                   # back to NCHW


# ---------------------------------------------------------------------------
# Faithful f32 reference + deterministic init
# ---------------------------------------------------------------------------
def coordnet_reference(x, params):
    """Faithful reference: AddCoords -> Conv2d(3x3, pad 1) -> BN(eval) -> ReLU."""
    B, _, H, W = x.shape
    coords = _coord_channels(H, W)
    out = x.astype(jnp.float32)
    n = len(params)
    for i, p in enumerate(params):
        inp = jnp.concatenate(
            [out, jnp.broadcast_to(coords[None], (B, 2, H, W))], axis=1)
        y = jax.lax.conv_general_dilated(
            inp, p["w"], window_strides=(1, 1), padding=((1, 1), (1, 1)),
            dimension_numbers=("NCHW", "OIHW", "NCHW"))
        y = y + p["b"][None, :, None, None]
        s = p["gamma"] / jnp.sqrt(p["var"] + _BN_EPS)
        y = (s[None, :, None, None] * (y - p["mean"][None, :, None, None])
             + p["beta"][None, :, None, None])
        if i < n - 1:
            y = jnp.maximum(y, 0.0)
        out = y
    return out


def init_coordnet_params(in_channels=88, seed=0):
    """Conv2d-style U(-1/sqrt(fan_in), 1/sqrt(fan_in)) weights; randomized
    eval-mode BN stats so the BN folding is actually exercised."""
    channels = [in_channels, 32, 64, 128]
    key = jax.random.PRNGKey(seed)
    params = []
    for cin, cout in zip(channels[:-1], channels[1:]):
        bound = ((cin + 2) * 9) ** -0.5
        key, kw, kb, kg, kbe, km, kv = jax.random.split(key, 7)
        params.append(dict(
            w=jax.random.uniform(kw, (cout, cin + 2, 3, 3), jnp.float32, -bound, bound),
            b=jax.random.uniform(kb, (cout,), jnp.float32, -bound, bound),
            gamma=jax.random.uniform(kg, (cout,), jnp.float32, 0.8, 1.2),
            beta=0.1 * jax.random.normal(kbe, (cout,), jnp.float32),
            mean=0.1 * jax.random.normal(km, (cout,), jnp.float32),
            var=jax.random.uniform(kv, (cout,), jnp.float32, 0.8, 1.2),
        ))
    return params


if __name__ == "__main__":
    B, C_IN, H, W = 2, 88, 16, 16
    x = jax.random.normal(jax.random.PRNGKey(0), (B, C_IN, H, W), jnp.float32)
    params = init_coordnet_params(C_IN, seed=0)

    out = coordnet_forward(x, params)
    out = jax.block_until_ready(out)
    assert out.shape == (B, 128, H, W), out.shape

    ref = coordnet_reference(x, params)
    max_err = float(jnp.max(jnp.abs(out - ref)))
    # bf16 inputs/weights with f32 accumulation vs. an all-f32 reference.
    assert jnp.allclose(out, ref, atol=5e-2, rtol=5e-2), f"max_abs_err={max_err}"

    print("KERNEL_OK")
</pallas_src>

<mosaic_0001>
module attributes {stable_mosaic.version = 11 : i64} {
  func.func @_coordnet_kernel(%arg0: i32, %arg1: memref<1x16x16x88xbf16, #tpu.memory_space<vmem>>, %arg2: memref<9x88x32xbf16, #tpu.memory_space<vmem>>, %arg3: memref<16x16x32xf32, #tpu.memory_space<vmem>>, %arg4: memref<9x32x64xbf16, #tpu.memory_space<vmem>>, %arg5: memref<16x16x64xf32, #tpu.memory_space<vmem>>, %arg6: memref<9x64x128xbf16, #tpu.memory_space<vmem>>, %arg7: memref<16x16x128xf32, #tpu.memory_space<vmem>>, %arg8: memref<1x16x16x128xf32, #tpu.memory_space<vmem>>, %arg9: memref<18x18x88xf32, #tpu.memory_space<vmem>>, %arg10: memref<18x18x32xf32, #tpu.memory_space<vmem>>, %arg11: memref<18x18x64xf32, #tpu.memory_space<vmem>>) attributes {dimension_semantics = [#tpu.dimension_semantics<parallel>], iteration_bounds = array<i64: 2>, scalar_prefetch = 0 : i64, scratch_operands = 3 : i64, tpu.core_type = #tpu.core_type<tc>, window_params = [{transform_indices = @transform_0, window_bounds = array<i64: 1, 16, 16, 88>}, {pipeline_mode = #tpu.pipeline_mode<synchronous>, transform_indices = @transform_1, window_bounds = array<i64: 9, 88, 32>}, {pipeline_mode = #tpu.pipeline_mode<synchronous>, transform_indices = @transform_2, window_bounds = array<i64: 16, 16, 32>}, {pipeline_mode = #tpu.pipeline_mode<synchronous>, transform_indices = @transform_3, window_bounds = array<i64: 9, 32, 64>}, {pipeline_mode = #tpu.pipeline_mode<synchronous>, transform_indices = @transform_4, window_bounds = array<i64: 16, 16, 64>}, {pipeline_mode = #tpu.pipeline_mode<synchronous>, transform_indices = @transform_5, window_bounds = array<i64: 9, 64, 128>}, {pipeline_mode = #tpu.pipeline_mode<synchronous>, transform_indices = @transform_6, window_bounds = array<i64: 16, 16, 128>}, {transform_indices = @transform_7, window_bounds = array<i64: 1, 16, 16, 128>}]} {
    %cst = arith.constant 0.000000e+00 : f32
    %0 = vector.broadcast %cst : f32 to vector<18x18x88xf32>
    %c0 = arith.constant 0 : index
    %c0_0 = arith.constant 0 : index
    %c0_1 = arith.constant 0 : index
    %1 = vector.load %arg9[%c0, %c0_0, %c0_1] : memref<18x18x88xf32, #tpu.memory_space<vmem>>, vector<18x18x88xf32>
    tpu.vector_store %arg9[%c0, %c0_0, %c0_1], %0 {strides = array<i32>} : memref<18x18x88xf32, #tpu.memory_space<vmem>>, vector<18x18x88xf32>,
    %cst_2 = arith.constant 0.000000e+00 : f32
    %2 = vector.broadcast %cst_2 : f32 to vector<18x18x32xf32>
    %c0_3 = arith.constant 0 : index
    %c0_4 = arith.constant 0 : index
    %c0_5 = arith.constant 0 : index
    %3 = vector.load %arg10[%c0_3, %c0_4, %c0_5] : memref<18x18x32xf32, #tpu.memory_space<vmem>>, vector<18x18x32xf32>
    tpu.vector_store %arg10[%c0_3, %c0_4, %c0_5], %2 {strides = array<i32>} : memref<18x18x32xf32, #tpu.memory_space<vmem>>, vector<18x18x32xf32>,
    %cst_6 = arith.constant 0.000000e+00 : f32
    %4 = vector.broadcast %cst_6 : f32 to vector<18x18x64xf32>
    %c0_7 = arith.constant 0 : index
    %c0_8 = arith.constant 0 : index
    %c0_9 = arith.constant 0 : index
    %5 = vector.load %arg11[%c0_7, %c0_8, %c0_9] : memref<18x18x64xf32, #tpu.memory_space<vmem>>, vector<18x18x64xf32>
    tpu.vector_store %arg11[%c0_7, %c0_8, %c0_9], %4 {strides = array<i32>} : memref<18x18x64xf32, #tpu.memory_space<vmem>>, vector<18x18x64xf32>,
    %c0_10 = arith.constant 0 : index
    %c0_11 = arith.constant 0 : index
    %c0_12 = arith.constant 0 : index
    %c0_13 = arith.constant 0 : index
    %6 = vector.load %arg1[%c0_10, %c0_11, %c0_12, %c0_13] : memref<1x16x16x88xbf16, #tpu.memory_space<vmem>>, vector<1x16x16x88xbf16>
    %7 = vector.shape_cast %6 : vector<1x16x16x88xbf16> to vector<16x16x88xbf16>
    %8 = arith.extf %7 : vector<16x16x88xbf16> to vector<16x16x88xf32>
    %c1 = arith.constant 1 : index
    %c1_14 = arith.constant 1 : index
    %c0_15 = arith.constant 0 : index
    %9 = vector.load %arg9[%c1, %c1_14, %c0_15] : memref<18x18x88xf32, #tpu.memory_space<vmem>>, vector<16x16x88xf32>
    tpu.vector_store %arg9[%c1, %c1_14, %c0_15], %8 {strides = array<i32>} : memref<18x18x88xf32, #tpu.memory_space<vmem>>, vector<16x16x88xf32>,
    %cst_16 = arith.constant 0.000000e+00 : f32
    %10 = vector.broadcast %cst_16 : f32 to vector<256x32xf32>
    %c0_17 = arith.constant 0 : index
    %c0_18 = arith.constant 0 : index
    %c0_19 = arith.constant 0 : index
    %11 = vector.load %arg9[%c0_17, %c0_18, %c0_19] : memref<18x18x88xf32, #tpu.memory_space<vmem>>, vector<16x16x88xf32>
    %12 = vector.shape_cast %11 : vector<16x16x88xf32> to vector<256x88xf32>
    %13 = arith.truncf %12 : vector<256x88xf32> to vector<256x88xbf16>
    %c0_20 = arith.constant 0 : index
    %c0_21 = arith.constant 0 : index
    %c0_22 = arith.constant 0 : index
    %14 = vector.load %arg2[%c0_20, %c0_21, %c0_22] : memref<9x88x32xbf16, #tpu.memory_space<vmem>>, vector<1x88x32xbf16>
    %15 = vector.shape_cast %14 : vector<1x88x32xbf16> to vector<88x32xbf16>
    %cst_23 = arith.constant dense<0.000000e+00> : vector<256x32xf32>
    %16 = tpu.matmul %13, %15, %cst_23 {dimension_numbers = #tpu.dot_dimension_numbers<[1], [0], [0], [1], [0, 0, 1, 1], [], []>} : vector<256x88xbf16>, vector<88x32xbf16>, vector<256x32xf32> -> vector<256x32xf32>
    %17 = arith.addf %10, %16 : vector<256x32xf32>
    %c0_24 = arith.constant 0 : index
    %c1_25 = arith.constant 1 : index
    %c0_26 = arith.constant 0 : index
    %18 = vector.load %arg9[%c0_24, %c1_25, %c0_26] : memref<18x18x88xf32, #tpu.memory_space<vmem>>, vector<16x16x88xf32>
    %19 = vector.shape_cast %18 : vector<16x16x88xf32> to vector<256x88xf32>
    %20 = arith.truncf %19 : vector<256x88xf32> to vector<256x88xbf16>
    %c1_27 = arith.constant 1 : index
    %c0_28 = arith.constant 0 : index
    %c0_29 = arith.constant 0 : index
    %21 = vector.load %arg2[%c1_27, %c0_28, %c0_29] : memref<9x88x32xbf16, #tpu.memory_space<vmem>>, vector<1x88x32xbf16>
    %22 = vector.shape_cast %21 : vector<1x88x32xbf16> to vector<88x32xbf16>
    %cst_30 = arith.constant dense<0.000000e+00> : vector<256x32xf32>
    %23 = tpu.matmul %20, %22, %cst_30 {dimension_numbers = #tpu.dot_dimension_numbers<[1], [0], [0], [1], [0, 0, 1, 1], [], []>} : vector<256x88xbf16>, vector<88x32xbf16>, vector<256x32xf32> -> vector<256x32xf32>
    %24 = arith.addf %17, %23 : vector<256x32xf32>
    %c0_31 = arith.constant 0 : index
    %c2 = arith.constant 2 : index
    %c0_32 = arith.constant 0 : index
    %25 = vector.load %arg9[%c0_31, %c2, %c0_32] : memref<18x18x88xf32, #tpu.memory_space<vmem>>, vector<16x16x88xf32>
    %26 = vector.shape_cast %25 : vector<16x16x88xf32> to vector<256x88xf32>
    %27 = arith.truncf %26 : vector<256x88xf32> to vector<256x88xbf16>
    %c2_33 = arith.constant 2 : index
    %c0_34 = arith.constant 0 : index
    %c0_35 = arith.constant 0 : index
    %28 = vector.load %arg2[%c2_33, %c0_34, %c0_35] : memref<9x88x32xbf16, #tpu.memory_space<vmem>>, vector<1x88x32xbf16>
    %29 = vector.shape_cast %28 : vector<1x88x32xbf16> to vector<88x32xbf16>
    %cst_36 = arith.constant dense<0.000000e+00> : vector<256x32xf32>
    %30 = tpu.matmul %27, %29, %cst_36 {dimension_numbers = #tpu.dot_dimension_numbers<[1], [0], [0], [1], [0, 0, 1, 1], [], []>} : vector<256x88xbf16>, vector<88x32xbf16>, vector<256x32xf32> -> vector<256x32xf32>
    %31 = arith.addf %24, %30 : vector<256x32xf32>
    %c1_37 = arith.constant 1 : index
    %c0_38 = arith.constant 0 : index
    %c0_39 = arith.constant 0 : index
    %32 = vector.load %arg9[%c1_37, %c0_38, %c0_39] : memref<18x18x88xf32, #tpu.memory_space<vmem>>, vector<16x16x88xf32>
    %33 = vector.shape_cast %32 : vector<16x16x88xf32> to vector<256x88xf32>
    %34 = arith.truncf %33 : vector<256x88xf32> to vector<256x88xbf16>
    %c3 = arith.constant 3 : index
    %c0_40 = arith.constant 0 : index
    %c0_41 = arith.constant 0 : index
    %35 = vector.load %arg2[%c3, %c0_40, %c0_41] : memref<9x88x32xbf16, #tpu.memory_space<vmem>>, vector<1x88x32xbf16>
    %36 = vector.shape_cast %35 : vector<1x88x32xbf16> to vector<88x32xbf16>
    %cst_42 = arith.constant dense<0.000000e+00> : vector<256x32xf32>
    %37 = tpu.matmul %34, %36, %cst_42 {dimension_numbers = #tpu.dot_dimension_numbers<[1], [0], [0], [1], [0, 0, 1, 1], [], []>} : vector<256x88xbf16>, vector<88x32xbf16>, vector<256x32xf32> -> vector<256x32xf32>
    %38 = arith.addf %31, %37 : vector<256x32xf32>
    %c1_43 = arith.constant 1 : index
    %c1_44 = arith.constant 1 : index
    %c0_45 = arith.constant 0 : index
    %39 = vector.load %arg9[%c1_43, %c1_44, %c0_45] : memref<18x18x88xf32, #tpu.memory_space<vmem>>, vector<16x16x88xf32>
    %40 = vector.shape_cast %39 : vector<16x16x88xf32> to vector<256x88xf32>
    %41 = arith.truncf %40 : vector<256x88xf32> to vector<256x88xbf16>
    %c4 = arith.constant 4 : index
    %c0_46 = arith.constant 0 : index
    %c0_47 = arith.constant 0 : index
    %42 = vector.load %arg2[%c4, %c0_46, %c0_47] : memref<9x88x32xbf16, #tpu.memory_space<vmem>>, vector<1x88x32xbf16>
    %43 = vector.shape_cast %42 : vector<1x88x32xbf16> to vector<88x32xbf16>
    %cst_48 = arith.constant dense<0.000000e+00> : vector<256x32xf32>
    %44 = tpu.matmul %41, %43, %cst_48 {dimension_numbers = #tpu.dot_dimension_numbers<[1], [0], [0], [1], [0, 0, 1, 1], [], []>} : vector<256x88xbf16>, vector<88x32xbf16>, vector<256x32xf32> -> vector<256x32xf32>
    %45 = arith.addf %38, %44 : vector<256x32xf32>
    %c1_49 = arith.constant 1 : index
    %c2_50 = arith.constant 2 : index
    %c0_51 = arith.constant 0 : index
    %46 = vector.load %arg9[%c1_49, %c2_50, %c0_51] : memref<18x18x88xf32, #tpu.memory_space<vmem>>, vector<16x16x88xf32>
    %47 = vector.shape_cast %46 : vector<16x16x88xf32> to vector<256x88xf32>
    %48 = arith.truncf %47 : vector<256x88xf32> to vector<256x88xbf16>
    %c5 = arith.constant 5 : index
    %c0_52 = arith.constant 0 : index
    %c0_53 = arith.constant 0 : index
    %49 = vector.load %arg2[%c5, %c0_52, %c0_53] : memref<9x88x32xbf16, #tpu.memory_space<vmem>>, vector<1x88x32xbf16>
    %50 = vector.shape_cast %49 : vector<1x88x32xbf16> to vector<88x32xbf16>
    %cst_54 = arith.constant dense<0.000000e+00> : vector<256x32xf32>
    %51 = tpu.matmul %48, %50, %cst_54 {dimension_numbers = #tpu.dot_dimension_numbers<[1], [0], [0], [1], [0, 0, 1, 1], [], []>} : vector<256x88xbf16>, vector<88x32xbf16>, vector<256x32xf32> -> vector<256x32xf32>
    %52 = arith.addf %45, %51 : vector<256x32xf32>
    %c2_55 = arith.constant 2 : index
    %c0_56 = arith.constant 0 : index
    %c0_57 = arith.constant 0 : index
    %53 = vector.load %arg9[%c2_55, %c0_56, %c0_57] : memref<18x18x88xf32, #tpu.memory_space<vmem>>, vector<16x16x88xf32>
    %54 = vector.shape_cast %53 : vector<16x16x88xf32> to vector<256x88xf32>
    %55 = arith.truncf %54 : vector<256x88xf32> to vector<256x88xbf16>
    %c6 = arith.constant 6 : index
    %c0_58 = arith.constant 0 : index
    %c0_59 = arith.constant 0 : index
    %56 = vector.load %arg2[%c6, %c0_58, %c0_59] : memref<9x88x32xbf16, #tpu.memory_space<vmem>>, vector<1x88x32xbf16>
    %57 = vector.shape_cast %56 : vector<1x88x32xbf16> to vector<88x32xbf16>
    %cst_60 = arith.constant dense<0.000000e+00> : vector<256x32xf32>
    %58 = tpu.matmul %55, %57, %cst_60 {dimension_numbers = #tpu.dot_dimension_numbers<[1], [0], [0], [1], [0, 0, 1, 1], [], []>} : vector<256x88xbf16>, vector<88x32xbf16>, vector<256x32xf32> -> vector<256x32xf32>
    %59 = arith.addf %52, %58 : vector<256x32xf32>
    %c2_61 = arith.constant 2 : index
    %c1_62 = arith.constant 1 : index
    %c0_63 = arith.constant 0 : index
    %60 = vector.load %arg9[%c2_61, %c1_62, %c0_63] : memref<18x18x88xf32, #tpu.memory_space<vmem>>, vector<16x16x88xf32>
    %61 = vector.shape_cast %60 : vector<16x16x88xf32> to vector<256x88xf32>
    %62 = arith.truncf %61 : vector<256x88xf32> to vector<256x88xbf16>
    %c7 = arith.constant 7 : index
    %c0_64 = arith.constant 0 : index
    %c0_65 = arith.constant 0 : index
    %63 = vector.load %arg2[%c7, %c0_64, %c0_65] : memref<9x88x32xbf16, #tpu.memory_space<vmem>>, vector<1x88x32xbf16>
    %64 = vector.shape_cast %63 : vector<1x88x32xbf16> to vector<88x32xbf16>
    %cst_66 = arith.constant dense<0.000000e+00> : vector<256x32xf32>
    %65 = tpu.matmul %62, %64, %cst_66 {dimension_numbers = #tpu.dot_dimension_numbers<[1], [0], [0], [1], [0, 0, 1, 1], [], []>} : vector<256x88xbf16>, vector<88x32xbf16>, vector<256x32xf32> -> vector<256x32xf32>
    %66 = arith.addf %59, %65 : vector<256x32xf32>
    %c2_67 = arith.constant 2 : index
    %c2_68 = arith.constant 2 : index
    %c0_69 = arith.constant 0 : index
    %67 = vector.load %arg9[%c2_67, %c2_68, %c0_69] : memref<18x18x88xf32, #tpu.memory_space<vmem>>, vector<16x16x88xf32>
    %68 = vector.shape_cast %67 : vector<16x16x88xf32> to vector<256x88xf32>
    %69 = arith.truncf %68 : vector<256x88xf32> to vector<256x88xbf16>
    %c8 = arith.constant 8 : index
    %c0_70 = arith.constant 0 : index
    %c0_71 = arith.constant 0 : index
    %70 = vector.load %arg2[%c8, %c0_70, %c0_71] : memref<9x88x32xbf16, #tpu.memory_space<vmem>>, vector<1x88x32xbf16>
    %71 = vector.shape_cast %70 : vector<1x88x32xbf16> to vector<88x32xbf16>
    %cst_72 = arith.constant dense<0.000000e+00> : vector<256x32xf32>
    %72 = tpu.matmul %69, %71, %cst_72 {dimension_numbers = #tpu.dot_dimension_numbers<[1], [0], [0], [1], [0, 0, 1, 1], [], []>} : vector<256x88xbf16>, vector<88x32xbf16>, vector<256x32xf32> -> vector<256x32xf32>
    %73 = arith.addf %66, %72 : vector<256x32xf32>
    %74 = vector.shape_cast %73 : vector<256x32xf32> to vector<16x16x32xf32>
    %c0_73 = arith.constant 0 : index
    %c0_74 = arith.constant 0 : index
    %c0_75 = arith.constant 0 : index
    %75 = vector.load %arg3[%c0_73, %c0_74, %c0_75] : memref<16x16x32xf32, #tpu.memory_space<vmem>>, vector<16x16x32xf32>
    %76 = arith.addf %74, %75 : vector<16x16x32xf32>
    %cst_76 = arith.constant 0.000000e+00 : f32
    %77 = vector.broadcast %cst_76 : f32 to vector<16x16x32xf32>
    %78 = arith.maximumf %76, %77 : vector<16x16x32xf32>
    %c1_77 = arith.constant 1 : index
    %c1_78 = arith.constant 1 : index
    %c0_79 = arith.constant 0 : index
    %79 = vector.load %arg10[%c1_77, %c1_78, %c0_79] : memref<18x18x32xf32, #tpu.memory_space<vmem>>, vector<16x16x32xf32>
    tpu.vector_store %arg10[%c1_77, %c1_78, %c0_79], %78 {strides = array<i32>} : memref<18x18x32xf32, #tpu.memory_space<vmem>>, vector<16x16x32xf32>,
    %cst_80 = arith.constant 0.000000e+00 : f32
    %80 = vector.broadcast %cst_80 : f32 to vector<256x64xf32>
    %c0_81 = arith.constant 0 : index
    %c0_82 = arith.constant 0 : index
    %c0_83 = arith.constant 0 : index
    %81 = vector.load %arg10[%c0_81, %c0_82, %c0_83] : memref<18x18x32xf32, #tpu.memory_space<vmem>>, vector<16x16x32xf32>
    %82 = vector.shape_cast %81 : vector<16x16x32xf32> to vector<256x32xf32>
    %83 = arith.truncf %82 : vector<256x32xf32> to vector<256x32xbf16>
    %c0_84 = arith.constant 0 : index
    %c0_85 = arith.constant 0 : index
    %c0_86 = arith.constant 0 : index
    %84 = vector.load %arg4[%c0_84, %c0_85, %c0_86] : memref<9x32x64xbf16, #tpu.memory_space<vmem>>, vector<1x32x64xbf16>
    %85 = vector.shape_cast %84 : vector<1x32x64xbf16> to vector<32x64xbf16>
    %cst_87 = arith.constant dense<0.000000e+00> : vector<256x64xf32>
    %86 = tpu.matmul %83, %85, %cst_87 {dimension_numbers = #tpu.dot_dimension_numbers<[1], [0], [0], [1], [0, 0, 1, 1], [], []>} : vector<256x32xbf16>, vector<32x64xbf16>, vector<256x64xf32> -> vector<256x64xf32>
    %87 = arith.addf %80, %86 : vector<256x64xf32>
    %c0_88 = arith.constant 0 : index
    %c1_89 = arith.constant 1 : index
    %c0_90 = arith.constant 0 : index
    %88 = vector.load %arg10[%c0_88, %c1_89, %c0_90] : memref<18x18x32xf32, #tpu.memory_space<vmem>>, vector<16x16x32xf32>
    %89 = vector.shape_cast %88 : vector<16x16x32xf32> to vector<256x32xf32>
    %90 = arith.truncf %89 : vector<256x32xf32> to vector<256x32xbf16>
    %c1_91 = arith.constant 1 : index
    %c0_92 = arith.constant 0 : index
    %c0_93 = arith.constant 0 : index
    %91 = vector.load %arg4[%c1_91, %c0_92, %c0_93] : memref<9x32x64xbf16, #tpu.memory_space<vmem>>, vector<1x32x64xbf16>
    %92 = vector.shape_cast %91 : vector<1x32x64xbf16> to vector<32x64xbf16>
    %cst_94 = arith.constant dense<0.000000e+00> : vector<256x64xf32>
    %93 = tpu.matmul %90, %92, %cst_94 {dimension_numbers = #tpu.dot_dimension_numbers<[1], [0], [0], [1], [0, 0, 1, 1], [], []>} : vector<256x32xbf16>, vector<32x64xbf16>, vector<256x64xf32> -> vector<256x64xf32>
    %94 = arith.addf %87, %93 : vector<256x64xf32>
    %c0_95 = arith.constant 0 : index
    %c2_96 = arith.constant 2 : index
    %c0_97 = arith.constant 0 : index
    %95 = vector.load %arg10[%c0_95, %c2_96, %c0_97] : memref<18x18x32xf32, #tpu.memory_space<vmem>>, vector<16x16x32xf32>
    %96 = vector.shape_cast %95 : vector<16x16x32xf32> to vector<256x32xf32>
    %97 = arith.truncf %96 : vector<256x32xf32> to vector<256x32xbf16>
    %c2_98 = arith.constant 2 : index
    %c0_99 = arith.constant 0 : index
    %c0_100 = arith.constant 0 : index
    %98 = vector.load %arg4[%c2_98, %c0_99, %c0_100] : memref<9x32x64xbf16, #tpu.memory_space<vmem>>, vector<1x32x64xbf16>
    %99 = vector.shape_cast %98 : vector<1x32x64xbf16> to vector<32x64xbf16>
    %cst_101 = arith.constant dense<0.000000e+00> : vector<256x64xf32>
    %100 = tpu.matmul %97, %99, %cst_101 {dimension_numbers = #tpu.dot_dimension_numbers<[1], [0], [0], [1], [0, 0, 1, 1], [], []>} : vector<256x32xbf16>, vector<32x64xbf16>, vector<256x64xf32> -> vector<256x64xf32>
    %101 = arith.addf %94, %100 : vector<256x64xf32>
    %c1_102 = arith.constant 1 : index
    %c0_103 = arith.constant 0 : index
    %c0_104 = arith.constant 0 : index
    %102 = vector.load %arg10[%c1_102, %c0_103, %c0_104] : memref<18x18x32xf32, #tpu.memory_space<vmem>>, vector<16x16x32xf32>
    %103 = vector.shape_cast %102 : vector<16x16x32xf32> to vector<256x32xf32>
    %104 = arith.truncf %103 : vector<256x32xf32> to vector<256x32xbf16>
    %c3_105 = arith.constant 3 : index
    %c0_106 = arith.constant 0 : index
    %c0_107 = arith.constant 0 : index
    %105 = vector.load %arg4[%c3_105, %c0_106, %c0_107] : memref<9x32x64xbf16, #tpu.memory_space<vmem>>, vector<1x32x64xbf16>
    %106 = vector.shape_cast %105 : vector<1x32x64xbf16> to vector<32x64xbf16>
    %cst_108 = arith.constant dense<0.000000e+00> : vector<256x64xf32>
    %107 = tpu.matmul %104, %106, %cst_108 {dimension_numbers = #tpu.dot_dimension_numbers<[1], [0], [0], [1], [0, 0, 1, 1], [], []>} : vector<256x32xbf16>, vector<32x64xbf16>, vector<256x64xf32> -> vector<256x64xf32>
    %108 = arith.addf %101, %107 : vector<256x64xf32>
    %c1_109 = arith.constant 1 : index
    %c1_110 = arith.constant 1 : index
    %c0_111 = arith.constant 0 : index
    %109 = vector.load %arg10[%c1_109, %c1_110, %c0_111] : memref<18x18x32xf32, #tpu.memory_space<vmem>>, vector<16x16x32xf32>
    %110 = vector.shape_cast %109 : vector<16x16x32xf32> to vector<256x32xf32>
    %111 = arith.truncf %110 : vector<256x32xf32> to vector<256x32xbf16>
    %c4_112 = arith.constant 4 : index
    %c0_113 = arith.constant 0 : index
    %c0_114 = arith.constant 0 : index
    %112 = vector.load %arg4[%c4_112, %c0_113, %c0_114] : memref<9x32x64xbf16, #tpu.memory_space<vmem>>, vector<1x32x64xbf16>
    %113 = vector.shape_cast %112 : vector<1x32x64xbf16> to vector<32x64xbf16>
    %cst_115 = arith.constant dense<0.000000e+00> : vector<256x64xf32>
    %114 = tpu.matmul %111, %113, %cst_115 {dimension_numbers = #tpu.dot_dimension_numbers<[1], [0], [0], [1], [0, 0, 1, 1], [], []>} : vector<256x32xbf16>, vector<32x64xbf16>, vector<256x64xf32> -> vector<256x64xf32>
    %115 = arith.addf %108, %114 : vector<256x64xf32>
    %c1_116 = arith.constant 1 : index
    %c2_117 = arith.constant 2 : index
    %c0_118 = arith.constant 0 : index
    %116 = vector.load %arg10[%c1_116, %c2_117, %c0_118] : memref<18x18x32xf32, #tpu.memory_space<vmem>>, vector<16x16x32xf32>
    %117 = vector.shape_cast %116 : vector<16x16x32xf32> to vector<256x32xf32>
    %118 = arith.truncf %117 : vector<256x32xf32> to vector<256x32xbf16>
    %c5_119 = arith.constant 5 : index
    %c0_120 = arith.constant 0 : index
    %c0_121 = arith.constant 0 : index
    %119 = vector.load %arg4[%c5_119, %c0_120, %c0_121] : memref<9x32x64xbf16, #tpu.memory_space<vmem>>, vector<1x32x64xbf16>
    %120 = vector.shape_cast %119 : vector<1x32x64xbf16> to vector<32x64xbf16>
    %cst_122 = arith.constant dense<0.000000e+00> : vector<256x64xf32>
    %121 = tpu.matmul %118, %120, %cst_122 {dimension_numbers = #tpu.dot_dimension_numbers<[1], [0], [0], [1], [0, 0, 1, 1], [], []>} : vector<256x32xbf16>, vector<32x64xbf16>, vector<256x64xf32> -> vector<256x64xf32>
    %122 = arith.addf %115, %121 : vector<256x64xf32>
    %c2_123 = arith.constant 2 : index
    %c0_124 = arith.constant 0 : index
    %c0_125 = arith.constant 0 : index
    %123 = vector.load %arg10[%c2_123, %c0_124, %c0_125] : memref<18x18x32xf32, #tpu.memory_space<vmem>>, vector<16x16x32xf32>
    %124 = vector.shape_cast %123 : vector<16x16x32xf32> to vector<256x32xf32>
    %125 = arith.truncf %124 : vector<256x32xf32> to vector<256x32xbf16>
    %c6_126 = arith.constant 6 : index
    %c0_127 = arith.constant 0 : index
    %c0_128 = arith.constant 0 : index
    %126 = vector.load %arg4[%c6_126, %c0_127, %c0_128] : memref<9x32x64xbf16, #tpu.memory_space<vmem>>, vector<1x32x64xbf16>
    %127 = vector.shape_cast %126 : vector<1x32x64xbf16> to vector<32x64xbf16>
    %cst_129 = arith.constant dense<0.000000e+00> : vector<256x64xf32>
    %128 = tpu.matmul %125, %127, %cst_129 {dimension_numbers = #tpu.dot_dimension_numbers<[1], [0], [0], [1], [0, 0, 1, 1], [], []>} : vector<256x32xbf16>, vector<32x64xbf16>, vector<256x64xf32> -> vector<256x64xf32>
    %129 = arith.addf %122, %128 : vector<256x64xf32>
    %c2_130 = arith.constant 2 : index
    %c1_131 = arith.constant 1 : index
    %c0_132 = arith.constant 0 : index
    %130 = vector.load %arg10[%c2_130, %c1_131, %c0_132] : memref<18x18x32xf32, #tpu.memory_space<vmem>>, vector<16x16x32xf32>
    %131 = vector.shape_cast %130 : vector<16x16x32xf32> to vector<256x32xf32>
    %132 = arith.truncf %131 : vector<256x32xf32> to vector<256x32xbf16>
    %c7_133 = arith.constant 7 : index
    %c0_134 = arith.constant 0 : index
    %c0_135 = arith.constant 0 : index
    %133 = vector.load %arg4[%c7_133, %c0_134, %c0_135] : memref<9x32x64xbf16, #tpu.memory_space<vmem>>, vector<1x32x64xbf16>
    %134 = vector.shape_cast %133 : vector<1x32x64xbf16> to vector<32x64xbf16>
    %cst_136 = arith.constant dense<0.000000e+00> : vector<256x64xf32>
    %135 = tpu.matmul %132, %134, %cst_136 {dimension_numbers = #tpu.dot_dimension_numbers<[1], [0], [0], [1], [0, 0, 1, 1], [], []>} : vector<256x32xbf16>, vector<32x64xbf16>, vector<256x64xf32> -> vector<256x64xf32>
    %136 = arith.addf %129, %135 : vector<256x64xf32>
    %c2_137 = arith.constant 2 : index
    %c2_138 = arith.constant 2 : index
    %c0_139 = arith.constant 0 : index
    %137 = vector.load %arg10[%c2_137, %c2_138, %c0_139] : memref<18x18x32xf32, #tpu.memory_space<vmem>>, vector<16x16x32xf32>
    %138 = vector.shape_cast %137 : vector<16x16x32xf32> to vector<256x32xf32>
    %139 = arith.truncf %138 : vector<256x32xf32> to vector<256x32xbf16>
    %c8_140 = arith.constant 8 : index
    %c0_141 = arith.constant 0 : index
    %c0_142 = arith.constant 0 : index
    %140 = vector.load %arg4[%c8_140, %c0_141, %c0_142] : memref<9x32x64xbf16, #tpu.memory_space<vmem>>, vector<1x32x64xbf16>
    %141 = vector.shape_cast %140 : vector<1x32x64xbf16> to vector<32x64xbf16>
    %cst_143 = arith.constant dense<0.000000e+00> : vector<256x64xf32>
    %142 = tpu.matmul %139, %141, %cst_143 {dimension_numbers = #tpu.dot_dimension_numbers<[1], [0], [0], [1], [0, 0, 1, 1], [], []>} : vector<256x32xbf16>, vector<32x64xbf16>, vector<256x64xf32> -> vector<256x64xf32>
    %143 = arith.addf %136, %142 : vector<256x64xf32>
    %144 = vector.shape_cast %143 : vector<256x64xf32> to vector<16x16x64xf32>
    %c0_144 = arith.constant 0 : index
    %c0_145 = arith.constant 0 : index
    %c0_146 = arith.constant 0 : index
    %145 = vector.load %arg5[%c0_144, %c0_145, %c0_146] : memref<16x16x64xf32, #tpu.memory_space<vmem>>, vector<16x16x64xf32>
    %146 = arith.addf %144, %145 : vector<16x16x64xf32>
    %cst_147 = arith.constant 0.000000e+00 : f32
    %147 = vector.broadcast %cst_147 : f32 to vector<16x16x64xf32>
    %148 = arith.maximumf %146, %147 : vector<16x16x64xf32>
    %c1_148 = arith.constant 1 : index
    %c1_149 = arith.constant 1 : index
    %c0_150 = arith.constant 0 : index
    %149 = vector.load %arg11[%c1_148, %c1_149, %c0_150] : memref<18x18x64xf32, #tpu.memory_space<vmem>>, vector<16x16x64xf32>
    tpu.vector_store %arg11[%c1_148, %c1_149, %c0_150], %148 {strides = array<i32>} : memref<18x18x64xf32, #tpu.memory_space<vmem>>, vector<16x16x64xf32>,
    %cst_151 = arith.constant 0.000000e+00 : f32
    %150 = vector.broadcast %cst_151 : f32 to vector<256x128xf32>
    %c0_152 = arith.constant 0 : index
    %c0_153 = arith.constant 0 : index
    %c0_154 = arith.constant 0 : index
    %151 = vector.load %arg11[%c0_152, %c0_153, %c0_154] : memref<18x18x64xf32, #tpu.memory_space<vmem>>, vector<16x16x64xf32>
    %152 = vector.shape_cast %151 : vector<16x16x64xf32> to vector<256x64xf32>
    %153 = arith.truncf %152 : vector<256x64xf32> to vector<256x64xbf16>
    %c0_155 = arith.constant 0 : index
    %c0_156 = arith.constant 0 : index
    %c0_157 = arith.constant 0 : index
    %154 = vector.load %arg6[%c0_155, %c0_156, %c0_157] : memref<9x64x128xbf16, #tpu.memory_space<vmem>>, vector<1x64x128xbf16>
    %155 = vector.shape_cast %154 : vector<1x64x128xbf16> to vector<64x128xbf16>
    %cst_158 = arith.constant dense<0.000000e+00> : vector<256x128xf32>
    %156 = tpu.matmul %153, %155, %cst_158 {dimension_numbers = #tpu.dot_dimension_numbers<[1], [0], [0], [1], [0, 0, 1, 1], [], []>} : vector<256x64xbf16>, vector<64x128xbf16>, vector<256x128xf32> -> vector<256x128xf32>
    %157 = arith.addf %150, %156 : vector<256x128xf32>
    %c0_159 = arith.constant 0 : index
    %c1_160 = arith.constant 1 : index
    %c0_161 = arith.constant 0 : index
    %158 = vector.load %arg11[%c0_159, %c1_160, %c0_161] : memref<18x18x64xf32, #tpu.memory_space<vmem>>, vector<16x16x64xf32>
    %159 = vector.shape_cast %158 : vector<16x16x64xf32> to vector<256x64xf32>
    %160 = arith.truncf %159 : vector<256x64xf32> to vector<256x64xbf16>
    %c1_162 = arith.constant 1 : index
    %c0_163 = arith.constant 0 : index
    %c0_164 = arith.constant 0 : index
    %161 = vector.load %arg6[%c1_162, %c0_163, %c0_164] : memref<9x64x128xbf16, #tpu.memory_space<vmem>>, vector<1x64x128xbf16>
    %162 = vector.shape_cast %161 : vector<1x64x128xbf16> to vector<64x128xbf16>
    %cst_165 = arith.constant dense<0.000000e+00> : vector<256x128xf32>
    %163 = tpu.matmul %160, %162, %cst_165 {dimension_numbers = #tpu.dot_dimension_numbers<[1], [0], [0], [1], [0, 0, 1, 1], [], []>} : vector<256x64xbf16>, vector<64x128xbf16>, vector<256x128xf32> -> vector<256x128xf32>
    %164 = arith.addf %157, %163 : vector<256x128xf32>
    %c0_166 = arith.constant 0 : index
    %c2_167 = arith.constant 2 : index
    %c0_168 = arith.constant 0 : index
    %165 = vector.load %arg11[%c0_166, %c2_167, %c0_168] : memref<18x18x64xf32, #tpu.memory_space<vmem>>, vector<16x16x64xf32>
    %166 = vector.shape_cast %165 : vector<16x16x64xf32> to vector<256x64xf32>
    %167 = arith.truncf %166 : vector<256x64xf32> to vector<256x64xbf16>
    %c2_169 = arith.constant 2 : index
    %c0_170 = arith.constant 0 : index
    %c0_171 = arith.constant 0 : index
    %168 = vector.load %arg6[%c2_169, %c0_170, %c0_171] : memref<9x64x128xbf16, #tpu.memory_space<vmem>>, vector<1x64x128xbf16>
    %169 = vector.shape_cast %168 : vector<1x64x128xbf16> to vector<64x128xbf16>
    %cst_172 = arith.constant dense<0.000000e+00> : vector<256x128xf32>
    %170 = tpu.matmul %167, %169, %cst_172 {dimension_numbers = #tpu.dot_dimension_numbers<[1], [0], [0], [1], [0, 0, 1, 1], [], []>} : vector<256x64xbf16>, vector<64x128xbf16>, vector<256x128xf32> -> vector<256x128xf32>
    %171 = arith.addf %164, %170 : vector<256x128xf32>
    %c1_173 = arith.constant 1 : index
    %c0_174 = arith.constant 0 : index
    %c0_175 = arith.constant 0 : index
    %172 = vector.load %arg11[%c1_173, %c0_174, %c0_175] : memref<18x18x64xf32, #tpu.memory_space<vmem>>, vector<16x16x64xf32>
    %173 = vector.shape_cast %172 : vector<16x16x64xf32> to vector<256x64xf32>
    %174 = arith.truncf %173 : vector<256x64xf32> to vector<256x64xbf16>
    %c3_176 = arith.constant 3 : index
    %c0_177 = arith.constant 0 : index
    %c0_178 = arith.constant 0 : index
    %175 = vector.load %arg6[%c3_176, %c0_177, %c0_178] : memref<9x64x128xbf16, #tpu.memory_space<vmem>>, vector<1x64x128xbf16>
    %176 = vector.shape_cast %175 : vector<1x64x128xbf16> to vector<64x128xbf16>
    %cst_179 = arith.constant dense<0.000000e+00> : vector<256x128xf32>
    %177 = tpu.matmul %174, %176, %cst_179 {dimension_numbers = #tpu.dot_dimension_numbers<[1], [0], [0], [1], [0, 0, 1, 1], [], []>} : vector<256x64xbf16>, vector<64x128xbf16>, vector<256x128xf32> -> vector<256x128xf32>
    %178 = arith.addf %171, %177 : vector<256x128xf32>
    %c1_180 = arith.constant 1 : index
    %c1_181 = arith.constant 1 : index
    %c0_182 = arith.constant 0 : index
    %179 = vector.load %arg11[%c1_180, %c1_181, %c0_182] : memref<18x18x64xf32, #tpu.memory_space<vmem>>, vector<16x16x64xf32>
    %180 = vector.shape_cast %179 : vector<16x16x64xf32> to vector<256x64xf32>
    %181 = arith.truncf %180 : vector<256x64xf32> to vector<256x64xbf16>
    %c4_183 = arith.constant 4 : index
    %c0_184 = arith.constant 0 : index
    %c0_185 = arith.constant 0 : index
    %182 = vector.load %arg6[%c4_183, %c0_184, %c0_185] : memref<9x64x128xbf16, #tpu.memory_space<vmem>>, vector<1x64x128xbf16>
    %183 = vector.shape_cast %182 : vector<1x64x128xbf16> to vector<64x128xbf16>
    %cst_186 = arith.constant dense<0.000000e+00> : vector<256x128xf32>
    %184 = tpu.matmul %181, %183, %cst_186 {dimension_numbers = #tpu.dot_dimension_numbers<[1], [0], [0], [1], [0, 0, 1, 1], [], []>} : vector<256x64xbf16>, vector<64x128xbf16>, vector<256x128xf32> -> vector<256x128xf32>
    %185 = arith.addf %178, %184 : vector<256x128xf32>
    %c1_187 = arith.constant 1 : index
    %c2_188 = arith.constant 2 : index
    %c0_189 = arith.constant 0 : index
    %186 = vector.load %arg11[%c1_187, %c2_188, %c0_189] : memref<18x18x64xf32, #tpu.memory_space<vmem>>, vector<16x16x64xf32>
    %187 = vector.shape_cast %186 : vector<16x16x64xf32> to vector<256x64xf32>
    %188 = arith.truncf %187 : vector<256x64xf32> to vector<256x64xbf16>
    %c5_190 = arith.constant 5 : index
    %c0_191 = arith.constant 0 : index
    %c0_192 = arith.constant 0 : index
    %189 = vector.load %arg6[%c5_190, %c0_191, %c0_192] : memref<9x64x128xbf16, #tpu.memory_space<vmem>>, vector<1x64x128xbf16>
    %190 = vector.shape_cast %189 : vector<1x64x128xbf16> to vector<64x128xbf16>
    %cst_193 = arith.constant dense<0.000000e+00> : vector<256x128xf32>
    %191 = tpu.matmul %188, %190, %cst_193 {dimension_numbers = #tpu.dot_dimension_numbers<[1], [0], [0], [1], [0, 0, 1, 1], [], []>} : vector<256x64xbf16>, vector<64x128xbf16>, vector<256x128xf32> -> vector<256x128xf32>
    %192 = arith.addf %185, %191 : vector<256x128xf32>
    %c2_194 = arith.constant 2 : index
    %c0_195 = arith.constant 0 : index
    %c0_196 = arith.constant 0 : index
    %193 = vector.load %arg11[%c2_194, %c0_195, %c0_196] : memref<18x18x64xf32, #tpu.memory_space<vmem>>, vector<16x16x64xf32>
    %194 = vector.shape_cast %193 : vector<16x16x64xf32> to vector<256x64xf32>
    %195 = arith.truncf %194 : vector<256x64xf32> to vector<256x64xbf16>
    %c6_197 = arith.constant 6 : index
    %c0_198 = arith.constant 0 : index
    %c0_199 = arith.constant 0 : index
    %196 = vector.load %arg6[%c6_197, %c0_198, %c0_199] : memref<9x64x128xbf16, #tpu.memory_space<vmem>>, vector<1x64x128xbf16>
    %197 = vector.shape_cast %196 : vector<1x64x128xbf16> to vector<64x128xbf16>
    %cst_200 = arith.constant dense<0.000000e+00> : vector<256x128xf32>
    %198 = tpu.matmul %195, %197, %cst_200 {dimension_numbers = #tpu.dot_dimension_numbers<[1], [0], [0], [1], [0, 0, 1, 1], [], []>} : vector<256x64xbf16>, vector<64x128xbf16>, vector<256x128xf32> -> vector<256x128xf32>
    %199 = arith.addf %192, %198 : vector<256x128xf32>
    %c2_201 = arith.constant 2 : index
    %c1_202 = arith.constant 1 : index
    %c0_203 = arith.constant 0 : index
    %200 = vector.load %arg11[%c2_201, %c1_202, %c0_203] : memref<18x18x64xf32, #tpu.memory_space<vmem>>, vector<16x16x64xf32>
    %201 = vector.shape_cast %200 : vector<16x16x64xf32> to vector<256x64xf32>
    %202 = arith.truncf %201 : vector<256x64xf32> to vector<256x64xbf16>
    %c7_204 = arith.constant 7 : index
    %c0_205 = arith.constant 0 : index
    %c0_206 = arith.constant 0 : index
    %203 = vector.load %arg6[%c7_204, %c0_205, %c0_206] : memref<9x64x128xbf16, #tpu.memory_space<vmem>>, vector<1x64x128xbf16>
    %204 = vector.shape_cast %203 : vector<1x64x128xbf16> to vector<64x128xbf16>
    %cst_207 = arith.constant dense<0.000000e+00> : vector<256x128xf32>
    %205 = tpu.matmul %202, %204, %cst_207 {dimension_numbers = #tpu.dot_dimension_numbers<[1], [0], [0], [1], [0, 0, 1, 1], [], []>} : vector<256x64xbf16>, vector<64x128xbf16>, vector<256x128xf32> -> vector<256x128xf32>
    %206 = arith.addf %199, %205 : vector<256x128xf32>
    %c2_208 = arith.constant 2 : index
    %c2_209 = arith.constant 2 : index
    %c0_210 = arith.constant 0 : index
    %207 = vector.load %arg11[%c2_208, %c2_209, %c0_210] : memref<18x18x64xf32, #tpu.memory_space<vmem>>, vector<16x16x64xf32>
    %208 = vector.shape_cast %207 : vector<16x16x64xf32> to vector<256x64xf32>
    %209 = arith.truncf %208 : vector<256x64xf32> to vector<256x64xbf16>
    %c8_211 = arith.constant 8 : index
    %c0_212 = arith.constant 0 : index
    %c0_213 = arith.constant 0 : index
    %210 = vector.load %arg6[%c8_211, %c0_212, %c0_213] : memref<9x64x128xbf16, #tpu.memory_space<vmem>>, vector<1x64x128xbf16>
    %211 = vector.shape_cast %210 : vector<1x64x128xbf16> to vector<64x128xbf16>
    %cst_214 = arith.constant dense<0.000000e+00> : vector<256x128xf32>
    %212 = tpu.matmul %209, %211, %cst_214 {dimension_numbers = #tpu.dot_dimension_numbers<[1], [0], [0], [1], [0, 0, 1, 1], [], []>} : vector<256x64xbf16>, vector<64x128xbf16>, vector<256x128xf32> -> vector<256x128xf32>
    %213 = arith.addf %206, %212 : vector<256x128xf32>
    %214 = vector.shape_cast %213 : vector<256x128xf32> to vector<16x16x128xf32>
    %c0_215 = arith.constant 0 : index
    %c0_216 = arith.constant 0 : index
    %c0_217 = arith.constant 0 : index
    %215 = vector.load %arg7[%c0_215, %c0_216, %c0_217] : memref<16x16x128xf32, #tpu.memory_space<vmem>>, vector<16x16x128xf32>
    %216 = arith.addf %214, %215 : vector<16x16x128xf32>
    %c0_218 = arith.constant 0 : index
    %c0_219 = arith.constant 0 : index
    %c0_220 = arith.constant 0 : index
    %c0_221 = arith.constant 0 : index
    %217 = vector.load %arg8[%c0_218, %c0_219, %c0_220, %c0_221] : memref<1x16x16x128xf32, #tpu.memory_space<vmem>>, vector<1x16x16x128xf32>
    %218 = vector.shape_cast %217 : vector<1x16x16x128xf32> to vector<16x16x128xf32>
    %219 = vector.shape_cast %216 : vector<16x16x128xf32> to vector<1x16x16x128xf32>
    tpu.vector_store %arg8[%c0_218, %c0_219, %c0_220, %c0_221], %219 {strides = array<i32>} : memref<1x16x16x128xf32, #tpu.memory_space<vmem>>, vector<1x16x16x128xf32>,
    return
  }
  func.func @transform_0(%arg0: i32) -> (i32, i32, i32, i32) {
    %c0_i32 = arith.constant 0 : i32
    %c0_i32_0 = arith.constant 0 : i32
    %c0_i32_1 = arith.constant 0 : i32
    %c0_i32_2 = arith.constant 0 : i32
    return %arg0, %c0_i32, %c0_i32_0, %c0_i32_1 : i32, i32, i32, i32
  }
  func.func @transform_1(%arg0: i32) -> (i32, i32, i32) {
    %c0_i32 = arith.constant 0 : i32
    %c0_i32_0 = arith.constant 0 : i32
    %c0_i32_1 = arith.constant 0 : i32
    %c0_i32_2 = arith.constant 0 : i32
    return %c0_i32, %c0_i32_0, %c0_i32_1 : i32, i32, i32
  }
  func.func @transform_2(%arg0: i32) -> (i32, i32, i32) {
    %c0_i32 = arith.constant 0 : i32
    %c0_i32_0 = arith.constant 0 : i32
    %c0_i32_1 = arith.constant 0 : i32
    %c0_i32_2 = arith.constant 0 : i32
    return %c0_i32, %c0_i32_0, %c0_i32_1 : i32, i32, i32
  }
  func.func @transform_3(%arg0: i32) -> (i32, i32, i32) {
    %c0_i32 = arith.constant 0 : i32
    %c0_i32_0 = arith.constant 0 : i32
    %c0_i32_1 = arith.constant 0 : i32
    %c0_i32_2 = arith.constant 0 : i32
    return %c0_i32, %c0_i32_0, %c0_i32_1 : i32, i32, i32
  }
  func.func @transform_4(%arg0: i32) -> (i32, i32, i32) {
    %c0_i32 = arith.constant 0 : i32
    %c0_i32_0 = arith.constant 0 : i32
    %c0_i32_1 = arith.constant 0 : i32
    %c0_i32_2 = arith.constant 0 : i32
    return %c0_i32, %c0_i32_0, %c0_i32_1 : i32, i32, i32
  }
  func.func @transform_5(%arg0: i32) -> (i32, i32, i32) {
    %c0_i32 = arith.constant 0 : i32
    %c0_i32_0 = arith.constant 0 : i32
    %c0_i32_1 = arith.constant 0 : i32
    %c0_i32_2 = arith.constant 0 : i32
    return %c0_i32, %c0_i32_0, %c0_i32_1 : i32, i32, i32
  }
  func.func @transform_6(%arg0: i32) -> (i32, i32, i32) {
    %c0_i32 = arith.constant 0 : i32
    %c0_i32_0 = arith.constant 0 : i32
    %c0_i32_1 = arith.constant 0 : i32
    %c0_i32_2 = arith.constant 0 : i32
    return %c0_i32, %c0_i32_0, %c0_i32_1 : i32, i32, i32
  }
  func.func @transform_7(%arg0: i32) -> (i32, i32, i32, i32) {
    %c0_i32 = arith.constant 0 : i32
    %c0_i32_0 = arith.constant 0 : i32
    %c0_i32_1 = arith.constant 0 : i32
    %c0_i32_2 = arith.constant 0 : i32
    return %arg0, %c0_i32, %c0_i32_0, %c0_i32_1 : i32, i32, i32, i32
  }
}

</mosaic_0001>

<bundles_post_ra>
// kernel: coordnet_forward.1
= control target key start
LH: loop header
LB: loop body
LE: loop exit
PB: predicated region body
PF: predicated region fallthrough
CT: control target
= control target key end

     0   :  { %12 = vsyncpa [#allocation6], 0  ;;  %s16130_s0 = inlined_call_operand.vmem [shape: bf16[2,16,16,88], index: 0, kind: input, shape index: {}]   ;;  %s16131_s1 = inlined_call_operand.vmem [shape: bf16[9,88,32], index: 1, kind: input, shape index: {}]   ;;  %s16132_s2 = inlined_call_operand.vmem [shape: f32[16,16,32], index: 2, kind: input, shape index: {}]   ;;  %s16133_s3 = inlined_call_operand.vmem [shape: bf16[9,32,64], index: 3, kind: input, shape index: {}]   ;;  %s16134_s4 = inlined_call_operand.vmem [shape: f32[16,16,64], index: 4, kind: input, shape index: {}]   ;;  %s16135_s5 = inlined_call_operand.vmem [shape: bf16[9,64,128], index: 5, kind: input, shape index: {}]   ;;  %s16136_s6 = inlined_call_operand.vmem [shape: f32[16,16,128], index: 6, kind: input, shape index: {}]   ;;  %s16137_s7 = inlined_call_operand.hbm [shape: f32[2,16,16,128], index: 7, kind: output, shape index: {}]  }
   0x1   :  { %14 = vsyncpa [#allocation6 + $0x1], 0  ;;  %s12182_s24 = smov 0   ;;  %s12184_s25 = smov 0  }
   0x2   :  { %s12186_s26 = smov 0   ;;  %s12188_s27 = smov 0  }
   0x3 LB: > { %s12203_s28 = sadd.s32 4294967295, %s12136_s27   ;;  %s9467_s29 = sadd.s32 4294967294, %s12136_s27   ;;  %s12136_s27 = sphi %s12188_s27, %s16552_s27   ;;  %s12132_s26 = sphi %s12186_s26, %s16551_s26   ;;  %s12128_s25 = sphi %s12184_s25, %s16550_s25   ;;  %s12124_s24 = sphi %s12182_s24, %s16549_s24  }
   0x4   : > { %s12207_s30 = sadd.s32 1, %s12136_s27   ;;  %s179_s8 = sadd.s32 1, %s12132_s26 }
   0x5   : > { %s176_s9 = ssub.s32 %s12136_s27, %s12207_s30  ;;  %p189_p0 = scmp.ne.s32.totalorder %s12132_s26, %s12128_s25 }
   0x6   : > { %p177_p1 = scmp.eq.s32.totalorder %s176_s9, 0  ;;  %p190_p2 = scmp.eq.s32.totalorder %s12203_s28, 1 }
   0x7   : > { %p195_p3 = scmp.ne.s32.totalorder %s12128_s25, %s12124_s24  ;;  %p196_p4 = scmp.eq.s32.totalorder %s9467_s29, 1 }
   0x8   : > { %s12218_s10 = scalar_select %p177_p1, %s12132_s26, %s179_s8  }
   0x9   : > { %p12220_p5 = por %p190_p2, %p189_p0  ;;  %p12224_p6 = por %p196_p4, %p195_p3 }
   0xa   : > { %p9470_p7 = scmp.ge.s32.totalorder %s12136_s27, 1  ;;  %p240_p8 = scmp.lt.s32.totalorder %s12136_s27, 3 }
   0xc   : > { %p241_p9 = pnand %p9470_p7, %p240_p8 }
   0xe   : > { %244 = sbr.rel (%p241_p9) target bundleno = 1505 (0x5e1), region = 48 }
  0x13   : > { %v11968_v0 = vld [vmem:[%s16131_s1 + $0x54] ss:$0 sps:$4 sm:$0xff]   ;;  %vm743_vm0 = vcmask 1043456   ;;  %v12236_v1 = vld [vmem:[%s16131_s1 + $0x4c] sm:$0xff]   ;;  %vm278_vm1 = vcmask 719872   ;;  %v12246_v3 = vld [vmem:[%s16131_s1 + $0x44] sm:$0xff]  }
  0x14   : > { %11916 = vmatprep.subr.msk.bf16.mxu0 %vm743_vm0, %v11968_v0  ;;  %11917 = vmatprep.subr.msk.bf16.mxu1 %vm743_vm0, %v11968_v0  ;;  %v745_v2 = vsel %vm743_vm0, %v11968_v0, 0  ;;  %v16138_v4 = vmov 0.0   ;;  %vm281_vm2 = vcmask 713728   ;;  %p272_p10 = scmp.lt.s32.totalorder %s12203_s28, 1  ;;  %v11971_v5 = vld [vmem:[%s16131_s1 + $0x3c] sm:$0xff]   ;;  %v12370_v6 = vld [vmem:[%s16131_s1 + $0x34] sm:$0xff]  }
  0x15   : > { %10825 = vmatpush3.bf16.msra.mxu0 %v745_v2  ;;  %11910 = vmatpush3.bf16.msra.mxu1 %v745_v2  ;;  %279 = vst.msk [vmem:[#allocation2] sm:$0xff] %vm278_vm1, %v16138_v4  ;;  %280 = vst.msk [vmem:[#allocation2 + $0x8] sm:$0xff] %vm278_vm1, %v16138_v4  ;;  %v11973_v36 = vld [vmem:[%s16131_s1 + $0x2c] sm:$0xff]   ;;  %v11974_v44 = vld [vmem:[%s16131_s1 + $0x28] ss:$0 sps:$4 sm:$0xff]   ;;  %vm334_vm3 = vcmask 261120  }
  0x16   : > { %10826 = vmatprep.subr.bf16.mxu0 %v12236_v1  ;;  %11905 = vmatprep.subr.bf16.mxu1 %v12236_v1  ;;  %283 = vst.msk [vmem:[#allocation2 + $0x18] sm:$0xff] %vm278_vm1, %v16138_v4  ;;  %284 = vst.msk [vmem:[#allocation2 + $0x20] sm:$0xff] %vm278_vm1, %v16138_v4  ;;  %s273_s19 = scalar_select %p272_p10, %s12203_s28, 1  ;;  %v11975_v51 = vld [vmem:[%s16131_s1 + $0x80] ss:$0 sps:$4 sm:$0xff]   ;;  %vm337_vm4 = vcmask 254976  }
  0x17   : > { %286 = vst.msk [vmem:[#allocation2 + $0x30] sm:$0xff] %vm278_vm1, %v16138_v4  ;;  %287 = vst.msk [vmem:[#allocation2 + $0x38] sm:$0xff] %vm278_vm1, %v16138_v4  ;;  %vm390_vm5 = vcmask 523264   ;;  %vm393_vm6 = vcmask 517120   ;;  %s12139_s15 = smov [#allocation5]  }
  0x18   : > { %289 = vst.msk [vmem:[#allocation2 + $0x48] sm:$0xff] %vm278_vm1, %v16138_v4  ;;  %290 = vst.msk [vmem:[#allocation2 + $0x50] sm:$0xff] %vm278_vm1, %v16138_v4  ;;  %s10203_s22 = sshll.u32 %s273_s19, 7  ;;  %s10204_s19 = sshll.u32 %s12203_s28, 12 }
  0x19   : > { %292 = vst.msk [vmem:[#allocation2 + $0x60] sm:$0xff] %vm278_vm1, %v16138_v4  ;;  %293 = vst.msk [vmem:[#allocation2 + $0x68] sm:$0xff] %vm278_vm1, %v16138_v4  ;;  %10827 = vmatpush3.bf16.msra.mxu0 %v12236_v1  ;;  %11911 = vmatpush3.bf16.msra.mxu1 %v12236_v1  ;;  %s12375_s13 = scalar_lea.vmem %s16130_s0, %s10203_s22  ;;  %s16082_s9 = scalar_lea.hbm %s16137_s7, %s10204_s19 }
  0x1a   : > { %295 = vst.msk [vmem:[#allocation2 + $0x78] sm:$0xff] %vm278_vm1, %v16138_v4  ;;  %296 = vst.msk [vmem:[#allocation2 + $0x80] sm:$0xff] %vm278_vm1, %v16138_v4  ;;  %10828 = vmatprep.subr.bf16.mxu0 %v12246_v3  ;;  %11906 = vmatprep.subr.bf16.mxu1 %v12246_v3  ;;  %v10275_v7 = vld [vmem:[%s12375_s13 + $0x38] sm:$0xff]   ;;  %v10206_v8 = vld [vmem:[%s12375_s13] sm:$0xff]  }
  0x1b   : > { %298 = vst.msk [vmem:[#allocation2 + $0x90] sm:$0xff] %vm278_vm1, %v16138_v4  ;;  %299 = vst.msk [vmem:[#allocation2 + $0x98] sm:$0xff] %vm278_vm1, %v16138_v4  ;;  %v10276_v9 = vld [vmem:[%s12375_s13 + $0x40] sm:$0xff]   ;;  %v10235_v11 = vunpack.c.l.bf16 %v10275_v7  ;;  %v10236_v12 = vunpack.c.h.bf16 %v10275_v7  ;;  %v10207_v13 = vunpack.c.l.bf16 %v10206_v8  ;;  %v10208_v14 = vunpack.c.h.bf16 %v10206_v8  ;;  %v10269_v15 = vld [vmem:[%s12375_s13 + $0x8] sm:$0xff]  }
  0x1c   : > { %301 = vst.msk [vmem:[#allocation2 + $0xa8] sm:$0xff] %vm278_vm1, %v16138_v4  ;;  %302 = vst.msk [vmem:[#allocation2 + $0xb0] sm:$0xff] %vm278_vm1, %v16138_v4  ;;  %v602_v10 = vld [vmem:[#allocation2 + $0x1] sm:$0xff]  ;;  %v10239_v18 = vunpack.c.l.bf16 %v10276_v9  ;;  %v10240_v19 = vunpack.c.h.bf16 %v10276_v9  ;;  %v10211_v20 = vunpack.c.l.bf16 %v10269_v15  ;;  %v10212_v21 = vunpack.c.h.bf16 %v10269_v15  ;;  %v10270_v22 = vld [vmem:[%s12375_s13 + $0x10] sm:$0xff]  }
  0x1d   : > { %304 = vst.msk [vmem:[#allocation2 + $0xc0] sm:$0xff] %vm278_vm1, %v16138_v4  ;;  %305 = vst.msk [vmem:[#allocation2 + $0xc8] sm:$0xff] %vm278_vm1, %v16138_v4  ;;  %10829 = vmatpush3.bf16.msra.mxu0 %v12246_v3  ;;  %11912 = vmatpush3.bf16.msra.mxu1 %v12246_v3  ;;  %v10277_v16 = vld [vmem:[%s12375_s13 + $0x48] sm:$0xff]   ;;  %v10278_v23 = vld [vmem:[%s12375_s13 + $0x50] sm:$0xff]   ;;  %v10215_v27 = vunpack.c.l.bf16 %v10270_v22  ;;  %v10216_v30 = vunpack.c.h.bf16 %v10270_v22  ;;  %v990_v7 = vsel %vm743_vm0, %v11974_v44, 0  ;;  %v1295_v8 = vsel %vm743_vm0, %v11975_v51, 0 }
  0x1e   : > { %307 = vst.msk [vmem:[#allocation2 + $0xd8] sm:$0xff] %vm278_vm1, %v16138_v4  ;;  %308 = vst.msk [vmem:[#allocation2 + $0xe0] sm:$0xff] %vm278_vm1, %v16138_v4  ;;  %10830 = vmatprep.subr.bf16.mxu0 %v11971_v5  ;;  %11907 = vmatprep.subr.bf16.mxu1 %v11971_v5  ;;  %v10243_v25 = vunpack.c.l.bf16 %v10277_v16  ;;  %v10244_v26 = vunpack.c.h.bf16 %v10277_v16  ;;  %v10271_v28 = vld [vmem:[%s12375_s13 + $0x18] sm:$0xff]   ;;  %v10247_v31 = vunpack.c.l.bf16 %v10278_v23  ;;  %v10248_v32 = vunpack.c.h.bf16 %v10278_v23  ;;  %v10272_v34 = vld [vmem:[%s12375_s13 + $0x20] sm:$0xff]  }
  0x1f   : > { %310 = vst.msk [vmem:[#allocation2 + $0xf0] sm:$0xff] %vm278_vm1, %v16138_v4  ;;  %311 = vst.msk [vmem:[#allocation2 + $0xf8] sm:$0xff] %vm278_vm1, %v16138_v4  ;;  %v10279_v29 = vld [vmem:[%s12375_s13 + $0x58] sm:$0xff]   ;;  %v10219_v33 = vunpack.c.l.bf16 %v10271_v28  ;;  %v10280_v35 = vld [vmem:[%s12375_s13 + $0x60] sm:$0xff]   ;;  %v10220_v37 = vunpack.c.h.bf16 %v10271_v28  ;;  %v10223_v40 = vunpack.c.l.bf16 %v10272_v34  ;;  %v10224_v41 = vunpack.c.h.bf16 %v10272_v34 }
  0x20   : > { %313 = vst.msk [vmem:[#allocation2 + $0x108] sm:$0xff] %vm278_vm1, %v16138_v4  ;;  %314 = vst.msk [vmem:[#allocation2 + $0x110] sm:$0xff] %vm278_vm1, %v16138_v4  ;;  %v10251_v38 = vunpack.c.l.bf16 %v10279_v29  ;;  %v10252_v39 = vunpack.c.h.bf16 %v10279_v29  ;;  %v10255_v42 = vunpack.c.l.bf16 %v10280_v35  ;;  %v10256_v43 = vunpack.c.h.bf16 %v10280_v35  ;;  %v10273_v45 = vld [vmem:[%s12375_s13 + $0x28] sm:$0xff]   ;;  %v10274_v49 = vld [vmem:[%s12375_s13 + $0x30] sm:$0xff]  }
  0x21   : > { %316 = vst.msk [vmem:[#allocation2 + $0x120] sm:$0xff] %vm278_vm1, %v16138_v4  ;;  %317 = vst.msk [vmem:[#allocation2 + $0x128] sm:$0xff] %vm278_vm1, %v16138_v4  ;;  %10831 = vmatpush3.bf16.msra.mxu0 %v11971_v5  ;;  %11913 = vmatpush3.bf16.msra.mxu1 %v11971_v5  ;;  %v10227_v46 = vunpack.c.l.bf16 %v10273_v45  ;;  %v10228_v47 = vunpack.c.h.bf16 %v10273_v45  ;;  %v10281_v48 = vld [vmem:[%s12375_s13 + $0x68] sm:$0xff]   ;;  %v10282_v50 = vld [vmem:[%s12375_s13 + $0x70] sm:$0xff]   ;;  %v10231_v54 = vunpack.c.l.bf16 %v10274_v49  ;;  %v10232_v55 = vunpack.c.h.bf16 %v10274_v49 }
  0x22   : > { %319 = vst.msk [vmem:[#allocation2 + $0x138] sm:$0xff] %vm278_vm1, %v16138_v4  ;;  %320 = vst.msk [vmem:[#allocation2 + $0x140] sm:$0xff] %vm278_vm1, %v16138_v4  ;;  %10832 = vmatprep.subr.bf16.mxu0 %v12370_v6  ;;  %11908 = vmatprep.subr.bf16.mxu1 %v12370_v6  ;;  %v10259_v52 = vunpack.c.l.bf16 %v10281_v48  ;;  %v10260_v53 = vunpack.c.h.bf16 %v10281_v48  ;;  %v10263_v59 = vunpack.c.l.bf16 %v10282_v50  ;;  %v10264_v60 = vunpack.c.h.bf16 %v10282_v50  ;;  %v11976_v9 = vld [vmem:[%s16131_s1 + $0x20] sm:$0xff]   ;;  %v11980_v29 = vld [vmem:[%s16131_s1 + $0x10] sm:$0xff]  }
  0x23   : > { %322 = vst.msk [vmem:[#allocation2 + $0x150] sm:$0xff] %vm278_vm1, %v16138_v4  ;;  %323 = vst.msk [vmem:[#allocation2 + $0x158] sm:$0xff] %vm278_vm1, %v16138_v4  ;;  %v11982_v34 = vld [vmem:[%s16131_s1 + $0x8] sm:$0xff]   ;;  %v11983_v35 = vld [vmem:[%s16131_s1 + $0x60] sm:$0xff]  }
  0x24   : > { %325 = vst.msk [vmem:[#allocation2 + $0x168] sm:$0xff] %vm278_vm1, %v16138_v4  ;;  %326 = vst.msk [vmem:[#allocation2 + $0x170] sm:$0xff] %vm278_vm1, %v16138_v4  ;;  %v11984_v45 = vld [vmem:[%s16131_s1] sm:$0xff]  }
  0x25   : > { %328 = vst.msk [vmem:[#allocation2 + $0x180] sm:$0xff] %vm278_vm1, %v16138_v4  ;;  %329 = vst.msk [vmem:[#allocation2 + $0x188] sm:$0xff] %vm278_vm1, %v16138_v4  ;;  %10833 = vmatpush3.bf16.msra.mxu0 %v12370_v6  ;;  %11914 = vmatpush3.bf16.msra.mxu1 %v12370_v6  ;;  %v543_v50 = vld [vmem:[#allocation2] sm:$0xff] }
  0x26   : > { %331 = vst.msk [vmem:[#allocation2 + $0x198] sm:$0xff] %vm278_vm1, %v16138_v4  ;;  %332 = vst.msk [vmem:[#allocation2 + $0x1a0] sm:$0xff] %vm278_vm1, %v16138_v4  ;;  %10834 = vmatprep.subr.bf16.mxu0 %v11973_v36  ;;  %11909 = vmatprep.subr.bf16.mxu1 %v11973_v36 }
  0x27   : > { %282 = vst.msk [vmem:[#allocation2 + $0x10] sm:$0x3] %vm281_vm2, %v16138_v4  ;;  %285 = vst.msk [vmem:[#allocation2 + $0x28] sm:$0x3] %vm281_vm2, %v16138_v4 }
  0x28   : > { %288 = vst.msk [vmem:[#allocation2 + $0x40] sm:$0x3] %vm281_vm2, %v16138_v4  ;;  %291 = vst.msk [vmem:[#allocation2 + $0x58] sm:$0x3] %vm281_vm2, %v16138_v4 }
  0x29   : > { %294 = vst.msk [vmem:[#allocation2 + $0x70] sm:$0x3] %vm281_vm2, %v16138_v4  ;;  %297 = vst.msk [vmem:[#allocation2 + $0x88] sm:$0x3] %vm281_vm2, %v16138_v4  ;;  %10835 = vmatpush3.bf16.msra.mxu0 %v11973_v36  ;;  %11915 = vmatpush3.bf16.msra.mxu1 %v11973_v36 }
  0x2a   : > { %300 = vst.msk [vmem:[#allocation2 + $0xa0] sm:$0x3] %vm281_vm2, %v16138_v4  ;;  %303 = vst.msk [vmem:[#allocation2 + $0xb8] sm:$0x3] %vm281_vm2, %v16138_v4  ;;  %11918 = vmatprep.subr.msk.bf16.mxu1 %vm743_vm0, %v11974_v44  ;;  %11919 = vmatprep.subr.msk.bf16.mxu0 %vm743_vm0, %v11975_v51  ;;  %v544_v51 = vld [vmem:[#allocation2 + $0x8] sm:$0xff] }
  0x2b   : > { %306 = vst.msk [vmem:[#allocation2 + $0xd0] sm:$0x3] %vm281_vm2, %v16138_v4  ;;  %309 = vst.msk [vmem:[#allocation2 + $0xe8] sm:$0x3] %vm281_vm2, %v16138_v4 }
  0x2c   : > { %312 = vst.msk [vmem:[#allocation2 + $0x100] sm:$0x3] %vm281_vm2, %v16138_v4  ;;  %315 = vst.msk [vmem:[#allocation2 + $0x118] sm:$0x3] %vm281_vm2, %v16138_v4 }
  0x2d   : > { %318 = vst.msk [vmem:[#allocation2 + $0x130] sm:$0x3] %vm281_vm2, %v16138_v4  ;;  %321 = vst.msk [vmem:[#allocation2 + $0x148] sm:$0x3] %vm281_vm2, %v16138_v4 }
  0x2e   : > { %324 = vst.msk [vmem:[#allocation2 + $0x160] sm:$0x3] %vm281_vm2, %v16138_v4  ;;  %327 = vst.msk [vmem:[#allocation2 + $0x178] sm:$0x3] %vm281_vm2, %v16138_v4  ;;  %v603_v17 = vld [vmem:[#allocation2 + $0x9] sm:$0xff] }
  0x2f   : > { %330 = vst.msk [vmem:[#allocation2 + $0x190] sm:$0x3] %vm281_vm2, %v16138_v4  ;;  %333 = vst.msk [vmem:[#allocation2 + $0x1a8] sm:$0x3] %vm281_vm2, %v16138_v4  ;;  %v634_v24 = vpack.c.bf16 %v603_v17, %v602_v10 }
  0x30   : > { %525 = vst.msk [vmem:[#allocation2 + $0xc1] sm:$0xff] %vm278_vm1, %v10235_v11  ;;  %526 = vst.msk [vmem:[#allocation2 + $0xc9] sm:$0xff] %vm278_vm1, %v10236_v12 }
  0x31   : > { %511 = vst.msk [vmem:[#allocation2 + $0x19] sm:$0xff] %vm278_vm1, %v10207_v13  ;;  %512 = vst.msk [vmem:[#allocation2 + $0x21] sm:$0xff] %vm278_vm1, %v10208_v14  ;;  %10836 = vmatprep.mubr.msk.bf16.mxu0 %vm278_vm1, %v634_v24  ;;  %v11977_v13 = vld [vmem:[%s16131_s1 + $0x78] sm:$0xff]  }
  0x32   : > { %527 = vst.msk [vmem:[#allocation2 + $0xd9] sm:$0xff] %vm278_vm1, %v10239_v18  ;;  %528 = vst.msk [vmem:[#allocation2 + $0xe1] sm:$0xff] %vm278_vm1, %v10240_v19  ;;  %v11978_v18 = vld [vmem:[%s16131_s1 + $0x18] sm:$0xff]   ;;  %v11979_v19 = vld [vmem:[%s16131_s1 + $0x70] sm:$0xff]  }
  0x33   : > { %513 = vst.msk [vmem:[#allocation2 + $0x31] sm:$0xff] %vm278_vm1, %v10211_v20  ;;  %514 = vst.msk [vmem:[#allocation2 + $0x39] sm:$0xff] %vm278_vm1, %v10212_v21 }
  0x34   : > { %529 = vst.msk [vmem:[#allocation2 + $0xf1] sm:$0xff] %vm278_vm1, %v10243_v25  ;;  %530 = vst.msk [vmem:[#allocation2 + $0xf9] sm:$0xff] %vm278_vm1, %v10244_v26 }
  0x35   : > { %515 = vst.msk [vmem:[#allocation2 + $0x49] sm:$0xff] %vm278_vm1, %v10215_v27  ;;  %516 = vst.msk [vmem:[#allocation2 + $0x51] sm:$0xff] %vm278_vm1, %v10216_v30  ;;  %v11981_v30 = vld [vmem:[%s16131_s1 + $0x68] sm:$0xff]  }
  0x36   : > { %531 = vst.msk [vmem:[#allocation2 + $0x109] sm:$0xff] %vm278_vm1, %v10247_v31  ;;  %532 = vst.msk [vmem:[#allocation2 + $0x111] sm:$0xff] %vm278_vm1, %v10248_v32 }
  0x37   : > { %517 = vst.msk [vmem:[#allocation2 + $0x61] sm:$0xff] %vm278_vm1, %v10219_v33  ;;  %518 = vst.msk [vmem:[#allocation2 + $0x69] sm:$0xff] %vm278_vm1, %v10220_v37  ;;  %v618_v56 = vld [vmem:[#allocation2 + $0xc1] sm:$0xff]  ;;  %v619_v57 = vld [vmem:[#allocation2 + $0xc9] sm:$0xff] }
  0x38   : > { %533 = vst.msk [vmem:[#allocation2 + $0x121] sm:$0xff] %vm278_vm1, %v10251_v38  ;;  %534 = vst.msk [vmem:[#allocation2 + $0x129] sm:$0xff] %vm278_vm1, %v10252_v39  ;;  %v604_v58 = vld [vmem:[#allocation2 + $0x19] sm:$0xff]  ;;  %v12432_v61 = vpack.c.bf16 %v619_v57, %v618_v56  ;;  %v605_v62 = vld [vmem:[#allocation2 + $0x21] sm:$0xff] }
  0x39   : > { %519 = vst.msk [vmem:[#allocation2 + $0x79] sm:$0xff] %vm278_vm1, %v10223_v40  ;;  %520 = vst.msk [vmem:[#allocation2 + $0x81] sm:$0xff] %vm278_vm1, %v10224_v41  ;;  %v620_v63 = vld [vmem:[#allocation2 + $0xd9] sm:$0xff]  ;;  %v621_v0 = vld [vmem:[#allocation2 + $0xe1] sm:$0xff]  ;;  %v12438_v1 = vpack.c.bf16 %v605_v62, %v604_v58  ;;  %v575_v58 = vpack.c.bf16 %v544_v51, %v543_v50 }
  0x3a   : > { %535 = vst.msk [vmem:[#allocation2 + $0x139] sm:$0xff] %vm278_vm1, %v10255_v42  ;;  %536 = vst.msk [vmem:[#allocation2 + $0x141] sm:$0xff] %vm278_vm1, %v10256_v43  ;;  %v12440_v2 = vpack.c.bf16 %v621_v0, %v620_v63  ;;  %v606_v3 = vld [vmem:[#allocation2 + $0x31] sm:$0xff]  ;;  %v607_v5 = vld [vmem:[#allocation2 + $0x39] sm:$0xff]  ;;  %10852 = vmatprep.mubr.msk.bf16.mxu1 %vm278_vm1, %v12432_v61 }
  0x3b   : > { %521 = vst.msk [vmem:[#allocation2 + $0x91] sm:$0xff] %vm278_vm1, %v10227_v46  ;;  %522 = vst.msk [vmem:[#allocation2 + $0x99] sm:$0xff] %vm278_vm1, %v10228_v47  ;;  %v622_v6 = vld [vmem:[#allocation2 + $0xf1] sm:$0xff]  ;;  %v12452_v10 = vpack.c.bf16 %v607_v5, %v606_v3  ;;  %v623_v11 = vld [vmem:[#allocation2 + $0xf9] sm:$0xff]  ;;  %10837 = vmatmul.mubr.msk.bf16.vlgmr.msra.gmra.mxu0 %vm278_vm1, %v12438_v1 }
  0x3c   : > { %537 = vst.msk [vmem:[#allocation2 + $0x151] sm:$0xff] %vm278_vm1, %v10259_v52  ;;  %538 = vst.msk [vmem:[#allocation2 + $0x159] sm:$0xff] %vm278_vm1, %v10260_v53  ;;  %v12455_v12 = vpack.c.bf16 %v623_v11, %v622_v6  ;;  %10853 = vmatmul.mubr.msk.bf16.vlgmr.msra.gmra.mxu1 %vm278_vm1, %v12440_v2  ;;  %v608_v14 = vld [vmem:[#allocation2 + $0x49] sm:$0xff]  ;;  %10913 = vmatpush3.bf16.msra.mxu0 %v1295_v8  ;;  %v609_v15 = vld [vmem:[#allocation2 + $0x51] sm:$0xff] }
  0x3d   : > { %523 = vst.msk [vmem:[#allocation2 + $0xa9] sm:$0xff] %vm278_vm1, %v10231_v54  ;;  %524 = vst.msk [vmem:[#allocation2 + $0xb1] sm:$0xff] %vm278_vm1, %v10232_v55  ;;  %10869 = vmatpush3.bf16.msra.mxu1 %v990_v7  ;;  %v624_v16 = vld [vmem:[#allocation2 + $0x109] sm:$0xff]  ;;  %v625_v17 = vld [vmem:[#allocation2 + $0x111] sm:$0xff]  ;;  %10840 = vmatprep.mubr.msk.bf16.mxu0 %vm278_vm1, %v12452_v10  ;;  %v12474_v24 = vpack.c.bf16 %v609_v15, %v608_v14 }
  0x3e   : > { %539 = vst.msk [vmem:[#allocation2 + $0x169] sm:$0xff] %vm278_vm1, %v10263_v59  ;;  %540 = vst.msk [vmem:[#allocation2 + $0x171] sm:$0xff] %vm278_vm1, %v10264_v60  ;;  %10870 = vmatprep.subr.bf16.mxu1 %v11976_v9  ;;  %v610_v20 = vld [vmem:[#allocation2 + $0x61] sm:$0xff]  ;;  %10856 = vmatprep.mubr.msk.bf16.mxu1 %vm278_vm1, %v12455_v12  ;;  %v611_v21 = vld [vmem:[#allocation2 + $0x69] sm:$0xff]  ;;  %v12476_v25 = vpack.c.bf16 %v625_v17, %v624_v16 }
  0x3f   : > { %10914 = vmatprep.subr.bf16.mxu0 %v11977_v13  ;;  %v626_v22 = vld [vmem:[#allocation2 + $0x121] sm:$0xff]  ;;  %v627_v23 = vld [vmem:[#allocation2 + $0x129] sm:$0xff]  ;;  %v12478_v26 = vpack.c.bf16 %v611_v21, %v610_v20  ;;  %v11985_v46 = vld [vmem:[%s16131_s1 + $0x58] sm:$0xff]   ;;  %342 = vst.msk [vmem:[#allocation3 + $0x30] sm:$0xff] %vm334_vm3, %v16138_v4 }
  0x40   : > { %10915 = vmatpush3.bf16.msra.mxu0 %v11977_v13  ;;  %v12480_v27 = vpack.c.bf16 %v627_v23, %v626_v22  ;;  %v612_v28 = vld [vmem:[#allocation2 + $0x79] sm:$0xff]  ;;  %v613_v31 = vld [vmem:[#allocation2 + $0x81] sm:$0xff]  ;;  %v1154_v53 = vld [vmem:[#allocation2 + $0xa] sm:$0xff]  ;;  %343 = vst.msk [vmem:[#allocation3 + $0x38] sm:$0xff] %vm334_vm3, %v16138_v4 }
  0x41   : > { %10871 = vmatpush3.bf16.msra.mxu1 %v11976_v9  ;;  %10916 = vmatprep.subr.bf16.mxu0 %v11979_v19  ;;  %v628_v32 = vld [vmem:[#allocation2 + $0x139] sm:$0xff]  ;;  %v629_v33 = vld [vmem:[#allocation2 + $0x141] sm:$0xff]  ;;  %v12502_v40 = vpack.c.bf16 %v613_v31, %v612_v28  ;;  %v11986_v54 = vld [vmem:[%s16131_s1 + $0xac] ss:$0 sps:$4 sm:$0xff]   ;;  %335 = vst.msk [vmem:[#allocation3] sm:$0xff] %vm334_vm3, %v16138_v4 }
  0x42   : > { %10872 = vmatprep.subr.bf16.mxu1 %v11978_v18  ;;  %v614_v36 = vld [vmem:[#allocation2 + $0x91] sm:$0xff]  ;;  %v615_v37 = vld [vmem:[#allocation2 + $0x99] sm:$0xff]  ;;  %v12504_v41 = vpack.c.bf16 %v629_v33, %v628_v32  ;;  %v1153_v52 = vld [vmem:[#allocation2 + $0x2] sm:$0xff]  ;;  %v1632_v11 = vsel %vm743_vm0, %v11986_v54, 0  ;;  %336 = vst.msk [vmem:[#allocation3 + $0x8] sm:$0xff] %vm334_vm3, %v16138_v4 }
  0x43   : > { %10841 = vmatmul.mubr.msk.bf16.gmra.mxu0 %vm278_vm1, %v12474_v24  ;;  %v630_v38 = vld [vmem:[#allocation2 + $0x151] sm:$0xff]  ;;  %v631_v39 = vld [vmem:[#allocation2 + $0x159] sm:$0xff]  ;;  %v12506_v42 = vpack.c.bf16 %v615_v37, %v614_v36  ;;  %v1185_v59 = vpack.c.bf16 %v1154_v53, %v1153_v52  ;;  %v1156_v0 = vld [vmem:[#allocation2 + $0x22] sm:$0xff]  ;;  %339 = vst.msk [vmem:[#allocation3 + $0x18] sm:$0xff] %vm334_vm3, %v16138_v4 }
  0x44   : > { %10857 = vmatmul.mubr.msk.bf16.gmra.mxu1 %vm278_vm1, %v12476_v25  ;;  %10917 = vmatpush3.bf16.msra.mxu0 %v11979_v19  ;;  %v12508_v43 = vpack.c.bf16 %v631_v39, %v630_v38  ;;  %v616_v44 = vld [vmem:[#allocation2 + $0xa9] sm:$0xff]  ;;  %v617_v47 = vld [vmem:[#allocation2 + $0xb1] sm:$0xff]  ;;  %v546_v62 = vld [vmem:[#allocation2 + $0x20] sm:$0xff]  ;;  %340 = vst.msk [vmem:[#allocation3 + $0x20] sm:$0xff] %vm334_vm3, %v16138_v4 }
  0x45   : > { %10873 = vmatpush3.bf16.msra.mxu1 %v11978_v18  ;;  %10844 = vmatprep.mubr.msk.bf16.mxu0 %vm278_vm1, %v12478_v26  ;;  %v632_v48 = vld [vmem:[#allocation2 + $0x169] sm:$0xff]  ;;  %v633_v49 = vld [vmem:[#allocation2 + $0x171] sm:$0xff]  ;;  %v12530_v56 = vpack.c.bf16 %v617_v47, %v616_v44  ;;  %v1155_v63 = vld [vmem:[#allocation2 + $0x1a] sm:$0xff]  ;;  %345 = vst.msk [vmem:[#allocation3 + $0x48] sm:$0xff] %vm334_vm3, %v16138_v4 }
  0x46   : > { %10860 = vmatprep.mubr.msk.bf16.mxu1 %vm278_vm1, %v12480_v27  ;;  %10874 = vmatprep.subr.bf16.mxu1 %v11980_v29  ;;  %v11987_v55 = vld [vmem:[%s16131_s1 + $0xd8] ss:$0 sps:$4 sm:$0xff]   ;;  %v12532_v57 = vpack.c.bf16 %v633_v49, %v632_v48  ;;  %v547_v3 = vld [vmem:[#allocation2 + $0x30] sm:$0xff]  ;;  %v1158_v7 = vld [vmem:[#allocation2 + $0x3a] sm:$0xff]  ;;  %v12544_v9 = vpack.c.bf16 %v1156_v0, %v1155_v63  ;;  %346 = vst.msk [vmem:[#allocation3 + $0x50] sm:$0xff] %vm334_vm3, %v16138_v4 }
  0x47   : > { %10918 = vmatprep.subr.bf16.mxu0 %v11981_v30  ;;  %v545_v60 = vld [vmem:[#allocation2 + $0x18] sm:$0xff]  ;;  %v1969_v13 = vsel %vm743_vm0, %v11987_v55, 0  ;;  %v11988_v16 = vld [vmem:[%s16131_s1 + $0xa4] sm:$0xff]   ;;  %v11989_v18 = vld [vmem:[%s16131_s1 + $0xd0] sm:$0xff]   ;;  %348 = vst.msk [vmem:[#allocation3 + $0x60] sm:$0xff] %vm334_vm3, %v16138_v4 }
  0x48   : > { %10919 = vmatpush3.bf16.msra.mxu0 %v11981_v30  ;;  %v548_v5 = vld [vmem:[#allocation2 + $0x38] sm:$0xff]  ;;  %v12542_v8 = vpack.c.bf16 %v546_v62, %v545_v60  ;;  %v549_v17 = vld [vmem:[#allocation2 + $0x48] sm:$0xff]  ;;  %v550_v19 = vld [vmem:[#allocation2 + $0x50] sm:$0xff]  ;;  %349 = vst.msk [vmem:[#allocation3 + $0x68] sm:$0xff] %vm334_vm3, %v16138_v4 }
  0x49   : > { %10875 = vmatpush3.bf16.msra.mxu1 %v11980_v29  ;;  %10920 = vmatprep.subr.bf16.mxu0 %v11983_v35  ;;  %v1157_v6 = vld [vmem:[#allocation2 + $0x32] sm:$0xff]  ;;  %v12548_v14 = vpack.c.bf16 %v548_v5, %v547_v3  ;;  %v1159_v20 = vld [vmem:[#allocation2 + $0x4a] sm:$0xff]  ;;  %v551_v22 = vld [vmem:[#allocation2 + $0x60] sm:$0xff]  ;;  %v12572_v32 = vpack.c.bf16 %v550_v19, %v549_v17  ;;  %351 = vst.msk [vmem:[#allocation3 + $0x78] sm:$0xff] %vm334_vm3, %v16138_v4 }
  0x4a   : > { %10876 = vmatprep.subr.bf16.mxu1 %v11982_v34  ;;  %v12550_v15 = vpack.c.bf16 %v1158_v7, %v1157_v6  ;;  %v1160_v21 = vld [vmem:[#allocation2 + $0x52] sm:$0xff]  ;;  %v552_v23 = vld [vmem:[#allocation2 + $0x68] sm:$0xff]  ;;  %v11990_v30 = vld [vmem:[%s16131_s1 + $0x9c] sm:$0xff]   ;;  %352 = vst.msk [vmem:[#allocation3 + $0x80] sm:$0xff] %vm334_vm3, %v16138_v4 }
  0x4b   : > { %10845 = vmatmul.mubr.msk.bf16.gmra.mxu0 %vm278_vm1, %v12502_v40  ;;  %v1161_v28 = vld [vmem:[#allocation2 + $0x62] sm:$0xff]  ;;  %v1162_v29 = vld [vmem:[#allocation2 + $0x6a] sm:$0xff]  ;;  %v12574_v33 = vpack.c.bf16 %v1160_v21, %v1159_v20  ;;  %v11992_v36 = vld [vmem:[%s16131_s1 + $0x94] sm:$0xff]   ;;  %354 = vst.msk [vmem:[#allocation3 + $0x90] sm:$0xff] %vm334_vm3, %v16138_v4 }
  0x4c   : > { %10861 = vmatmul.mubr.msk.bf16.gmra.mxu1 %vm278_vm1, %v12504_v41  ;;  %10848 = vmatprep.mubr.msk.bf16.mxu0 %vm278_vm1, %v12506_v42  ;;  %v11991_v31 = vld [vmem:[%s16131_s1 + $0xc8] sm:$0xff]   ;;  %v553_v37 = vld [vmem:[#allocation2 + $0x78] sm:$0xff]  ;;  %v554_v38 = vld [vmem:[#allocation2 + $0x80] sm:$0xff]  ;;  %355 = vst.msk [vmem:[#allocation3 + $0x98] sm:$0xff] %vm334_vm3, %v16138_v4 }
  0x4d   : > { %10864 = vmatprep.mubr.msk.bf16.mxu1 %vm278_vm1, %v12508_v43  ;;  %10877 = vmatpush3.bf16.msra.mxu1 %v11982_v34  ;;  %v12576_v34 = vpack.c.bf16 %v552_v23, %v551_v22  ;;  %v1163_v39 = vld [vmem:[#allocation2 + $0x7a] sm:$0xff]  ;;  %v1164_v44 = vld [vmem:[#allocation2 + $0x82] sm:$0xff]  ;;  %v1165_v48 = vld [vmem:[#allocation2 + $0x92] sm:$0xff]  ;;  %v12600_v52 = vpack.c.bf16 %v554_v38, %v553_v37  ;;  %357 = vst.msk [vmem:[#allocation3 + $0xa8] sm:$0xff] %vm334_vm3, %v16138_v4 }
  0x4e   : > { %10921 = vmatpush3.bf16.msra.mxu0 %v11983_v35  ;;  %10878 = vmatprep.subr.bf16.mxu1 %v11984_v45  ;;  %v12578_v35 = vpack.c.bf16 %v1162_v29, %v1161_v28  ;;  %v556_v47 = vld [vmem:[#allocation2 + $0x98] sm:$0xff]  ;;  %v11994_v50 = vld [vmem:[%s16131_s1 + $0x8c] sm:$0xff]   ;;  %v12602_v53 = vpack.c.bf16 %v1164_v44, %v1163_v39  ;;  %v559_v3 = vld [vmem:[#allocation2 + $0xc0] sm:$0xff]  ;;  %358 = vst.msk [vmem:[#allocation3 + $0xb0] sm:$0xff] %vm334_vm3, %v16138_v4 }
  0x4f   : > { %10922 = vmatprep.subr.bf16.mxu0 %v11985_v46  ;;  %v1166_v49 = vld [vmem:[#allocation2 + $0x9a] sm:$0xff]  ;;  %v558_v60 = vld [vmem:[#allocation2 + $0xb0] sm:$0xff]  ;;  %v560_v5 = vld [vmem:[#allocation2 + $0xc8] sm:$0xff]  ;;  %360 = vst.msk [vmem:[#allocation3 + $0xc0] sm:$0xff] %vm334_vm3, %v16138_v4 }
  0x50   : > { %v11995_v51 = vld [vmem:[%s16131_s1 + $0xb8] sm:$0xff]   ;;  %v1167_v62 = vld [vmem:[#allocation2 + $0xaa] sm:$0xff]  ;;  %v1169_v6 = vld [vmem:[#allocation2 + $0xc2] sm:$0xff]  ;;  %v12637_v21 = vpack.c.bf16 %v560_v5, %v559_v3  ;;  %361 = vst.msk [vmem:[#allocation3 + $0xc8] sm:$0xff] %vm334_vm3, %v16138_v4 }
  0x51   : > { %10879 = vmatpush3.bf16.msra.mxu1 %v11984_v45  ;;  %v11993_v45 = vld [vmem:[%s16131_s1 + $0xc0] sm:$0xff]   ;;  %v1168_v63 = vld [vmem:[#allocation2 + $0xb2] sm:$0xff]  ;;  %v1170_v7 = vld [vmem:[#allocation2 + $0xca] sm:$0xff]  ;;  %363 = vst.msk [vmem:[#allocation3 + $0xd8] sm:$0xff] %vm334_vm3, %v16138_v4 }
  0x52   : > { %10923 = vmatpush3.bf16.msra.mxu0 %v11985_v46  ;;  %11920 = vmatprep.subr.msk.bf16.mxu1 %vm743_vm0, %v11986_v54  ;;  %v555_v46 = vld [vmem:[#allocation2 + $0x90] sm:$0xff]  ;;  %v12635_v20 = vpack.c.bf16 %v1168_v63, %v1167_v62  ;;  %v12639_v22 = vpack.c.bf16 %v1170_v7, %v1169_v6  ;;  %v561_v23 = vld [vmem:[#allocation2 + $0xd8] sm:$0xff]  ;;  %v562_v28 = vld [vmem:[#allocation2 + $0xe0] sm:$0xff]  ;;  %364 = vst.msk [vmem:[#allocation3 + $0xe0] sm:$0xff] %vm334_vm3, %v16138_v4 }
  0x53   : > { %11921 = vmatprep.subr.msk.bf16.mxu0 %vm743_vm0, %v11987_v55  ;;  %10849 = vmatmul.mubr.msk.bf16.gmra.mxu0 %vm278_vm1, %v12530_v56  ;;  %v12604_v54 = vpack.c.bf16 %v556_v47, %v555_v46  ;;  %v12606_v55 = vpack.c.bf16 %v1166_v49, %v1165_v48  ;;  %v11997_v0 = vld [vmem:[%s16131_s1 + $0xb0] sm:$0xff]   ;;  %v1171_v29 = vld [vmem:[#allocation2 + $0xda] sm:$0xff]  ;;  %v12655_v39 = vpack.c.bf16 %v562_v28, %v561_v23  ;;  %v565_v47 = vld [vmem:[#allocation2 + $0x108] sm:$0xff] }
  0x54   : > { %10865 = vmatmul.mubr.msk.bf16.gmra.mxu1 %vm278_vm1, %v12532_v57  ;;  %10924 = vmatprep.mubr.msk.bf16.mxu0 %vm278_vm1, %v1185_v59  ;;  %v557_v59 = vld [vmem:[#allocation2 + $0xa8] sm:$0xff]  ;;  %v1173_v37 = vld [vmem:[#allocation2 + $0xf2] sm:$0xff]  ;;  %v1174_v38 = vld [vmem:[#allocation2 + $0xfa] sm:$0xff]  ;;  %366 = vst.msk [vmem:[#allocation3 + $0xf0] sm:$0xff] %vm334_vm3, %v16138_v4 }
  0x55   : > { %10880 = vmatprep.mubr.msk.bf16.mxu1 %vm278_vm1, %v575_v58  ;;  %v11996_v58 = vld [vmem:[%s16131_s1 + $0x84] sm:$0xff]   ;;  %v12633_v19 = vpack.c.bf16 %v558_v60, %v557_v59  ;;  %v12661_v46 = vpack.c.bf16 %v1174_v38, %v1173_v37  ;;  %v566_v48 = vld [vmem:[#allocation2 + $0x110] sm:$0xff]  ;;  %v569_v5 = vld [vmem:[#allocation2 + $0x138] sm:$0xff]  ;;  %367 = vst.msk [vmem:[#allocation3 + $0xf8] sm:$0xff] %vm334_vm3, %v16138_v4 }
  0x56   : > { %v1175_v49 = vld [vmem:[#allocation2 + $0x10a] sm:$0xff]  ;;  %v1177_v59 = vld [vmem:[#allocation2 + $0x122] sm:$0xff]  ;;  %v12671_v62 = vpack.c.bf16 %v566_v48, %v565_v47  ;;  %v1179_v7 = vld [vmem:[#allocation2 + $0x13a] sm:$0xff]  ;;  %369 = vst.msk [vmem:[#allocation3 + $0x108] sm:$0xff] %vm334_vm3, %v16138_v4 }
  0x57   : > { %v1178_v60 = vld [vmem:[#allocation2 + $0x12a] sm:$0xff]  ;;  %v570_v6 = vld [vmem:[#allocation2 + $0x140] sm:$0xff]  ;;  %v1181_v23 = vld [vmem:[#allocation2 + $0x152] sm:$0xff]  ;;  %370 = vst.msk [vmem:[#allocation3 + $0x110] sm:$0xff] %vm334_vm3, %v16138_v4 }
  0x58   : > { %v12677_v3 = vpack.c.bf16 %v1178_v60, %v1177_v59  ;;  %v1182_v28 = vld [vmem:[#allocation2 + $0x15a] sm:$0xff]  ;;  %v573_v37 = vld [vmem:[#allocation2 + $0x168] sm:$0xff]  ;;  %v574_v38 = vld [vmem:[#allocation2 + $0x170] sm:$0xff]  ;;  %372 = vst.msk [vmem:[#allocation3 + $0x120] sm:$0xff] %vm334_vm3, %v16138_v4 }
  0x59   : > { %v1183_v47 = vld [vmem:[#allocation2 + $0x16a] sm:$0xff]  ;;  %v1184_v48 = vld [vmem:[#allocation2 + $0x172] sm:$0xff]  ;;  %v12000_v59 = vld [vmem:[%s16131_s1 + $0xfc] sm:$0xff]   ;;  %373 = vst.msk [vmem:[#allocation3 + $0x128] sm:$0xff] %vm334_vm3, %v16138_v4 }
  0x5a   : > { %v12001_v60 = vld [vmem:[%s16131_s1 + $0x128] sm:$0xff]   ;;  %375 = vst.msk [vmem:[#allocation3 + $0x138] sm:$0xff] %vm334_vm3, %v16138_v4  ;;  %376 = vst.msk [vmem:[#allocation3 + $0x140] sm:$0xff] %vm334_vm3, %v16138_v4 }
  0x5b   : > { %10925 = vmatmul.mubr.msk.bf16.vlgmr.msra.gmra.mxu0 %vm278_vm1, %v12544_v9  ;;  %378 = vst.msk [vmem:[#allocation3 + $0x150] sm:$0xff] %vm334_vm3, %v16138_v4  ;;  %379 = vst.msk [vmem:[#allocation3 + $0x158] sm:$0xff] %vm334_vm3, %v16138_v4 }
  0x5c   : > { %10881 = vmatmul.mubr.msk.bf16.vlgmr.msra.gmra.mxu1 %vm278_vm1, %v12542_v8  ;;  %11001 = vmatpush3.bf16.msra.mxu0 %v1969_v13  ;;  %v10283_v13 = vld [vmem:[%s12375_s13 + $0x78] sm:$0xff]   ;;  %381 = vst.msk [vmem:[#allocation3 + $0x168] sm:$0xff] %vm334_vm3, %v16138_v4  ;;  %382 = vst.msk [vmem:[#allocation3 + $0x170] sm:$0xff] %vm334_vm3, %v16138_v4  ;;  %s269_s13 = sand.u32 1, %s12128_s25  }
  0x5d   : > { %10957 = vmatpush3.bf16.msra.mxu1 %v1632_v11  ;;  %10884 = vmatprep.mubr.msk.bf16.mxu1 %vm278_vm1, %v12548_v14  ;;  %v12625_v11 = vld [vmem:[%s16131_s1 + $0x104] ss:$0 sps:$4 sm:$0xff]   ;;  %v10267_v17 = vunpack.c.l.bf16 %v10283_v13  ;;  %384 = vst.msk [vmem:[#allocation3 + $0x180] sm:$0xff] %vm334_vm3, %v16138_v4  ;;  %385 = vst.msk [vmem:[#allocation3 + $0x188] sm:$0xff] %vm334_vm3, %v16138_v4  ;;  %s9471_s16 = sshll.u32 %s269_s13, 8  ;;  %s16090_s28 = scalar_lea.sflag [#allocation6], %s269_s13 }
  0x5e   : > { %10928 = vmatprep.mubr.msk.bf16.mxu0 %vm278_vm1, %v12550_v15  ;;  %10958 = vmatprep.subr.bf16.mxu1 %v11988_v16  ;;  %387 = vst.msk [vmem:[#allocation3 + $0x198] sm:$0xff] %vm334_vm3, %v16138_v4  ;;  %388 = vst.msk [vmem:[#allocation3 + $0x1a0] sm:$0xff] %vm334_vm3, %v16138_v4  ;;  %s15847_s23 = scalar_lea.vmem [#allocation5], %s9471_s16  ;;  %s12080_s16 = sshll.u32 %s12139_s15, 4  ;;  %s12081_s16 = int_to_ptr.vmem [resolvable:$false] %s12080_s16 }
  0x5f   : > { %11002 = vmatprep.subr.bf16.mxu0 %v11989_v18  ;;  %541 = vst.msk [vmem:[#allocation2 + $0x181] sm:$0xff] %vm278_vm1, %v10267_v17  ;;  %v571_v17 = vld [vmem:[#allocation2 + $0x150] sm:$0xff]  ;;  %s9405_s20 = sshll.u32 %s15847_s23, 4  ;;  %s12082_s17 = scalar_lea.vmem %s12081_s16, 8192  ;;  %s16084_s20 = int_to_ptr.vmem [resolvable:$true] %s9405_s20 }
  0x60   : > { %11003 = vmatpush3.bf16.msra.mxu0 %v11989_v18  ;;  %v10268_v18 = vunpack.c.h.bf16 %v10283_v13  ;;  %v1180_v13 = vld [vmem:[#allocation2 + $0x142] sm:$0xff]  ;;  %344 = vst.msk [vmem:[#allocation3 + $0x40] sm:$0x3] %vm337_vm4, %v16138_v4  ;;  %338 = vst.msk [vmem:[#allocation3 + $0x10] sm:$0x3] %vm337_vm4, %v16138_v4  ;;  %s12076_s14 = scalar_lea.vmem %s16084_s20, 4096  ;;  %p12083_p0 = scmp.lt.s32.totalorder %s16084_s20, %s12081_s16 }
  0x61   : > { %10959 = vmatpush3.bf16.msra.mxu1 %v11988_v16  ;;  %11004 = vmatprep.subr.bf16.mxu0 %v11991_v31  ;;  %v12631_v16 = vld [vmem:[%s16131_s1 + $0x130] ss:$0 sps:$4 sm:$0xff]   ;;  %341 = vst.msk [vmem:[#allocation3 + $0x28] sm:$0x3] %vm337_vm4, %v16138_v4  ;;  %347 = vst.msk [vmem:[#allocation3 + $0x58] sm:$0x3] %vm337_vm4, %v16138_v4  ;;  %p12077_p11 = scmp.ne.s32.totalorder %s16084_s20, %s12076_s14  ;;  %p12084_p1 = scmp.lt.s32.totalorder %s12082_s17, %s12076_s14 }
  0x62   : > { %10960 = vmatprep.subr.bf16.mxu1 %v11990_v30  ;;  %542 = vst.msk [vmem:[#allocation2 + $0x189] sm:$0xff] %vm278_vm1, %v10268_v18  ;;  %v572_v18 = vld [vmem:[#allocation2 + $0x158] sm:$0xff] }
  0x63   : > { %10929 = vmatmul.mubr.msk.bf16.gmra.mxu0 %vm278_vm1, %v12574_v33  ;;  %350 = vst.msk [vmem:[#allocation3 + $0x70] sm:$0x3] %vm337_vm4, %v16138_v4  ;;  %353 = vst.msk [vmem:[#allocation3 + $0x88] sm:$0x3] %vm337_vm4, %v16138_v4  ;;  %p12078_p12 = pnand %p12077_p11, %p12220_p5  ;;  %p12085_p2 = por %p12084_p1, %p12083_p0 }
  0x64   : > { %10885 = vmatmul.mubr.msk.bf16.gmra.mxu1 %vm278_vm1, %v12572_v32  ;;  %10932 = vmatprep.mubr.msk.bf16.mxu0 %vm278_vm1, %v12578_v35  ;;  %356 = vst.msk [vmem:[#allocation3 + $0xa0] sm:$0x3] %vm337_vm4, %v16138_v4  ;;  %359 = vst.msk [vmem:[#allocation3 + $0xb8] sm:$0x3] %vm337_vm4, %v16138_v4 }
  0x65   : > { %10888 = vmatprep.mubr.msk.bf16.mxu1 %vm278_vm1, %v12576_v34  ;;  %10961 = vmatpush3.bf16.msra.mxu1 %v11990_v30  ;;  %v1172_v30 = vld [vmem:[#allocation2 + $0xe2] sm:$0xff]  ;;  %362 = vst.msk [vmem:[#allocation3 + $0xd0] sm:$0x3] %vm337_vm4, %v16138_v4  ;;  %365 = vst.msk [vmem:[#allocation3 + $0xe8] sm:$0x3] %vm337_vm4, %v16138_v4  ;;  %p12079_p13 = pneg %p12078_p12 }
  0x66   : > { %11005 = vmatpush3.bf16.msra.mxu0 %v11991_v31  ;;  %10962 = vmatprep.subr.bf16.mxu1 %v11992_v36  ;;  %v563_v31 = vld [vmem:[#allocation2 + $0xf0] sm:$0xff]  ;;  %v12657_v44 = vpack.c.bf16 %v1172_v30, %v1171_v29  ;;  %v12687_v29 = vpack.c.bf16 %v570_v6, %v569_v5  ;;  %v12689_v30 = vpack.c.bf16 %v1180_v13, %v1179_v7  ;;  %v12010_v5 = vld [vmem:[%s16131_s1 + $0x15c] ss:$0 sps:$4 sm:$0xff]   ;;  %v12011_v6 = vld [vmem:[%s16131_s1 + $0x188] ss:$0 sps:$4 sm:$0xff]  }
  0x67   : > { %11006 = vmatprep.subr.bf16.mxu0 %v11993_v45  ;;  %368 = vst.msk [vmem:[#allocation3 + $0x100] sm:$0x3] %vm337_vm4, %v16138_v4  ;;  %371 = vst.msk [vmem:[#allocation3 + $0x118] sm:$0x3] %vm337_vm4, %v16138_v4  ;;  %p12086_p3 = pnand %p12085_p2, %p12079_p13 }
  0x68   : > { %374 = vst.msk [vmem:[#allocation3 + $0x130] sm:$0x3] %vm337_vm4, %v16138_v4  ;;  %377 = vst.msk [vmem:[#allocation3 + $0x148] sm:$0x3] %vm337_vm4, %v16138_v4 }
  0x69   : > { %10963 = vmatpush3.bf16.msra.mxu1 %v11992_v36  ;;  %v564_v36 = vld [vmem:[#allocation2 + $0xf8] sm:$0xff]  ;;  %380 = vst.msk [vmem:[#allocation3 + $0x160] sm:$0x3] %vm337_vm4, %v16138_v4  ;;  %383 = vst.msk [vmem:[#allocation3 + $0x178] sm:$0x3] %vm337_vm4, %v16138_v4 }
  0x6a   : > { %11007 = vmatpush3.bf16.msra.mxu0 %v11993_v45  ;;  %10964 = vmatprep.subr.bf16.mxu1 %v11994_v50  ;;  %v12659_v45 = vpack.c.bf16 %v564_v36, %v563_v31  ;;  %v12691_v31 = vpack.c.bf16 %v572_v18, %v571_v17  ;;  %v12693_v36 = vpack.c.bf16 %v1182_v28, %v1181_v23  ;;  %v2194_v18 = vld [vmem:[#allocation2 + $0x182] sm:$0xff]  ;;  %v2195_v23 = vld [vmem:[#allocation2 + $0x18a] sm:$0xff]  ;;  %v2532_v28 = vld [vmem:[#allocation2 + $0x198] sm:$0xff] }
  0x6b   : > { %11008 = vmatprep.subr.bf16.mxu0 %v11995_v51  ;;  %10933 = vmatmul.mubr.msk.bf16.gmra.mxu0 %vm278_vm1, %v12602_v53  ;;  %386 = vst.msk [vmem:[#allocation3 + $0x190] sm:$0x3] %vm337_vm4, %v16138_v4  ;;  %389 = vst.msk [vmem:[#allocation3 + $0x1a8] sm:$0x3] %vm337_vm4, %v16138_v4 }
  0x6c   : > { %10889 = vmatmul.mubr.msk.bf16.gmra.mxu1 %vm278_vm1, %v12600_v52  ;;  %10936 = vmatprep.mubr.msk.bf16.mxu0 %vm278_vm1, %v12606_v55 }
  0x6d   : > { %10892 = vmatprep.mubr.msk.bf16.mxu1 %vm278_vm1, %v12604_v54  ;;  %10965 = vmatpush3.bf16.msra.mxu1 %v11994_v50  ;;  %v1176_v50 = vld [vmem:[#allocation2 + $0x112] sm:$0xff] }
  0x6e   : > { %11009 = vmatpush3.bf16.msra.mxu0 %v11995_v51  ;;  %10966 = vmatprep.subr.bf16.mxu1 %v11996_v58  ;;  %v567_v51 = vld [vmem:[#allocation2 + $0x120] sm:$0xff]  ;;  %v12673_v63 = vpack.c.bf16 %v1176_v50, %v1175_v49  ;;  %v12703_v49 = vpack.c.bf16 %v574_v38, %v573_v37  ;;  %v12705_v50 = vpack.c.bf16 %v1184_v48, %v1183_v47 }
  0x6f   : > { %11010 = vmatprep.subr.bf16.mxu0 %v11997_v0  ;;  %v2840_v38 = vld [vmem:[#allocation2 + $0x39] sm:$0xff] }
  0x70   : > { %v3177_v47 = vld [vmem:[#allocation2 + $0x3a] sm:$0xff] }
  0x71   : > { %10967 = vmatpush3.bf16.msra.mxu1 %v11996_v58  ;;  %v568_v58 = vld [vmem:[#allocation2 + $0x128] sm:$0xff] }
  0x72   : > { %11011 = vmatpush3.bf16.msra.mxu0 %v11997_v0  ;;  %11922 = vmatprep.subr.msk.bf16.mxu1 %vm743_vm0, %v12625_v11  ;;  %v12675_v0 = vpack.c.bf16 %v568_v58, %v567_v51  ;;  %v2306_v51 = vsel %vm743_vm0, %v12625_v11, 0  ;;  %v2644_v58 = vsel %vm743_vm0, %v12631_v16, 0  ;;  %v12005_v11 = vld [vmem:[%s16131_s1 + $0x118] sm:$0xff]  }
  0x73   : > { %11923 = vmatprep.subr.msk.bf16.mxu0 %vm743_vm0, %v12631_v16  ;;  %10937 = vmatmul.mubr.msk.bf16.gmra.mxu0 %vm278_vm1, %v12635_v20  ;;  %v12007_v16 = vld [vmem:[%s16131_s1 + $0x110] sm:$0xff]  }
  0x74   : > { %10893 = vmatmul.mubr.msk.bf16.gmra.mxu1 %vm278_vm1, %v12633_v19  ;;  %10940 = vmatprep.mubr.msk.bf16.mxu0 %vm278_vm1, %v12639_v22 }
  0x75   : > { %10896 = vmatprep.mubr.msk.bf16.mxu1 %vm278_vm1, %v12637_v21 }
  0x7b   : > { %10941 = vmatmul.mubr.msk.bf16.gmra.mxu0 %vm278_vm1, %v12657_v44 }
  0x7c   : > { %10897 = vmatmul.mubr.msk.bf16.gmra.mxu1 %vm278_vm1, %v12655_v39  ;;  %10944 = vmatprep.mubr.msk.bf16.mxu0 %vm278_vm1, %v12661_v46 }
  0x7d   : > { %10900 = vmatprep.mubr.msk.bf16.mxu1 %vm278_vm1, %v12659_v45 }
  0x83   : > { %10945 = vmatmul.mubr.msk.bf16.gmra.mxu0 %vm278_vm1, %v12673_v63 }
  0x84   : > { %10901 = vmatmul.mubr.msk.bf16.gmra.mxu1 %vm278_vm1, %v12671_v62  ;;  %10948 = vmatprep.mubr.msk.bf16.mxu0 %vm278_vm1, %v12677_v3 }
  0x85   : > { %10904 = vmatprep.mubr.msk.bf16.mxu1 %vm278_vm1, %v12675_v0 }
  0x8b   : > { %10949 = vmatmul.mubr.msk.bf16.gmra.mxu0 %vm278_vm1, %v12689_v30 }
  0x8c   : > { %10905 = vmatmul.mubr.msk.bf16.gmra.mxu1 %vm278_vm1, %v12687_v29  ;;  %10952 = vmatprep.mubr.msk.bf16.mxu0 %vm278_vm1, %v12693_v36 }
  0x8d   : > { %10908 = vmatprep.mubr.msk.bf16.mxu1 %vm278_vm1, %v12691_v31 }
  0x93   : > { %10953 = vmatmul.mubr.msk.bf16.gmra.mxu0 %vm278_vm1, %v12705_v50 }
  0x94   : > { %10909 = vmatmul.mubr.msk.bf16.gmra.mxu1 %vm278_vm1, %v12703_v49  ;;  %11012 = vmatprep.mubr.msk.bf16.mxu0 %vm278_vm1, %v12438_v1  ;;  %v12002_v1 = vld [vmem:[%s16131_s1 + $0xf4] sm:$0xff]  }
  0x95   : > { %10968 = vmatprep.mubr.msk.bf16.mxu1 %vm278_vm1, %v12542_v8  ;;  %v12003_v8 = vld [vmem:[%s16131_s1 + $0x120] sm:$0xff]  }
  0x9b   : > { %11013 = vmatmul.mubr.msk.bf16.vlgmr.msra.gmra.mxu0 %vm278_vm1, %v12452_v10  ;;  %v12004_v10 = vld [vmem:[%s16131_s1 + $0xec] sm:$0xff]  }
  0x9c   : > { %10969 = vmatmul.mubr.msk.bf16.vlgmr.msra.gmra.mxu1 %vm278_vm1, %v12548_v14  ;;  %11089 = vmatpush3.bf16.msra.mxu0 %v2644_v58 }
  0x9d   : > { %11045 = vmatpush3.bf16.msra.mxu1 %v2306_v51  ;;  %10972 = vmatprep.mubr.msk.bf16.mxu1 %vm278_vm1, %v12572_v32  ;;  %v12957_v51 = vpack.c.bf16 %v2195_v23, %v2194_v18  ;;  %v3183_v18 = vld [vmem:[#allocation2 + $0x82] sm:$0xff]  ;;  %v2847_v23 = vld [vmem:[#allocation2 + $0x91] sm:$0xff] }
  0x9e   : > { %11016 = vmatprep.mubr.msk.bf16.mxu0 %vm278_vm1, %v12474_v24  ;;  %11046 = vmatprep.subr.bf16.mxu1 %v12000_v59  ;;  %v12006_v24 = vld [vmem:[%s16131_s1 + $0xe4] sm:$0xff]  }
  0x9f   : > { %11090 = vmatprep.subr.bf16.mxu0 %v12001_v60 }
  0xa0   : > { %11091 = vmatpush3.bf16.msra.mxu0 %v12001_v60 }
  0xa1   : > { %11047 = vmatpush3.bf16.msra.mxu1 %v12000_v59  ;;  %11092 = vmatprep.subr.bf16.mxu0 %v12003_v8 }
  0xa2   : > { %11048 = vmatprep.subr.bf16.mxu1 %v12002_v1 }
  0xa3   : > { %11017 = vmatmul.mubr.msk.bf16.gmra.mxu0 %vm278_vm1, %v12478_v26  ;;  %v12008_v26 = vld [vmem:[%s16131_s1 + $0xdc] sm:$0xff]  }
  0xa4   : > { %10973 = vmatmul.mubr.msk.bf16.gmra.mxu1 %vm278_vm1, %v12576_v34  ;;  %11020 = vmatprep.mubr.msk.bf16.mxu0 %vm278_vm1, %v12502_v40  ;;  %v12009_v40 = vld [vmem:[%s16131_s1 + $0x108] sm:$0xff]  }
  0xa5   : > { %10976 = vmatprep.mubr.msk.bf16.mxu1 %vm278_vm1, %v12600_v52  ;;  %11049 = vmatpush3.bf16.msra.mxu1 %v12002_v1 }
  0xa6   : > { %11093 = vmatpush3.bf16.msra.mxu0 %v12003_v8  ;;  %11050 = vmatprep.subr.bf16.mxu1 %v12004_v10 }
  0xa7   : > { %11094 = vmatprep.subr.bf16.mxu0 %v12005_v11 }
  0xa9   : > { %11051 = vmatpush3.bf16.msra.mxu1 %v12004_v10 }
  0xaa   : > { %11095 = vmatpush3.bf16.msra.mxu0 %v12005_v11  ;;  %11052 = vmatprep.subr.bf16.mxu1 %v12006_v24  ;;  %v2841_v11 = vld [vmem:[#allocation2 + $0x49] sm:$0xff] }
  0xab   : > { %11096 = vmatprep.subr.bf16.mxu0 %v12007_v16  ;;  %11021 = vmatmul.mubr.msk.bf16.gmra.mxu0 %vm278_vm1, %v12506_v42 }
  0xac   : > { %10977 = vmatmul.mubr.msk.bf16.gmra.mxu1 %vm278_vm1, %v12604_v54  ;;  %11024 = vmatprep.mubr.msk.bf16.mxu0 %vm278_vm1, %v12530_v56  ;;  %v12012_v56 = vld [vmem:[%s16131_s1 + $0x154] sm:$0xff]  }
  0xad   : > { %10980 = vmatprep.mubr.msk.bf16.mxu1 %vm278_vm1, %v12633_v19  ;;  %11053 = vmatpush3.bf16.msra.mxu1 %v12006_v24  ;;  %v2842_v24 = vld [vmem:[#allocation2 + $0x51] sm:$0xff] }
  0xae   : > { %11097 = vmatpush3.bf16.msra.mxu0 %v12007_v16  ;;  %11054 = vmatprep.subr.bf16.mxu1 %v12008_v26  ;;  %v3178_v16 = vld [vmem:[#allocation2 + $0x4a] sm:$0xff] }
  0xaf   : > { %11098 = vmatprep.subr.bf16.mxu0 %v12009_v40 }
  0xb1   : > { %11055 = vmatpush3.bf16.msra.mxu1 %v12008_v26  ;;  %v3179_v26 = vld [vmem:[#allocation2 + $0x52] sm:$0xff] }
  0xb2   : > { %11099 = vmatpush3.bf16.msra.mxu0 %v12009_v40  ;;  %11924 = vmatprep.subr.msk.bf16.mxu1 %vm743_vm0, %v12010_v5  ;;  %v2843_v40 = vld [vmem:[#allocation2 + $0x61] sm:$0xff] }
  0xb3   : > { %11925 = vmatprep.subr.msk.bf16.mxu0 %vm743_vm0, %v12011_v6  ;;  %11025 = vmatmul.mubr.msk.bf16.gmra.mxu0 %vm278_vm1, %v12432_v61  ;;  %v1520_v61 = vld [vmem:[#allocation2 + $0x180] sm:$0xff] }
  0xb4   : > { %10981 = vmatmul.mubr.msk.bf16.gmra.mxu1 %vm278_vm1, %v12637_v21  ;;  %11028 = vmatprep.mubr.msk.bf16.mxu0 %vm278_vm1, %v12440_v2  ;;  %v1521_v2 = vld [vmem:[#allocation2 + $0x188] sm:$0xff] }
  0xb5   : > { %10984 = vmatprep.mubr.msk.bf16.mxu1 %vm278_vm1, %v12655_v39 }
  0xbb   : > { %11029 = vmatmul.mubr.msk.bf16.gmra.mxu0 %vm278_vm1, %v12455_v12  ;;  %v1857_v12 = vld [vmem:[#allocation2 + $0x181] sm:$0xff] }
  0xbc   : > { %10985 = vmatmul.mubr.msk.bf16.gmra.mxu1 %vm278_vm1, %v12659_v45  ;;  %11032 = vmatprep.mubr.msk.bf16.mxu0 %vm278_vm1, %v12476_v25  ;;  %v1858_v25 = vld [vmem:[#allocation2 + $0x189] sm:$0xff] }
  0xbd   : > { %10988 = vmatprep.mubr.msk.bf16.mxu1 %vm278_vm1, %v12671_v62  ;;  %v12815_v42 = vpack.c.bf16 %v1858_v25, %v1857_v12  ;;  %v3181_v12 = vld [vmem:[#allocation2 + $0x6a] sm:$0xff] }
  0xc3   : > { %11033 = vmatmul.mubr.msk.bf16.gmra.mxu0 %vm278_vm1, %v12480_v27  ;;  %v12813_v27 = vpack.c.bf16 %v1521_v2, %v1520_v61  ;;  %v2844_v61 = vld [vmem:[#allocation2 + $0x69] sm:$0xff] }
  0xc4   : > { %10989 = vmatmul.mubr.msk.bf16.gmra.mxu1 %vm278_vm1, %v12675_v0  ;;  %11036 = vmatprep.mubr.msk.bf16.mxu0 %vm278_vm1, %v12504_v41  ;;  %v2981_v41 = vsel %vm743_vm0, %v12010_v5, 0  ;;  %v3180_v2 = vld [vmem:[#allocation2 + $0x62] sm:$0xff] }
  0xc5   : > { %10992 = vmatprep.mubr.msk.bf16.mxu1 %vm278_vm1, %v12687_v29 }
  0xcb   : > { %11037 = vmatmul.mubr.msk.bf16.gmra.mxu0 %vm278_vm1, %v12508_v43  ;;  %v3318_v43 = vsel %vm743_vm0, %v12011_v6, 0 }
  0xcc   : > { %10993 = vmatmul.mubr.msk.bf16.gmra.mxu1 %vm278_vm1, %v12691_v31  ;;  %11040 = vmatprep.mubr.msk.bf16.mxu0 %vm278_vm1, %v12532_v57  ;;  %v12013_v57 = vld [vmem:[%s16131_s1 + $0x180] sm:$0xff]  }
  0xcd   : > { %10996 = vmatprep.mubr.msk.bf16.mxu1 %vm278_vm1, %v12703_v49 }
  0xd3   : > { %11041 = vmatmul.mubr.msk.bf16.gmra.mxu0 %vm278_vm1, %v12815_v42 }
  0xd4   : > { %10997 = vmatmul.mubr.msk.bf16.gmra.mxu1 %vm278_vm1, %v12813_v27  ;;  %11100 = vmatprep.mubr.msk.bf16.mxu0 %vm278_vm1, %v12548_v14  ;;  %v12015_v14 = vld [vmem:[%s16131_s1 + $0x178] sm:$0xff]  }
  0xd5   : > { %11056 = vmatprep.mubr.msk.bf16.mxu1 %vm278_vm1, %v12544_v9  ;;  %v12014_v9 = vld [vmem:[%s16131_s1 + $0x14c] sm:$0xff]  }
  0xdb   : > { %11101 = vmatmul.mubr.msk.bf16.vlgmr.msra.gmra.mxu0 %vm278_vm1, %v12572_v32  ;;  %v12017_v32 = vld [vmem:[%s16131_s1 + $0x170] sm:$0xff]  }
  0xdc   : > { %11057 = vmatmul.mubr.msk.bf16.vlgmr.msra.gmra.mxu1 %vm278_vm1, %v12550_v15  ;;  %11177 = vmatpush3.bf16.msra.mxu0 %v3318_v43  ;;  %v12016_v15 = vld [vmem:[%s16131_s1 + $0x144] sm:$0xff]   ;;  %v3209_v43 = vpack.c.bf16 %v3179_v26, %v3178_v16 }
  0xdd   : > { %11133 = vmatpush3.bf16.msra.mxu1 %v2981_v41  ;;  %11060 = vmatprep.mubr.msk.bf16.mxu1 %vm278_vm1, %v12574_v33  ;;  %v12018_v33 = vld [vmem:[%s16131_s1 + $0x13c] sm:$0xff]   ;;  %v2872_v41 = vpack.c.bf16 %v2842_v24, %v2841_v11 }
  0xde   : > { %11104 = vmatprep.mubr.msk.bf16.mxu0 %vm278_vm1, %v12576_v34  ;;  %11134 = vmatprep.subr.bf16.mxu1 %v12012_v56  ;;  %v12019_v34 = vld [vmem:[%s16131_s1 + $0x168] sm:$0xff]  }
  0xdf   : > { %11178 = vmatprep.subr.bf16.mxu0 %v12013_v57 }
  0xe0   : > { %11179 = vmatpush3.bf16.msra.mxu0 %v12013_v57  ;;  %v3210_v57 = vpack.c.bf16 %v3181_v12, %v3180_v2 }
  0xe1   : > { %11135 = vmatpush3.bf16.msra.mxu1 %v12012_v56  ;;  %11180 = vmatprep.subr.bf16.mxu0 %v12015_v14  ;;  %v2873_v56 = vpack.c.bf16 %v2844_v61, %v2843_v40 }
  0xe2   : > { %11136 = vmatprep.subr.bf16.mxu1 %v12014_v9 }
  0xe3   : > { %11105 = vmatmul.mubr.msk.bf16.gmra.mxu0 %vm278_vm1, %v12600_v52  ;;  %v12021_v52 = vld [vmem:[%s16131_s1 + $0x160] sm:$0xff]  }
  0xe4   : > { %11061 = vmatmul.mubr.msk.bf16.gmra.mxu1 %vm278_vm1, %v12578_v35  ;;  %11108 = vmatprep.mubr.msk.bf16.mxu0 %vm278_vm1, %v12604_v54  ;;  %v12020_v35 = vld [vmem:[%s16131_s1 + $0x134] sm:$0xff]  }
  0xe5   : > { %11064 = vmatprep.mubr.msk.bf16.mxu1 %vm278_vm1, %v12602_v53  ;;  %11137 = vmatpush3.bf16.msra.mxu1 %v12014_v9 }
  0xe6   : > { %11181 = vmatpush3.bf16.msra.mxu0 %v12015_v14  ;;  %11138 = vmatprep.subr.bf16.mxu1 %v12016_v15 }
  0xe7   : > { %11182 = vmatprep.subr.bf16.mxu0 %v12017_v32 }
  0xe9   : > { %11139 = vmatpush3.bf16.msra.mxu1 %v12016_v15 }
  0xea   : > { %11183 = vmatpush3.bf16.msra.mxu0 %v12017_v32  ;;  %11140 = vmatprep.subr.bf16.mxu1 %v12018_v33 }
  0xeb   : > { %11184 = vmatprep.subr.bf16.mxu0 %v12019_v34  ;;  %11109 = vmatmul.mubr.msk.bf16.gmra.mxu0 %vm278_vm1, %v12633_v19 }
  0xec   : > { %11065 = vmatmul.mubr.msk.bf16.gmra.mxu1 %vm278_vm1, %v12606_v55  ;;  %11112 = vmatprep.mubr.msk.bf16.mxu0 %vm278_vm1, %v12637_v21 }
  0xed   : > { %11068 = vmatprep.mubr.msk.bf16.mxu1 %vm278_vm1, %v12635_v20  ;;  %11141 = vmatpush3.bf16.msra.mxu1 %v12018_v33  ;;  %v2845_v33 = vld [vmem:[#allocation2 + $0x79] sm:$0xff] }
  0xee   : > { %11185 = vmatpush3.bf16.msra.mxu0 %v12019_v34  ;;  %11142 = vmatprep.subr.bf16.mxu1 %v12020_v35  ;;  %v2846_v34 = vld [vmem:[#allocation2 + $0x81] sm:$0xff] }
  0xef   : > { %11186 = vmatprep.subr.bf16.mxu0 %v12021_v52  ;;  %v2874_v11 = vpack.c.bf16 %v2846_v34, %v2845_v33  ;;  %v3187_v33 = vld [vmem:[#allocation2 + $0xb2] sm:$0xff]  ;;  %v2851_v34 = vld [vmem:[#allocation2 + $0xc1] sm:$0xff] }
  0xf1   : > { %11143 = vmatpush3.bf16.msra.mxu1 %v12020_v35 }
  0xf2   : > { %11187 = vmatpush3.bf16.msra.mxu0 %v12021_v52  ;;  %v3182_v52 = vld [vmem:[#allocation2 + $0x7a] sm:$0xff] }
  0xf3   : > { %11113 = vmatmul.mubr.msk.bf16.gmra.mxu0 %vm278_vm1, %v12655_v39 }
  0xf4   : > { %11069 = vmatmul.mubr.msk.bf16.gmra.mxu1 %vm278_vm1, %v12639_v22  ;;  %11116 = vmatprep.mubr.msk.bf16.mxu0 %vm278_vm1, %v12659_v45 }
  0xf5   : > { %11072 = vmatprep.mubr.msk.bf16.mxu1 %vm278_vm1, %v12657_v44 }
  0xfb   : > { %v12889_v53 = vpop.f32.mrf.mxu0  ;;  %11117 = vmatmul.mubr.msk.bf16.gmra.mxu0 %vm278_vm1, %v12671_v62 }
  0xfc   : > { %v12891_v54 = vpop.f32.mrf.mxu1  ;;  %11073 = vmatmul.mubr.msk.bf16.gmra.mxu1 %vm278_vm1, %v12661_v46  ;;  %11120 = vmatprep.mubr.msk.bf16.mxu0 %vm278_vm1, %v12675_v0 }
  0xfd   : > { %11076 = vmatprep.mubr.msk.bf16.mxu1 %vm278_vm1, %v12673_v63  ;;  %v12901_v55 = vpop.f32.mrf.mxu0 }
  0xfe   : > { %v12903_v19 = vpop.f32.mrf.mxu1 }
  0xff   : > { %v12905_v20 = vpop.f32.mrf.mxu0 }
 0x100   : > { %v12907_v21 = vpop.f32.mrf.mxu1 }
 0x101   : > { %v12909_v22 = vpop.f32.mrf.mxu0 }
 0x102   : > { %v12911_v39 = vpop.f32.mrf.mxu1 }
 0x103   : > { %v12913_v44 = vpop.f32.mrf.mxu0  ;;  %11121 = vmatmul.mubr.msk.bf16.gmra.mxu0 %vm278_vm1, %v12687_v29  ;;  %v2533_v29 = vld [vmem:[#allocation2 + $0x1a0] sm:$0xff] }
 0x104   : > { %v12915_v45 = vpop.f32.mrf.mxu1  ;;  %11077 = vmatmul.mubr.msk.bf16.gmra.mxu1 %vm278_vm1, %v12677_v3  ;;  %11124 = vmatprep.mubr.msk.bf16.mxu0 %vm278_vm1, %v12691_v31 }
 0x105   : > { %11080 = vmatprep.mubr.msk.bf16.mxu1 %vm278_vm1, %v12689_v30  ;;  %v12925_v46 = vpop.f32.mrf.mxu0  ;;  %v2839_v30 = vld [vmem:[#allocation2 + $0x31] sm:$0xff] }
 0x106   : > { %v12927_v62 = vpop.f32.mrf.mxu1  ;;  %v2871_v58 = vpack.c.bf16 %v2840_v38, %v2839_v30  ;;  %v2848_v30 = vld [vmem:[#allocation2 + $0x99] sm:$0xff] }
 0x107   : > { %v12929_v63 = vpop.f32.mrf.mxu0  ;;  %v3184_v38 = vld [vmem:[#allocation2 + $0x92] sm:$0xff]  ;;  %v2875_v26 = vpack.c.bf16 %v2848_v30, %v2847_v23  ;;  %v3189_v23 = vld [vmem:[#allocation2 + $0xca] sm:$0xff] }
 0x108   : > { %v12931_v0 = vpop.f32.mrf.mxu1 }
 0x109   : > { %v12933_v7 = vpop.f32.mrf.mxu0 }
 0x10a   : > { %v12935_v3 = vpop.f32.mrf.mxu1 }
 0x10b   : > { %v12937_v13 = vpop.f32.mrf.mxu0  ;;  %11125 = vmatmul.mubr.msk.bf16.gmra.mxu0 %vm278_vm1, %v12703_v49 }
 0x10c   : > { %v12939_v17 = vpop.f32.mrf.mxu1  ;;  %11081 = vmatmul.mubr.msk.bf16.gmra.mxu1 %vm278_vm1, %v12693_v36  ;;  %11128 = vmatprep.mubr.msk.bf16.mxu0 %vm278_vm1, %v12813_v27  ;;  %v3176_v36 = vld [vmem:[#allocation2 + $0x32] sm:$0xff] }
 0x10d   : > { %11084 = vmatprep.mubr.msk.bf16.mxu1 %vm278_vm1, %v12705_v50  ;;  %v12949_v31 = vpop.f32.mrf.mxu0  ;;  %v2549_v50 = vpack.c.bf16 %v2533_v29, %v2532_v28  ;;  %v3208_v59 = vpack.c.bf16 %v3177_v47, %v3176_v36  ;;  %v3185_v36 = vld [vmem:[#allocation2 + $0x9a] sm:$0xff] }
 0x10e   : > { %v12951_v37 = vpop.f32.mrf.mxu1  ;;  %v3212_v40 = vpack.c.bf16 %v3185_v36, %v3184_v38 }
 0x10f   : > { %v12953_v48 = vpop.f32.mrf.mxu0 }
 0x110   : > { %v12955_v49 = vpop.f32.mrf.mxu1 }
 0x111   : > { %v12959_v60 = vpop.f32.mrf.mxu0 }
 0x112   : > { %v12961_v1 = vpop.f32.mrf.mxu1 }
 0x113   : > { %v12963_v8 = vpop.f32.mrf.mxu0  ;;  %11129 = vmatmul.mubr.msk.bf16.gmra.mxu0 %vm278_vm1, %v2549_v50 }
 0x114   : > { %v12965_v10 = vpop.f32.mrf.mxu1  ;;  %11085 = vmatmul.mubr.msk.bf16.gmra.mxu1 %vm278_vm1, %v12957_v51  ;;  %11188 = vmatprep.mubr.msk.bf16.mxu0 %vm278_vm1, %v3208_v59 }
 0x115   : > { %11144 = vmatprep.mubr.msk.bf16.mxu1 %vm278_vm1, %v2871_v58  ;;  %v12972_v5 = vpop.f32.mrf.mxu0 }
 0x116   : > { %v12974_v6 = vpop.f32.mrf.mxu1 }
 0x117   : > { %v12976_v25 = vpop.f32.mrf.mxu0 }
 0x118   : > { %v12978_v27 = vpop.f32.mrf.mxu1 }
 0x119   : > { %v12980_v9 = vpop.f32.mrf.mxu0 }
 0x11a   : > { %v12982_v14 = vpop.f32.mrf.mxu1 }
 0x11b   : > { %16146 = vst [vmem:[#allocation8_spill] sm:$0xff] %v12982_v14  ;;  %v10926_v32 = vpop.f32.mrf.mxu0  ;;  %11189 = vmatmul.mubr.msk.bf16.vlgmr.msra.gmra.mxu0 %vm278_vm1, %v3209_v43 }
 0x11c   : > { %v10882_v15 = vpop.f32.mrf.mxu1  ;;  %11145 = vmatmul.mubr.msk.bf16.vlgmr.msra.gmra.mxu1 %vm278_vm1, %v2872_v41  ;;  %11192 = vmatprep.mubr.msk.bf16.mxu0 %vm278_vm1, %v3210_v57  ;;  %v2850_v57 = vld [vmem:[#allocation2 + $0xb1] sm:$0xff] }
 0x11d   : > { %v1035_v35 = vadd.f32 %v10882_v15, %v12889_v53  ;;  %11148 = vmatprep.mubr.msk.bf16.mxu1 %vm278_vm1, %v2873_v56  ;;  %v1331_v29 = vpop.f32.mrf.mxu0  ;;  %v3211_v53 = vpack.c.bf16 %v3183_v18, %v3182_v52  ;;  %v2852_v52 = vld [vmem:[#allocation2 + $0xc9] sm:$0xff] }
 0x11e   : > { %v1026_v28 = vpop.f32.mrf.mxu1  ;;  %v3188_v18 = vld [vmem:[#allocation2 + $0xc2] sm:$0xff] }
 0x11f   : > { %v12989_v47 = vadd.f32 %v10926_v32, %v1035_v35  ;;  %v1027_v50 = vadd.f32 %v1026_v28, %v12901_v55  ;;  %v10927_v59 = vpop.f32.mrf.mxu0  ;;  %v2849_v55 = vld [vmem:[#allocation2 + $0xa9] sm:$0xff] }
 0x120   : > { %v10883_v58 = vpop.f32.mrf.mxu1  ;;  %v3186_v32 = vld [vmem:[#allocation2 + $0xaa] sm:$0xff]  ;;  %v2876_v36 = vpack.c.bf16 %v2850_v57, %v2849_v55  ;;  %v3191_v55 = vld [vmem:[#allocation2 + $0xe2] sm:$0xff] }
 0x121   : > { %v12992_v24 = vadd.f32 %v1331_v29, %v1027_v50  ;;  %v1038_v16 = vadd.f32 %v10883_v58, %v12905_v20  ;;  %v1334_v2 = vpop.f32.mrf.mxu0  ;;  %v2855_v57 = vld [vmem:[#allocation2 + $0xf1] sm:$0xff] }
 0x122   : > { %v1029_v61 = vpop.f32.mrf.mxu1 }
 0x123   : > { %v12995_v12 = vadd.f32 %v10927_v59, %v1038_v16  ;;  %v1030_v41 = vadd.f32 %v1029_v61, %v12909_v22  ;;  %v10930_v56 = vpop.f32.mrf.mxu0  ;;  %11193 = vmatmul.mubr.msk.bf16.gmra.mxu0 %vm278_vm1, %v3211_v53  ;;  %v2877_v59 = vpack.c.bf16 %v2852_v52, %v2851_v34  ;;  %v3193_v34 = vld [vmem:[#allocation2 + $0xfa] sm:$0xff] }
 0x124   : > { %v10886_v43 = vpop.f32.mrf.mxu1  ;;  %11149 = vmatmul.mubr.msk.bf16.gmra.mxu1 %vm278_vm1, %v2874_v11  ;;  %11196 = vmatprep.mubr.msk.bf16.mxu0 %vm278_vm1, %v3212_v40  ;;  %v3214_v11 = vpack.c.bf16 %v3189_v23, %v3188_v18 }
 0x125   : > { %v13000_v15 = vadd.f32 %v1334_v2, %v1030_v41  ;;  %v1051_v20 = vadd.f32 %v10886_v43, %v12913_v44  ;;  %11152 = vmatprep.mubr.msk.bf16.mxu1 %vm278_vm1, %v2875_v26  ;;  %v1347_v35 = vpop.f32.mrf.mxu0  ;;  %v3213_v44 = vpack.c.bf16 %v3187_v33, %v3186_v32  ;;  %v2854_v41 = vld [vmem:[#allocation2 + $0xe1] sm:$0xff]  ;;  %v2856_v32 = vld [vmem:[#allocation2 + $0xf9] sm:$0xff] }
 0x126   : > { %v1042_v22 = vpop.f32.mrf.mxu1  ;;  %v3192_v33 = vld [vmem:[#allocation2 + $0xf2] sm:$0xff] }
 0x127   : > { %v13005_v28 = vadd.f32 %v10930_v56, %v1051_v20  ;;  %v1043_v29 = vadd.f32 %v1042_v22, %v12925_v46  ;;  %v10931_v38 = vpop.f32.mrf.mxu0  ;;  %v2853_v46 = vld [vmem:[#allocation2 + $0xd9] sm:$0xff] }
 0x128   : > { %v10887_v30 = vpop.f32.mrf.mxu1  ;;  %v3190_v56 = vld [vmem:[#allocation2 + $0xda] sm:$0xff]  ;;  %v2878_v23 = vpack.c.bf16 %v2854_v41, %v2853_v46  ;;  %v3195_v46 = vld [vmem:[#allocation2 + $0x112] sm:$0xff] }
 0x129   : > { %v13008_v50 = vadd.f32 %v1347_v35, %v1043_v29  ;;  %v1054_v58 = vadd.f32 %v10887_v30, %v12929_v63  ;;  %v1350_v16 = vpop.f32.mrf.mxu0  ;;  %v2859_v41 = vld [vmem:[#allocation2 + $0x121] sm:$0xff] }
 0x12a   : > { %v1045_v53 = vpop.f32.mrf.mxu1 }
 0x12b   : > { %v13011_v26 = vadd.f32 %v10931_v38, %v1054_v58  ;;  %v1046_v40 = vadd.f32 %v1045_v53, %v12933_v7  ;;  %v10934_v2 = vpop.f32.mrf.mxu0  ;;  %11197 = vmatmul.mubr.msk.bf16.gmra.mxu0 %vm278_vm1, %v3213_v44  ;;  %v2879_v38 = vpack.c.bf16 %v2856_v32, %v2855_v57  ;;  %v3197_v57 = vld [vmem:[#allocation2 + $0x12a] sm:$0xff] }
 0x12c   : > { %v10890_v61 = vpop.f32.mrf.mxu1  ;;  %11153 = vmatmul.mubr.msk.bf16.gmra.mxu1 %vm278_vm1, %v2876_v36  ;;  %11200 = vmatprep.mubr.msk.bf16.mxu0 %vm278_vm1, %v3214_v11  ;;  %v3216_v36 = vpack.c.bf16 %v3193_v34, %v3192_v33 }
 0x12d   : > { %v13016_v43 = vadd.f32 %v1350_v16, %v1046_v40  ;;  %v1067_v63 = vadd.f32 %v10890_v61, %v12937_v13  ;;  %11156 = vmatprep.mubr.msk.bf16.mxu1 %vm278_vm1, %v2877_v59  ;;  %v1363_v20 = vpop.f32.mrf.mxu0  ;;  %v3215_v13 = vpack.c.bf16 %v3191_v55, %v3190_v56  ;;  %v2858_v40 = vld [vmem:[#allocation2 + $0x111] sm:$0xff]  ;;  %v2860_v56 = vld [vmem:[#allocation2 + $0x129] sm:$0xff] }
 0x12e   : > { %v1058_v7 = vpop.f32.mrf.mxu1  ;;  %v3196_v55 = vld [vmem:[#allocation2 + $0x122] sm:$0xff] }
 0x12f   : > { %v13021_v22 = vadd.f32 %v10934_v2, %v1067_v63  ;;  %v1059_v35 = vadd.f32 %v1058_v7, %v12949_v31  ;;  %v10935_v18 = vpop.f32.mrf.mxu0  ;;  %v2857_v31 = vld [vmem:[#allocation2 + $0x109] sm:$0xff] }
 0x130   : > { %v10891_v52 = vpop.f32.mrf.mxu1  ;;  %v3194_v2 = vld [vmem:[#allocation2 + $0x10a] sm:$0xff]  ;;  %v2880_v34 = vpack.c.bf16 %v2858_v40, %v2857_v31  ;;  %v3198_v31 = vld [vmem:[#allocation2 + $0x13a] sm:$0xff]  ;;  %v3199_v40 = vld [vmem:[#allocation2 + $0x142] sm:$0xff] }
 0x131   : > { %v13024_v29 = vadd.f32 %v1363_v20, %v1059_v35  ;;  %v1070_v30 = vadd.f32 %v10891_v52, %v12953_v48  ;;  %v1366_v58 = vpop.f32.mrf.mxu0  ;;  %v3217_v35 = vpack.c.bf16 %v3195_v46, %v3194_v2  ;;  %v2864_v46 = vld [vmem:[#allocation2 + $0x159] sm:$0xff] }
 0x132   : > { %v1061_v44 = vpop.f32.mrf.mxu1 }
 0x133   : > { %v13027_v59 = vadd.f32 %v10935_v18, %v1070_v30  ;;  %v1062_v11 = vadd.f32 %v1061_v44, %v12959_v60  ;;  %v10938_v16 = vpop.f32.mrf.mxu0  ;;  %11201 = vmatmul.mubr.msk.bf16.gmra.mxu0 %vm278_vm1, %v3215_v13  ;;  %v3218_v13 = vpack.c.bf16 %v3197_v57, %v3196_v55 }
 0x134   : > { %v10894_v53 = vpop.f32.mrf.mxu1  ;;  %11157 = vmatmul.mubr.msk.bf16.gmra.mxu1 %vm278_vm1, %v2878_v23  ;;  %11204 = vmatprep.mubr.msk.bf16.mxu0 %vm278_vm1, %v3216_v36  ;;  %v2881_v23 = vpack.c.bf16 %v2860_v56, %v2859_v41  ;;  %v3200_v41 = vld [vmem:[#allocation2 + $0x152] sm:$0xff] }
 0x135   : > { %v13032_v61 = vadd.f32 %v1366_v58, %v1062_v11  ;;  %v1083_v48 = vadd.f32 %v10894_v53, %v12963_v8  ;;  %11160 = vmatprep.mubr.msk.bf16.mxu1 %vm278_vm1, %v2879_v38  ;;  %v1379_v63 = vpop.f32.mrf.mxu0  ;;  %v12022_v8 = vld [vmem:[%s16133_s3 + $0x18] sm:$0xff]   ;;  %v2862_v53 = vld [vmem:[#allocation2 + $0x141] sm:$0xff] }
 0x136   : > { %v1074_v60 = vpop.f32.mrf.mxu1  ;;  %11220 = vmatprep.subr.bf16.mxu1 %v12022_v8  ;;  %v2861_v11 = vld [vmem:[#allocation2 + $0x139] sm:$0xff] }
 0x137   : > { %v13037_v7 = vadd.f32 %v10938_v16, %v1083_v48  ;;  %v1075_v20 = vadd.f32 %v1074_v60, %v12972_v5  ;;  %v10939_v33 = vpop.f32.mrf.mxu0  ;;  %11221 = vmatpush3.bf16.msra.mxu1 %v12022_v8  ;;  %v2863_v48 = vld [vmem:[#allocation2 + $0x151] sm:$0xff]  ;;  %v3201_v60 = vld [vmem:[#allocation2 + $0x15a] sm:$0xff] }
 0x138   : > { %v10895_v32 = vpop.f32.mrf.mxu1 }
 0x139   : > { %v13043_v52 = vadd.f32 %v1379_v63, %v1075_v20  ;;  %v1086_v18 = vadd.f32 %v10895_v32, %v12976_v25  ;;  %v1382_v38 = vpop.f32.mrf.mxu0  ;;  %v2882_v20 = vpack.c.bf16 %v2862_v53, %v2861_v11 }
 0x13a   : > { %v1077_v30 = vpop.f32.mrf.mxu1 }
 0x13b   : > { %v13046_v36 = vadd.f32 %v10939_v33, %v1086_v18  ;;  %v1078_v5 = vadd.f32 %v1077_v30, %v12980_v9  ;;  %v10942_v58 = vpop.f32.mrf.mxu0  ;;  %11205 = vmatmul.mubr.msk.bf16.gmra.mxu0 %vm278_vm1, %v3217_v35  ;;  %v2883_v33 = vpack.c.bf16 %v2864_v46, %v2863_v48 }
 0x13c   : > { %v10898_v44 = vpop.f32.mrf.mxu1  ;;  %11161 = vmatmul.mubr.msk.bf16.gmra.mxu1 %vm278_vm1, %v2880_v34  ;;  %11208 = vmatprep.mubr.msk.bf16.mxu0 %vm278_vm1, %v3218_v13  ;;  %v3220_v34 = vpack.c.bf16 %v3201_v60, %v3200_v41 }
 0x13d   : > { %v13051_v16 = vadd.f32 %v1382_v38, %v1078_v5  ;;  %v1099_v25 = vadd.f32 %v10898_v44, %v12891_v54  ;;  %11164 = vmatprep.mubr.msk.bf16.mxu1 %vm278_vm1, %v2881_v23  ;;  %v1395_v2 = vpop.f32.mrf.mxu0  ;;  %v3219_v54 = vpack.c.bf16 %v3199_v40, %v3198_v31  ;;  %v3202_v5 = vld [vmem:[#allocation2 + $0x16a] sm:$0xff]  ;;  %v3203_v44 = vld [vmem:[#allocation2 + $0x172] sm:$0xff] }
 0x13e   : > { %v1090_v9 = vpop.f32.mrf.mxu1 }
 0x13f   : > { %v13056_v63 = vadd.f32 %v10942_v58, %v1099_v25  ;;  %v1091_v56 = vadd.f32 %v1090_v9, %v12903_v19  ;;  %v10943_v57 = vpop.f32.mrf.mxu0  ;;  %v2865_v19 = vld [vmem:[#allocation2 + $0x169] sm:$0xff]  ;;  %v3221_v9 = vpack.c.bf16 %v3203_v44, %v3202_v5 }
 0x140   : > { %v10899_v55 = vpop.f32.mrf.mxu1 }
 0x141   : > { %v13059_v8 = vadd.f32 %v1395_v2, %v1091_v56  ;;  %v1102_v32 = vadd.f32 %v10899_v55, %v12907_v21  ;;  %v13064_v18 = vpop.f32.mrf.mxu0  ;;  %v2866_v21 = vld [vmem:[#allocation2 + $0x171] sm:$0xff] }
 0x142   : > { %v13062_v35 = vpop.f32.mrf.mxu1  ;;  %v2884_v48 = vpack.c.bf16 %v2866_v21, %v2865_v19 }
 0x143   : > { %v13066_v23 = vadd.f32 %v10943_v57, %v1102_v32  ;;  %v10946_v30 = vpop.f32.mrf.mxu0  ;;  %11209 = vmatmul.mubr.msk.bf16.gmra.mxu0 %vm278_vm1, %v3219_v54  ;;  %v3207_v54 = vld [vmem:[#allocation2 + $0x1a2] sm:$0xff] }
 0x144   : > { %v10902_v13 = vpop.f32.mrf.mxu1  ;;  %11165 = vmatmul.mubr.msk.bf16.gmra.mxu1 %vm278_vm1, %v2882_v20  ;;  %11212 = vmatprep.mubr.msk.bf16.mxu0 %vm278_vm1, %v3220_v34  ;;  %v3206_v20 = vld [vmem:[#allocation2 + $0x19a] sm:$0xff] }
 0x145   : > { %v1115_v38 = vadd.f32 %v10902_v13, %v12915_v45  ;;  %11168 = vmatprep.mubr.msk.bf16.mxu1 %vm278_vm1, %v2883_v33  ;;  %v1411_v11 = vpop.f32.mrf.mxu0  ;;  %v3223_v21 = vpack.c.bf16 %v3207_v54, %v3206_v20 }
 0x146   : > { %v1106_v58 = vpop.f32.mrf.mxu1 }
 0x147   : > { %v13073_v53 = vadd.f32 %v10946_v30, %v1115_v38  ;;  %v1107_v25 = vadd.f32 %v1106_v58, %v12927_v62  ;;  %v10947_v40 = vpop.f32.mrf.mxu0  ;;  %v2869_v62 = vld [vmem:[#allocation2 + $0x199] sm:$0xff] }
 0x148   : > { %v10903_v31 = vpop.f32.mrf.mxu1 }
 0x149   : > { %v13076_v2 = vadd.f32 %v1411_v11, %v1107_v25  ;;  %v1118_v45 = vadd.f32 %v10903_v31, %v12931_v0  ;;  %v13081_v41 = vpop.f32.mrf.mxu0  ;;  %v2870_v0 = vld [vmem:[#allocation2 + $0x1a1] sm:$0xff] }
 0x14a   : > { %v13079_v46 = vpop.f32.mrf.mxu1  ;;  %v2886_v38 = vpack.c.bf16 %v2870_v0, %v2869_v62 }
 0x14b   : > { %v13083_v60 = vadd.f32 %v10947_v40, %v1118_v45  ;;  %v10950_v55 = vpop.f32.mrf.mxu0  ;;  %11213 = vmatmul.mubr.msk.bf16.gmra.mxu0 %vm278_vm1, %v3221_v9 }
 0x14c   : > { %v10906_v56 = vpop.f32.mrf.mxu1  ;;  %11169 = vmatmul.mubr.msk.bf16.gmra.mxu1 %vm278_vm1, %v2884_v48  ;;  %11216 = vmatprep.mubr.msk.bf16.mxu0 %vm278_vm1, %v12957_v51  ;;  %v12023_v48 = vld [vmem:[%s16133_s3 + $0x10] sm:$0xff]  }
 0x14d   : > { %v1131_v57 = vadd.f32 %v10906_v56, %v12939_v17  ;;  %11172 = vmatprep.mubr.msk.bf16.mxu1 %vm278_vm1, %v12815_v42  ;;  %v1427_v33 = vpop.f32.mrf.mxu0  ;;  %11222 = vmatprep.subr.bf16.mxu1 %v12023_v48 }
 0x14e   : > { %v1122_v32 = vpop.f32.mrf.mxu1  ;;  %11223 = vmatpush3.bf16.msra.mxu1 %v12023_v48 }
 0x14f   : > { %v13092_v34 = vadd.f32 %v10950_v55, %v1131_v57  ;;  %v1123_v13 = vadd.f32 %v1122_v32, %v12951_v37  ;;  %v10951_v19 = vpop.f32.mrf.mxu0 }
 0x150   : > { %v10907_v30 = vpop.f32.mrf.mxu1 }
 0x151   : > { %v13095_v17 = vadd.f32 %v1427_v33, %v1123_v13  ;;  %v1134_v42 = vadd.f32 %v10907_v30, %v12955_v49  ;;  %v13100_v51 = vpop.f32.mrf.mxu0 }
 0x152   : > { %v13098_v5 = vpop.f32.mrf.mxu1 }
 0x153   : > { %v13102_v44 = vadd.f32 %v10951_v19, %v1134_v42  ;;  %v10954_v11 = vpop.f32.mrf.mxu0  ;;  %11217 = vmatmul.mubr.msk.bf16.gmra.mxu0 %vm278_vm1, %v3223_v21 }
 0x154   : > { %v10910_v58 = vpop.f32.mrf.mxu1  ;;  %11173 = vmatmul.mubr.msk.bf16.gmra.mxu1 %vm278_vm1, %v2886_v38 }
 0x155   : > { %v1147_v37 = vadd.f32 %v10910_v58, %v12965_v10  ;;  %v1443_v31 = vpop.f32.mrf.mxu0 }
 0x156   : > { %v1138_v25 = vpop.f32.mrf.mxu1 }
 0x157   : > { %v13107_v40 = vadd.f32 %v10954_v11, %v1147_v37  ;;  %v1139_v49 = vadd.f32 %v1138_v25, %v12974_v6  ;;  %v10955_v45 = vpop.f32.mrf.mxu0 }
 0x158   : > { %v10911_v9 = vpop.f32.mrf.mxu1 }
 0x159   : > { %v13113_v56 = vadd.f32 %v1443_v31, %v1139_v49  ;;  %v1150_v55 = vadd.f32 %v10911_v9, %v12978_v27  ;;  %v13118_v10 = vpop.f32.mrf.mxu0 }
 0x15a   : > { %v13116_v62 = vpop.f32.mrf.mxu1  ;;  %16148 = vst [vmem:[#allocation10_spill] sm:$0xff] %v13118_v10 }
 0x15b   : > { %16147 = vst [vmem:[#allocation9_spill] sm:$0xff] %v13116_v62  ;;  %v13120_v57 = vadd.f32 %v10955_v45, %v1150_v55  ;;  %v11014_v6 = vpop.f32.mrf.mxu0 }
 0x15c   : > { %v10970_v0 = vpop.f32.mrf.mxu1 }
 0x15d   : > { %v1797_v20 = vadd.f32 %v10970_v0, %v12989_v47  ;;  %v2005_v32 = vpop.f32.mrf.mxu0  ;;  %v12024_v0 = vld [vmem:[%s16133_s3 + $0x8] sm:$0xff]  }
 0x15e   : > { %v1668_v54 = vpop.f32.mrf.mxu1  ;;  %11256 = vmatprep.subr.bf16.mxu0 %v12024_v0 }
 0x15f   : > { %v13195_v27 = vadd.f32 %v11014_v6, %v1797_v20  ;;  %v1795_v47 = vadd.f32 %v1668_v54, %v12992_v24  ;;  %v11015_v13 = vpop.f32.mrf.mxu0  ;;  %11257 = vmatpush3.bf16.msra.mxu0 %v12024_v0 }
 0x160   : > { %v10971_v33 = vpop.f32.mrf.mxu1 }
 0x161   : > { %v13198_v30 = vadd.f32 %v2005_v32, %v1795_v47  ;;  %v1798_v19 = vadd.f32 %v10971_v33, %v12995_v12  ;;  %v13203_v21 = vpop.f32.mrf.mxu0 }
 0x162   : > { %v13201_v38 = vpop.f32.mrf.mxu1 }
 0x163   : > { %v13205_v42 = vadd.f32 %v11015_v13, %v1798_v19  ;;  %v11018_v11 = vpop.f32.mrf.mxu0  ;;  %v12025_v13 = vld [vmem:[%s16133_s3] sm:$0xff]  }
 0x164   : > { %v10974_v58 = vpop.f32.mrf.mxu1  ;;  %11258 = vmatprep.subr.bf16.mxu0 %v12025_v13 }
 0x165   : > { %v1801_v37 = vadd.f32 %v10974_v58, %v13005_v28  ;;  %v2021_v31 = vpop.f32.mrf.mxu0  ;;  %11259 = vmatpush3.bf16.msra.mxu0 %v12025_v13 }
 0x166   : > { %v1684_v25 = vpop.f32.mrf.mxu1 }
 0x167   : > { %v13208_v49 = vadd.f32 %v11018_v11, %v1801_v37  ;;  %v1799_v24 = vadd.f32 %v1684_v25, %v13008_v50  ;;  %v11019_v9 = vpop.f32.mrf.mxu0  ;;  %v3695_v25 = vld [vmem:[#allocation3 + $0x9] sm:$0xff] }
 0x168   : > { %v10975_v48 = vpop.f32.mrf.mxu1 }
 0x169   : > { %v13247_v12 = vadd.f32 %v2021_v31, %v1799_v24  ;;  %v1802_v28 = vadd.f32 %v10975_v48, %v13011_v26  ;;  %v13252_v45 = vpop.f32.mrf.mxu0  ;;  %v3642_v31 = vld [vmem:[#allocation3] sm:$0xff] }
 0x16a   : > { %v13250_v50 = vpop.f32.mrf.mxu1 }
 0x16b   : > { %v13254_v55 = vadd.f32 %v11019_v9, %v1802_v28  ;;  %v11022_v20 = vpop.f32.mrf.mxu0  ;;  %v3643_v9 = vld [vmem:[#allocation3 + $0x8] sm:$0xff] }
 0x16c   : > { %v10978_v6 = vpop.f32.mrf.mxu1  ;;  %v3674_v0 = vpack.c.bf16 %v3643_v9, %v3642_v31 }
 0x16d   : > { %v1805_v54 = vadd.f32 %v10978_v6, %v13021_v22  ;;  %v2037_v47 = vpop.f32.mrf.mxu0  ;;  %v3694_v22 = vld [vmem:[#allocation3 + $0x1] sm:$0xff] }
 0x16e   : > { %v1700_v32 = vpop.f32.mrf.mxu1  ;;  %11260 = vmatprep.mubr.msk.bf16.mxu0 %vm334_vm3, %v3674_v0 }
 0x16f   : > { %v13260_v33 = vadd.f32 %v11022_v20, %v1805_v54  ;;  %v1803_v26 = vadd.f32 %v1700_v32, %v13024_v29  ;;  %v11023_v58 = vpop.f32.mrf.mxu0  ;;  %v3726_v29 = vpack.c.bf16 %v3695_v25, %v3694_v22 }
 0x170   : > { %v10979_v19 = vpop.f32.mrf.mxu1 }
 0x171   : > { %v13266_v11 = vadd.f32 %v2037_v47, %v1803_v26  ;;  %v1806_v37 = vadd.f32 %v10979_v19, %v13027_v59  ;;  %v13271_v48 = vpop.f32.mrf.mxu0  ;;  %11224 = vmatprep.mubr.msk.bf16.mxu1 %vm334_vm3, %v3726_v29 }
 0x172   : > { %v13269_v24 = vpop.f32.mrf.mxu1 }
 0x173   : > { %v13273_v28 = vadd.f32 %v11023_v58, %v1806_v37  ;;  %v11026_v20 = vpop.f32.mrf.mxu0 }
 0x174   : > { %v10982_v6 = vpop.f32.mrf.mxu1 }
 0x175   : > { %v1809_v59 = vadd.f32 %v10982_v6, %v13037_v7  ;;  %v2053_v32 = vpop.f32.mrf.mxu0 }
 0x176   : > { %v1716_v54 = vpop.f32.mrf.mxu1 }
 0x177   : > { %v13278_v47 = vadd.f32 %v11026_v20, %v1809_v59  ;;  %v1807_v26 = vadd.f32 %v1716_v54, %v13043_v52  ;;  %v11027_v19 = vpop.f32.mrf.mxu0  ;;  %v13294_v52 = vld [vmem:[%s16133_s3 + $0x28] sm:$0xff]  }
 0x178   : > { %v10983_v13 = vpop.f32.mrf.mxu1  ;;  %16152 = vst [vmem:[#allocation14_spill] sm:$0xff] %v13294_v52  ;;  %11292 = vmatprep.subr.bf16.mxu1 %v13294_v52 }
 0x179   : > { %v13281_v22 = vadd.f32 %v2053_v32, %v1807_v26  ;;  %v1810_v58 = vadd.f32 %v10983_v13, %v13046_v36  ;;  %v13286_v25 = vpop.f32.mrf.mxu0 }
 0x17a   : > { %v13284_v37 = vpop.f32.mrf.mxu1  ;;  %16150 = vst [vmem:[#allocation12_spill] sm:$0xff] %v13286_v25 }
 0x17b   : > { %16149 = vst [vmem:[#allocation11_spill] sm:$0xff] %v13281_v22  ;;  %v13288_v31 = vadd.f32 %v11027_v19, %v1810_v58  ;;  %v11030_v29 = vpop.f32.mrf.mxu0 }
 0x17c   : > { %v10986_v7 = vpop.f32.mrf.mxu1 }
 0x17d   : > { %16151 = vst [vmem:[#allocation13_spill] sm:$0xff] %v13288_v31  ;;  %v1813_v9 = vadd.f32 %v10986_v7, %v13056_v63  ;;  %v2069_v6 = vpop.f32.mrf.mxu0 }
 0x17e   : > { %v1732_v0 = vpop.f32.mrf.mxu1 }
 0x17f   : > { %v13296_v20 = vadd.f32 %v11030_v29, %v1813_v9  ;;  %v1811_v36 = vadd.f32 %v1732_v0, %v13059_v8  ;;  %v11031_v54 = vpop.f32.mrf.mxu0 }
 0x180   : > { %v10987_v59 = vpop.f32.mrf.mxu1 }
 0x181   : > { %16153 = vst [vmem:[#allocation15_spill] sm:$0xff] %v13296_v20  ;;  %v13300_v32 = vadd.f32 %v2069_v6, %v1811_v36  ;;  %v1814_v26 = vadd.f32 %v10987_v59, %v13066_v23  ;;  %v13305_v13 = vpop.f32.mrf.mxu0 }
 0x182   : > { %v13303_v63 = vpop.f32.mrf.mxu1  ;;  %16156 = vst [vmem:[#allocation18_spill] sm:$0xff] %v13305_v13 }
 0x183   : > { %16154 = vst [vmem:[#allocation16_spill] sm:$0xff] %v13300_v32  ;;  %16155 = vst [vmem:[#allocation17_spill] sm:$0xff] %v13303_v63  ;;  %v13307_v19 = vadd.f32 %v11031_v54, %v1814_v26  ;;  %v11034_v7 = vpop.f32.mrf.mxu0 }
 0x184   : > { %v10990_v58 = vpop.f32.mrf.mxu1 }
 0x185   : > { %16157 = vst [vmem:[#allocation19_spill] sm:$0xff] %v13307_v19  ;;  %v1817_v29 = vadd.f32 %v10990_v58, %v13073_v53  ;;  %v2085_v8 = vpop.f32.mrf.mxu0 }
 0x186   : > { %v1748_v9 = vpop.f32.mrf.mxu1 }
 0x187   : > { %v13310_v0 = vadd.f32 %v11034_v7, %v1817_v29  ;;  %v1815_v4 = vadd.f32 %v1748_v9, %v13076_v2  ;;  %v11035_v36 = vpop.f32.mrf.mxu0 }
 0x188   : > { %v10991_v6 = vpop.f32.mrf.mxu1 }
 0x189   : > { %16158 = vst [vmem:[#allocation20_spill] sm:$0xff] %v13310_v0  ;;  %v13313_v10 = vadd.f32 %v2085_v8, %v1815_v4  ;;  %v1818_v23 = vadd.f32 %v10991_v6, %v13083_v60  ;;  %v13318_v54 = vpop.f32.mrf.mxu0 }
 0x18a   : > { %v13316_v59 = vpop.f32.mrf.mxu1  ;;  %16161 = vst [vmem:[#allocation23_spill] sm:$0xff] %v13318_v54 }
 0x18b   : > { %16159 = vst [vmem:[#allocation21_spill] sm:$0xff] %v13313_v10  ;;  %16160 = vst [vmem:[#allocation22_spill] sm:$0xff] %v13316_v59  ;;  %v13320_v26 = vadd.f32 %v11035_v36, %v1818_v23  ;;  %v11038_v53 = vpop.f32.mrf.mxu0 }
 0x18c   : > { %v10994_v19 = vpop.f32.mrf.mxu1 }
 0x18d   : > { %16162 = vst [vmem:[#allocation24_spill] sm:$0xff] %v13320_v26  ;;  %v1821_v58 = vadd.f32 %v10994_v19, %v13092_v34  ;;  %v2101_v29 = vpop.f32.mrf.mxu0 }
 0x18e   : > { %v1764_v7 = vpop.f32.mrf.mxu1 }
 0x18f   : > { %v13323_v0 = vadd.f32 %v11038_v53, %v1821_v58  ;;  %v1819_v2 = vadd.f32 %v1764_v7, %v13095_v17  ;;  %v11039_v9 = vpop.f32.mrf.mxu0 }
 0x190   : > { %v10995_v4 = vpop.f32.mrf.mxu1 }
 0x191   : > { %16163 = vst [vmem:[#allocation25_spill] sm:$0xff] %v13323_v0  ;;  %v13326_v8 = vadd.f32 %v2101_v29, %v1819_v2  ;;  %v1822_v60 = vadd.f32 %v10995_v4, %v13102_v44  ;;  %v13331_v36 = vpop.f32.mrf.mxu0 }
 0x192   : > { %v13329_v6 = vpop.f32.mrf.mxu1  ;;  %16166 = vst [vmem:[#allocation28_spill] sm:$0xff] %v13331_v36  ;;  %v13387_v36 = vld [vmem:[%s16133_s3 + $0x38] sm:$0xff]  }
 0x193   : > { %16164 = vst [vmem:[#allocation26_spill] sm:$0xff] %v13326_v8  ;;  %16165 = vst [vmem:[#allocation27_spill] sm:$0xff] %v13329_v6  ;;  %v13333_v23 = vadd.f32 %v11039_v9, %v1822_v60  ;;  %v11042_v34 = vpop.f32.mrf.mxu0  ;;  %11328 = vmatprep.subr.bf16.mxu0 %v13387_v36 }
 0x194   : > { %v10998_v26 = vpop.f32.mrf.mxu1  ;;  %16173 = vst [vmem:[#allocation35_spill] sm:$0xff] %v13387_v36 }
 0x195   : > { %16167 = vst [vmem:[#allocation29_spill] sm:$0xff] %v13333_v23  ;;  %v1825_v19 = vadd.f32 %v10998_v26, %v13107_v40  ;;  %v2117_v58 = vpop.f32.mrf.mxu0 }
 0x196   : > { %v1780_v53 = vpop.f32.mrf.mxu1 }
 0x197   : > { %v13336_v0 = vadd.f32 %v11042_v34, %v1825_v19  ;;  %v1823_v17 = vadd.f32 %v1780_v53, %v13113_v56  ;;  %v11043_v29 = vpop.f32.mrf.mxu0 }
 0x198   : > { %v10999_v7 = vpop.f32.mrf.mxu1 }
 0x199   : > { %16168 = vst [vmem:[#allocation30_spill] sm:$0xff] %v13336_v0  ;;  %v13339_v2 = vadd.f32 %v2117_v58, %v1823_v17  ;;  %v1826_v44 = vadd.f32 %v10999_v7, %v13120_v57  ;;  %v13344_v9 = vpop.f32.mrf.mxu0 }
 0x19a   : > { %v13342_v4 = vpop.f32.mrf.mxu1  ;;  %16171 = vst [vmem:[#allocation33_spill] sm:$0xff] %v13344_v9 }
 0x19b   : > { %16169 = vst [vmem:[#allocation31_spill] sm:$0xff] %v13339_v2  ;;  %16170 = vst [vmem:[#allocation32_spill] sm:$0xff] %v13342_v4  ;;  %v13346_v60 = vadd.f32 %v11043_v29, %v1826_v44  ;;  %v13350_v40 = vpop.f32.mrf.mxu0 }
 0x19c   : > { %v13348_v23 = vpop.f32.mrf.mxu1 }
 0x19d   : > { %16172 = vst [vmem:[#allocation34_spill] sm:$0xff] %v13346_v60  ;;  %v13354_v34 = vpop.f32.mrf.mxu0 }
 0x19e   : > { %v13352_v26 = vpop.f32.mrf.mxu1 }
 0x19f   : > { %v13358_v19 = vpop.f32.mrf.mxu0 }
 0x1a0   : > { %v13356_v56 = vpop.f32.mrf.mxu1 }
 0x1a1   : > { %v13362_v57 = vpop.f32.mrf.mxu0 }
 0x1a2   : > { %v13360_v53 = vpop.f32.mrf.mxu1 }
 0x1a3   : > { %v13366_v17 = vpop.f32.mrf.mxu0 }
 0x1a4   : > { %v13364_v58 = vpop.f32.mrf.mxu1 }
 0x1a5   : > { %v13370_v29 = vpop.f32.mrf.mxu0 }
 0x1a6   : > { %v13368_v7 = vpop.f32.mrf.mxu1 }
 0x1a7   : > { %v13374_v60 = vpop.f32.mrf.mxu0 }
 0x1a8   : > { %v13372_v44 = vpop.f32.mrf.mxu1 }
 0x1a9   : > { %v13378_v2 = vpop.f32.mrf.mxu0 }
 0x1aa   : > { %v13376_v9 = vpop.f32.mrf.mxu1 }
 0x1ab   : > { %v13382_v4 = vpop.f32.mrf.mxu0 }
 0x1ac   : > { %v13380_v0 = vpop.f32.mrf.mxu1 }
 0x1ad   : > { %v13391_v6 = vpop.f32.mrf.mxu0 }
 0x1ae   : > { %v13389_v8 = vpop.f32.mrf.mxu1 }
 0x1af   : > { %v13396_v10 = vpop.f32.mrf.mxu0 }
 0x1b0   : > { %v13394_v54 = vpop.f32.mrf.mxu1  ;;  %16174 = vst [vmem:[#allocation36_spill] sm:$0xff] %v13396_v10 }
 0x1b1   : > { %v13400_v59 = vpop.f32.mrf.mxu0 }
 0x1b2   : > { %v13398_v52 = vpop.f32.mrf.mxu1  ;;  %16175 = vst [vmem:[#allocation37_spill] sm:$0xff] %v13400_v59 }
 0x1b3   : > { %v13404_v13 = vpop.f32.mrf.mxu0 }
 0x1b4   : > { %v13402_v32 = vpop.f32.mrf.mxu1  ;;  %16176 = vst [vmem:[#allocation38_spill] sm:$0xff] %v13404_v13 }
 0x1b5   : > { %v13408_v31 = vpop.f32.mrf.mxu0 }
 0x1b6   : > { %v13406_v20 = vpop.f32.mrf.mxu1  ;;  %16178 = vst [vmem:[#allocation40_spill] sm:$0xff] %v13408_v31 }
 0x1b7   : > { %16177 = vst [vmem:[#allocation39_spill] sm:$0xff] %v13406_v20  ;;  %v13412_v25 = vpop.f32.mrf.mxu0 }
 0x1b8   : > { %v13410_v63 = vpop.f32.mrf.mxu1  ;;  %16180 = vst [vmem:[#allocation42_spill] sm:$0xff] %v13412_v25 }
 0x1b9   : > { %16179 = vst [vmem:[#allocation41_spill] sm:$0xff] %v13410_v63  ;;  %v13416_v22 = vpop.f32.mrf.mxu0 }
 0x1ba   : > { %v13414_v36 = vpop.f32.mrf.mxu1  ;;  %16182 = vst [vmem:[#allocation44_spill] sm:$0xff] %v13416_v22 }
 0x1bb   : > { %16181 = vst [vmem:[#allocation43_spill] sm:$0xff] %v13414_v36  ;;  %v13420_v62 = vpop.f32.mrf.mxu0 }
 0x1bc   : > { %v13418_v10 = vpop.f32.mrf.mxu1  ;;  %16184 = vst [vmem:[#allocation46_spill] sm:$0xff] %v13420_v62 }
 0x1bd   : > { %16183 = vst [vmem:[#allocation45_spill] sm:$0xff] %v13418_v10  ;;  %v13424_v14 = vpop.f32.mrf.mxu0 }
 0x1be   : > { %v13422_v59 = vpop.f32.mrf.mxu1  ;;  %16186 = vst [vmem:[#allocation48_spill] sm:$0xff] %v13424_v14 }
 0x1bf   : > { %16185 = vst [vmem:[#allocation47_spill] sm:$0xff] %v13422_v59  ;;  %v13428_v20 = vpop.f32.mrf.mxu0 }
 0x1c0   : > { %v13426_v13 = vpop.f32.mrf.mxu1  ;;  %16188 = vst [vmem:[#allocation50_spill] sm:$0xff] %v13428_v20 }
 0x1c1   : > { %16187 = vst [vmem:[#allocation49_spill] sm:$0xff] %v13426_v13  ;;  %v13432_v63 = vpop.f32.mrf.mxu0 }
 0x1c2   : > { %v13430_v31 = vpop.f32.mrf.mxu1  ;;  %16190 = vst [vmem:[#allocation52_spill] sm:$0xff] %v13432_v63 }
 0x1c3   : > { %16189 = vst [vmem:[#allocation51_spill] sm:$0xff] %v13430_v31  ;;  %v13436_v36 = vpop.f32.mrf.mxu0 }
 0x1c4   : > { %v13434_v25 = vpop.f32.mrf.mxu1  ;;  %16192 = vst [vmem:[#allocation54_spill] sm:$0xff] %v13436_v36 }
 0x1c5   : > { %16191 = vst [vmem:[#allocation53_spill] sm:$0xff] %v13434_v25  ;;  %v13440_v10 = vpop.f32.mrf.mxu0 }
 0x1c6   : > { %v13438_v22 = vpop.f32.mrf.mxu1  ;;  %16194 = vst [vmem:[#allocation56_spill] sm:$0xff] %v13440_v10 }
 0x1c7   : > { %16193 = vst [vmem:[#allocation55_spill] sm:$0xff] %v13438_v22  ;;  %v13444_v59 = vpop.f32.mrf.mxu0 }
 0x1c8   : > { %v13442_v62 = vpop.f32.mrf.mxu1  ;;  %16196 = vst [vmem:[#allocation58_spill] sm:$0xff] %v13444_v59 }
 0x1c9   : > { %16195 = vst [vmem:[#allocation57_spill] sm:$0xff] %v13442_v62  ;;  %v13448_v13 = vpop.f32.mrf.mxu0 }
 0x1ca   : > { %v13446_v14 = vpop.f32.mrf.mxu1  ;;  %16198 = vst [vmem:[#allocation60_spill] sm:$0xff] %v13448_v13 }
 0x1cb   : > { %16197 = vst [vmem:[#allocation59_spill] sm:$0xff] %v13446_v14  ;;  %v13452_v31 = vpop.f32.mrf.mxu0 }
 0x1cc   : > { %v13450_v20 = vpop.f32.mrf.mxu1  ;;  %16200 = vst [vmem:[#allocation62_spill] sm:$0xff] %v13452_v31  ;;  %v1796_v31 = vadd.f32 %v13201_v38, %v13000_v15  ;;  %v2472_v15 = vadd.f32 %v13356_v56, %v13205_v42 }
 0x1cd   : > { %16199 = vst [vmem:[#allocation61_spill] sm:$0xff] %v13450_v20  ;;  %v13456_v25 = vpop.f32.mrf.mxu0 }
 0x1ce   : > { %v13454_v63 = vpop.f32.mrf.mxu1  ;;  %16201 = vst [vmem:[#allocation63_spill] sm:$0xff] %v13456_v25  ;;  %v2810_v42 = vadd.f32 %v13358_v19, %v2472_v15 }
 0x1cf   : > { %v13460_v22 = vpop.f32.mrf.mxu0 }
 0x1d0   : > { %v13458_v36 = vpop.f32.mrf.mxu1  ;;  %16203 = vst [vmem:[#allocation65_spill] sm:$0xff] %v13460_v22 }
 0x1d1   : > { %16202 = vst [vmem:[#allocation64_spill] sm:$0xff] %v13458_v36  ;;  %v13464_v62 = vpop.f32.mrf.mxu0  ;;  %v2471_v36 = vadd.f32 %v13348_v23, %v13195_v27 }
 0x1d2   : > { %v13462_v10 = vpop.f32.mrf.mxu1  ;;  %16204 = vst [vmem:[#allocation66_spill] sm:$0xff] %v13464_v62  ;;  %v2469_v62 = vadd.f32 %v13352_v26, %v13198_v30  ;;  %v1800_v30 = vadd.f32 %v13250_v50, %v13016_v43  ;;  %v2475_v26 = vadd.f32 %v13364_v58, %v13208_v49  ;;  %v3513_v43 = vld [vmem:[%s16132_s2] sm:$0xff] }
 0x1d3   : > { %v13468_v14 = vpop.f32.mrf.mxu0 }
 0x1d4   : > { %v13466_v59 = vpop.f32.mrf.mxu1  ;;  %16206 = vst [vmem:[#allocation68_spill] sm:$0xff] %v13468_v14  ;;  %v2807_v23 = vadd.f32 %v13354_v34, %v2469_v62  ;;  %v2473_v62 = vadd.f32 %v13368_v7, %v13247_v12  ;;  %v2137_v58 = vadd.f32 %v13252_v45, %v1800_v30  ;;  %v2813_v19 = vadd.f32 %v13366_v17, %v2475_v26  ;;  %v3516_v12 = vld [vmem:[%s16132_s2 + $0x18] sm:$0xff] }
 0x1d5   : > { %16205 = vst [vmem:[#allocation67_spill] sm:$0xff] %v13466_v59  ;;  %v13472_v20 = vpop.f32.mrf.mxu0  ;;  %v1110_v45 = vadd.f32 %v13079_v46, %v12935_v3  ;;  %v3519_v46 = vld [vmem:[%s16132_s2 + $0x30] sm:$0xff] }
 0x1d6   : > { %v13470_v13 = vpop.f32.mrf.mxu1  ;;  %16208 = vst [vmem:[#allocation70_spill] sm:$0xff] %v13472_v20  ;;  %v2809_v20 = vadd.f32 %v13350_v40, %v2471_v36  ;;  %v2811_v17 = vadd.f32 %v13370_v29, %v2473_v62 }
 0x1d7   : > { %16207 = vst [vmem:[#allocation69_spill] sm:$0xff] %v13470_v13  ;;  %v13480_v22 = vpop.f32.mrf.mxu0  ;;  %v2133_v13 = vadd.f32 %v13203_v21, %v1796_v31  ;;  %v3515_v21 = vld [vmem:[%s16132_s2 + $0x10] sm:$0xff] }
 0x1d8   : > { %v13478_v25 = vpop.f32.mrf.mxu1  ;;  %16210 = vst [vmem:[#allocation72_spill] sm:$0xff] %v13480_v22 }
 0x1d9   : > { %16209 = vst [vmem:[#allocation71_spill] sm:$0xff] %v13478_v25  ;;  %v13486_v14 = vpop.f32.mrf.mxu0  ;;  %v2470_v22 = vadd.f32 %v13360_v53, %v2133_v13 }
 0x1da   : > { %v13484_v59 = vpop.f32.mrf.mxu1 }
 0x1db   : > { %v11190_v27 = vpop.f32.mrf.mxu0  ;;  %v2808_v49 = vadd.f32 %v13362_v57, %v2470_v22  ;;  %v1094_v57 = vadd.f32 %v13062_v35, %v12911_v39  ;;  %v1804_v39 = vadd.f32 %v13269_v24, %v13032_v61  ;;  %v2479_v35 = vadd.f32 %v13380_v0, %v13260_v33  ;;  %v3517_v0 = vld [vmem:[%s16132_s2 + $0x20] sm:$0xff] }
 0x1dc   : > { %v11146_v38 = vpop.f32.mrf.mxu1  ;;  %v13536_v61 = vadd.f32 %v13081_v41, %v1110_v45  ;;  %v2477_v33 = vadd.f32 %v13389_v8, %v13266_v11  ;;  %v1126_v41 = vadd.f32 %v13098_v5, %v12961_v1  ;;  %v2480_v11 = vadd.f32 %v13394_v54, %v13273_v28  ;;  %v3520_v8 = vld [vmem:[%s16132_s2 + $0x38] sm:$0xff]  ;;  %v3518_v54 = vld [vmem:[%s16132_s2 + $0x28] sm:$0xff] }
 0x1dd   : > { %v3146_v25 = vadd.f32 %v11146_v38, %v2809_v20  ;;  %v3354_v36 = vpop.f32.mrf.mxu0  ;;  %v1808_v1 = vadd.f32 %v13284_v37, %v13051_v16  ;;  %v2483_v28 = vadd.f32 %v13402_v32, %v13278_v47  ;;  %v16211_v37 = vld [vmem:[#allocation8_spill] sm:$0xff]  ;;  %v16214_v45 = vld [vmem:[#allocation11_spill] sm:$0xff] }
 0x1de   : > { %v3017_v31 = vpop.f32.mrf.mxu1  ;;  %v2815_v5 = vadd.f32 %v13391_v6, %v2477_v33  ;;  %v13566_v16 = vadd.f32 %v13100_v51, %v1126_v41  ;;  %v16213_v47 = vld [vmem:[#allocation36_spill] sm:$0xff]  ;;  %v16222_v41 = vld [vmem:[#allocation41_spill] sm:$0xff] }
 0x1df   : > { %v3483_v40 = vadd.f32 %v11190_v27, %v3146_v25  ;;  %v3144_v56 = vadd.f32 %v3017_v31, %v2807_v23  ;;  %v11191_v20 = vpop.f32.mrf.mxu0  ;;  %v2476_v25 = vadd.f32 %v13372_v44, %v13254_v55  ;;  %v2474_v55 = vadd.f32 %v13376_v9, %v2137_v58  ;;  %v3514_v44 = vld [vmem:[%s16132_s2 + $0x8] sm:$0xff] }
 0x1e0   : > { %v11147_v50 = vpop.f32.mrf.mxu1  ;;  %v2818_v32 = vadd.f32 %v16213_v47, %v2480_v11 }
 0x1e1   : > { %v3547_v13 = vadd.f32 %v3515_v21, %v3483_v40  ;;  %v3481_v34 = vadd.f32 %v3354_v36, %v3144_v56  ;;  %v3147_v53 = vadd.f32 %v11147_v50, %v2810_v42  ;;  %v3357_v15 = vpop.f32.mrf.mxu0  ;;  %v2814_v3 = vadd.f32 %v13374_v60, %v2476_v25 }
 0x1e2   : > { %v3020_v7 = vpop.f32.mrf.mxu1  ;;  %v1475_v50 = vadd.f32 %v13064_v18, %v1094_v57  ;;  %v2812_v24 = vadd.f32 %v13378_v2, %v2474_v55  ;;  %v2141_v2 = vadd.f32 %v13271_v48, %v1804_v39 }
 0x1e3   : > { %v3579_v38 = vmax.f32 %v3547_v13, 0.0  ;;  %v3545_v27 = vadd.f32 %v3513_v43, %v3481_v34  ;;  %v3484_v23 = vadd.f32 %v11191_v20, %v3147_v53  ;;  %v3145_v22 = vadd.f32 %v3020_v7, %v2808_v49  ;;  %v11194_v26 = vpop.f32.mrf.mxu0 }
 0x1e4   : > { %v11150_v30 = vpop.f32.mrf.mxu1  ;;  %v2817_v53 = vadd.f32 %v13382_v4, %v2479_v35  ;;  %v2478_v48 = vadd.f32 %v13398_v52, %v2141_v2  ;;  %v16212_v52 = vld [vmem:[#allocation9_spill] sm:$0xff] }
 0x1e5   : > { %3612 = vst.msk [vmem:[#allocation3 + $0x31] sm:$0xff] %vm334_vm3, %v3579_v38  ;;  %v3577_v21 = vmax.f32 %v3545_v27, 0.0  ;;  %v3548_v31 = vadd.f32 %v3516_v12, %v3484_v23  ;;  %v3482_v36 = vadd.f32 %v3357_v15, %v3145_v22  ;;  %v3150_v42 = vadd.f32 %v11150_v30, %v2813_v19  ;;  %v3370_v29 = vpop.f32.mrf.mxu0 }
 0x1e6   : > { %v3033_v9 = vpop.f32.mrf.mxu1  ;;  %v13570_v6 = vadd.f32 %v16212_v52, %v16211_v37 }
 0x1e7   : > { %3610 = vst.msk [vmem:[#allocation3 + $0x19] sm:$0xff] %vm334_vm3, %v3577_v21  ;;  %v3580_v40 = vmax.f32 %v3548_v31, 0.0  ;;  %v3546_v56 = vadd.f32 %v3514_v44, %v3482_v36  ;;  %v3487_v62 = vadd.f32 %v11194_v26, %v3150_v42  ;;  %v3148_v43 = vadd.f32 %v3033_v9, %v2811_v17  ;;  %v11195_v20 = vpop.f32.mrf.mxu0  ;;  %v16215_v17 = vld [vmem:[#allocation39_spill] sm:$0xff]  ;;  %v3523_v44 = vld [vmem:[%s16132_s2 + $0x50] sm:$0xff] }
 0x1e8   : > { %v11151_v60 = vpop.f32.mrf.mxu1  ;;  %v2481_v55 = vadd.f32 %v16215_v17, %v16214_v45  ;;  %v16216_v42 = vld [vmem:[#allocation12_spill] sm:$0xff] }
 0x1e9   : > { %3613 = vst.msk [vmem:[#allocation3 + $0x39] sm:$0xff] %vm334_vm3, %v3580_v40  ;;  %v3578_v49 = vmax.f32 %v3546_v56, 0.0  ;;  %v3551_v13 = vadd.f32 %v3519_v46, %v3487_v62  ;;  %v3485_v34 = vadd.f32 %v3370_v29, %v3148_v43  ;;  %v3151_v18 = vadd.f32 %v11151_v60, %v2814_v3  ;;  %v3373_v19 = vpop.f32.mrf.mxu0  ;;  %v16217_v3 = vld [vmem:[#allocation17_spill] sm:$0xff]  ;;  %v16219_v29 = vld [vmem:[#allocation38_spill] sm:$0xff] }
 0x1ea   : > { %v3036_v58 = vpop.f32.mrf.mxu1  ;;  %v2145_v39 = vadd.f32 %v16216_v42, %v1808_v1  ;;  %v1812_v35 = vadd.f32 %v16217_v3, %v1475_v50  ;;  %v16218_v46 = vld [vmem:[#allocation37_spill] sm:$0xff]  ;;  %v2821_v40 = vadd.f32 %v16219_v29, %v2483_v28  ;;  %v3521_v56 = vld [vmem:[%s16132_s2 + $0x40] sm:$0xff]  ;;  %v16228_v42 = vld [vmem:[#allocation16_spill] sm:$0xff] }
 0x1eb   : > { %3611 = vst.msk [vmem:[#allocation3 + $0x21] sm:$0xff] %vm334_vm3, %v3578_v49  ;;  %v3583_v25 = vmax.f32 %v3551_v13, 0.0  ;;  %v3549_v12 = vadd.f32 %v3517_v0, %v3485_v34  ;;  %v3488_v7 = vadd.f32 %v11195_v20, %v3151_v18  ;;  %v3149_v15 = vadd.f32 %v3036_v58, %v2812_v24  ;;  %v11198_v38 = vpop.f32.mrf.mxu0  ;;  %v3524_v50 = vld [vmem:[%s16132_s2 + $0x58] sm:$0xff]  ;;  %v16220_v13 = vld [vmem:[#allocation40_spill] sm:$0xff] }
 0x1ec   : > { %v11154_v4 = vpop.f32.mrf.mxu1  ;;  %v2816_v9 = vadd.f32 %v16218_v46, %v2478_v48  ;;  %v2819_v34 = vadd.f32 %v16220_v13, %v2481_v55  ;;  %v16221_v18 = vld [vmem:[#allocation13_spill] sm:$0xff]  ;;  %v3698_v1 = vld [vmem:[#allocation3 + $0x31] sm:$0xff]  ;;  %v3527_v46 = vld [vmem:[%s16132_s2 + $0x70] sm:$0xff] }
 0x1ed   : > { %3616 = vst.msk [vmem:[#allocation3 + $0x61] sm:$0xff] %vm334_vm3, %v3583_v25  ;;  %v3581_v27 = vmax.f32 %v3549_v12, 0.0  ;;  %v3552_v23 = vadd.f32 %v3520_v8, %v3488_v7  ;;  %v3486_v22 = vadd.f32 %v3373_v19, %v3149_v15  ;;  %v3154_v57 = vadd.f32 %v11154_v4, %v2817_v53  ;;  %v3386_v26 = vpop.f32.mrf.mxu0  ;;  %v16223_v53 = vld [vmem:[#allocation43_spill] sm:$0xff]  ;;  %v16225_v58 = vld [vmem:[#allocation45_spill] sm:$0xff] }
 0x1ee   : > { %v3049_v30 = vpop.f32.mrf.mxu1  ;;  %v2484_v2 = vadd.f32 %v16222_v41, %v16221_v18  ;;  %v2482_v11 = vadd.f32 %v16223_v53, %v2145_v39  ;;  %v16224_v8 = vld [vmem:[#allocation15_spill] sm:$0xff] }
 0x1ef   : > { %3614 = vst.msk [vmem:[#allocation3 + $0x49] sm:$0xff] %vm334_vm3, %v3581_v27  ;;  %v3584_v21 = vmax.f32 %v3552_v23, 0.0  ;;  %v3550_v51 = vadd.f32 %v3518_v54, %v3486_v22  ;;  %v3491_v31 = vadd.f32 %v11198_v38, %v3154_v57  ;;  %v3152_v36 = vadd.f32 %v3049_v30, %v2815_v5  ;;  %v11199_v43 = vpop.f32.mrf.mxu0  ;;  %v3696_v4 = vld [vmem:[#allocation3 + $0x19] sm:$0xff]  ;;  %v3646_v27 = vld [vmem:[#allocation3 + $0x30] sm:$0xff] }
 0x1f0   : > { %v11155_v62 = vpop.f32.mrf.mxu1  ;;  %v3699_v20 = vld [vmem:[#allocation3 + $0x39] sm:$0xff]  ;;  %v2487_v19 = vadd.f32 %v16225_v58, %v16224_v8  ;;  %v12027_v30 = vld [vmem:[%s16133_s3 + $0x20] sm:$0xff]  }
 0x1f1   : > { %3617 = vst.msk [vmem:[#allocation3 + $0x69] sm:$0xff] %vm334_vm3, %v3584_v21  ;;  %v3582_v24 = vmax.f32 %v3550_v51, 0.0  ;;  %v3555_v33 = vadd.f32 %v3523_v44, %v3491_v31  ;;  %v3489_v0 = vadd.f32 %v3386_v26, %v3152_v36  ;;  %v3155_v60 = vadd.f32 %v11155_v62, %v2818_v32  ;;  %v3647_v49 = vld [vmem:[#allocation3 + $0x38] sm:$0xff]  ;;  %v3389_v12 = vpop.f32.mrf.mxu0  ;;  %v12029_v26 = vld [vmem:[%s16133_s3 + $0x30] sm:$0xff]   ;;  %v16226_v21 = vld [vmem:[#allocation18_spill] sm:$0xff] }
 0x1f2   : > { %v3052_v25 = vpop.f32.mrf.mxu1  ;;  %v3697_v7 = vld [vmem:[#allocation3 + $0x21] sm:$0xff]  ;;  %v3644_v38 = vld [vmem:[#allocation3 + $0x18] sm:$0xff]  ;;  %v13604_v47 = vpack.c.bf16 %v3699_v20, %v3698_v1  ;;  %v13606_v32 = vpack.c.bf16 %v3647_v49, %v3646_v27  ;;  %v2149_v51 = vadd.f32 %v16226_v21, %v1812_v35  ;;  %v16227_v31 = vld [vmem:[#allocation42_spill] sm:$0xff] }
 0x1f3   : > { %v3645_v15 = vld [vmem:[#allocation3 + $0x20] sm:$0xff]  ;;  %3615 = vst.msk [vmem:[#allocation3 + $0x51] sm:$0xff] %vm334_vm3, %v3582_v24  ;;  %v3587_v5 = vmax.f32 %v3555_v33, 0.0  ;;  %v3553_v48 = vadd.f32 %v3521_v56, %v3489_v0  ;;  %v3492_v28 = vadd.f32 %v11199_v43, %v3155_v60  ;;  %v3153_v54 = vadd.f32 %v3052_v25, %v2816_v9  ;;  %v3522_v23 = vld [vmem:[%s16132_s2 + $0x48] sm:$0xff]  ;;  %v11202_v57 = vpop.f32.mrf.mxu0  ;;  %v16230_v43 = vld [vmem:[#allocation22_spill] sm:$0xff] }
 0x1f4   : > { %v11158_v22 = vpop.f32.mrf.mxu1  ;;  %v13600_v37 = vpack.c.bf16 %v3697_v7, %v3696_v4  ;;  %v13602_v52 = vpack.c.bf16 %v3645_v15, %v3644_v38  ;;  %v2822_v36 = vadd.f32 %v16227_v31, %v2484_v2  ;;  %v16229_v39 = vld [vmem:[#allocation47_spill] sm:$0xff]  ;;  %v13633_v24 = vadd.f32 %v16230_v43, %v13536_v61  ;;  %v16231_v33 = vld [vmem:[#allocation44_spill] sm:$0xff]  ;;  %v16232_v60 = vld [vmem:[#allocation46_spill] sm:$0xff] }
 0x1f5   : > { %3620 = vst.msk [vmem:[#allocation3 + $0x91] sm:$0xff] %vm334_vm3, %v3587_v5  ;;  %v3585_v45 = vmax.f32 %v3553_v48, 0.0  ;;  %v3556_v17 = vadd.f32 %v3524_v50, %v3492_v28  ;;  %v3490_v55 = vadd.f32 %v3389_v12, %v3153_v54  ;;  %v3158_v44 = vadd.f32 %v11158_v22, %v2821_v40  ;;  %v3402_v29 = vpop.f32.mrf.mxu0  ;;  %v3525_v20 = vld [vmem:[%s16132_s2 + $0x60] sm:$0xff]  ;;  %v16234_v41 = vld [vmem:[#allocation35_spill] sm:$0xff]  ;;  %v3702_v58 = vld [vmem:[#allocation3 + $0x61] sm:$0xff] }
 0x1f6   : > { %v2485_v3 = vadd.f32 %v16229_v39, %v16228_v42  ;;  %11225 = vmatmul.mubr.msk.bf16.vlgmr.msra.gmra.mxu1 %vm334_vm3, %v13600_v37  ;;  %11261 = vmatmul.mubr.msk.bf16.vlgmr.msra.gmra.mxu0 %vm334_vm3, %v13602_v52  ;;  %v3065_v9 = vpop.f32.mrf.mxu1  ;;  %v2820_v0 = vadd.f32 %v16231_v33, %v2482_v11  ;;  %v2825_v50 = vadd.f32 %v16232_v60, %v2487_v19  ;;  %v16233_v49 = vld [vmem:[#allocation14_spill] sm:$0xff]  ;;  %v13645_v61 = vld [vmem:[%s16133_s3 + $0x48] sm:$0xff]   ;;  %v13651_v25 = vld [vmem:[%s16133_s3 + $0x58] sm:$0xff]  }
 0x1f7   : > { %3618 = vst.msk [vmem:[#allocation3 + $0x79] sm:$0xff] %vm334_vm3, %v3585_v45  ;;  %v3588_v35 = vmax.f32 %v3556_v17, 0.0  ;;  %v3554_v40 = vadd.f32 %v3522_v23, %v3490_v55  ;;  %v3495_v56 = vadd.f32 %v11202_v57, %v3158_v44  ;;  %v3156_v62 = vadd.f32 %v3065_v9, %v2819_v34  ;;  %11228 = vmatprep.mubr.msk.bf16.mxu1 %vm334_vm3, %v13604_v47  ;;  %v11203_v34 = vpop.f32.mrf.mxu0  ;;  %v16235_v12 = vld [vmem:[#allocation48_spill] sm:$0xff]  ;;  %v16236_v15 = vld [vmem:[#allocation19_spill] sm:$0xff]  ;;  %v16237_v1 = vld [vmem:[#allocation49_spill] sm:$0xff] }
 0x1f8   : > { %11264 = vmatprep.mubr.msk.bf16.mxu0 %vm334_vm3, %v13606_v32  ;;  %11293 = vmatpush3.bf16.msra.mxu1 %v16233_v49  ;;  %v11159_v13 = vpop.f32.mrf.mxu1  ;;  %v3703_v18 = vld [vmem:[#allocation3 + $0x69] sm:$0xff]  ;;  %v2823_v7 = vadd.f32 %v16235_v12, %v2485_v3  ;;  %v2488_v5 = vadd.f32 %v16237_v1, %v16236_v15  ;;  %v16238_v48 = vld [vmem:[#allocation51_spill] sm:$0xff]  ;;  %v3650_v31 = vld [vmem:[#allocation3 + $0x60] sm:$0xff] }
 0x1f9   : > { %11329 = vmatpush3.bf16.msra.mxu0 %v16234_v41  ;;  %3621 = vst.msk [vmem:[#allocation3 + $0x99] sm:$0xff] %vm334_vm3, %v3588_v35  ;;  %v3586_v2 = vmax.f32 %v3554_v40, 0.0  ;;  %v3559_v53 = vadd.f32 %v3527_v46, %v3495_v56  ;;  %v3493_v11 = vadd.f32 %v3402_v29, %v3156_v62  ;;  %v3159_v8 = vadd.f32 %v11159_v13, %v2822_v36  ;;  %v3651_v19 = vld [vmem:[#allocation3 + $0x68] sm:$0xff]  ;;  %v3405_v38 = vpop.f32.mrf.mxu0  ;;  %v16239_v56 = vld [vmem:[#allocation50_spill] sm:$0xff]  ;;  %v16240_v43 = vld [vmem:[#allocation20_spill] sm:$0xff] }
 0x1fa   : > { %11294 = vmatprep.subr.bf16.mxu1 %v12027_v30  ;;  %11330 = vmatprep.subr.bf16.mxu0 %v12029_v26  ;;  %v2486_v28 = vadd.f32 %v16238_v48, %v2149_v51  ;;  %v3528_v54 = vld [vmem:[%s16132_s2 + $0x78] sm:$0xff]  ;;  %v3068_v4 = vpop.f32.mrf.mxu1  ;;  %v3701_v27 = vld [vmem:[#allocation3 + $0x51] sm:$0xff]  ;;  %v13660_v22 = vpack.c.bf16 %v3703_v18, %v3702_v58  ;;  %v13670_v46 = vpack.c.bf16 %v3651_v19, %v3650_v31  ;;  %v16247_v12 = vld [vmem:[#allocation52_spill] sm:$0xff] }
 0x1fb   : > { %v3649_v23 = vld [vmem:[#allocation3 + $0x50] sm:$0xff]  ;;  %3619 = vst.msk [vmem:[#allocation3 + $0x81] sm:$0xff] %vm334_vm3, %v3586_v2  ;;  %v3591_v57 = vmax.f32 %v3559_v53, 0.0  ;;  %v3557_v45 = vadd.f32 %v3525_v20, %v3493_v11  ;;  %v3496_v17 = vadd.f32 %v11203_v34, %v3159_v8  ;;  %v3157_v55 = vadd.f32 %v3068_v4, %v2820_v0  ;;  %v3648_v21 = vld [vmem:[#allocation3 + $0x48] sm:$0xff]  ;;  %v3526_v51 = vld [vmem:[%s16132_s2 + $0x68] sm:$0xff]  ;;  %v11206_v42 = vpop.f32.mrf.mxu0 }
 0x1fc   : > { %v3700_v44 = vld [vmem:[#allocation3 + $0x49] sm:$0xff]  ;;  %v11162_v36 = vpop.f32.mrf.mxu1  ;;  %v13668_v3 = vpack.c.bf16 %v3649_v23, %v3648_v21  ;;  %11295 = vmatpush3.bf16.msra.mxu1 %v12027_v30  ;;  %v2826_v62 = vadd.f32 %v16239_v56, %v2488_v5  ;;  %v16243_v20 = vld [vmem:[#allocation55_spill] sm:$0xff]  ;;  %v3531_v30 = vld [vmem:[%s16132_s2 + $0x90] sm:$0xff]  ;;  %v2824_v15 = vadd.f32 %v16247_v12, %v2486_v28 }
 0x1fd   : > { %v13666_v39 = vpack.c.bf16 %v3701_v27, %v3700_v44  ;;  %11331 = vmatpush3.bf16.msra.mxu0 %v12029_v26  ;;  %3624 = vst.msk [vmem:[#allocation3 + $0xc1] sm:$0xff] %vm334_vm3, %v3591_v57  ;;  %v3589_v9 = vmax.f32 %v3557_v45, 0.0  ;;  %v3560_v29 = vadd.f32 %v3528_v54, %v3496_v17  ;;  %v3494_v35 = vadd.f32 %v3405_v38, %v3157_v55  ;;  %v16241_v33 = vld [vmem:[#allocation53_spill] sm:$0xff]  ;;  %v16244_v2 = vld [vmem:[#allocation10_spill] sm:$0xff]  ;;  %v16245_v11 = vld [vmem:[#allocation23_spill] sm:$0xff] }
 0x1fe   : > { %v3162_v40 = vadd.f32 %v11162_v36, %v2825_v50  ;;  %11364 = vmatprep.subr.bf16.mxu1 %v13645_v61  ;;  %11400 = vmatprep.subr.bf16.mxu0 %v13651_v25  ;;  %v2491_v0 = vadd.f32 %v16241_v33, %v16240_v43  ;;  %v16242_v60 = vld [vmem:[#allocation21_spill] sm:$0xff]  ;;  %v3081_v26 = vpop.f32.mrf.mxu1  ;;  %v3418_v50 = vpop.f32.mrf.mxu0  ;;  %v1487_v53 = vadd.f32 %v16244_v2, %v13570_v6  ;;  %v16246_v58 = vld [vmem:[#allocation27_spill] sm:$0xff]  ;;  %v16248_v27 = vld [vmem:[#allocation54_spill] sm:$0xff] }
 0x1ff   : > { %v2489_v49 = vadd.f32 %v16243_v20, %v16242_v60  ;;  %11229 = vmatmul.mubr.msk.bf16.gmra.mxu1 %vm334_vm3, %v13666_v39  ;;  %11265 = vmatmul.mubr.msk.bf16.gmra.mxu0 %vm334_vm3, %v13668_v3  ;;  %3622 = vst.msk [vmem:[#allocation3 + $0xa9] sm:$0xff] %vm334_vm3, %v3589_v9  ;;  %v3592_v13 = vmax.f32 %v3560_v29, 0.0  ;;  %v3558_v34 = vadd.f32 %v3526_v51, %v3494_v35  ;;  %v16249_v23 = vld [vmem:[#allocation56_spill] sm:$0xff]  ;;  %v16251_v17 = vld [vmem:[#allocation57_spill] sm:$0xff]  ;;  %v16252_v44 = vld [vmem:[#allocation59_spill] sm:$0xff] }
 0x200   : > { %v3499_v18 = vadd.f32 %v11206_v42, %v3162_v40  ;;  %v3160_v41 = vadd.f32 %v3081_v26, %v2823_v7  ;;  %11232 = vmatprep.mubr.msk.bf16.mxu1 %vm334_vm3, %v13660_v22  ;;  %11268 = vmatprep.mubr.msk.bf16.mxu0 %vm334_vm3, %v13670_v46  ;;  %v2153_v8 = vadd.f32 %v16245_v11, %v13633_v24  ;;  %v3529_v7 = vld [vmem:[%s16132_s2 + $0x80] sm:$0xff]  ;;  %v11163_v1 = vpop.f32.mrf.mxu1  ;;  %v11207_v5 = vpop.f32.mrf.mxu0  ;;  %v3532_v24 = vld [vmem:[%s16132_s2 + $0x98] sm:$0xff]  ;;  %v3707_v38 = vld [vmem:[#allocation3 + $0x99] sm:$0xff] }
 0x201   : > { %v1820_v19 = vadd.f32 %v16246_v58, %v13566_v16  ;;  %3625 = vst.msk [vmem:[#allocation3 + $0xc9] sm:$0xff] %vm334_vm3, %v3592_v13  ;;  %v3590_v48 = vmax.f32 %v3558_v34, 0.0  ;;  %v3163_v6 = vadd.f32 %v11163_v1, %v2826_v62  ;;  %v3655_v16 = vld [vmem:[#allocation3 + $0x98] sm:$0xff]  ;;  %v2829_v28 = vadd.f32 %v16248_v27, %v2491_v0  ;;  %v16250_v45 = vld [vmem:[#allocation24_spill] sm:$0xff]  ;;  %v3654_v33 = vld [vmem:[#allocation3 + $0x90] sm:$0xff] }
 0x202   : > { %v3563_v54 = vadd.f32 %v3531_v30, %v3499_v18  ;;  %v3497_v4 = vadd.f32 %v3418_v50, %v3160_v41  ;;  %v2827_v57 = vadd.f32 %v16249_v23, %v2489_v49  ;;  %v2492_v55 = vadd.f32 %v16251_v17, %v16250_v45  ;;  %v3084_v31 = vpop.f32.mrf.mxu1  ;;  %v3421_v51 = vpop.f32.mrf.mxu0  ;;  %v3705_v36 = vld [vmem:[#allocation3 + $0x81] sm:$0xff]  ;;  %v3706_v9 = vld [vmem:[#allocation3 + $0x91] sm:$0xff]  ;;  %v3704_v62 = vld [vmem:[#allocation3 + $0x79] sm:$0xff] }
 0x203   : > { %v2490_v21 = vadd.f32 %v16252_v44, %v2153_v8  ;;  %v3653_v42 = vld [vmem:[#allocation3 + $0x80] sm:$0xff]  ;;  %3623 = vst.msk [vmem:[#allocation3 + $0xb1] sm:$0xff] %vm334_vm3, %v3590_v48  ;;  %v3500_v40 = vadd.f32 %v11207_v5, %v3163_v6  ;;  %v3161_v56 = vadd.f32 %v3084_v31, %v2824_v15  ;;  %v3652_v43 = vld [vmem:[#allocation3 + $0x78] sm:$0xff]  ;;  %v13715_v49 = vpack.c.bf16 %v3705_v36, %v3704_v62  ;;  %v16253_v2 = vld [vmem:[#allocation58_spill] sm:$0xff] }
 0x204   : > { %v3595_v29 = vmax.f32 %v3563_v54, 0.0  ;;  %v3561_v35 = vadd.f32 %v3529_v7, %v3497_v4  ;;  %v3530_v0 = vld [vmem:[%s16132_s2 + $0x88] sm:$0xff]  ;;  %v11166_v60 = vpop.f32.mrf.mxu1  ;;  %v11210_v20 = vpop.f32.mrf.mxu0  ;;  %v13717_v30 = vpack.c.bf16 %v3653_v42, %v3652_v43  ;;  %v13719_v26 = vpack.c.bf16 %v3707_v38, %v3706_v9  ;;  %v16254_v8 = vld [vmem:[#allocation25_spill] sm:$0xff]  ;;  %v16256_v15 = vld [vmem:[#allocation26_spill] sm:$0xff] }
 0x205   : > { %v13721_v50 = vpack.c.bf16 %v3655_v16, %v3654_v33  ;;  %v3564_v34 = vadd.f32 %v3532_v24, %v3500_v40  ;;  %v3498_v18 = vadd.f32 %v3421_v51, %v3161_v56  ;;  %v3166_v41 = vadd.f32 %v11166_v60, %v2829_v28  ;;  %v16255_v58 = vld [vmem:[#allocation61_spill] sm:$0xff]  ;;  %v3535_v1 = vld [vmem:[%s16132_s2 + $0xb0] sm:$0xff]  ;;  %v3533_v45 = vld [vmem:[%s16132_s2 + $0xa0] sm:$0xff] }
 0x206   : > { %3628 = vst.msk [vmem:[#allocation3 + $0xf1] sm:$0xff] %vm334_vm3, %v3595_v29  ;;  %v3593_v13 = vmax.f32 %v3561_v35, 0.0  ;;  %v2830_v11 = vadd.f32 %v16253_v2, %v2492_v55  ;;  %v2495_v12 = vadd.f32 %v16255_v58, %v16254_v8  ;;  %v2493_v7 = vadd.f32 %v13454_v63, %v16256_v15  ;;  %v3097_v5 = vpop.f32.mrf.mxu1  ;;  %v3434_v48 = vpop.f32.mrf.mxu0  ;;  %v16257_v63 = vld [vmem:[#allocation28_spill] sm:$0xff]  ;;  %v16260_v42 = vld [vmem:[#allocation62_spill] sm:$0xff]  ;;  %v16261_v9 = vld [vmem:[#allocation63_spill] sm:$0xff] }
 0x207   : > { %11233 = vmatmul.mubr.msk.bf16.gmra.mxu1 %vm334_vm3, %v13715_v49  ;;  %11269 = vmatmul.mubr.msk.bf16.gmra.mxu0 %vm334_vm3, %v13717_v30  ;;  %v3596_v54 = vmax.f32 %v3564_v34, 0.0  ;;  %v3562_v4 = vadd.f32 %v3530_v0, %v3498_v18  ;;  %v3503_v6 = vadd.f32 %v11210_v20, %v3166_v41  ;;  %v3164_v24 = vadd.f32 %v3097_v5, %v2827_v57  ;;  %v16258_v16 = vld [vmem:[#allocation32_spill] sm:$0xff]  ;;  %v16262_v35 = vld [vmem:[#allocation29_spill] sm:$0xff]  ;;  %v3534_v58 = vld [vmem:[%s16132_s2 + $0xa8] sm:$0xff] }
 0x208   : > { %3626 = vst.msk [vmem:[#allocation3 + $0xd9] sm:$0xff] %vm334_vm3, %v3593_v13  ;;  %11236 = vmatprep.mubr.msk.bf16.mxu1 %vm334_vm3, %v13719_v26  ;;  %11272 = vmatprep.mubr.msk.bf16.mxu0 %vm334_vm3, %v13721_v50  ;;  %v2157_v38 = vadd.f32 %v16257_v63, %v1820_v19  ;;  %v1824_v27 = vadd.f32 %v16258_v16, %v1487_v53  ;;  %v16259_v28 = vld [vmem:[#allocation60_spill] sm:$0xff]  ;;  %v11167_v17 = vpop.f32.mrf.mxu1  ;;  %v11211_v55 = vpop.f32.mrf.mxu0  ;;  %v3536_v19 = vld [vmem:[%s16132_s2 + $0xb8] sm:$0xff]  ;;  %v16266_v16 = vld [vmem:[#allocation67_spill] sm:$0xff] }
 0x209   : > { %v2828_v23 = vadd.f32 %v16259_v28, %v2490_v21  ;;  %3629 = vst.msk [vmem:[#allocation3 + $0xf9] sm:$0xff] %vm334_vm3, %v3596_v54  ;;  %v3594_v57 = vmax.f32 %v3562_v4, 0.0  ;;  %v3567_v44 = vadd.f32 %v3535_v1, %v3503_v6  ;;  %v3501_v31 = vadd.f32 %v3434_v48, %v3164_v24  ;;  %v3711_v36 = vld [vmem:[#allocation3 + $0xc9] sm:$0xff]  ;;  %v16263_v40 = vld [vmem:[#allocation64_spill] sm:$0xff] }
 0x20a   : > { %v3167_v51 = vadd.f32 %v11167_v17, %v2830_v11  ;;  %v3659_v53 = vld [vmem:[#allocation3 + $0xc8] sm:$0xff]  ;;  %v2833_v21 = vadd.f32 %v16260_v42, %v2495_v12  ;;  %v2831_v29 = vadd.f32 %v16261_v9, %v2493_v7  ;;  %v2496_v56 = vadd.f32 %v16263_v40, %v16262_v35  ;;  %v3100_v43 = vpop.f32.mrf.mxu1  ;;  %v3437_v33 = vpop.f32.mrf.mxu0  ;;  %v3709_v0 = vld [vmem:[#allocation3 + $0xb1] sm:$0xff]  ;;  %v3658_v8 = vld [vmem:[#allocation3 + $0xc0] sm:$0xff] }
 0x20b   : > { %v2494_v62 = vadd.f32 %v13462_v10, %v2157_v38  ;;  %v3657_v60 = vld [vmem:[#allocation3 + $0xb0] sm:$0xff]  ;;  %v3710_v20 = vld [vmem:[#allocation3 + $0xc1] sm:$0xff]  ;;  %3627 = vst.msk [vmem:[#allocation3 + $0xe1] sm:$0xff] %vm334_vm3, %v3594_v57  ;;  %v3599_v13 = vmax.f32 %v3567_v44, 0.0  ;;  %v3565_v34 = vadd.f32 %v3533_v45, %v3501_v31  ;;  %v3165_v41 = vadd.f32 %v3100_v43, %v2828_v23  ;;  %v16267_v23 = vld [vmem:[#allocation31_spill] sm:$0xff] }
 0x20c   : > { %v3504_v18 = vadd.f32 %v11211_v55, %v3167_v51  ;;  %v3708_v2 = vld [vmem:[#allocation3 + $0xa9] sm:$0xff]  ;;  %v11170_v12 = vpop.f32.mrf.mxu1  ;;  %v11214_v10 = vpop.f32.mrf.mxu0  ;;  %v13764_v1 = vpack.c.bf16 %v3711_v36, %v3710_v20  ;;  %v13766_v5 = vpack.c.bf16 %v3659_v53, %v3658_v8  ;;  %v3539_v55 = vld [vmem:[%s16132_s2 + $0xd0] sm:$0xff] }
 0x20d   : > { %v3656_v11 = vld [vmem:[#allocation3 + $0xa8] sm:$0xff]  ;;  %v13760_v15 = vpack.c.bf16 %v3709_v0, %v3708_v2  ;;  %3632 = vst.msk [vmem:[#allocation3 + $0x121] sm:$0xff] %vm334_vm3, %v3599_v13  ;;  %v3597_v48 = vmax.f32 %v3565_v34, 0.0  ;;  %v3502_v4 = vadd.f32 %v3437_v33, %v3165_v41  ;;  %v3170_v6 = vadd.f32 %v11170_v12, %v2833_v21  ;;  %v16265_v38 = vld [vmem:[#allocation30_spill] sm:$0xff]  ;;  %v16271_v13 = vld [vmem:[#allocation68_spill] sm:$0xff] }
 0x20e   : > { %v13762_v7 = vpack.c.bf16 %v3657_v60, %v3656_v11  ;;  %v3568_v54 = vadd.f32 %v3536_v19, %v3504_v18  ;;  %v16264_v24 = vld [vmem:[#allocation65_spill] sm:$0xff]  ;;  %v2499_v28 = vadd.f32 %v16266_v16, %v16265_v38  ;;  %v3113_v57 = vpop.f32.mrf.mxu1  ;;  %v3450_v44 = vpop.f32.mrf.mxu0  ;;  %v16270_v21 = vld [vmem:[#allocation66_spill] sm:$0xff]  ;;  %v16274_v2 = vld [vmem:[#allocation71_spill] sm:$0xff] }
 0x20f   : > { %v2834_v63 = vadd.f32 %v16264_v24, %v2496_v56  ;;  %v16268_v45 = vld [vmem:[#allocation69_spill] sm:$0xff]  ;;  %11237 = vmatmul.mubr.msk.bf16.gmra.mxu1 %vm334_vm3, %v13760_v15  ;;  %3630 = vst.msk [vmem:[#allocation3 + $0x109] sm:$0xff] %vm334_vm3, %v3597_v48  ;;  %v3566_v51 = vadd.f32 %v3534_v58, %v3502_v4  ;;  %v3507_v19 = vadd.f32 %v11214_v10, %v3170_v6  ;;  %v3537_v35 = vld [vmem:[%s16132_s2 + $0xc0] sm:$0xff]  ;;  %v3712_v38 = vld [vmem:[#allocation3 + $0xd9] sm:$0xff] }
 0x210   : > { %v2497_v17 = vadd.f32 %v16268_v45, %v16267_v23  ;;  %11273 = vmatmul.mubr.msk.bf16.gmra.mxu0 %vm334_vm3, %v13762_v7  ;;  %v3600_v31 = vmax.f32 %v3568_v54, 0.0  ;;  %v3168_v36 = vadd.f32 %v3113_v57, %v2831_v29  ;;  %11240 = vmatprep.mubr.msk.bf16.mxu1 %vm334_vm3, %v13764_v1  ;;  %v16269_v53 = vld [vmem:[#allocation33_spill] sm:$0xff]  ;;  %v2832_v9 = vadd.f32 %v16270_v21, %v2494_v62  ;;  %v11171_v40 = vpop.f32.mrf.mxu1  ;;  %v11215_v56 = vpop.f32.mrf.mxu0  ;;  %v3715_v20 = vld [vmem:[#allocation3 + $0xf9] sm:$0xff]  ;;  %v16272_v34 = vld [vmem:[#allocation70_spill] sm:$0xff] }
 0x211   : > { %11276 = vmatprep.mubr.msk.bf16.mxu0 %vm334_vm3, %v13766_v5  ;;  %v2161_v42 = vadd.f32 %v16269_v53, %v1824_v27  ;;  %v3598_v43 = vmax.f32 %v3566_v51, 0.0  ;;  %v3571_v29 = vadd.f32 %v3539_v55, %v3507_v19  ;;  %v3171_v0 = vadd.f32 %v11171_v40, %v2834_v63  ;;  %v3540_v60 = vld [vmem:[%s16132_s2 + $0xd8] sm:$0xff]  ;;  %v3663_v27 = vld [vmem:[#allocation3 + $0xf8] sm:$0xff]  ;;  %v16273_v41 = vld [vmem:[#allocation34_spill] sm:$0xff] }
 0x212   : > { %3633 = vst.msk [vmem:[#allocation3 + $0x129] sm:$0xff] %vm334_vm3, %v3600_v31  ;;  %v3505_v33 = vadd.f32 %v3450_v44, %v3168_v36  ;;  %v2837_v62 = vadd.f32 %v16271_v13, %v2499_v28  ;;  %v2835_v18 = vadd.f32 %v16272_v34, %v2497_v17  ;;  %v2500_v11 = vadd.f32 %v16274_v2, %v16273_v41  ;;  %v3116_v58 = vpop.f32.mrf.mxu1  ;;  %v3453_v12 = vpop.f32.mrf.mxu0  ;;  %v3713_v10 = vld [vmem:[#allocation3 + $0xe1] sm:$0xff]  ;;  %v3714_v54 = vld [vmem:[#allocation3 + $0xf1] sm:$0xff] }
 0x213   : > { %v2498_v8 = vadd.f32 %v13484_v59, %v2161_v42  ;;  %v3661_v48 = vld [vmem:[#allocation3 + $0xe0] sm:$0xff]  ;;  %3631 = vst.msk [vmem:[#allocation3 + $0x111] sm:$0xff] %vm334_vm3, %v3598_v43  ;;  %v3603_v4 = vmax.f32 %v3571_v29, 0.0  ;;  %v3508_v24 = vadd.f32 %v11215_v56, %v3171_v0  ;;  %v3169_v63 = vadd.f32 %v3116_v58, %v2832_v9  ;;  %v3660_v16 = vld [vmem:[#allocation3 + $0xd8] sm:$0xff]  ;;  %v3662_v28 = vld [vmem:[#allocation3 + $0xf0] sm:$0xff] }
 0x214   : > { %v3569_v6 = vadd.f32 %v3537_v35, %v3505_v33  ;;  %v3538_v23 = vld [vmem:[%s16132_s2 + $0xc8] sm:$0xff]  ;;  %v11174_v45 = vpop.f32.mrf.mxu1  ;;  %v11218_v59 = vpop.f32.mrf.mxu0  ;;  %v13804_v17 = vpack.c.bf16 %v3713_v10, %v3712_v38  ;;  %v13806_v55 = vpack.c.bf16 %v3661_v48, %v3660_v16  ;;  %v13808_v57 = vpack.c.bf16 %v3715_v20, %v3714_v54  ;;  %v16275_v53 = vld [vmem:[#allocation72_spill] sm:$0xff]  ;;  %v3541_v0 = vld [vmem:[%s16132_s2 + $0xe0] sm:$0xff] }
 0x215   : > { %v13810_v44 = vpack.c.bf16 %v3663_v27, %v3662_v28  ;;  %3636 = vst.msk [vmem:[#allocation3 + $0x151] sm:$0xff] %vm334_vm3, %v3603_v4  ;;  %v3572_v51 = vadd.f32 %v3540_v60, %v3508_v24  ;;  %v3506_v19 = vadd.f32 %v3453_v12, %v3169_v63  ;;  %v3174_v36 = vadd.f32 %v11174_v45, %v2837_v62  ;;  %v3543_v21 = vld [vmem:[%s16132_s2 + $0xf0] sm:$0xff]  ;;  %v3542_v63 = vld [vmem:[%s16132_s2 + $0xe8] sm:$0xff] }
 0x216   : > { %v3601_v31 = vmax.f32 %v3569_v6, 0.0  ;;  %v2838_v42 = vadd.f32 %v16275_v53, %v2500_v11  ;;  %v3129_v9 = vpop.f32.mrf.mxu1  ;;  %v3466_v35 = vpop.f32.mrf.mxu0  ;;  %v2836_v33 = vadd.f32 %v13486_v14, %v2498_v8  ;;  %v3716_v54 = vld [vmem:[#allocation3 + $0x109] sm:$0xff]  ;;  %v3718_v6 = vld [vmem:[#allocation3 + $0x121] sm:$0xff] }
 0x217   : > { %11241 = vmatmul.mubr.msk.bf16.gmra.mxu1 %vm334_vm3, %v13804_v17  ;;  %v3604_v40 = vmax.f32 %v3572_v51, 0.0  ;;  %v3570_v56 = vadd.f32 %v3538_v23, %v3506_v19  ;;  %v3511_v43 = vadd.f32 %v11218_v59, %v3174_v36  ;;  %v3172_v29 = vadd.f32 %v3129_v9, %v2835_v18  ;;  %v3544_v18 = vld [vmem:[%s16132_s2 + $0xf8] sm:$0xff]  ;;  %v3666_v23 = vld [vmem:[#allocation3 + $0x120] sm:$0xff] }
 0x218   : > { %11277 = vmatmul.mubr.msk.bf16.gmra.mxu0 %vm334_vm3, %v13806_v55  ;;  %3634 = vst.msk [vmem:[#allocation3 + $0x139] sm:$0xff] %vm334_vm3, %v3601_v31  ;;  %11244 = vmatprep.mubr.msk.bf16.mxu1 %vm334_vm3, %v13808_v57  ;;  %v11175_v60 = vpop.f32.mrf.mxu1  ;;  %v11219_v20 = vpop.f32.mrf.mxu0  ;;  %v3664_v4 = vld [vmem:[#allocation3 + $0x108] sm:$0xff] }
 0x219   : > { %11280 = vmatprep.mubr.msk.bf16.mxu0 %vm334_vm3, %v13810_v44  ;;  %3637 = vst.msk [vmem:[#allocation3 + $0x159] sm:$0xff] %vm334_vm3, %v3604_v40  ;;  %v3602_v27 = vmax.f32 %v3570_v56, 0.0  ;;  %v3575_v13 = vadd.f32 %v3543_v21, %v3511_v43  ;;  %v3509_v62 = vadd.f32 %v3466_v35, %v3172_v29  ;;  %v3175_v34 = vadd.f32 %v11175_v60, %v2838_v42  ;;  %v3719_v41 = vld [vmem:[#allocation3 + $0x129] sm:$0xff] }
 0x21a   : > { %v3132_v2 = vpop.f32.mrf.mxu1  ;;  %v3717_v11 = vld [vmem:[#allocation3 + $0x111] sm:$0xff]  ;;  %v3667_v8 = vld [vmem:[#allocation3 + $0x128] sm:$0xff]  ;;  %v3469_v24 = vpop.f32.mrf.mxu0  ;;  %v13842_v28 = vpack.c.bf16 %v3719_v41, %v3718_v6  ;;  %v12033_v6 = vld [vmem:[%s16133_s3 + $0x50] sm:$0xff]  }
 0x21b   : > { %v3665_v14 = vld [vmem:[#allocation3 + $0x110] sm:$0xff]  ;;  %3635 = vst.msk [vmem:[#allocation3 + $0x141] sm:$0xff] %vm334_vm3, %v3602_v27  ;;  %v3607_v58 = vmax.f32 %v3575_v13, 0.0  ;;  %v3573_v12 = vadd.f32 %v3541_v0, %v3509_v62  ;;  %v3512_v10 = vadd.f32 %v11219_v20, %v3175_v34  ;;  %v3173_v48 = vadd.f32 %v3132_v2, %v2836_v33  ;;  %v4189_v27 = vld [vmem:[#allocation3 + $0x2] sm:$0xff] }
 0x21c   : > { %v13838_v38 = vpack.c.bf16 %v3717_v11, %v3716_v54  ;;  %v13840_v16 = vpack.c.bf16 %v3665_v14, %v3664_v4  ;;  %v13845_v51 = vpack.c.bf16 %v3667_v8, %v3666_v23  ;;  %v3722_v33 = vld [vmem:[#allocation3 + $0x151] sm:$0xff]  ;;  %v4191_v8 = vld [vmem:[#allocation3 + $0x1a] sm:$0xff]  ;;  %v4197_v23 = vld [vmem:[#allocation3 + $0x62] sm:$0xff] }
 0x21d   : > { %3640 = vst.msk [vmem:[#allocation3 + $0x181] sm:$0xff] %vm334_vm3, %v3607_v58  ;;  %v3605_v45 = vmax.f32 %v3573_v12, 0.0  ;;  %v3576_v59 = vadd.f32 %v3544_v18, %v3512_v10  ;;  %v3510_v31 = vadd.f32 %v3469_v24, %v3173_v48  ;;  %v3670_v0 = vld [vmem:[#allocation3 + $0x150] sm:$0xff]  ;;  %v4192_v58 = vld [vmem:[#allocation3 + $0x22] sm:$0xff]  ;;  %v4194_v10 = vld [vmem:[#allocation3 + $0x3a] sm:$0xff] }
 0x21e   : > { %v4190_v13 = vld [vmem:[#allocation3 + $0xa] sm:$0xff]  ;;  %v4193_v12 = vld [vmem:[#allocation3 + $0x32] sm:$0xff]  ;;  %v13885_v48 = vpack.c.bf16 %v4192_v58, %v4191_v8 }
 0x21f   : > { %11245 = vmatmul.mubr.msk.bf16.gmra.mxu1 %vm334_vm3, %v13838_v38  ;;  %3638 = vst.msk [vmem:[#allocation3 + $0x169] sm:$0xff] %vm334_vm3, %v3605_v45  ;;  %v3608_v19 = vmax.f32 %v3576_v59, 0.0  ;;  %v3574_v36 = vadd.f32 %v3542_v63, %v3510_v31  ;;  %v3720_v42 = vld [vmem:[#allocation3 + $0x139] sm:$0xff]  ;;  %v4221_v14 = vpack.c.bf16 %v4190_v13, %v4189_v27  ;;  %v13887_v54 = vpack.c.bf16 %v4194_v10, %v4193_v12  ;;  %v12031_v4 = vld [vmem:[%s16133_s3 + $0x40] sm:$0xff]   ;;  %v4200_v59 = vld [vmem:[#allocation3 + $0x82] sm:$0xff] }
 0x220   : > { %11281 = vmatmul.mubr.msk.bf16.gmra.mxu0 %vm334_vm3, %v13840_v16  ;;  %11248 = vmatprep.mubr.msk.bf16.mxu1 %vm334_vm3, %v13842_v28  ;;  %v3668_v21 = vld [vmem:[#allocation3 + $0x138] sm:$0xff]  ;;  %v4195_v24 = vld [vmem:[#allocation3 + $0x4a] sm:$0xff] }
 0x221   : > { %11284 = vmatprep.mubr.msk.bf16.mxu0 %vm334_vm3, %v13845_v51  ;;  %3641 = vst.msk [vmem:[#allocation3 + $0x189] sm:$0xff] %vm334_vm3, %v3608_v19  ;;  %v3606_v53 = vmax.f32 %v3574_v36, 0.0  ;;  %v3723_v9 = vld [vmem:[#allocation3 + $0x159] sm:$0xff]  ;;  %v4211_v13 = vld [vmem:[#allocation3 + $0x10a] sm:$0xff] }
 0x222   : > { %v3721_v35 = vld [vmem:[#allocation3 + $0x141] sm:$0xff]  ;;  %v3671_v56 = vld [vmem:[#allocation3 + $0x158] sm:$0xff]  ;;  %v13862_v60 = vpack.c.bf16 %v3723_v9, %v3722_v33 }
 0x223   : > { %v3669_v40 = vld [vmem:[#allocation3 + $0x140] sm:$0xff]  ;;  %3639 = vst.msk [vmem:[#allocation3 + $0x171] sm:$0xff] %vm334_vm3, %v3606_v53  ;;  %v13858_v43 = vpack.c.bf16 %v3721_v35, %v3720_v42  ;;  %v13864_v20 = vpack.c.bf16 %v3671_v56, %v3670_v0  ;;  %v4196_v63 = vld [vmem:[#allocation3 + $0x52] sm:$0xff] }
 0x224   : > { %v13860_v29 = vpack.c.bf16 %v3669_v40, %v3668_v21  ;;  %v13915_v45 = vpack.c.bf16 %v4196_v63, %v4195_v24  ;;  %v4201_v31 = vld [vmem:[#allocation3 + $0x92] sm:$0xff]  ;;  %v4202_v19 = vld [vmem:[#allocation3 + $0x9a] sm:$0xff]  ;;  %v4205_v42 = vld [vmem:[#allocation3 + $0xc2] sm:$0xff] }
 0x225   : > { %v13931_v53 = vpack.c.bf16 %v4202_v19, %v4201_v31  ;;  %v4206_v21 = vld [vmem:[#allocation3 + $0xca] sm:$0xff]  ;;  %v4208_v40 = vld [vmem:[#allocation3 + $0xe2] sm:$0xff]  ;;  %v4209_v56 = vld [vmem:[#allocation3 + $0xf2] sm:$0xff] }
 0x226   : > { %v3724_v62 = vld [vmem:[#allocation3 + $0x169] sm:$0xff]  ;;  %v13943_v35 = vpack.c.bf16 %v4206_v21, %v4205_v42  ;;  %v4210_v33 = vld [vmem:[#allocation3 + $0xfa] sm:$0xff]  ;;  %v4217_v12 = vld [vmem:[#allocation3 + $0x152] sm:$0xff] }
 0x227   : > { %11249 = vmatmul.mubr.msk.bf16.gmra.mxu1 %vm334_vm3, %v13858_v43  ;;  %v3672_v18 = vld [vmem:[#allocation3 + $0x168] sm:$0xff]  ;;  %v4231_v27 = vpack.c.bf16 %v4210_v33, %v4209_v56  ;;  %v4215_v8 = vld [vmem:[#allocation3 + $0x13a] sm:$0xff]  ;;  %v12035_v31 = vld [vmem:[%s16133_s3 + $0x60] sm:$0xff]  }
 0x228   : > { %11285 = vmatmul.mubr.msk.bf16.gmra.mxu0 %vm334_vm3, %v13860_v29  ;;  %11252 = vmatprep.mubr.msk.bf16.mxu1 %vm334_vm3, %v13862_v60  ;;  %v4216_v58 = vld [vmem:[#allocation3 + $0x142] sm:$0xff]  ;;  %v4218_v10 = vld [vmem:[#allocation3 + $0x15a] sm:$0xff]  ;;  %v5723_v42 = vld [vmem:[#allocation3 + $0x51] sm:$0xff] }
 0x229   : > { %11288 = vmatprep.mubr.msk.bf16.mxu0 %vm334_vm3, %v13864_v20  ;;  %v12037_v19 = vld [vmem:[%s16133_s3 + $0x70] sm:$0xff]   ;;  %v5419_v21 = vld [vmem:[#allocation3 + $0x68] sm:$0xff] }
 0x22a   : > { %v3725_v34 = vld [vmem:[#allocation3 + $0x171] sm:$0xff]  ;;  %v5418_v33 = vld [vmem:[#allocation3 + $0x60] sm:$0xff] }
 0x22b   : > { %v3673_v41 = vld [vmem:[#allocation3 + $0x170] sm:$0xff]  ;;  %v13874_v2 = vpack.c.bf16 %v3725_v34, %v3724_v62  ;;  %v4213_v34 = vld [vmem:[#allocation3 + $0x122] sm:$0xff] }
 0x22c   : > { %v13876_v11 = vpack.c.bf16 %v3673_v41, %v3672_v18  ;;  %v4212_v62 = vld [vmem:[#allocation3 + $0x112] sm:$0xff]  ;;  %v4214_v18 = vld [vmem:[#allocation3 + $0x12a] sm:$0xff] }
 0x22d   : > { %v4232_v41 = vpack.c.bf16 %v4212_v62, %v4211_v13  ;;  %v4219_v24 = vld [vmem:[#allocation3 + $0x16a] sm:$0xff]  ;;  %v4220_v63 = vld [vmem:[#allocation3 + $0x172] sm:$0xff] }
 0x22e   : > { %v12039_v62 = vld [vmem:[%s16133_s3 + $0x80] sm:$0xff]  }
 0x22f   : > { %11253 = vmatmul.mubr.msk.bf16.gmra.mxu1 %vm334_vm3, %v13874_v2 }
 0x230   : > { %11289 = vmatmul.mubr.msk.bf16.gmra.mxu0 %vm334_vm3, %v13876_v11  ;;  %11296 = vmatprep.mubr.msk.bf16.mxu1 %vm334_vm3, %v4221_v14  ;;  %v4233_v14 = vpack.c.bf16 %v4214_v18, %v4213_v34 }
 0x231   : > { %11332 = vmatprep.mubr.msk.bf16.mxu0 %vm334_vm3, %v13602_v52  ;;  %v13908_v52 = vld [vmem:[%s16133_s3 + $0x68] sm:$0xff]  }
 0x237   : > { %11297 = vmatmul.mubr.msk.bf16.vlgmr.msra.gmra.mxu1 %vm334_vm3, %v13885_v48 }
 0x238   : > { %11333 = vmatmul.mubr.msk.bf16.vlgmr.msra.gmra.mxu0 %vm334_vm3, %v13606_v32  ;;  %11300 = vmatprep.mubr.msk.bf16.mxu1 %vm334_vm3, %v13887_v54  ;;  %v13913_v32 = vld [vmem:[%s16133_s3 + $0x78] sm:$0xff]  }
 0x239   : > { %11336 = vmatprep.mubr.msk.bf16.mxu0 %vm334_vm3, %v13668_v3  ;;  %11365 = vmatpush3.bf16.msra.mxu1 %v13645_v61  ;;  %v4198_v3 = vld [vmem:[#allocation3 + $0x6a] sm:$0xff] }
 0x23a   : > { %11401 = vmatpush3.bf16.msra.mxu0 %v13651_v25  ;;  %11366 = vmatprep.subr.bf16.mxu1 %v12031_v4  ;;  %v13917_v61 = vpack.c.bf16 %v4198_v3, %v4197_v23  ;;  %v4199_v25 = vld [vmem:[#allocation3 + $0x7a] sm:$0xff]  ;;  %v4526_v23 = vld [vmem:[#allocation3 + $0x188] sm:$0xff] }
 0x23b   : > { %11402 = vmatprep.subr.bf16.mxu0 %v12033_v6  ;;  %v13929_v36 = vpack.c.bf16 %v4200_v59, %v4199_v25  ;;  %v4525_v3 = vld [vmem:[#allocation3 + $0x180] sm:$0xff]  ;;  %v4236_v25 = vpack.c.bf16 %v4220_v63, %v4219_v24  ;;  %v5423_v24 = vld [vmem:[#allocation3 + $0x98] sm:$0xff] }
 0x23c   : > { %v13971_v59 = vpack.c.bf16 %v4526_v23, %v4525_v3  ;;  %v5729_v63 = vld [vmem:[#allocation3 + $0x99] sm:$0xff] }
 0x23d   : > { %11367 = vmatpush3.bf16.msra.mxu1 %v12031_v4  ;;  %v4234_v4 = vpack.c.bf16 %v4216_v58, %v4215_v8  ;;  %v5420_v3 = vld [vmem:[#allocation3 + $0x78] sm:$0xff] }
 0x23e   : > { %11403 = vmatpush3.bf16.msra.mxu0 %v12033_v6  ;;  %11436 = vmatprep.subr.bf16.mxu1 %v13908_v52  ;;  %v4235_v6 = vpack.c.bf16 %v4218_v10, %v4217_v12  ;;  %v5421_v12 = vld [vmem:[#allocation3 + $0x80] sm:$0xff] }
 0x23f   : > { %11472 = vmatprep.subr.bf16.mxu0 %v13913_v32  ;;  %11301 = vmatmul.mubr.msk.bf16.gmra.mxu1 %vm334_vm3, %v13915_v45  ;;  %v5727_v10 = vld [vmem:[#allocation3 + $0x81] sm:$0xff] }
 0x240   : > { %11337 = vmatmul.mubr.msk.bf16.gmra.mxu0 %vm334_vm3, %v13670_v46  ;;  %11304 = vmatprep.mubr.msk.bf16.mxu1 %vm334_vm3, %v13917_v61  ;;  %v4203_v46 = vld [vmem:[#allocation3 + $0xaa] sm:$0xff] }
 0x241   : > { %11340 = vmatprep.mubr.msk.bf16.mxu0 %vm334_vm3, %v13717_v30  ;;  %v4204_v30 = vld [vmem:[#allocation3 + $0xb2] sm:$0xff] }
 0x242   : > { %v13941_v9 = vpack.c.bf16 %v4204_v30, %v4203_v46  ;;  %v5417_v30 = vld [vmem:[#allocation3 + $0x50] sm:$0xff] }
 0x247   : > { %11305 = vmatmul.mubr.msk.bf16.gmra.mxu1 %vm334_vm3, %v13929_v36 }
 0x248   : > { %11341 = vmatmul.mubr.msk.bf16.gmra.mxu0 %vm334_vm3, %v13721_v50  ;;  %11308 = vmatprep.mubr.msk.bf16.mxu1 %vm334_vm3, %v13931_v53  ;;  %v4207_v50 = vld [vmem:[#allocation3 + $0xda] sm:$0xff] }
 0x249   : > { %11344 = vmatprep.mubr.msk.bf16.mxu0 %vm334_vm3, %v13762_v7  ;;  %v4230_v0 = vpack.c.bf16 %v4208_v40, %v4207_v50  ;;  %v5722_v50 = vld [vmem:[#allocation3 + $0x49] sm:$0xff] }
 0x24a   : > { %v5753_v56 = vpack.c.bf16 %v5723_v42, %v5722_v50 }
 0x24f   : > { %11309 = vmatmul.mubr.msk.bf16.gmra.mxu1 %vm334_vm3, %v13941_v9 }
 0x250   : > { %11345 = vmatmul.mubr.msk.bf16.gmra.mxu0 %vm334_vm3, %v13766_v5  ;;  %11312 = vmatprep.mubr.msk.bf16.mxu1 %vm334_vm3, %v13943_v35 }
 0x251   : > { %11348 = vmatprep.mubr.msk.bf16.mxu0 %vm334_vm3, %v13806_v55 }
 0x257   : > { %11313 = vmatmul.mubr.msk.bf16.gmra.mxu1 %vm334_vm3, %v4230_v0 }
 0x258   : > { %11349 = vmatmul.mubr.msk.bf16.gmra.mxu0 %vm334_vm3, %v13810_v44  ;;  %11316 = vmatprep.mubr.msk.bf16.mxu1 %vm334_vm3, %v4231_v27 }
 0x259   : > { %11352 = vmatprep.mubr.msk.bf16.mxu0 %vm334_vm3, %v13840_v16 }
 0x25f   : > { %11317 = vmatmul.mubr.msk.bf16.gmra.mxu1 %vm334_vm3, %v4232_v41 }
 0x260   : > { %11353 = vmatmul.mubr.msk.bf16.gmra.mxu0 %vm334_vm3, %v13845_v51  ;;  %11320 = vmatprep.mubr.msk.bf16.mxu1 %vm334_vm3, %v4233_v14 }
 0x261   : > { %11356 = vmatprep.mubr.msk.bf16.mxu0 %vm334_vm3, %v13860_v29 }
 0x267   : > { %11321 = vmatmul.mubr.msk.bf16.gmra.mxu1 %vm334_vm3, %v4234_v4 }
 0x268   : > { %11357 = vmatmul.mubr.msk.bf16.gmra.mxu0 %vm334_vm3, %v13864_v20  ;;  %11324 = vmatprep.mubr.msk.bf16.mxu1 %vm334_vm3, %v4235_v6 }
 0x269   : > { %11360 = vmatprep.mubr.msk.bf16.mxu0 %vm334_vm3, %v13876_v11 }
 0x26f   : > { %11325 = vmatmul.mubr.msk.bf16.gmra.mxu1 %vm334_vm3, %v4236_v25 }
 0x270   : > { %11361 = vmatmul.mubr.msk.bf16.gmra.mxu0 %vm334_vm3, %v13971_v59  ;;  %11368 = vmatprep.mubr.msk.bf16.mxu1 %vm334_vm3, %v13600_v37  ;;  %v13999_v37 = vld [vmem:[%s16133_s3 + $0x88] sm:$0xff]  }
 0x271   : > { %11404 = vmatprep.mubr.msk.bf16.mxu0 %vm334_vm3, %v13885_v48 }
 0x277   : > { %11369 = vmatmul.mubr.msk.bf16.vlgmr.msra.gmra.mxu1 %vm334_vm3, %v13604_v47  ;;  %v4832_v47 = vld [vmem:[#allocation3 + $0x189] sm:$0xff] }
 0x278   : > { %11405 = vmatmul.mubr.msk.bf16.vlgmr.msra.gmra.mxu0 %vm334_vm3, %v13887_v54  ;;  %11372 = vmatprep.mubr.msk.bf16.mxu1 %vm334_vm3, %v13666_v39  ;;  %v5138_v39 = vld [vmem:[#allocation3 + $0x18a] sm:$0xff] }
 0x279   : > { %11408 = vmatprep.mubr.msk.bf16.mxu0 %vm334_vm3, %v13915_v45  ;;  %11437 = vmatpush3.bf16.msra.mxu1 %v13908_v52 }
 0x27a   : > { %11473 = vmatpush3.bf16.msra.mxu0 %v13913_v32  ;;  %11438 = vmatprep.subr.bf16.mxu1 %v12035_v31  ;;  %v5414_v32 = vld [vmem:[#allocation3 + $0x30] sm:$0xff] }
 0x27b   : > { %11474 = vmatprep.subr.bf16.mxu0 %v12037_v19 }
 0x27d   : > { %11439 = vmatpush3.bf16.msra.mxu1 %v12035_v31 }
 0x27e   : > { %11475 = vmatpush3.bf16.msra.mxu0 %v12037_v19  ;;  %11508 = vmatprep.subr.bf16.mxu1 %v13999_v37 }
 0x27f   : > { %11373 = vmatmul.mubr.msk.bf16.gmra.mxu1 %vm334_vm3, %v13660_v22  ;;  %v5137_v22 = vld [vmem:[#allocation3 + $0x182] sm:$0xff] }
 0x280   : > { %11409 = vmatmul.mubr.msk.bf16.gmra.mxu0 %vm334_vm3, %v13917_v61  ;;  %11376 = vmatprep.mubr.msk.bf16.mxu1 %vm334_vm3, %v13715_v49  ;;  %v5415_v49 = vld [vmem:[#allocation3 + $0x38] sm:$0xff]  ;;  %v14045_v52 = vpack.c.bf16 %v5138_v39, %v5137_v22 }
 0x281   : > { %11412 = vmatprep.mubr.msk.bf16.mxu0 %vm334_vm3, %v13929_v36  ;;  %v5720_v36 = vld [vmem:[#allocation3 + $0x31] sm:$0xff] }
 0x282   : > { %v5728_v39 = vld [vmem:[#allocation3 + $0x91] sm:$0xff] }
 0x287   : > { %11377 = vmatmul.mubr.msk.bf16.gmra.mxu1 %vm334_vm3, %v13719_v26  ;;  %v5721_v26 = vld [vmem:[#allocation3 + $0x39] sm:$0xff] }
 0x288   : > { %11413 = vmatmul.mubr.msk.bf16.gmra.mxu0 %vm334_vm3, %v13931_v53  ;;  %11380 = vmatprep.mubr.msk.bf16.mxu1 %vm334_vm3, %v13760_v15  ;;  %v4831_v15 = vld [vmem:[#allocation3 + $0x181] sm:$0xff]  ;;  %v5446_v53 = vpack.c.bf16 %v5415_v49, %v5414_v32  ;;  %v5752_v46 = vpack.c.bf16 %v5721_v26, %v5720_v36 }
 0x289   : > { %11416 = vmatprep.mubr.msk.bf16.mxu0 %vm334_vm3, %v13941_v9  ;;  %v14043_v48 = vpack.c.bf16 %v4832_v47, %v4831_v15  ;;  %v5725_v9 = vld [vmem:[#allocation3 + $0x69] sm:$0xff]  ;;  %v5449_v47 = vpack.c.bf16 %v5421_v12, %v5420_v3  ;;  %v5756_v15 = vpack.c.bf16 %v5729_v63, %v5728_v39 }
 0x28f   : > { %11381 = vmatmul.mubr.msk.bf16.gmra.mxu1 %vm334_vm3, %v13764_v1 }
 0x290   : > { %11417 = vmatmul.mubr.msk.bf16.gmra.mxu0 %vm334_vm3, %v13943_v35  ;;  %11384 = vmatprep.mubr.msk.bf16.mxu1 %vm334_vm3, %v13804_v17  ;;  %v5416_v35 = vld [vmem:[#allocation3 + $0x48] sm:$0xff] }
 0x291   : > { %11420 = vmatprep.mubr.msk.bf16.mxu0 %vm334_vm3, %v4230_v0  ;;  %v5447_v40 = vpack.c.bf16 %v5417_v30, %v5416_v35  ;;  %v5724_v0 = vld [vmem:[#allocation3 + $0x61] sm:$0xff] }
 0x292   : > { %v5754_v13 = vpack.c.bf16 %v5725_v9, %v5724_v0 }
 0x297   : > { %11385 = vmatmul.mubr.msk.bf16.gmra.mxu1 %vm334_vm3, %v13808_v57 }
 0x298   : > { %11421 = vmatmul.mubr.msk.bf16.gmra.mxu0 %vm334_vm3, %v4231_v27  ;;  %11388 = vmatprep.mubr.msk.bf16.mxu1 %vm334_vm3, %v13838_v38  ;;  %v5448_v27 = vpack.c.bf16 %v5419_v21, %v5418_v33  ;;  %v5731_v21 = vld [vmem:[#allocation3 + $0xb1] sm:$0xff] }
 0x299   : > { %11424 = vmatprep.mubr.msk.bf16.mxu0 %vm334_vm3, %v4232_v41 }
 0x29f   : > { %11389 = vmatmul.mubr.msk.bf16.gmra.mxu1 %vm334_vm3, %v13842_v28 }
 0x2a0   : > { %11425 = vmatmul.mubr.msk.bf16.gmra.mxu0 %vm334_vm3, %v4233_v14  ;;  %11392 = vmatprep.mubr.msk.bf16.mxu1 %vm334_vm3, %v13858_v43 }
 0x2a1   : > { %11428 = vmatprep.mubr.msk.bf16.mxu0 %vm334_vm3, %v4234_v4 }
 0x2a7   : > { %11393 = vmatmul.mubr.msk.bf16.gmra.mxu1 %vm334_vm3, %v13862_v60 }
 0x2a8   : > { %11429 = vmatmul.mubr.msk.bf16.gmra.mxu0 %vm334_vm3, %v4235_v6  ;;  %11396 = vmatprep.mubr.msk.bf16.mxu1 %vm334_vm3, %v13874_v2 }
 0x2a9   : > { %11432 = vmatprep.mubr.msk.bf16.mxu0 %vm334_vm3, %v4236_v25  ;;  %v5726_v25 = vld [vmem:[#allocation3 + $0x79] sm:$0xff] }
 0x2aa   : > { %v5755_v22 = vpack.c.bf16 %v5727_v10, %v5726_v25 }
 0x2af   : > { %11397 = vmatmul.mubr.msk.bf16.gmra.mxu1 %vm334_vm3, %v14043_v48 }
 0x2b0   : > { %11433 = vmatmul.mubr.msk.bf16.gmra.mxu0 %vm334_vm3, %v14045_v52  ;;  %11440 = vmatprep.mubr.msk.bf16.mxu1 %vm334_vm3, %v5446_v53 }
 0x2b1   : > { %11476 = vmatprep.mubr.msk.bf16.mxu0 %vm334_vm3, %v5752_v46 }
 0x2b6   : > { %v11226_v34 = vpop.f32.mrf.mxu1  ;;  %v11262_v18 = vpop.f32.mrf.mxu0 }
 0x2b7   : > { %11441 = vmatmul.mubr.msk.bf16.vlgmr.msra.gmra.mxu1 %vm334_vm3, %v5447_v40  ;;  %v14058_v41 = vadd.f32 %v11262_v18, %v11226_v34  ;;  %v5730_v40 = vld [vmem:[#allocation3 + $0xa9] sm:$0xff] }
 0x2b8   : > { %11477 = vmatmul.mubr.msk.bf16.vlgmr.msra.gmra.mxu0 %vm334_vm3, %v5753_v56  ;;  %11444 = vmatprep.mubr.msk.bf16.mxu1 %vm334_vm3, %v5448_v27  ;;  %v3841_v14 = vpop.f32.mrf.mxu1  ;;  %v4062_v8 = vpop.f32.mrf.mxu0  ;;  %v5757_v0 = vpack.c.bf16 %v5731_v21, %v5730_v40 }
 0x2b9   : > { %11480 = vmatprep.mubr.msk.bf16.mxu0 %vm334_vm3, %v5754_v13  ;;  %11509 = vmatpush3.bf16.msra.mxu1 %v13999_v37  ;;  %v14063_v58 = vadd.f32 %v4062_v8, %v3841_v14  ;;  %v5422_v37 = vld [vmem:[#allocation3 + $0x90] sm:$0xff] }
 0x2ba   : > { %11510 = vmatprep.subr.bf16.mxu1 %v12039_v62  ;;  %v11227_v4 = vpop.f32.mrf.mxu1  ;;  %v11263_v6 = vpop.f32.mrf.mxu0  ;;  %v5450_v26 = vpack.c.bf16 %v5423_v24, %v5422_v37 }
 0x2bb   : > { %v14065_v23 = vadd.f32 %v11263_v6, %v11227_v4 }
 0x2bc   : > { %v3844_v31 = vpop.f32.mrf.mxu1  ;;  %v4065_v19 = vpop.f32.mrf.mxu0 }
 0x2bd   : > { %11511 = vmatpush3.bf16.msra.mxu1 %v12039_v62  ;;  %v14067_v49 = vadd.f32 %v4065_v19, %v3844_v31 }
 0x2bf   : > { %v11230_v32 = vpop.f32.mrf.mxu1  ;;  %v11266_v36 = vpop.f32.mrf.mxu0  ;;  %11445 = vmatmul.mubr.msk.bf16.gmra.mxu1 %vm334_vm3, %v5449_v47 }
 0x2c0   : > { %11481 = vmatmul.mubr.msk.bf16.gmra.mxu0 %vm334_vm3, %v5755_v22  ;;  %v14071_v53 = vadd.f32 %v11266_v36, %v11230_v32  ;;  %11448 = vmatprep.mubr.msk.bf16.mxu1 %vm334_vm3, %v5450_v26 }
 0x2c1   : > { %11484 = vmatprep.mubr.msk.bf16.mxu0 %vm334_vm3, %v5756_v15  ;;  %v3857_v46 = vpop.f32.mrf.mxu1  ;;  %v4078_v30 = vpop.f32.mrf.mxu0 }
 0x2c2   : > { %v14075_v42 = vadd.f32 %v4078_v30, %v3857_v46 }
 0x2c3   : > { %v11231_v9 = vpop.f32.mrf.mxu1  ;;  %v11267_v35 = vpop.f32.mrf.mxu0 }
 0x2c4   : > { %v14077_v50 = vadd.f32 %v11267_v35, %v11231_v9 }
 0x2c5   : > { %v3860_v56 = vpop.f32.mrf.mxu1  ;;  %v4081_v33 = vpop.f32.mrf.mxu0 }
 0x2c6   : > { %v14079_v27 = vadd.f32 %v4081_v33, %v3860_v56 }
 0x2c7   : > { %v11234_v13 = vpop.f32.mrf.mxu1  ;;  %v11270_v62 = vpop.f32.mrf.mxu0  ;;  %11449 = vmatmul.mubr.msk.bf16.gmra.mxu1 %vm334_vm3, %v13762_v7 }
 0x2c8   : > { %11485 = vmatmul.mubr.msk.bf16.gmra.mxu0 %vm334_vm3, %v5757_v0  ;;  %v14084_v34 = vadd.f32 %v11270_v62, %v11234_v13  ;;  %11452 = vmatprep.mubr.msk.bf16.mxu1 %vm334_vm3, %v13766_v5 }
 0x2c9   : > { %11488 = vmatprep.mubr.msk.bf16.mxu0 %vm334_vm3, %v13764_v1  ;;  %v3873_v18 = vpop.f32.mrf.mxu1  ;;  %v4094_v14 = vpop.f32.mrf.mxu0 }
 0x2ca   : > { %v14090_v8 = vadd.f32 %v4094_v14, %v3873_v18  ;;  %v5445_v18 = vld [vmem:[#allocation3 + $0x1a0] sm:$0xff] }
 0x2cb   : > { %v11235_v12 = vpop.f32.mrf.mxu1  ;;  %v11271_v10 = vpop.f32.mrf.mxu0  ;;  %v5750_v14 = vld [vmem:[#allocation3 + $0x199] sm:$0xff] }
 0x2cc   : > { %v14092_v4 = vadd.f32 %v11271_v10, %v11235_v12  ;;  %v5751_v12 = vld [vmem:[#allocation3 + $0x1a1] sm:$0xff] }
 0x2cd   : > { %v3876_v6 = vpop.f32.mrf.mxu1  ;;  %v4097_v7 = vpop.f32.mrf.mxu0 }
 0x2ce   : > { %v14094_v24 = vadd.f32 %v4097_v7, %v3876_v6 }
 0x2cf   : > { %v11238_v63 = vpop.f32.mrf.mxu1  ;;  %11453 = vmatmul.mubr.msk.bf16.gmra.mxu1 %vm334_vm3, %v13806_v55 }
 0x2d0   : > { %v11274_v3 = vpop.f32.mrf.mxu0  ;;  %11489 = vmatmul.mubr.msk.bf16.gmra.mxu0 %vm334_vm3, %v13804_v17  ;;  %11456 = vmatprep.mubr.msk.bf16.mxu1 %vm334_vm3, %v13810_v44 }
 0x2d1   : > { %v14100_v1 = vadd.f32 %v11274_v3, %v11238_v63  ;;  %11492 = vmatprep.mubr.msk.bf16.mxu0 %vm334_vm3, %v13808_v57  ;;  %v3889_v5 = vpop.f32.mrf.mxu1 }
 0x2d2   : > { %v4110_v25 = vpop.f32.mrf.mxu0 }
 0x2d3   : > { %v14106_v31 = vadd.f32 %v4110_v25, %v3889_v5  ;;  %v11239_v19 = vpop.f32.mrf.mxu1 }
 0x2d4   : > { %v11275_v47 = vpop.f32.mrf.mxu0 }
 0x2d5   : > { %v14108_v22 = vadd.f32 %v11275_v47, %v11239_v19  ;;  %v3892_v55 = vpop.f32.mrf.mxu1 }
 0x2d6   : > { %v4113_v37 = vpop.f32.mrf.mxu0 }
 0x2d7   : > { %v14110_v39 = vadd.f32 %v4113_v37, %v3892_v55  ;;  %v11242_v17 = vpop.f32.mrf.mxu1  ;;  %11457 = vmatmul.mubr.msk.bf16.gmra.mxu1 %vm334_vm3, %v13840_v16 }
 0x2d8   : > { %v11278_v26 = vpop.f32.mrf.mxu0  ;;  %11493 = vmatmul.mubr.msk.bf16.gmra.mxu0 %vm334_vm3, %v13838_v38  ;;  %11460 = vmatprep.mubr.msk.bf16.mxu1 %vm334_vm3, %v13845_v51 }
 0x2d9   : > { %v14116_v57 = vadd.f32 %v11278_v26, %v11242_v17  ;;  %11496 = vmatprep.mubr.msk.bf16.mxu0 %vm334_vm3, %v13842_v28  ;;  %v3905_v44 = vpop.f32.mrf.mxu1 }
 0x2da   : > { %v4126_v15 = vpop.f32.mrf.mxu0 }
 0x2db   : > { %v14122_v32 = vadd.f32 %v4126_v15, %v3905_v44  ;;  %v11243_v36 = vpop.f32.mrf.mxu1 }
 0x2dc   : > { %v11279_v46 = vpop.f32.mrf.mxu0 }
 0x2dd   : > { %v14124_v30 = vadd.f32 %v11279_v46, %v11243_v36  ;;  %v14126_v16 = vpop.f32.mrf.mxu1 }
 0x2de   : > { %v14128_v21 = vpop.f32.mrf.mxu0 }
 0x2df   : > { %v11246_v38 = vpop.f32.mrf.mxu1  ;;  %11461 = vmatmul.mubr.msk.bf16.gmra.mxu1 %vm334_vm3, %v13860_v29 }
 0x2e0   : > { %v11282_v9 = vpop.f32.mrf.mxu0  ;;  %11497 = vmatmul.mubr.msk.bf16.gmra.mxu0 %vm334_vm3, %v13858_v43  ;;  %11464 = vmatprep.mubr.msk.bf16.mxu1 %vm334_vm3, %v13864_v20 }
 0x2e1   : > { %v14134_v28 = vadd.f32 %v11282_v9, %v11246_v38  ;;  %11500 = vmatprep.mubr.msk.bf16.mxu0 %vm334_vm3, %v13862_v60  ;;  %v3921_v51 = vpop.f32.mrf.mxu1  ;;  %v5444_v60 = vld [vmem:[#allocation3 + $0x198] sm:$0xff] }
 0x2e2   : > { %v4142_v35 = vpop.f32.mrf.mxu0  ;;  %v5461_v3 = vpack.c.bf16 %v5445_v18, %v5444_v60 }
 0x2e3   : > { %v14140_v40 = vadd.f32 %v4142_v35, %v3921_v51  ;;  %v11247_v56 = vpop.f32.mrf.mxu1 }
 0x2e4   : > { %v11283_v33 = vpop.f32.mrf.mxu0 }
 0x2e5   : > { %v14142_v0 = vadd.f32 %v11283_v33, %v11247_v56  ;;  %v14144_v29 = vpop.f32.mrf.mxu1 }
 0x2e6   : > { %v14146_v13 = vpop.f32.mrf.mxu0 }
 0x2e7   : > { %v11250_v43 = vpop.f32.mrf.mxu1  ;;  %11465 = vmatmul.mubr.msk.bf16.gmra.mxu1 %vm334_vm3, %v13876_v11 }
 0x2e8   : > { %v11286_v62 = vpop.f32.mrf.mxu0  ;;  %11501 = vmatmul.mubr.msk.bf16.gmra.mxu0 %vm334_vm3, %v13874_v2  ;;  %11468 = vmatprep.mubr.msk.bf16.mxu1 %vm334_vm3, %v13971_v59  ;;  %v5767_v2 = vpack.c.bf16 %v5751_v12, %v5750_v14  ;;  %v6034_v14 = vld [vmem:[#allocation3 + $0x92] sm:$0xff]  ;;  %v6035_v12 = vld [vmem:[#allocation3 + $0x9a] sm:$0xff] }
 0x2e9   : > { %v14152_v20 = vadd.f32 %v11286_v62, %v11250_v43  ;;  %11504 = vmatprep.mubr.msk.bf16.mxu0 %vm334_vm3, %v14043_v48  ;;  %v3937_v10 = vpop.f32.mrf.mxu1  ;;  %v6032_v43 = vld [vmem:[#allocation3 + $0x7a] sm:$0xff]  ;;  %v6033_v62 = vld [vmem:[#allocation3 + $0x82] sm:$0xff] }
 0x2ea   : > { %v4158_v6 = vpop.f32.mrf.mxu0 }
 0x2eb   : > { %v14158_v7 = vadd.f32 %v4158_v6, %v3937_v10  ;;  %v11251_v11 = vpop.f32.mrf.mxu1 }
 0x2ec   : > { %v11287_v63 = vpop.f32.mrf.mxu0 }
 0x2ed   : > { %v14160_v5 = vadd.f32 %v11287_v63, %v11251_v11  ;;  %v14162_v25 = vpop.f32.mrf.mxu1 }
 0x2ee   : > { %v14164_v19 = vpop.f32.mrf.mxu0 }
 0x2ef   : > { %v11254_v59 = vpop.f32.mrf.mxu1  ;;  %11469 = vmatmul.mubr.msk.bf16.gmra.mxu1 %vm334_vm3, %v5461_v3 }
 0x2f0   : > { %v11290_v47 = vpop.f32.mrf.mxu0  ;;  %11505 = vmatmul.mubr.msk.bf16.gmra.mxu0 %vm334_vm3, %v5767_v2  ;;  %11512 = vmatprep.mubr.msk.bf16.mxu1 %vm334_vm3, %v13887_v54 }
 0x2f1   : > { %v14168_v48 = vadd.f32 %v11290_v47, %v11254_v59  ;;  %v3953_v55 = vpop.f32.mrf.mxu1 }
 0x2f2   : > { %v4174_v37 = vpop.f32.mrf.mxu0 }
 0x2f3   : > { %v14172_v17 = vadd.f32 %v4174_v37, %v3953_v55  ;;  %v11255_v26 = vpop.f32.mrf.mxu1 }
 0x2f4   : > { %v11291_v44 = vpop.f32.mrf.mxu0 }
 0x2f5   : > { %v14174_v15 = vadd.f32 %v11291_v44, %v11255_v26  ;;  %v14176_v36 = vpop.f32.mrf.mxu1  ;;  %v6036_v26 = vld [vmem:[#allocation3 + $0xaa] sm:$0xff]  ;;  %v6037_v44 = vld [vmem:[#allocation3 + $0xb2] sm:$0xff] }
 0x2f6   : > { %v14178_v46 = vpop.f32.mrf.mxu0 }
 0x2f7   : > { %v11298_v38 = vpop.f32.mrf.mxu1  ;;  %11513 = vmatmul.mubr.msk.bf16.vlgmr.msra.gmra.mxu1 %vm334_vm3, %v13915_v45 }
 0x2f8   : > { %v11334_v9 = vpop.f32.mrf.mxu0  ;;  %v4465_v51 = vadd.f32 %v11298_v38, %v14058_v41  ;;  %11516 = vmatprep.mubr.msk.bf16.mxu1 %vm334_vm3, %v13917_v61  ;;  %v6061_v61 = vpack.c.bf16 %v6033_v62, %v6032_v43  ;;  %v6063_v43 = vpack.c.bf16 %v6037_v44, %v6036_v26 }
 0x2f9   : > { %v4336_v54 = vpop.f32.mrf.mxu1 }
 0x2fa   : > { %v4642_v35 = vpop.f32.mrf.mxu0  ;;  %v14185_v56 = vadd.f32 %v11334_v9, %v4465_v51  ;;  %v4463_v33 = vadd.f32 %v4336_v54, %v14063_v58  ;;  %v6062_v58 = vpack.c.bf16 %v6035_v12, %v6034_v14  ;;  %v6038_v9 = vld [vmem:[#allocation3 + $0xc2] sm:$0xff]  ;;  %v6039_v51 = vld [vmem:[#allocation3 + $0xca] sm:$0xff] }
 0x2fb   : > { %v11299_v60 = vpop.f32.mrf.mxu1 }
 0x2fc   : > { %v11335_v18 = vpop.f32.mrf.mxu0  ;;  %v14188_v10 = vadd.f32 %v4642_v35, %v4463_v33  ;;  %v4466_v45 = vadd.f32 %v11299_v60, %v14065_v23 }
 0x2fd   : > { %v4339_v41 = vpop.f32.mrf.mxu1 }
 0x2fe   : > { %v14191_v6 = vpop.f32.mrf.mxu0  ;;  %v14193_v11 = vadd.f32 %v11335_v18, %v4466_v45  ;;  %v14196_v63 = vadd.f32 %v4339_v41, %v14067_v49 }
 0x2ff   : > { %v11302_v3 = vpop.f32.mrf.mxu1  ;;  %11517 = vmatmul.mubr.msk.bf16.gmra.mxu1 %vm334_vm3, %v6061_v61 }
 0x300   : > { %v11338_v2 = vpop.f32.mrf.mxu0  ;;  %v4469_v59 = vadd.f32 %v11302_v3, %v14071_v53  ;;  %11520 = vmatprep.mubr.msk.bf16.mxu1 %vm334_vm3, %v6062_v58  ;;  %v6040_v58 = vld [vmem:[#allocation3 + $0xda] sm:$0xff]  ;;  %v6041_v3 = vld [vmem:[#allocation3 + $0xe2] sm:$0xff] }
 0x301   : > { %v4352_v47 = vpop.f32.mrf.mxu1  ;;  %v6065_v44 = vpack.c.bf16 %v6041_v3, %v6040_v58 }
 0x302   : > { %v4658_v23 = vpop.f32.mrf.mxu0  ;;  %v14201_v55 = vadd.f32 %v11338_v2, %v4469_v59  ;;  %v4467_v37 = vadd.f32 %v4352_v47, %v14075_v42  ;;  %v6064_v42 = vpack.c.bf16 %v6039_v51, %v6038_v9  ;;  %v6042_v59 = vld [vmem:[#allocation3 + $0xf2] sm:$0xff]  ;;  %v6043_v47 = vld [vmem:[#allocation3 + $0xfa] sm:$0xff] }
 0x303   : > { %v11303_v38 = vpop.f32.mrf.mxu1 }
 0x304   : > { %v11339_v49 = vpop.f32.mrf.mxu0  ;;  %v14204_v54 = vadd.f32 %v4658_v23, %v4467_v37  ;;  %v4470_v35 = vadd.f32 %v11303_v38, %v14077_v50 }
 0x305   : > { %v4355_v33 = vpop.f32.mrf.mxu1 }
 0x306   : > { %v14207_v53 = vpop.f32.mrf.mxu0  ;;  %v14209_v62 = vadd.f32 %v11339_v49, %v4470_v35  ;;  %v14212_v60 = vadd.f32 %v4355_v33, %v14079_v27 }
 0x307   : > { %v11306_v18 = vpop.f32.mrf.mxu1  ;;  %11521 = vmatmul.mubr.msk.bf16.gmra.mxu1 %vm334_vm3, %v6063_v43 }
 0x308   : > { %v11342_v14 = vpop.f32.mrf.mxu0  ;;  %v4473_v12 = vadd.f32 %v11306_v18, %v14084_v34  ;;  %11524 = vmatprep.mubr.msk.bf16.mxu1 %vm334_vm3, %v6064_v42  ;;  %v6044_v18 = vld [vmem:[#allocation3 + $0x10a] sm:$0xff] }
 0x309   : > { %v4368_v45 = vpop.f32.mrf.mxu1 }
 0x30a   : > { %v4674_v50 = vpop.f32.mrf.mxu0  ;;  %v14217_v41 = vadd.f32 %v11342_v14, %v4473_v12  ;;  %v4471_v61 = vadd.f32 %v4368_v45, %v14090_v8  ;;  %v6066_v8 = vpack.c.bf16 %v6043_v47, %v6042_v59  ;;  %v6045_v14 = vld [vmem:[#allocation3 + $0x112] sm:$0xff] }
 0x30b   : > { %v11307_v2 = vpop.f32.mrf.mxu1 }
 0x30c   : > { %v11343_v27 = vpop.f32.mrf.mxu0  ;;  %v14220_v23 = vadd.f32 %v4674_v50, %v4471_v61  ;;  %v4474_v37 = vadd.f32 %v11307_v2, %v14092_v4  ;;  %v12040_v4 = vld [vmem:[%s16135_s5 + $0x38] sm:$0xff]  }
 0x30d   : > { %v4371_v26 = vpop.f32.mrf.mxu1  ;;  %11544 = vmatprep.subr.bf16.mxu0 %v12040_v4  ;;  %v6046_v50 = vld [vmem:[#allocation3 + $0x122] sm:$0xff]  ;;  %v6047_v61 = vld [vmem:[#allocation3 + $0x12a] sm:$0xff] }
 0x30e   : > { %v14223_v34 = vpop.f32.mrf.mxu0  ;;  %v14225_v38 = vadd.f32 %v11343_v27, %v4474_v37  ;;  %v14228_v49 = vadd.f32 %v4371_v26, %v14094_v24  ;;  %11545 = vmatpush3.bf16.msra.mxu0 %v12040_v4  ;;  %v6067_v27 = vpack.c.bf16 %v6045_v14, %v6044_v18  ;;  %v6068_v47 = vpack.c.bf16 %v6047_v61, %v6046_v50  ;;  %v6049_v4 = vld [vmem:[#allocation3 + $0x142] sm:$0xff] }
 0x30f   : > { %v11310_v9 = vpop.f32.mrf.mxu1  ;;  %11525 = vmatmul.mubr.msk.bf16.gmra.mxu1 %vm334_vm3, %v6065_v44 }
 0x310   : > { %v11346_v51 = vpop.f32.mrf.mxu0  ;;  %v4477_v35 = vadd.f32 %v11310_v9, %v14100_v1  ;;  %11528 = vmatprep.mubr.msk.bf16.mxu1 %vm334_vm3, %v6066_v8 }
 0x311   : > { %v4384_v33 = vpop.f32.mrf.mxu1 }
 0x312   : > { %v4690_v43 = vpop.f32.mrf.mxu0  ;;  %v14236_v42 = vadd.f32 %v11346_v51, %v4477_v35  ;;  %v4475_v24 = vadd.f32 %v4384_v33, %v14106_v31  ;;  %v6048_v35 = vld [vmem:[#allocation3 + $0x13a] sm:$0xff] }
 0x313   : > { %v11311_v12 = vpop.f32.mrf.mxu1 }
 0x314   : > { %v11347_v45 = vpop.f32.mrf.mxu0  ;;  %v14239_v1 = vadd.f32 %v4690_v43, %v4475_v24  ;;  %v4478_v58 = vadd.f32 %v11311_v12, %v14108_v22  ;;  %v6050_v43 = vld [vmem:[#allocation3 + $0x152] sm:$0xff]  ;;  %v6051_v24 = vld [vmem:[#allocation3 + $0x15a] sm:$0xff] }
 0x315   : > { %v4387_v3 = vpop.f32.mrf.mxu1  ;;  %v6070_v61 = vpack.c.bf16 %v6051_v24, %v6050_v43 }
 0x316   : > { %v14242_v2 = vpop.f32.mrf.mxu0  ;;  %v14244_v59 = vadd.f32 %v11347_v45, %v4478_v58  ;;  %v14247_v31 = vadd.f32 %v4387_v3, %v14110_v39  ;;  %v6069_v45 = vpack.c.bf16 %v6049_v4, %v6048_v35 }
 0x317   : > { %16276 = vst [vmem:[#allocation8_spill] sm:$0xff] %v14242_v2  ;;  %v11314_v37 = vpop.f32.mrf.mxu1  ;;  %11529 = vmatmul.mubr.msk.bf16.gmra.mxu1 %vm334_vm3, %v6067_v27 }
 0x318   : > { %16277 = vst [vmem:[#allocation9_spill] sm:$0xff] %v14247_v31  ;;  %v11350_v26 = vpop.f32.mrf.mxu0  ;;  %v4481_v44 = vadd.f32 %v11314_v37, %v14116_v57  ;;  %11532 = vmatprep.mubr.msk.bf16.mxu1 %vm334_vm3, %v6068_v47 }
 0x319   : > { %v4400_v8 = vpop.f32.mrf.mxu1 }
 0x31a   : > { %v4706_v22 = vpop.f32.mrf.mxu0  ;;  %v14252_v9 = vadd.f32 %v11350_v26, %v4481_v44  ;;  %v4479_v51 = vadd.f32 %v4400_v8, %v14122_v32  ;;  %v6052_v44 = vld [vmem:[#allocation3 + $0x16a] sm:$0xff]  ;;  %v6053_v8 = vld [vmem:[#allocation3 + $0x172] sm:$0xff] }
 0x31b   : > { %v11315_v33 = vpop.f32.mrf.mxu1 }
 0x31c   : > { %v11351_v39 = vpop.f32.mrf.mxu0  ;;  %v14255_v18 = vadd.f32 %v4706_v22, %v4479_v51  ;;  %v4482_v14 = vadd.f32 %v11315_v33, %v14124_v30  ;;  %v12041_v30 = vld [vmem:[%s16135_s5 + $0x30] sm:$0xff]  }
 0x31d   : > { %v14258_v12 = vpop.f32.mrf.mxu1  ;;  %11546 = vmatprep.subr.bf16.mxu0 %v12041_v30 }
 0x31e   : > { %v14260_v57 = vpop.f32.mrf.mxu0  ;;  %v14262_v50 = vadd.f32 %v11351_v39, %v4482_v14  ;;  %11547 = vmatpush3.bf16.msra.mxu0 %v12041_v30  ;;  %v6071_v39 = vpack.c.bf16 %v6053_v8, %v6052_v44 }
 0x31f   : > { %16278 = vst [vmem:[#allocation36_spill] sm:$0xff] %v14260_v57  ;;  %v11318_v58 = vpop.f32.mrf.mxu1  ;;  %11533 = vmatmul.mubr.msk.bf16.gmra.mxu1 %vm334_vm3, %v6069_v45  ;;  %v6056_v45 = vld [vmem:[#allocation3 + $0x19a] sm:$0xff] }
 0x320   : > { %v11354_v32 = vpop.f32.mrf.mxu0  ;;  %v4485_v3 = vadd.f32 %v11318_v58, %v14134_v28  ;;  %11536 = vmatprep.mubr.msk.bf16.mxu1 %vm334_vm3, %v6070_v61  ;;  %v6057_v61 = vld [vmem:[#allocation3 + $0x1a2] sm:$0xff] }
 0x321   : > { %v4416_v27 = vpop.f32.mrf.mxu1 }
 0x322   : > { %v4722_v47 = vpop.f32.mrf.mxu0  ;;  %v14270_v37 = vadd.f32 %v11354_v32, %v4485_v3  ;;  %v4483_v26 = vadd.f32 %v4416_v27, %v14140_v40 }
 0x323   : > { %v11319_v22 = vpop.f32.mrf.mxu1 }
 0x324   : > { %v11355_v51 = vpop.f32.mrf.mxu0  ;;  %v14273_v35 = vadd.f32 %v4722_v47, %v4483_v26  ;;  %v4486_v28 = vadd.f32 %v11319_v22, %v14142_v0  ;;  %v6073_v47 = vpack.c.bf16 %v6057_v61, %v6056_v45 }
 0x325   : > { %v14276_v4 = vpop.f32.mrf.mxu1 }
 0x326   : > { %16279 = vst [vmem:[#allocation11_spill] sm:$0xff] %v14276_v4  ;;  %v14278_v33 = vpop.f32.mrf.mxu0  ;;  %v14280_v43 = vadd.f32 %v11355_v51, %v4486_v28 }
 0x327   : > { %16280 = vst [vmem:[#allocation39_spill] sm:$0xff] %v14278_v33  ;;  %v11322_v24 = vpop.f32.mrf.mxu1  ;;  %11537 = vmatmul.mubr.msk.bf16.gmra.mxu1 %vm334_vm3, %v6071_v39 }
 0x328   : > { %v11358_v14 = vpop.f32.mrf.mxu0  ;;  %v4489_v40 = vadd.f32 %v11322_v24, %v14152_v20  ;;  %11540 = vmatprep.mubr.msk.bf16.mxu1 %vm334_vm3, %v14045_v52 }
 0x329   : > { %v4432_v58 = vpop.f32.mrf.mxu1 }
 0x32a   : > { %v4738_v0 = vpop.f32.mrf.mxu0  ;;  %v14286_v32 = vadd.f32 %v11358_v14, %v4489_v40  ;;  %v4487_v3 = vadd.f32 %v4432_v58, %v14158_v7  ;;  %v12042_v7 = vld [vmem:[%s16135_s5 + $0x28] sm:$0xff]  }
 0x32b   : > { %v11323_v30 = vpop.f32.mrf.mxu1  ;;  %11548 = vmatprep.subr.bf16.mxu0 %v12042_v7 }
 0x32c   : > { %v11359_v27 = vpop.f32.mrf.mxu0  ;;  %v14289_v26 = vadd.f32 %v4738_v0, %v4487_v3  ;;  %v4490_v44 = vadd.f32 %v11323_v30, %v14160_v5  ;;  %11549 = vmatpush3.bf16.msra.mxu0 %v12042_v7 }
 0x32d   : > { %v14292_v8 = vpop.f32.mrf.mxu1 }
 0x32e   : > { %16281 = vst [vmem:[#allocation12_spill] sm:$0xff] %v14292_v8  ;;  %v14294_v20 = vpop.f32.mrf.mxu0  ;;  %v14296_v52 = vadd.f32 %v11359_v27, %v4490_v44 }
 0x32f   : > { %16282 = vst [vmem:[#allocation17_spill] sm:$0xff] %v14294_v20  ;;  %v11326_v22 = vpop.f32.mrf.mxu1  ;;  %11541 = vmatmul.mubr.msk.bf16.gmra.mxu1 %vm334_vm3, %v6073_v47 }
 0x330   : > { %v11362_v51 = vpop.f32.mrf.mxu0  ;;  %v4493_v28 = vadd.f32 %v11326_v22, %v14168_v48  ;;  %v16285_v22 = vmov 0.0  }
 0x331   : > { %v4448_v39 = vpop.f32.mrf.mxu1  ;;  %398 = vst.msk [vmem:[#allocation4 + $0x30] sm:$0xff] %vm390_vm5, %v16285_v22  ;;  %399 = vst.msk [vmem:[#allocation4 + $0x38] sm:$0xff] %vm390_vm5, %v16285_v22 }
 0x332   : > { %v4754_v24 = vpop.f32.mrf.mxu0  ;;  %v14303_v14 = vadd.f32 %v11362_v51, %v4493_v28  ;;  %v4491_v5 = vadd.f32 %v4448_v39, %v14172_v17  ;;  %391 = vst.msk [vmem:[#allocation4] sm:$0xff] %vm390_vm5, %v16285_v22  ;;  %392 = vst.msk [vmem:[#allocation4 + $0x8] sm:$0xff] %vm390_vm5, %v16285_v22 }
 0x333   : > { %v11327_v40 = vpop.f32.mrf.mxu1  ;;  %395 = vst.msk [vmem:[#allocation4 + $0x18] sm:$0xff] %vm390_vm5, %v16285_v22  ;;  %396 = vst.msk [vmem:[#allocation4 + $0x20] sm:$0xff] %vm390_vm5, %v16285_v22 }
 0x334   : > { %v11363_v45 = vpop.f32.mrf.mxu0  ;;  %v14306_v61 = vadd.f32 %v4754_v24, %v4491_v5  ;;  %v4494_v58 = vadd.f32 %v11327_v40, %v14174_v15  ;;  %401 = vst.msk [vmem:[#allocation4 + $0x48] sm:$0xff] %vm390_vm5, %v16285_v22  ;;  %402 = vst.msk [vmem:[#allocation4 + $0x50] sm:$0xff] %vm390_vm5, %v16285_v22 }
 0x335   : > { %v14309_v0 = vpop.f32.mrf.mxu1  ;;  %404 = vst.msk [vmem:[#allocation4 + $0x60] sm:$0xff] %vm390_vm5, %v16285_v22  ;;  %405 = vst.msk [vmem:[#allocation4 + $0x68] sm:$0xff] %vm390_vm5, %v16285_v22 }
 0x336   : > { %16283 = vst [vmem:[#allocation37_spill] sm:$0xff] %v14309_v0  ;;  %v14311_v48 = vpop.f32.mrf.mxu0  ;;  %v14313_v3 = vadd.f32 %v11363_v45, %v4494_v58  ;;  %407 = vst.msk [vmem:[#allocation4 + $0x78] sm:$0xff] %vm390_vm5, %v16285_v22 }
 0x337   : > { %16284 = vst [vmem:[#allocation38_spill] sm:$0xff] %v14311_v48  ;;  %v11370_v30 = vpop.f32.mrf.mxu1  ;;  %408 = vst.msk [vmem:[#allocation4 + $0x80] sm:$0xff] %vm390_vm5, %v16285_v22 }
 0x338   : > { %v14315_v27 = vpop.f32.mrf.mxu0  ;;  %v14318_v47 = vadd.f32 %v11370_v30, %v14185_v56  ;;  %410 = vst.msk [vmem:[#allocation4 + $0x90] sm:$0xff] %vm390_vm5, %v16285_v22  ;;  %411 = vst.msk [vmem:[#allocation4 + $0x98] sm:$0xff] %vm390_vm5, %v16285_v22 }
 0x339   : > { %v4948_v17 = vpop.f32.mrf.mxu1  ;;  %413 = vst.msk [vmem:[#allocation4 + $0xa8] sm:$0xff] %vm390_vm5, %v16285_v22  ;;  %414 = vst.msk [vmem:[#allocation4 + $0xb0] sm:$0xff] %vm390_vm5, %v16285_v22 }
 0x33a   : > { %v14320_v44 = vpop.f32.mrf.mxu0  ;;  %416 = vst.msk [vmem:[#allocation4 + $0xc0] sm:$0xff] %vm390_vm5, %v16285_v22  ;;  %417 = vst.msk [vmem:[#allocation4 + $0xc8] sm:$0xff] %vm390_vm5, %v16285_v22  ;;  %v14395_v15 = vadd.f32 %v4948_v17, %v14188_v10 }
 0x33b   : > { %419 = vst.msk [vmem:[#allocation4 + $0xd8] sm:$0xff] %vm390_vm5, %v16285_v22  ;;  %420 = vst.msk [vmem:[#allocation4 + $0xe0] sm:$0xff] %vm390_vm5, %v16285_v22  ;;  %v11371_v56 = vpop.f32.mrf.mxu1 }
 0x33c   : > { %422 = vst.msk [vmem:[#allocation4 + $0xf0] sm:$0xff] %vm390_vm5, %v16285_v22  ;;  %423 = vst.msk [vmem:[#allocation4 + $0xf8] sm:$0xff] %vm390_vm5, %v16285_v22  ;;  %v14397_v51 = vpop.f32.mrf.mxu0  ;;  %v14400_v28 = vadd.f32 %v11371_v56, %v14193_v11  ;;  %v12043_v56 = vld [vmem:[%s16135_s5 + $0x20] sm:$0xff]  }
 0x33d   : > { %425 = vst.msk [vmem:[#allocation4 + $0x108] sm:$0xff] %vm390_vm5, %v16285_v22  ;;  %426 = vst.msk [vmem:[#allocation4 + $0x110] sm:$0xff] %vm390_vm5, %v16285_v22  ;;  %v14402_v7 = vpop.f32.mrf.mxu1  ;;  %11550 = vmatprep.subr.bf16.mxu0 %v12043_v56 }
 0x33e   : > { %428 = vst.msk [vmem:[#allocation4 + $0x120] sm:$0xff] %vm390_vm5, %v16285_v22  ;;  %429 = vst.msk [vmem:[#allocation4 + $0x128] sm:$0xff] %vm390_vm5, %v16285_v22  ;;  %v14404_v39 = vpop.f32.mrf.mxu0  ;;  %11551 = vmatpush3.bf16.msra.mxu0 %v12043_v56 }
 0x33f   : > { %431 = vst.msk [vmem:[#allocation4 + $0x138] sm:$0xff] %vm390_vm5, %v16285_v22  ;;  %432 = vst.msk [vmem:[#allocation4 + $0x140] sm:$0xff] %vm390_vm5, %v16285_v22  ;;  %v11374_v24 = vpop.f32.mrf.mxu1 }
 0x340   : > { %434 = vst.msk [vmem:[#allocation4 + $0x150] sm:$0xff] %vm390_vm5, %v16285_v22  ;;  %435 = vst.msk [vmem:[#allocation4 + $0x158] sm:$0xff] %vm390_vm5, %v16285_v22  ;;  %v14406_v5 = vpop.f32.mrf.mxu0  ;;  %v14409_v40 = vadd.f32 %v11374_v24, %v14201_v55  ;;  %v12044_v55 = vld [vmem:[%s16135_s5 + $0x18] sm:$0xff]  }
 0x341   : > { %437 = vst.msk [vmem:[#allocation4 + $0x168] sm:$0xff] %vm390_vm5, %v16285_v22  ;;  %438 = vst.msk [vmem:[#allocation4 + $0x170] sm:$0xff] %vm390_vm5, %v16285_v22  ;;  %v4964_v45 = vpop.f32.mrf.mxu1  ;;  %11584 = vmatprep.subr.bf16.mxu1 %v12044_v55 }
 0x342   : > { %440 = vst.msk [vmem:[#allocation4 + $0x180] sm:$0xff] %vm390_vm5, %v16285_v22  ;;  %441 = vst.msk [vmem:[#allocation4 + $0x188] sm:$0xff] %vm390_vm5, %v16285_v22  ;;  %v14411_v10 = vpop.f32.mrf.mxu0  ;;  %v14450_v11 = vadd.f32 %v4964_v45, %v14204_v54  ;;  %11585 = vmatpush3.bf16.msra.mxu1 %v12044_v55  ;;  %v12045_v54 = vld [vmem:[%s16135_s5 + $0x10] sm:$0xff]   ;;  %v12046_v55 = vld [vmem:[%s16135_s5 + $0x8] sm:$0xff]  }
 0x343   : > { %443 = vst.msk [vmem:[#allocation4 + $0x198] sm:$0xff] %vm390_vm5, %v16285_v22  ;;  %444 = vst.msk [vmem:[#allocation4 + $0x1a0] sm:$0xff] %vm390_vm5, %v16285_v22  ;;  %v11375_v58 = vpop.f32.mrf.mxu1  ;;  %11586 = vmatprep.subr.bf16.mxu1 %v12045_v54 }
 0x344   : > { %400 = vst.msk [vmem:[#allocation4 + $0x40] sm:$0x3] %vm393_vm6, %v16285_v22  ;;  %394 = vst.msk [vmem:[#allocation4 + $0x10] sm:$0x3] %vm393_vm6, %v16285_v22  ;;  %v14455_v30 = vpop.f32.mrf.mxu0  ;;  %v14458_v17 = vadd.f32 %v11375_v58, %v14209_v62 }
 0x345   : > { %397 = vst.msk [vmem:[#allocation4 + $0x28] sm:$0x3] %vm393_vm6, %v16285_v22  ;;  %403 = vst.msk [vmem:[#allocation4 + $0x58] sm:$0x3] %vm393_vm6, %v16285_v22  ;;  %v14463_v24 = vpop.f32.mrf.mxu1 }
 0x346   : > { %406 = vst.msk [vmem:[#allocation4 + $0x70] sm:$0x3] %vm393_vm6, %v16285_v22  ;;  %409 = vst.msk [vmem:[#allocation4 + $0x88] sm:$0x3] %vm393_vm6, %v16285_v22  ;;  %11587 = vmatpush3.bf16.msra.mxu1 %v12045_v54 }
 0x347   : > { %412 = vst.msk [vmem:[#allocation4 + $0xa0] sm:$0x3] %vm393_vm6, %v16285_v22  ;;  %415 = vst.msk [vmem:[#allocation4 + $0xb8] sm:$0x3] %vm393_vm6, %v16285_v22  ;;  %v11378_v45 = vpop.f32.mrf.mxu1  ;;  %11588 = vmatprep.subr.bf16.mxu1 %v12046_v55 }
 0x348   : > { %418 = vst.msk [vmem:[#allocation4 + $0xd0] sm:$0x3] %vm393_vm6, %v16285_v22  ;;  %421 = vst.msk [vmem:[#allocation4 + $0xe8] sm:$0x3] %vm393_vm6, %v16285_v22  ;;  %v14473_v62 = vadd.f32 %v11378_v45, %v14217_v41 }
 0x349   : > { %424 = vst.msk [vmem:[#allocation4 + $0x100] sm:$0x3] %vm393_vm6, %v16285_v22  ;;  %427 = vst.msk [vmem:[#allocation4 + $0x118] sm:$0x3] %vm393_vm6, %v16285_v22  ;;  %v4980_v58 = vpop.f32.mrf.mxu1 }
 0x34a   : > { %430 = vst.msk [vmem:[#allocation4 + $0x130] sm:$0x3] %vm393_vm6, %v16285_v22  ;;  %433 = vst.msk [vmem:[#allocation4 + $0x148] sm:$0x3] %vm393_vm6, %v16285_v22  ;;  %v14478_v20 = vadd.f32 %v4980_v58, %v14220_v23  ;;  %11589 = vmatpush3.bf16.msra.mxu1 %v12046_v55  ;;  %v12047_v23 = vld [vmem:[%s16135_s5] sm:$0xff]   ;;  %v6462_v55 = vld [vmem:[#allocation4 + $0x8] sm:$0xff] }
 0x34b   : > { %436 = vst.msk [vmem:[#allocation4 + $0x160] sm:$0x3] %vm393_vm6, %v16285_v22  ;;  %439 = vst.msk [vmem:[#allocation4 + $0x178] sm:$0x3] %vm393_vm6, %v16285_v22  ;;  %v11379_v8 = vpop.f32.mrf.mxu1  ;;  %11590 = vmatprep.subr.bf16.mxu1 %v12047_v23 }
 0x34c   : > { %442 = vst.msk [vmem:[#allocation4 + $0x190] sm:$0x3] %vm393_vm6, %v16285_v22  ;;  %445 = vst.msk [vmem:[#allocation4 + $0x1a8] sm:$0x3] %vm393_vm6, %v16285_v22  ;;  %v14465_v22 = vpop.f32.mrf.mxu0  ;;  %v14486_v56 = vadd.f32 %v11379_v8, %v14225_v38  ;;  %v6518_v38 = vld [vmem:[#allocation4 + $0x9] sm:$0xff] }
 0x34d   : > { %v14488_v41 = vpop.f32.mrf.mxu1 }
 0x34e   : > { %v14470_v48 = vpop.f32.mrf.mxu0  ;;  %16288 = vst [vmem:[#allocation41_spill] sm:$0xff] %v14486_v56  ;;  %16289 = vst [vmem:[#allocation43_spill] sm:$0xff] %v14488_v41  ;;  %11591 = vmatpush3.bf16.msra.mxu1 %v12047_v23 }
 0x34f   : > { %v11382_v54 = vpop.f32.mrf.mxu1 }
 0x350   : > { %v14475_v0 = vpop.f32.mrf.mxu0  ;;  %v14498_v57 = vadd.f32 %v11382_v54, %v14236_v42 }
 0x351   : > { %16286 = vst [vmem:[#allocation40_spill] sm:$0xff] %v14475_v0  ;;  %v4996_v8 = vpop.f32.mrf.mxu1 }
 0x352   : > { %v14483_v33 = vpop.f32.mrf.mxu0  ;;  %16292 = vst [vmem:[#allocation18_spill] sm:$0xff] %v14498_v57  ;;  %v14503_v2 = vadd.f32 %v4996_v8, %v14239_v1 }
 0x353   : > { %16287 = vst [vmem:[#allocation13_spill] sm:$0xff] %v14483_v33  ;;  %v6517_v33 = vld [vmem:[#allocation4 + $0x1] sm:$0xff]  ;;  %v11383_v41 = vpop.f32.mrf.mxu1 }
 0x354   : > { %v14490_v45 = vpop.f32.mrf.mxu0  ;;  %v6549_v4 = vpack.c.bf16 %v6518_v38, %v6517_v33  ;;  %16294 = vst [vmem:[#allocation16_spill] sm:$0xff] %v14503_v2  ;;  %v14509_v42 = vadd.f32 %v11383_v41, %v14244_v59  ;;  %v14515_v33 = vld [vmem:[%s16135_s5 + $0x58] sm:$0xff]  }
 0x355   : > { %16290 = vst [vmem:[#allocation15_spill] sm:$0xff] %v14490_v45  ;;  %v6461_v45 = vld [vmem:[#allocation4] sm:$0xff]  ;;  %16297 = vst [vmem:[#allocation44_spill] sm:$0xff] %v14515_v33  ;;  %v14517_v23 = vpop.f32.mrf.mxu1  ;;  %11624 = vmatprep.subr.bf16.mxu0 %v14515_v33 }
 0x356   : > { %v14495_v58 = vpop.f32.mrf.mxu0  ;;  %v6493_v31 = vpack.c.bf16 %v6462_v55, %v6461_v45  ;;  %11552 = vmatprep.mubr.msk.bf16.mxu0 %vm390_vm5, %v6549_v4  ;;  %16296 = vst [vmem:[#allocation22_spill] sm:$0xff] %v14509_v42 }
 0x357   : > { %16291 = vst [vmem:[#allocation45_spill] sm:$0xff] %v14495_v58  ;;  %v11386_v45 = vpop.f32.mrf.mxu1 }
 0x358   : > { %v14500_v56 = vpop.f32.mrf.mxu0  ;;  %11592 = vmatprep.mubr.msk.bf16.mxu1 %vm390_vm5, %v6493_v31  ;;  %v14525_v4 = vadd.f32 %v11386_v45, %v14252_v9 }
 0x359   : > { %16293 = vst [vmem:[#allocation42_spill] sm:$0xff] %v14500_v56  ;;  %v5012_v59 = vpop.f32.mrf.mxu1 }
 0x35a   : > { %v14505_v0 = vpop.f32.mrf.mxu0  ;;  %16300 = vst [vmem:[#allocation35_spill] sm:$0xff] %v14525_v4  ;;  %v14530_v31 = vadd.f32 %v5012_v59, %v14255_v18 }
 0x35b   : > { %16295 = vst [vmem:[#allocation47_spill] sm:$0xff] %v14505_v0  ;;  %v11387_v38 = vpop.f32.mrf.mxu1 }
 0x35c   : > { %v14519_v1 = vpop.f32.mrf.mxu0  ;;  %16302 = vst [vmem:[#allocation19_spill] sm:$0xff] %v14530_v31  ;;  %v14535_v55 = vadd.f32 %v11387_v38, %v14262_v50 }
 0x35d   : > { %16298 = vst [vmem:[#allocation46_spill] sm:$0xff] %v14519_v1  ;;  %v14537_v1 = vpop.f32.mrf.mxu1 }
 0x35e   : > { %v14522_v54 = vpop.f32.mrf.mxu0  ;;  %16304 = vst [vmem:[#allocation51_spill] sm:$0xff] %v14535_v55  ;;  %16305 = vst [vmem:[#allocation50_spill] sm:$0xff] %v14537_v1 }
 0x35f   : > { %16299 = vst [vmem:[#allocation14_spill] sm:$0xff] %v14522_v54  ;;  %v11390_v54 = vpop.f32.mrf.mxu1 }
 0x360   : > { %v14527_v41 = vpop.f32.mrf.mxu0  ;;  %v14544_v9 = vadd.f32 %v11390_v54, %v14270_v37 }
 0x361   : > { %16301 = vst [vmem:[#allocation48_spill] sm:$0xff] %v14527_v41  ;;  %v5028_v45 = vpop.f32.mrf.mxu1 }
 0x362   : > { %v14532_v8 = vpop.f32.mrf.mxu0  ;;  %16308 = vst [vmem:[#allocation21_spill] sm:$0xff] %v14544_v9  ;;  %v14549_v18 = vadd.f32 %v5028_v45, %v14273_v35 }
 0x363   : > { %16303 = vst [vmem:[#allocation49_spill] sm:$0xff] %v14532_v8  ;;  %v11391_v59 = vpop.f32.mrf.mxu1 }
 0x364   : > { %v14539_v33 = vpop.f32.mrf.mxu0  ;;  %16310 = vst [vmem:[#allocation10_spill] sm:$0xff] %v14549_v18  ;;  %v14554_v50 = vadd.f32 %v11391_v59, %v14280_v43 }
 0x365   : > { %16306 = vst [vmem:[#allocation20_spill] sm:$0xff] %v14539_v33  ;;  %v14556_v38 = vpop.f32.mrf.mxu1 }
 0x366   : > { %v14541_v0 = vpop.f32.mrf.mxu0  ;;  %16312 = vst [vmem:[#allocation27_spill] sm:$0xff] %v14554_v50  ;;  %16313 = vst [vmem:[#allocation52_spill] sm:$0xff] %v14556_v38 }
 0x367   : > { %16307 = vst [vmem:[#allocation53_spill] sm:$0xff] %v14541_v0  ;;  %v11394_v0 = vpop.f32.mrf.mxu1 }
 0x368   : > { %v14546_v41 = vpop.f32.mrf.mxu0  ;;  %v14563_v37 = vadd.f32 %v11394_v0, %v14286_v32 }
 0x369   : > { %16309 = vst [vmem:[#allocation55_spill] sm:$0xff] %v14546_v41  ;;  %v5044_v54 = vpop.f32.mrf.mxu1 }
 0x36a   : > { %v14551_v8 = vpop.f32.mrf.mxu0  ;;  %16316 = vst [vmem:[#allocation24_spill] sm:$0xff] %v14563_v37  ;;  %v14568_v35 = vadd.f32 %v5044_v54, %v14289_v26 }
 0x36b   : > { %16311 = vst [vmem:[#allocation23_spill] sm:$0xff] %v14551_v8  ;;  %v11395_v45 = vpop.f32.mrf.mxu1 }
 0x36c   : > { %v14558_v33 = vpop.f32.mrf.mxu0  ;;  %16318 = vst [vmem:[#allocation59_spill] sm:$0xff] %v14568_v35  ;;  %v14573_v43 = vadd.f32 %v11395_v45, %v14296_v52 }
 0x36d   : > { %16314 = vst [vmem:[#allocation54_spill] sm:$0xff] %v14558_v33  ;;  %v14575_v59 = vpop.f32.mrf.mxu1 }
 0x36e   : > { %v14560_v55 = vpop.f32.mrf.mxu0  ;;  %16320 = vst [vmem:[#allocation25_spill] sm:$0xff] %v14573_v43  ;;  %16321 = vst [vmem:[#allocation61_spill] sm:$0xff] %v14575_v59 }
 0x36f   : > { %16315 = vst [vmem:[#allocation56_spill] sm:$0xff] %v14560_v55  ;;  %v11398_v55 = vpop.f32.mrf.mxu1 }
 0x370   : > { %v14565_v41 = vpop.f32.mrf.mxu0  ;;  %v14582_v32 = vadd.f32 %v11398_v55, %v14303_v14 }
 0x371   : > { %16317 = vst [vmem:[#allocation57_spill] sm:$0xff] %v14565_v41  ;;  %v5060_v0 = vpop.f32.mrf.mxu1 }
 0x372   : > { %v14570_v8 = vpop.f32.mrf.mxu0  ;;  %16324 = vst [vmem:[#allocation32_spill] sm:$0xff] %v14582_v32  ;;  %v14587_v26 = vadd.f32 %v5060_v0, %v14306_v61  ;;  %v14605_v0 = vld [vmem:[%s16135_s5 + $0x78] sm:$0xff]  }
 0x373   : > { %16319 = vst [vmem:[#allocation58_spill] sm:$0xff] %v14570_v8  ;;  %v11399_v54 = vpop.f32.mrf.mxu1  ;;  %16331 = vst [vmem:[#allocation30_spill] sm:$0xff] %v14605_v0  ;;  %11664 = vmatprep.subr.bf16.mxu1 %v14605_v0 }
 0x374   : > { %v14577_v33 = vpop.f32.mrf.mxu0  ;;  %16326 = vst [vmem:[#allocation62_spill] sm:$0xff] %v14587_v26  ;;  %v14592_v52 = vadd.f32 %v11399_v54, %v14313_v3 }
 0x375   : > { %16322 = vst [vmem:[#allocation26_spill] sm:$0xff] %v14577_v33  ;;  %v14594_v45 = vpop.f32.mrf.mxu1 }
 0x376   : > { %v14579_v50 = vpop.f32.mrf.mxu0  ;;  %16328 = vst [vmem:[#allocation29_spill] sm:$0xff] %v14592_v52  ;;  %16329 = vst [vmem:[#allocation64_spill] sm:$0xff] %v14594_v45 }
 0x377   : > { %16323 = vst [vmem:[#allocation28_spill] sm:$0xff] %v14579_v50  ;;  %v11442_v50 = vpop.f32.mrf.mxu1 }
 0x378   : > { %v14584_v41 = vpop.f32.mrf.mxu0 }
 0x379   : > { %16325 = vst [vmem:[#allocation60_spill] sm:$0xff] %v14584_v41  ;;  %v5561_v14 = vpop.f32.mrf.mxu1 }
 0x37a   : > { %v14589_v8 = vpop.f32.mrf.mxu0 }
 0x37b   : > { %16327 = vst [vmem:[#allocation63_spill] sm:$0xff] %v14589_v8  ;;  %v11443_v32 = vpop.f32.mrf.mxu1 }
 0x37c   : > { %v14596_v33 = vpop.f32.mrf.mxu0 }
 0x37d   : > { %16330 = vst [vmem:[#allocation65_spill] sm:$0xff] %v14596_v33  ;;  %v5564_v41 = vpop.f32.mrf.mxu1 }
 0x37e   : > { %v11478_v43 = vpop.f32.mrf.mxu0 }
 0x37f   : > { %v11446_v61 = vpop.f32.mrf.mxu1 }
 0x380   : > { %v14598_v55 = vpop.f32.mrf.mxu0 }
 0x381   : > { %v14607_v3 = vpop.f32.mrf.mxu1 }
 0x382   : > { %v14600_v35 = vpop.f32.mrf.mxu0 }
 0x383   : > { %v14612_v33 = vpop.f32.mrf.mxu1 }
 0x384   : > { %v14610_v54 = vpop.f32.mrf.mxu0 }
 0x385   : > { %v14614_v8 = vpop.f32.mrf.mxu1 }
 0x386   : > { %v14616_v52 = vpop.f32.mrf.mxu0 }
 0x387   : > { %v14618_v26 = vpop.f32.mrf.mxu1 }
 0x388   : > { %v14622_v59 = vpop.f32.mrf.mxu0 }
 0x389   : > { %v14620_v45 = vpop.f32.mrf.mxu1 }
 0x38a   : > { %v14628_v38 = vpop.f32.mrf.mxu0 }
 0x38b   : > { %v14624_v37 = vpop.f32.mrf.mxu1 }
 0x38c   : > { %16332 = vst [vmem:[#allocation67_spill] sm:$0xff] %v14624_v37  ;;  %v14634_v31 = vpop.f32.mrf.mxu0 }
 0x38d   : > { %v14626_v18 = vpop.f32.mrf.mxu1 }
 0x38e   : > { %16333 = vst [vmem:[#allocation31_spill] sm:$0xff] %v14626_v18  ;;  %v14640_v42 = vpop.f32.mrf.mxu0 }
 0x38f   : > { %v14630_v9 = vpop.f32.mrf.mxu1  ;;  %16338 = vst [vmem:[#allocation70_spill] sm:$0xff] %v14640_v42 }
 0x390   : > { %16334 = vst [vmem:[#allocation69_spill] sm:$0xff] %v14630_v9  ;;  %v14646_v58 = vpop.f32.mrf.mxu0 }
 0x391   : > { %v14632_v0 = vpop.f32.mrf.mxu1  ;;  %16341 = vst [vmem:[#allocation72_spill] sm:$0xff] %v14646_v58 }
 0x392   : > { %16335 = vst [vmem:[#allocation33_spill] sm:$0xff] %v14632_v0  ;;  %v14652_v9 = vpop.f32.mrf.mxu0 }
 0x393   : > { %v14636_v1 = vpop.f32.mrf.mxu1  ;;  %16344 = vst [vmem:[#allocation75_spill] sm:$0xff] %v14652_v9 }
 0x394   : > { %16336 = vst [vmem:[#allocation66_spill] sm:$0xff] %v14636_v1  ;;  %v14658_v1 = vpop.f32.mrf.mxu0 }
 0x395   : > { %v14638_v4 = vpop.f32.mrf.mxu1 }
 0x396   : > { %16337 = vst [vmem:[#allocation68_spill] sm:$0xff] %v14638_v4 }
 0x397   : > { %v14642_v56 = vpop.f32.mrf.mxu1 }
 0x398   : > { %16339 = vst [vmem:[#allocation34_spill] sm:$0xff] %v14642_v56  ;;  %v14664_v56 = vpop.f32.mrf.mxu0 }
 0x399   : > { %v14644_v2 = vpop.f32.mrf.mxu1  ;;  %16349 = vst [vmem:[#allocation80_spill] sm:$0xff] %v14664_v56 }
 0x39a   : > { %16340 = vst [vmem:[#allocation71_spill] sm:$0xff] %v14644_v2 }
 0x39b   : > { %v14648_v18 = vpop.f32.mrf.mxu1 }
 0x39c   : > { %16342 = vst [vmem:[#allocation73_spill] sm:$0xff] %v14648_v18  ;;  %v14670_v18 = vpop.f32.mrf.mxu0 }
 0x39d   : > { %v14650_v57 = vpop.f32.mrf.mxu1  ;;  %16352 = vst [vmem:[#allocation83_spill] sm:$0xff] %v14670_v18 }
 0x39e   : > { %16343 = vst [vmem:[#allocation74_spill] sm:$0xff] %v14650_v57 }
 0x39f   : > { %v14654_v0 = vpop.f32.mrf.mxu1 }
 0x3a0   : > { %16345 = vst [vmem:[#allocation76_spill] sm:$0xff] %v14654_v0  ;;  %v14676_v0 = vpop.f32.mrf.mxu0 }
 0x3a1   : > { %v14656_v37 = vpop.f32.mrf.mxu1  ;;  %16355 = vst [vmem:[#allocation86_spill] sm:$0xff] %v14676_v0 }
 0x3a2   : > { %16346 = vst [vmem:[#allocation77_spill] sm:$0xff] %v14656_v37  ;;  %v4770_v37 = vadd.f32 %v14191_v6, %v14196_v63  ;;  %v14689_v18 = vpop.f32.mrf.mxu0  ;;  %v5384_v6 = vadd.f32 %v14397_v51, %v14400_v28  ;;  %v6334_v51 = vld [vmem:[%s16134_s4 + $0x10] sm:$0xff] }
 0x3a3   : > { %v14660_v4 = vpop.f32.mrf.mxu1 }
 0x3a4   : > { %16347 = vst [vmem:[#allocation78_spill] sm:$0xff] %v14660_v4 }
 0x3a5   : > { %v14662_v42 = vpop.f32.mrf.mxu1 }
 0x3a6   : > { %16348 = vst [vmem:[#allocation79_spill] sm:$0xff] %v14662_v42  ;;  %v5383_v42 = vadd.f32 %v14315_v27, %v14318_v47  ;;  %v5691_v47 = vadd.f32 %v11443_v32, %v5384_v6 }
 0x3a7   : > { %v14666_v2 = vpop.f32.mrf.mxu1 }
 0x3a8   : > { %16350 = vst [vmem:[#allocation81_spill] sm:$0xff] %v14666_v2  ;;  %v5076_v2 = vadd.f32 %v14402_v7, %v4770_v37  ;;  %v14698_v7 = vpop.f32.mrf.mxu0  ;;  %v4130_v37 = vadd.f32 %v14128_v21, %v14126_v16  ;;  %v4162_v16 = vadd.f32 %v14164_v19, %v14162_v25  ;;  %v14741_v25 = vadd.f32 %v14178_v46, %v14176_v36 }
 0x3a9   : > { %v14668_v58 = vpop.f32.mrf.mxu1  ;;  %v4778_v19 = vadd.f32 %v14223_v34, %v14228_v49  ;;  %v16357_v34 = vld [vmem:[#allocation40_spill] sm:$0xff] }
 0x3aa   : > { %16351 = vst [vmem:[#allocation82_spill] sm:$0xff] %v14668_v58  ;;  %v5381_v58 = vadd.f32 %v14320_v44, %v14395_v15  ;;  %v4774_v44 = vadd.f32 %v14207_v53, %v14212_v60  ;;  %v5387_v15 = vadd.f32 %v14406_v5, %v14409_v40  ;;  %v6332_v53 = vld [vmem:[%s16134_s4] sm:$0xff]  ;;  %v5385_v60 = vadd.f32 %v14411_v10, %v14450_v11  ;;  %v14715_v40 = vpop.f32.mrf.mxu0 }
 0x3ab   : > { %v14672_v57 = vpop.f32.mrf.mxu1  ;;  %v5997_v5 = vadd.f32 %v14600_v35, %v5691_v47  ;;  %v5389_v49 = vadd.f32 %v16357_v34, %v14478_v20  ;;  %v16360_v20 = vld [vmem:[#allocation8_spill] sm:$0xff] }
 0x3ac   : > { %16353 = vst [vmem:[#allocation84_spill] sm:$0xff] %v14672_v57  ;;  %v5690_v57 = vadd.f32 %v11442_v50, %v5383_v42  ;;  %v5688_v63 = vadd.f32 %v5561_v14, %v5381_v58  ;;  %v6335_v14 = vld [vmem:[%s16134_s4 + $0x18] sm:$0xff]  ;;  %v5692_v10 = vadd.f32 %v14607_v3, %v5385_v60  ;;  %v14736_v6 = vpop.f32.mrf.mxu0 }
 0x3ad   : > { %v14674_v9 = vpop.f32.mrf.mxu1  ;;  %v16363_v60 = vld [vmem:[#allocation13_spill] sm:$0xff] }
 0x3ae   : > { %16354 = vst [vmem:[#allocation85_spill] sm:$0xff] %v14674_v9  ;;  %v5996_v27 = vadd.f32 %v11478_v43, %v5690_v57  ;;  %v5080_v57 = vadd.f32 %v14463_v24, %v4774_v44  ;;  %v5388_v24 = vadd.f32 %v14455_v30, %v14458_v17  ;;  %v5998_v47 = vadd.f32 %v14622_v59, %v5692_v10 }
 0x3af   : > { %v14680_v4 = vpop.f32.mrf.mxu1 }
 0x3b0   : > { %16356 = vst [vmem:[#allocation87_spill] sm:$0xff] %v14680_v4  ;;  %v5382_v4 = vadd.f32 %v14404_v39, %v5076_v2  ;;  %v5994_v2 = vadd.f32 %v14598_v55, %v5688_v63  ;;  %v5694_v39 = vadd.f32 %v11446_v61, %v5387_v15  ;;  %v4146_v61 = vadd.f32 %v14146_v13, %v14144_v29 }
 0x3b1   : > { %v14685_v56 = vpop.f32.mrf.mxu1  ;;  %v5386_v21 = vadd.f32 %v14465_v22, %v5080_v57  ;;  %v5695_v3 = vadd.f32 %v14612_v33, %v5388_v24  ;;  %v5391_v22 = vadd.f32 %v14470_v48, %v14473_v62  ;;  %v4480_v15 = vadd.f32 %v14258_v12, %v4130_v37  ;;  %v16358_v48 = vld [vmem:[#allocation43_spill] sm:$0xff]  ;;  %v16359_v57 = vld [vmem:[#allocation9_spill] sm:$0xff] }
 0x3b2   : > { %v5689_v42 = vadd.f32 %v5564_v41, %v5382_v4  ;;  %v6000_v30 = vadd.f32 %v14616_v52, %v5694_v39  ;;  %v5084_v62 = vadd.f32 %v16358_v48, %v4778_v19  ;;  %v4782_v39 = vadd.f32 %v16360_v20, %v16359_v57  ;;  %v16379_v57 = vld [vmem:[#allocation69_spill] sm:$0xff] }
 0x3b3   : > { %v14691_v9 = vpop.f32.mrf.mxu1  ;;  %v5693_v52 = vadd.f32 %v14614_v8, %v5386_v21  ;;  %v5698_v8 = vadd.f32 %v14618_v26, %v5391_v22  ;;  %v6001_v59 = vadd.f32 %v14628_v38, %v5695_v3  ;;  %v16362_v26 = vld [vmem:[#allocation41_spill] sm:$0xff]  ;;  %v5696_v37 = vadd.f32 %v14620_v45, %v5389_v49 }
 0x3b4   : > { %v5995_v43 = vadd.f32 %v14610_v54, %v5689_v42  ;;  %v6333_v54 = vld [vmem:[%s16134_s4 + $0x8] sm:$0xff]  ;;  %v6339_v38 = vld [vmem:[%s16134_s4 + $0x38] sm:$0xff] }
 0x3b5   : > { %v14696_v0 = vpop.f32.mrf.mxu1 }
 0x3b7   : > { %v11514_v50 = vpop.f32.mrf.mxu1 }
 0x3b8   : > { %v6302_v28 = vadd.f32 %v11514_v50, %v5996_v27  ;;  %v6338_v27 = vld [vmem:[%s16134_s4 + $0x30] sm:$0xff]  ;;  %v6336_v50 = vld [vmem:[%s16134_s4 + $0x20] sm:$0xff] }
 0x3b9   : > { %v6173_v58 = vpop.f32.mrf.mxu1 }
 0x3ba   : > { %v6366_v4 = vadd.f32 %v6334_v51, %v6302_v28  ;;  %v6300_v41 = vadd.f32 %v6173_v58, %v5994_v2  ;;  %v14762_v51 = vpop.f32.mrf.mxu0  ;;  %v16361_v58 = vld [vmem:[#allocation11_spill] sm:$0xff] }
 0x3bb   : > { %v11515_v32 = vpop.f32.mrf.mxu1 }
 0x3bc   : > { %v6398_v11 = vmax.f32 %v6366_v4, 0.0  ;;  %v6364_v35 = vadd.f32 %v6332_v53, %v6300_v41  ;;  %v6303_v55 = vadd.f32 %v11515_v32, %v5997_v5  ;;  %v4484_v53 = vadd.f32 %v16361_v58, %v4146_v61  ;;  %v16366_v61 = vld [vmem:[#allocation70_spill] sm:$0xff] }
 0x3bd   : > { %v6176_v17 = vpop.f32.mrf.mxu1  ;;  %v5392_v5 = vadd.f32 %v16363_v60, %v16362_v26  ;;  %v5999_v4 = vadd.f32 %v14634_v31, %v5693_v52  ;;  %v6004_v31 = vadd.f32 %v16366_v61, %v5698_v8  ;;  %v16370_v52 = vld [vmem:[#allocation18_spill] sm:$0xff]  ;;  %v16374_v8 = vld [vmem:[#allocation16_spill] sm:$0xff]  ;;  %v16384_v61 = vld [vmem:[#allocation33_spill] sm:$0xff] }
 0x3be   : > { %6431 = vst.msk [vmem:[#allocation4 + $0x31] sm:$0xff] %vm390_vm5, %v6398_v11  ;;  %v6396_v63 = vmax.f32 %v6364_v35, 0.0  ;;  %v6367_v29 = vadd.f32 %v6335_v14, %v6303_v55  ;;  %v6301_v13 = vadd.f32 %v6176_v17, %v5995_v43  ;;  %v16364_v14 = vld [vmem:[#allocation36_spill] sm:$0xff]  ;;  %v16365_v11 = vld [vmem:[#allocation15_spill] sm:$0xff]  ;;  %v5088_v55 = vadd.f32 %v14517_v23, %v4782_v39  ;;  %v6340_v58 = vld [vmem:[%s16134_s4 + $0x40] sm:$0xff] }
 0x3bf   : > { %v11518_v33 = vpop.f32.mrf.mxu1  ;;  %v4786_v10 = vadd.f32 %v16364_v14, %v4480_v15  ;;  %v5390_v35 = vadd.f32 %v16365_v11, %v5084_v62  ;;  %v16367_v17 = vld [vmem:[#allocation67_spill] sm:$0xff]  ;;  %v16369_v23 = vld [vmem:[#allocation12_spill] sm:$0xff]  ;;  %v16383_v11 = vld [vmem:[#allocation50_spill] sm:$0xff] }
 0x3c0   : > { %6429 = vst.msk [vmem:[#allocation4 + $0x19] sm:$0xff] %vm390_vm5, %v6396_v63  ;;  %v6399_v44 = vmax.f32 %v6367_v29, 0.0  ;;  %v6365_v36 = vadd.f32 %v6333_v54, %v6301_v13  ;;  %v6306_v46 = vadd.f32 %v11518_v33, %v6000_v30  ;;  %v6337_v30 = vld [vmem:[%s16134_s4 + $0x28] sm:$0xff]  ;;  %v5699_v45 = vadd.f32 %v16367_v17, %v5392_v5  ;;  %v14784_v54 = vpop.f32.mrf.mxu0  ;;  %v16371_v33 = vld [vmem:[#allocation45_spill] sm:$0xff]  ;;  %v16373_v15 = vld [vmem:[#allocation72_spill] sm:$0xff] }
 0x3c1   : > { %v6189_v42 = vpop.f32.mrf.mxu1  ;;  %v16368_v13 = vld [vmem:[#allocation39_spill] sm:$0xff]  ;;  %v4488_v22 = vadd.f32 %v16369_v23, %v4162_v16  ;;  %v6002_v34 = vadd.f32 %v16373_v15, %v5696_v37 }
 0x3c2   : > { %6432 = vst.msk [vmem:[#allocation4 + $0x39] sm:$0xff] %vm390_vm5, %v6399_v44  ;;  %v6397_v2 = vmax.f32 %v6365_v36, 0.0  ;;  %v6370_v12 = vadd.f32 %v6338_v27, %v6306_v46  ;;  %v6304_v28 = vadd.f32 %v6189_v42, %v5998_v47  ;;  %v14788_v19 = vadd.f32 %v16368_v13, %v4484_v53  ;;  %v16372_v47 = vld [vmem:[#allocation31_spill] sm:$0xff]  ;;  %v6342_v46 = vld [vmem:[%s16134_s4 + $0x50] sm:$0xff]  ;;  %v16375_v42 = vld [vmem:[#allocation42_spill] sm:$0xff]  ;;  %v14809_v60 = vpop.f32.mrf.mxu0 }
 0x3c3   : > { %v11519_v41 = vpop.f32.mrf.mxu1  ;;  %v5395_v27 = vadd.f32 %v16371_v33, %v16370_v52  ;;  %v5697_v44 = vadd.f32 %v16372_v47, %v5390_v35  ;;  %v5393_v16 = vadd.f32 %v16375_v42, %v16374_v8  ;;  %v16380_v53 = vld [vmem:[#allocation75_spill] sm:$0xff]  ;;  %v5092_v35 = vadd.f32 %v16383_v11, %v4786_v10  ;;  %v16385_v33 = vld [vmem:[#allocation80_spill] sm:$0xff]  ;;  %v16386_v10 = vld [vmem:[#allocation66_spill] sm:$0xff] }
 0x3c4   : > { %6430 = vst.msk [vmem:[#allocation4 + $0x21] sm:$0xff] %vm390_vm5, %v6397_v2  ;;  %v6402_v24 = vmax.f32 %v6370_v12, 0.0  ;;  %v6368_v43 = vadd.f32 %v6336_v50, %v6304_v28  ;;  %v6307_v32 = vadd.f32 %v11519_v41, %v6001_v59  ;;  %v16376_v50 = vld [vmem:[#allocation22_spill] sm:$0xff]  ;;  %v16377_v59 = vld [vmem:[#allocation47_spill] sm:$0xff]  ;;  %v6005_v26 = vadd.f32 %v16380_v53, %v5699_v45 }
 0x3c5   : > { %v6192_v21 = vpop.f32.mrf.mxu1  ;;  %v5396_v2 = vadd.f32 %v16377_v59, %v16376_v50  ;;  %v16378_v12 = vld [vmem:[#allocation46_spill] sm:$0xff]  ;;  %v5702_v20 = vadd.f32 %v16379_v57, %v5395_v27  ;;  %v6521_v52 = vld [vmem:[#allocation4 + $0x31] sm:$0xff]  ;;  %v16390_v53 = vld [vmem:[#allocation83_spill] sm:$0xff] }
 0x3c6   : > { %6435 = vst.msk [vmem:[#allocation4 + $0x61] sm:$0xff] %vm390_vm5, %v6402_v24  ;;  %v6400_v3 = vmax.f32 %v6368_v43, 0.0  ;;  %v6371_v63 = vadd.f32 %v6339_v38, %v6307_v32  ;;  %v6305_v29 = vadd.f32 %v6192_v21, %v5999_v4  ;;  %v5394_v28 = vadd.f32 %v16378_v12, %v5088_v55  ;;  %v6343_v38 = vld [vmem:[%s16134_s4 + $0x58] sm:$0xff]  ;;  %v16381_v43 = vld [vmem:[#allocation35_spill] sm:$0xff]  ;;  %v16382_v32 = vld [vmem:[#allocation14_spill] sm:$0xff] }
 0x3c7   : > { %v11522_v36 = vpop.f32.mrf.mxu1  ;;  %v6519_v37 = vld [vmem:[#allocation4 + $0x19] sm:$0xff]  ;;  %v5399_v14 = vadd.f32 %v16382_v32, %v16381_v43  ;;  %v6003_v55 = vadd.f32 %v14658_v1, %v5697_v44  ;;  %v6008_v27 = vadd.f32 %v16385_v33, %v5702_v20  ;;  %v5703_v47 = vadd.f32 %v16386_v10, %v5396_v2  ;;  %v6341_v44 = vld [vmem:[%s16134_s4 + $0x48] sm:$0xff]  ;;  %v6465_v15 = vld [vmem:[#allocation4 + $0x30] sm:$0xff] }
 0x3c8   : > { %6433 = vst.msk [vmem:[#allocation4 + $0x49] sm:$0xff] %vm390_vm5, %v6400_v3  ;;  %v6403_v49 = vmax.f32 %v6371_v63, 0.0  ;;  %v6369_v48 = vadd.f32 %v6337_v30, %v6305_v29  ;;  %v6310_v62 = vadd.f32 %v11522_v36, %v6004_v31  ;;  %v5700_v31 = vadd.f32 %v16384_v61, %v5393_v16  ;;  %v6463_v23 = vld [vmem:[#allocation4 + $0x18] sm:$0xff]  ;;  %v12053_v16 = vld [vmem:[%s16135_s5 + $0x70] sm:$0xff]   ;;  %v16389_v57 = vld [vmem:[#allocation34_spill] sm:$0xff] }
 0x3c9   : > { %v6205_v39 = vpop.f32.mrf.mxu1  ;;  %v6522_v24 = vld [vmem:[#allocation4 + $0x39] sm:$0xff]  ;;  %v16388_v2 = vld [vmem:[#allocation68_spill] sm:$0xff]  ;;  %v5706_v20 = vadd.f32 %v16389_v57, %v5399_v14  ;;  %v12054_v33 = vld [vmem:[%s16135_s5 + $0x68] sm:$0xff]  }
 0x3ca   : > { %6436 = vst.msk [vmem:[#allocation4 + $0x69] sm:$0xff] %vm390_vm5, %v6403_v49  ;;  %v6401_v5 = vmax.f32 %v6369_v48, 0.0  ;;  %v6374_v4 = vadd.f32 %v6342_v46, %v6310_v62  ;;  %v6308_v41 = vadd.f32 %v6205_v39, %v6002_v34  ;;  %v6466_v45 = vld [vmem:[#allocation4 + $0x38] sm:$0xff]  ;;  %v14830_v46 = vpack.c.bf16 %v6522_v24, %v6521_v52  ;;  %v12049_v34 = vld [vmem:[%s16135_s5 + $0x50] sm:$0xff]   ;;  %v14835_v49 = vpop.f32.mrf.mxu0  ;;  %v16394_v24 = vld [vmem:[#allocation51_spill] sm:$0xff] }
 0x3cb   : > { %v11523_v21 = vpop.f32.mrf.mxu1  ;;  %v6520_v30 = vld [vmem:[#allocation4 + $0x21] sm:$0xff]  ;;  %v14840_v42 = vpack.c.bf16 %v6466_v45, %v6465_v15  ;;  %v16387_v50 = vld [vmem:[#allocation17_spill] sm:$0xff]  ;;  %v5701_v12 = vadd.f32 %v16388_v2, %v5394_v28  ;;  %v16396_v14 = vld [vmem:[#allocation20_spill] sm:$0xff] }
 0x3cc   : > { %v6464_v17 = vld [vmem:[#allocation4 + $0x20] sm:$0xff]  ;;  %6434 = vst.msk [vmem:[#allocation4 + $0x51] sm:$0xff] %vm390_vm5, %v6401_v5  ;;  %v6406_v3 = vmax.f32 %v6374_v4, 0.0  ;;  %v6372_v63 = vadd.f32 %v6340_v58, %v6308_v41  ;;  %v6311_v29 = vadd.f32 %v11523_v21, %v6005_v26  ;;  %v14821_v13 = vpack.c.bf16 %v6520_v30, %v6519_v37  ;;  %v6346_v58 = vld [vmem:[%s16134_s4 + $0x70] sm:$0xff]  ;;  %v16392_v41 = vld [vmem:[#allocation19_spill] sm:$0xff] }
 0x3cd   : > { %v6208_v1 = vpop.f32.mrf.mxu1  ;;  %v14828_v36 = vpack.c.bf16 %v6464_v17, %v6463_v23  ;;  %v14846_v59 = vadd.f32 %v16387_v50, %v4488_v22  ;;  %v6006_v26 = vadd.f32 %v16390_v53, %v5700_v31  ;;  %v16391_v4 = vld [vmem:[#allocation44_spill] sm:$0xff]  ;;  %v16395_v43 = vld [vmem:[#allocation49_spill] sm:$0xff]  ;;  %v5398_v11 = vadd.f32 %v16396_v14, %v5092_v35  ;;  %v6344_v61 = vld [vmem:[%s16134_s4 + $0x60] sm:$0xff] }
 0x3ce   : > { %6439 = vst.msk [vmem:[#allocation4 + $0x91] sm:$0xff] %vm390_vm5, %v6406_v3  ;;  %v6404_v48 = vmax.f32 %v6372_v63, 0.0  ;;  %v6375_v62 = vadd.f32 %v6343_v38, %v6311_v29  ;;  %v6309_v8 = vadd.f32 %v6208_v1, %v6003_v55  ;;  %11553 = vmatmul.mubr.msk.bf16.vlgmr.msra.gmra.mxu0 %vm390_vm5, %v14821_v13  ;;  %v16393_v38 = vld [vmem:[#allocation48_spill] sm:$0xff]  ;;  %v5400_v32 = vadd.f32 %v16395_v43, %v16394_v24  ;;  %v6347_v31 = vld [vmem:[%s16134_s4 + $0x78] sm:$0xff]  ;;  %v12050_v21 = vld [vmem:[%s16135_s5 + $0x48] sm:$0xff]   ;;  %v14878_v3 = vpop.f32.mrf.mxu0 }
 0x3cf   : > { %11593 = vmatmul.mubr.msk.bf16.vlgmr.msra.gmra.mxu1 %vm390_vm5, %v14828_v36  ;;  %v11526_v39 = vpop.f32.mrf.mxu1  ;;  %11556 = vmatprep.mubr.msk.bf16.mxu0 %vm390_vm5, %v14830_v46  ;;  %v5397_v37 = vadd.f32 %v16393_v38, %v16392_v41  ;;  %v16397_v30 = vld [vmem:[#allocation30_spill] sm:$0xff]  ;;  %v6523_v23 = vld [vmem:[#allocation4 + $0x49] sm:$0xff]  ;;  %v16400_v10 = vld [vmem:[#allocation53_spill] sm:$0xff] }
 0x3d0   : > { %6437 = vst.msk [vmem:[#allocation4 + $0x79] sm:$0xff] %vm390_vm5, %v6404_v48  ;;  %v6407_v22 = vmax.f32 %v6375_v62, 0.0  ;;  %v6373_v5 = vadd.f32 %v6341_v44, %v6309_v8  ;;  %v6314_v28 = vadd.f32 %v11526_v39, %v6008_v27  ;;  %11596 = vmatprep.mubr.msk.bf16.mxu1 %vm390_vm5, %v14840_v42  ;;  %11625 = vmatpush3.bf16.msra.mxu0 %v16391_v4  ;;  %v16398_v17 = vld [vmem:[#allocation86_spill] sm:$0xff]  ;;  %v16399_v27 = vld [vmem:[#allocation21_spill] sm:$0xff]  ;;  %v16401_v15 = vld [vmem:[#allocation71_spill] sm:$0xff]  ;;  %v14903_v38 = vpop.f32.mrf.mxu0 }
 0x3d1   : > { %v6221_v55 = vpop.f32.mrf.mxu1  ;;  %11626 = vmatprep.subr.bf16.mxu0 %v12049_v34  ;;  %11665 = vmatpush3.bf16.msra.mxu1 %v16397_v30  ;;  %v6009_v45 = vadd.f32 %v16398_v17, %v5703_v47  ;;  %v6526_v52 = vld [vmem:[#allocation4 + $0x69] sm:$0xff]  ;;  %v5403_v1 = vadd.f32 %v16400_v10, %v16399_v27  ;;  %v6007_v44 = vadd.f32 %v14689_v18, %v5701_v12  ;;  %v6469_v4 = vld [vmem:[#allocation4 + $0x60] sm:$0xff] }
 0x3d2   : > { %6440 = vst.msk [vmem:[#allocation4 + $0x99] sm:$0xff] %vm390_vm5, %v6407_v22  ;;  %v6405_v35 = vmax.f32 %v6373_v5, 0.0  ;;  %v6378_v63 = vadd.f32 %v6346_v58, %v6314_v28  ;;  %v6312_v29 = vadd.f32 %v6221_v55, %v6006_v26  ;;  %11666 = vmatprep.subr.bf16.mxu1 %v12053_v16  ;;  %v6012_v47 = vadd.f32 %v14698_v7, %v5706_v20  ;;  %v6470_v2 = vld [vmem:[#allocation4 + $0x68] sm:$0xff]  ;;  %v16402_v5 = vld [vmem:[#allocation73_spill] sm:$0xff]  ;;  %v12051_v41 = vld [vmem:[%s16135_s5 + $0x40] sm:$0xff]  }
 0x3d3   : > { %v5704_v48 = vadd.f32 %v16401_v15, %v5397_v37  ;;  %v11527_v62 = vpop.f32.mrf.mxu1  ;;  %v6524_v8 = vld [vmem:[#allocation4 + $0x51] sm:$0xff]  ;;  %v6467_v26 = vld [vmem:[#allocation4 + $0x48] sm:$0xff]  ;;  %v5707_v18 = vadd.f32 %v16402_v5, %v5400_v32  ;;  %v14908_v43 = vpack.c.bf16 %v6470_v2, %v6469_v4  ;;  %v12055_v32 = vld [vmem:[%s16135_s5 + $0x60] sm:$0xff]  }
 0x3d4   : > { %v6468_v50 = vld [vmem:[#allocation4 + $0x50] sm:$0xff]  ;;  %6438 = vst.msk [vmem:[#allocation4 + $0x81] sm:$0xff] %vm390_vm5, %v6405_v35  ;;  %v6410_v57 = vmax.f32 %v6378_v63, 0.0  ;;  %v6376_v39 = vadd.f32 %v6344_v61, %v6312_v29  ;;  %v6315_v58 = vadd.f32 %v11527_v62, %v6009_v45  ;;  %v14890_v53 = vpack.c.bf16 %v6524_v8, %v6523_v23  ;;  %v6525_v22 = vld [vmem:[#allocation4 + $0x61] sm:$0xff]  ;;  %11627 = vmatpush3.bf16.msra.mxu0 %v12049_v34  ;;  %v16406_v29 = vld [vmem:[#allocation37_spill] sm:$0xff]  ;;  %v14948_v62 = vpop.f32.mrf.mxu0 }
 0x3d5   : > { %v6224_v12 = vpop.f32.mrf.mxu1  ;;  %v6345_v7 = vld [vmem:[%s16134_s4 + $0x68] sm:$0xff]  ;;  %v14896_v20 = vpack.c.bf16 %v6468_v50, %v6467_v26  ;;  %v14898_v28 = vpack.c.bf16 %v6526_v52, %v6525_v22  ;;  %11628 = vmatprep.subr.bf16.mxu0 %v12050_v21  ;;  %11667 = vmatpush3.bf16.msra.mxu1 %v12053_v16  ;;  %v16403_v14 = vld [vmem:[#allocation52_spill] sm:$0xff]  ;;  %v16404_v55 = vld [vmem:[#allocation74_spill] sm:$0xff]  ;;  %v6010_v35 = vadd.f32 %v14715_v40, %v5704_v48 }
 0x3d6   : > { %6443 = vst.msk [vmem:[#allocation4 + $0xc1] sm:$0xff] %vm390_vm5, %v6410_v57  ;;  %v6408_v34 = vmax.f32 %v6376_v39, 0.0  ;;  %v6379_v37 = vadd.f32 %v6347_v31, %v6315_v58  ;;  %v6313_v24 = vadd.f32 %v6224_v12, %v6007_v44  ;;  %11557 = vmatmul.mubr.msk.bf16.gmra.mxu0 %vm390_vm5, %v14890_v53  ;;  %11668 = vmatprep.subr.bf16.mxu1 %v12054_v33  ;;  %v16405_v30 = vld [vmem:[#allocation76_spill] sm:$0xff]  ;;  %v16407_v52 = vld [vmem:[#allocation10_spill] sm:$0xff]  ;;  %v16408_v27 = vld [vmem:[#allocation55_spill] sm:$0xff] }
 0x3d7   : > { %v5096_v16 = vadd.f32 %v16403_v14, %v14788_v19  ;;  %v5705_v61 = vadd.f32 %v16404_v55, %v5398_v11  ;;  %v5710_v17 = vadd.f32 %v16405_v30, %v5403_v1  ;;  %11597 = vmatmul.mubr.msk.bf16.gmra.mxu1 %vm390_vm5, %v14896_v20  ;;  %v11530_v31 = vpop.f32.mrf.mxu1  ;;  %v6350_v45 = vld [vmem:[%s16134_s4 + $0x90] sm:$0xff]  ;;  %11560 = vmatprep.mubr.msk.bf16.mxu0 %vm390_vm5, %v14898_v28  ;;  %v16409_v1 = vld [vmem:[#allocation27_spill] sm:$0xff]  ;;  %v6348_v48 = vld [vmem:[%s16134_s4 + $0x80] sm:$0xff] }
 0x3d8   : > { %6441 = vst.msk [vmem:[#allocation4 + $0xa9] sm:$0xff] %vm390_vm5, %v6408_v34  ;;  %v6411_v19 = vmax.f32 %v6379_v37, 0.0  ;;  %v6377_v63 = vadd.f32 %v6345_v7, %v6313_v24  ;;  %v6318_v11 = vadd.f32 %v11530_v31, %v6012_v47  ;;  %11600 = vmatprep.mubr.msk.bf16.mxu1 %vm390_vm5, %v14908_v43  ;;  %11629 = vmatpush3.bf16.msra.mxu0 %v12050_v21  ;;  %v16410_v44 = vld [vmem:[#allocation23_spill] sm:$0xff]  ;;  %v6351_v47 = vld [vmem:[%s16134_s4 + $0x98] sm:$0xff]  ;;  %v16411_v58 = vld [vmem:[#allocation54_spill] sm:$0xff] }
 0x3d9   : > { %v14930_v23 = vadd.f32 %v16406_v29, %v14741_v25  ;;  %v5401_v10 = vadd.f32 %v16408_v27, %v16407_v52  ;;  %v5404_v15 = vadd.f32 %v16410_v44, %v16409_v1  ;;  %v6237_v40 = vpop.f32.mrf.mxu1  ;;  %11630 = vmatprep.subr.bf16.mxu0 %v12051_v41  ;;  %11669 = vmatpush3.bf16.msra.mxu1 %v12054_v33  ;;  %v14945_v25 = vld [vmem:[%s16135_s5 + $0x98] sm:$0xff]   ;;  %v16414_v52 = vld [vmem:[#allocation24_spill] sm:$0xff]  ;;  %v16417_v44 = vld [vmem:[#allocation79_spill] sm:$0xff] }
 0x3da   : > { %v6013_v21 = vadd.f32 %v14736_v6, %v5707_v18  ;;  %6444 = vst.msk [vmem:[#allocation4 + $0xc9] sm:$0xff] %vm390_vm5, %v6411_v19  ;;  %v6409_v8 = vmax.f32 %v6377_v63, 0.0  ;;  %v6382_v50 = vadd.f32 %v6350_v45, %v6318_v11  ;;  %v6316_v2 = vadd.f32 %v6237_v40, %v6010_v35  ;;  %v6527_v57 = vld [vmem:[#allocation4 + $0x79] sm:$0xff]  ;;  %11670 = vmatprep.subr.bf16.mxu1 %v12055_v32  ;;  %v6529_v31 = vld [vmem:[#allocation4 + $0x91] sm:$0xff]  ;;  %v14972_v19 = vpop.f32.mrf.mxu0 }
 0x3db   : > { %v6530_v39 = vld [vmem:[#allocation4 + $0x99] sm:$0xff]  ;;  %v5402_v26 = vadd.f32 %v16411_v58, %v5096_v16  ;;  %v6011_v22 = vadd.f32 %v14762_v51, %v5705_v61  ;;  %v6016_v6 = vadd.f32 %v14784_v54, %v5710_v17  ;;  %v11531_v12 = vpop.f32.mrf.mxu1  ;;  %v6528_v7 = vld [vmem:[#allocation4 + $0x81] sm:$0xff]  ;;  %v6473_v35 = vld [vmem:[#allocation4 + $0x90] sm:$0xff] }
 0x3dc   : > { %v14954_v33 = vld [vmem:[%s16135_s5 + $0xb8] sm:$0xff]   ;;  %v6472_v4 = vld [vmem:[#allocation4 + $0x80] sm:$0xff]  ;;  %6442 = vst.msk [vmem:[#allocation4 + $0xb1] sm:$0xff] %vm390_vm5, %v6409_v8  ;;  %v6414_v37 = vmax.f32 %v6382_v50, 0.0  ;;  %v6380_v24 = vadd.f32 %v6348_v48, %v6316_v2  ;;  %v6319_v14 = vadd.f32 %v11531_v12, %v6013_v21  ;;  %v14961_v55 = vpack.c.bf16 %v6528_v7, %v6527_v57  ;;  %11631 = vmatpush3.bf16.msra.mxu0 %v12051_v41  ;;  %v6349_v54 = vld [vmem:[%s16134_s4 + $0x88] sm:$0xff]  ;;  %v15005_v12 = vpop.f32.mrf.mxu0 }
 0x3dd   : > { %v16412_v5 = vld [vmem:[#allocation77_spill] sm:$0xff]  ;;  %v16413_v16 = vld [vmem:[#allocation78_spill] sm:$0xff]  ;;  %v6240_v61 = vpop.f32.mrf.mxu1  ;;  %v14969_v45 = vpack.c.bf16 %v6530_v39, %v6529_v31  ;;  %11671 = vmatpush3.bf16.msra.mxu1 %v12055_v32  ;;  %11704 = vmatprep.subr.bf16.mxu0 %v14945_v25  ;;  %v16415_v27 = vld [vmem:[#allocation56_spill] sm:$0xff] }
 0x3de   : > { %v5708_v18 = vadd.f32 %v16412_v5, %v5401_v10  ;;  %v6474_v34 = vld [vmem:[#allocation4 + $0x98] sm:$0xff]  ;;  %v5711_v51 = vadd.f32 %v16413_v16, %v5404_v15  ;;  %6447 = vst.msk [vmem:[#allocation4 + $0xf1] sm:$0xff] %vm390_vm5, %v6414_v37  ;;  %v6412_v41 = vmax.f32 %v6380_v24, 0.0  ;;  %v6383_v63 = vadd.f32 %v6351_v47, %v6319_v14  ;;  %11561 = vmatmul.mubr.msk.bf16.gmra.mxu0 %vm390_vm5, %v14961_v55  ;;  %v6354_v48 = vld [vmem:[%s16134_s4 + $0xb0] sm:$0xff]  ;;  %v16418_v50 = vld [vmem:[#allocation38_spill] sm:$0xff] }
 0x3df   : > { %v6471_v30 = vld [vmem:[#allocation4 + $0x78] sm:$0xff]  ;;  %v6317_v11 = vadd.f32 %v6240_v61, %v6011_v22  ;;  %v14977_v29 = vpack.c.bf16 %v6474_v34, %v6473_v35  ;;  %11744 = vmatprep.subr.bf16.mxu1 %v14954_v33  ;;  %v5407_v10 = vadd.f32 %v16415_v27, %v16414_v52  ;;  %v5709_v15 = vadd.f32 %v16417_v44, %v5402_v26  ;;  %v11534_v40 = vpop.f32.mrf.mxu1  ;;  %v16419_v57 = vld [vmem:[#allocation59_spill] sm:$0xff]  ;;  %v16423_v14 = vld [vmem:[#allocation58_spill] sm:$0xff] }
 0x3e0   : > { %v14967_v17 = vpack.c.bf16 %v6472_v4, %v6471_v30  ;;  %v16416_v32 = vld [vmem:[#allocation61_spill] sm:$0xff]  ;;  %11564 = vmatprep.mubr.msk.bf16.mxu0 %vm390_vm5, %v14969_v45  ;;  %v6014_v47 = vadd.f32 %v14809_v60, %v5708_v18  ;;  %6445 = vst.msk [vmem:[#allocation4 + $0xd9] sm:$0xff] %vm390_vm5, %v6412_v41  ;;  %v6415_v21 = vmax.f32 %v6383_v63, 0.0  ;;  %v4798_v2 = vadd.f32 %v16418_v50, %v14930_v23  ;;  %v6352_v60 = vld [vmem:[%s16134_s4 + $0xa0] sm:$0xff]  ;;  %v6531_v34 = vld [vmem:[#allocation4 + $0xa9] sm:$0xff] }
 0x3e1   : > { %v5100_v1 = vadd.f32 %v16416_v32, %v14846_v59  ;;  %v6381_v8 = vadd.f32 %v6349_v54, %v6317_v11  ;;  %v6322_v59 = vadd.f32 %v11534_v40, %v6016_v6  ;;  %v16420_v39 = vld [vmem:[#allocation57_spill] sm:$0xff]  ;;  %v6253_v5 = vpop.f32.mrf.mxu1  ;;  %v6017_v18 = vadd.f32 %v14835_v49, %v5711_v51  ;;  %v6534_v37 = vld [vmem:[#allocation4 + $0xc9] sm:$0xff]  ;;  %v16424_v31 = vld [vmem:[#allocation26_spill] sm:$0xff]  ;;  %v15016_v11 = vpop.f32.mrf.mxu0 }
 0x3e2   : > { %11601 = vmatmul.mubr.msk.bf16.gmra.mxu1 %vm390_vm5, %v14967_v17  ;;  %v5405_v58 = vadd.f32 %v16420_v39, %v16419_v57  ;;  %v16421_v26 = vld [vmem:[#allocation81_spill] sm:$0xff]  ;;  %6448 = vst.msk [vmem:[#allocation4 + $0xf9] sm:$0xff] %vm390_vm5, %v6415_v21  ;;  %v6320_v4 = vadd.f32 %v6253_v5, %v6014_v47  ;;  %v6015_v49 = vadd.f32 %v14878_v3, %v5709_v15  ;;  %v16425_v51 = vld [vmem:[#allocation82_spill] sm:$0xff]  ;;  %v6478_v63 = vld [vmem:[#allocation4 + $0xc8] sm:$0xff] }
 0x3e3   : > { %11604 = vmatprep.mubr.msk.bf16.mxu1 %vm390_vm5, %v14977_v29  ;;  %v5714_v22 = vadd.f32 %v16421_v26, %v5407_v10  ;;  %v6413_v6 = vmax.f32 %v6381_v8, 0.0  ;;  %v6386_v7 = vadd.f32 %v6354_v48, %v6322_v59  ;;  %v6355_v23 = vld [vmem:[%s16134_s4 + $0xb8] sm:$0xff]  ;;  %v5406_v16 = vadd.f32 %v16424_v31, %v5100_v1  ;;  %v11535_v54 = vpop.f32.mrf.mxu1  ;;  %v6476_v41 = vld [vmem:[#allocation4 + $0xb0] sm:$0xff]  ;;  %v6475_v44 = vld [vmem:[#allocation4 + $0xa8] sm:$0xff] }
 0x3e4   : > { %v16422_v24 = vld [vmem:[#allocation25_spill] sm:$0xff]  ;;  %v5712_v61 = vadd.f32 %v16425_v51, %v5405_v58  ;;  %v6384_v27 = vadd.f32 %v6352_v60, %v6320_v4  ;;  %v6323_v10 = vadd.f32 %v11535_v54, %v6017_v18  ;;  %v6533_v40 = vld [vmem:[#allocation4 + $0xc1] sm:$0xff]  ;;  %v16426_v3 = vld [vmem:[#allocation84_spill] sm:$0xff]  ;;  %v15026_v21 = vpack.c.bf16 %v6476_v41, %v6475_v44 }
 0x3e5   : > { %v5408_v30 = vadd.f32 %v16423_v14, %v16422_v24  ;;  %v6532_v35 = vld [vmem:[#allocation4 + $0xb1] sm:$0xff]  ;;  %6446 = vst.msk [vmem:[#allocation4 + $0xe1] sm:$0xff] %vm390_vm5, %v6413_v6  ;;  %v6418_v52 = vmax.f32 %v6386_v7, 0.0  ;;  %v6020_v1 = vadd.f32 %v14903_v38, %v5714_v22  ;;  %v6256_v48 = vpop.f32.mrf.mxu1  ;;  %v6353_v47 = vld [vmem:[%s16134_s4 + $0xa8] sm:$0xff]  ;;  %v15028_v8 = vpack.c.bf16 %v6534_v37, %v6533_v40  ;;  %v6477_v59 = vld [vmem:[#allocation4 + $0xc0] sm:$0xff] }
 0x3e6   : > { %v15019_v32 = vpack.c.bf16 %v6532_v35, %v6531_v34  ;;  %v6416_v50 = vmax.f32 %v6384_v27, 0.0  ;;  %v6387_v57 = vadd.f32 %v6355_v23, %v6323_v10  ;;  %v6321_v39 = vadd.f32 %v6256_v48, %v6015_v49  ;;  %v16427_v58 = vld [vmem:[#allocation32_spill] sm:$0xff]  ;;  %v16430_v18 = vld [vmem:[#allocation85_spill] sm:$0xff]  ;;  %v5979_v34 = vpop.f32.mrf.mxu0  ;;  %v16431_v14 = vld [vmem:[#allocation62_spill] sm:$0xff] }
 0x3e7   : > { %v5715_v15 = vadd.f32 %v16426_v3, %v5408_v30  ;;  %6451 = vst.msk [vmem:[#allocation4 + $0x121] sm:$0xff] %vm390_vm5, %v6418_v52  ;;  %v15033_v38 = vpack.c.bf16 %v6478_v63, %v6477_v59  ;;  %v16428_v26 = vld [vmem:[#allocation28_spill] sm:$0xff]  ;;  %v5713_v6 = vadd.f32 %v16430_v18, %v5406_v16  ;;  %v11538_v7 = vpop.f32.mrf.mxu1  ;;  %v6018_v23 = vadd.f32 %v14948_v62, %v5712_v61  ;;  %v16433_v16 = vld [vmem:[#allocation87_spill] sm:$0xff]  ;;  %v6356_v54 = vld [vmem:[%s16134_s4 + $0xc0] sm:$0xff] }
 0x3e8   : > { %11565 = vmatmul.mubr.msk.bf16.gmra.mxu0 %vm390_vm5, %v15019_v32  ;;  %v5411_v22 = vadd.f32 %v16428_v26, %v16427_v58  ;;  %v16429_v5 = vld [vmem:[#allocation64_spill] sm:$0xff]  ;;  %6449 = vst.msk [vmem:[#allocation4 + $0x109] sm:$0xff] %vm390_vm5, %v6416_v50  ;;  %v6419_v37 = vmax.f32 %v6387_v57, 0.0  ;;  %v6326_v24 = vadd.f32 %v11538_v7, %v6020_v1  ;;  %v6359_v63 = vld [vmem:[%s16134_s4 + $0xd8] sm:$0xff]  ;;  %v16435_v44 = vld [vmem:[#allocation63_spill] sm:$0xff]  ;;  %v11507_v57 = vpop.f32.mrf.mxu0 }
 0x3e9   : > { %v5104_v60 = vadd.f32 %v16429_v5, %v4798_v2  ;;  %v6358_v4 = vld [vmem:[%s16134_s4 + $0xd0] sm:$0xff]  ;;  %11568 = vmatprep.mubr.msk.bf16.mxu0 %vm390_vm5, %v15028_v8  ;;  %v6385_v2 = vadd.f32 %v6353_v47, %v6321_v39  ;;  %v6269_v51 = vpop.f32.mrf.mxu1  ;;  %v6021_v62 = vadd.f32 %v14972_v19, %v5715_v15  ;;  %v6535_v52 = vld [vmem:[#allocation4 + $0xd9] sm:$0xff]  ;;  %v6019_v48 = vadd.f32 %v15005_v12, %v5713_v6 }
 0x3ea   : > { %11605 = vmatmul.mubr.msk.bf16.gmra.mxu1 %vm390_vm5, %v15026_v21  ;;  %v16432_v30 = vld [vmem:[#allocation60_spill] sm:$0xff]  ;;  %v5718_v49 = vadd.f32 %v16433_v16, %v5411_v22  ;;  %6452 = vst.msk [vmem:[#allocation4 + $0x129] sm:$0xff] %vm390_vm5, %v6419_v37  ;;  %v6390_v35 = vadd.f32 %v6358_v4, %v6326_v24  ;;  %v6324_v41 = vadd.f32 %v6269_v51, %v6018_v23  ;;  %v6538_v27 = vld [vmem:[#allocation4 + $0xf9] sm:$0xff]  ;;  %v5982_v16 = vpop.f32.mrf.mxu0 }
 0x3eb   : > { %11608 = vmatprep.mubr.msk.bf16.mxu1 %vm390_vm5, %v15033_v38  ;;  %v5409_v31 = vadd.f32 %v16432_v30, %v16431_v14  ;;  %v6417_v61 = vmax.f32 %v6385_v2, 0.0  ;;  %v16434_v10 = vld [vmem:[#allocation29_spill] sm:$0xff]  ;;  %v11539_v15 = vpop.f32.mrf.mxu1  ;;  %v6481_v23 = vld [vmem:[#allocation4 + $0xf0] sm:$0xff] }
 0x3ec   : > { %v5412_v40 = vadd.f32 %v16435_v44, %v16434_v10  ;;  %v16436_v1 = vld [vmem:[#allocation65_spill] sm:$0xff]  ;;  %v6536_v47 = vld [vmem:[#allocation4 + $0xe1] sm:$0xff]  ;;  %v6422_v39 = vmax.f32 %v6390_v35, 0.0  ;;  %v6388_v58 = vadd.f32 %v6356_v54, %v6324_v41  ;;  %v6327_v26 = vadd.f32 %v11539_v15, %v6021_v62  ;;  %v6362_v30 = vld [vmem:[%s16134_s4 + $0xf0] sm:$0xff] }
 0x3ed   : > { %v5410_v3 = vadd.f32 %v16436_v1, %v5104_v60  ;;  %v5716_v19 = vadd.f32 %v14685_v56, %v5409_v31  ;;  %v6480_v59 = vld [vmem:[#allocation4 + $0xe0] sm:$0xff]  ;;  %v6482_v50 = vld [vmem:[#allocation4 + $0xf8] sm:$0xff]  ;;  %6450 = vst.msk [vmem:[#allocation4 + $0x111] sm:$0xff] %vm390_vm5, %v6417_v61  ;;  %v15067_v22 = vpack.c.bf16 %v6536_v47, %v6535_v52  ;;  %v6024_v60 = vadd.f32 %v15016_v11, %v5718_v49  ;;  %v6272_v6 = vpop.f32.mrf.mxu1  ;;  %v6357_v56 = vld [vmem:[%s16134_s4 + $0xc8] sm:$0xff] }
 0x3ee   : > { %v6479_v5 = vld [vmem:[#allocation4 + $0xd8] sm:$0xff]  ;;  %v5719_v12 = vadd.f32 %v14691_v9, %v5412_v40  ;;  %6455 = vst.msk [vmem:[#allocation4 + $0x151] sm:$0xff] %vm390_vm5, %v6422_v39  ;;  %v6420_v37 = vmax.f32 %v6388_v58, 0.0  ;;  %v6391_v2 = vadd.f32 %v6359_v63, %v6327_v26  ;;  %v6325_v24 = vadd.f32 %v6272_v6, %v6019_v48  ;;  %v6360_v62 = vld [vmem:[%s16134_s4 + $0xe0] sm:$0xff]  ;;  %v6361_v39 = vld [vmem:[%s16134_s4 + $0xe8] sm:$0xff] }
 0x3ef   : > { %v6537_v18 = vld [vmem:[#allocation4 + $0xf1] sm:$0xff]  ;;  %v15074_v7 = vpack.c.bf16 %v6480_v59, %v6479_v5  ;;  %v15081_v11 = vpack.c.bf16 %v6482_v50, %v6481_v23  ;;  %v5717_v9 = vadd.f32 %v14696_v0, %v5410_v3  ;;  %v11542_v14 = vpop.f32.mrf.mxu1  ;;  %v6022_v31 = vadd.f32 %v5979_v34, %v5716_v19  ;;  %v6539_v52 = vld [vmem:[#allocation4 + $0x109] sm:$0xff]  ;;  %v6541_v50 = vld [vmem:[#allocation4 + $0x121] sm:$0xff] }
 0x3f0   : > { %v15076_v4 = vpack.c.bf16 %v6538_v27, %v6537_v18  ;;  %11569 = vmatmul.mubr.msk.bf16.gmra.mxu0 %vm390_vm5, %v15067_v22  ;;  %6453 = vst.msk [vmem:[#allocation4 + $0x139] sm:$0xff] %vm390_vm5, %v6420_v37  ;;  %v6423_v49 = vmax.f32 %v6391_v2, 0.0  ;;  %v6389_v51 = vadd.f32 %v6357_v56, %v6325_v24  ;;  %v6330_v54 = vadd.f32 %v11542_v14, %v6024_v60  ;;  %v6363_v63 = vld [vmem:[%s16134_s4 + $0xf8] sm:$0xff]  ;;  %v6483_v59 = vld [vmem:[#allocation4 + $0x108] sm:$0xff]  ;;  %v6485_v5 = vld [vmem:[#allocation4 + $0x120] sm:$0xff] }
 0x3f1   : > { %v6285_v0 = vpop.f32.mrf.mxu1  ;;  %v6025_v61 = vadd.f32 %v11507_v57, %v5719_v12  ;;  %v6542_v27 = vld [vmem:[#allocation4 + $0x129] sm:$0xff]  ;;  %v6023_v10 = vadd.f32 %v5982_v16, %v5717_v9 }
 0x3f2   : > { %11609 = vmatmul.mubr.msk.bf16.gmra.mxu1 %vm390_vm5, %v15074_v7  ;;  %11572 = vmatprep.mubr.msk.bf16.mxu0 %vm390_vm5, %v15076_v4  ;;  %6456 = vst.msk [vmem:[#allocation4 + $0x159] sm:$0xff] %vm390_vm5, %v6423_v49  ;;  %v6421_v35 = vmax.f32 %v6389_v51, 0.0  ;;  %v6394_v41 = vadd.f32 %v6362_v30, %v6330_v54  ;;  %v6328_v34 = vadd.f32 %v6285_v0, %v6022_v31  ;;  %v6486_v3 = vld [vmem:[#allocation4 + $0x128] sm:$0xff] }
 0x3f3   : > { %11612 = vmatprep.mubr.msk.bf16.mxu1 %vm390_vm5, %v15081_v11  ;;  %v11543_v44 = vpop.f32.mrf.mxu1  ;;  %v15109_v26 = vpack.c.bf16 %v6542_v27, %v6541_v50  ;;  %v15114_v6 = vpack.c.bf16 %v6486_v3, %v6485_v5  ;;  %v7044_v3 = vld [vmem:[#allocation4 + $0x32] sm:$0xff]  ;;  %v7048_v5 = vld [vmem:[#allocation4 + $0x62] sm:$0xff] }
 0x3f4   : > { %v6540_v40 = vld [vmem:[#allocation4 + $0x111] sm:$0xff]  ;;  %6454 = vst.msk [vmem:[#allocation4 + $0x141] sm:$0xff] %vm390_vm5, %v6421_v35  ;;  %v6426_v48 = vmax.f32 %v6394_v41, 0.0  ;;  %v6392_v19 = vadd.f32 %v6360_v62, %v6328_v34  ;;  %v6331_v15 = vadd.f32 %v11543_v44, %v6025_v61  ;;  %v7040_v61 = vld [vmem:[#allocation4 + $0x2] sm:$0xff] }
 0x3f5   : > { %v6484_v1 = vld [vmem:[#allocation4 + $0x110] sm:$0xff]  ;;  %v15102_v47 = vpack.c.bf16 %v6540_v40, %v6539_v52  ;;  %v6288_v57 = vpop.f32.mrf.mxu1  ;;  %v7042_v40 = vld [vmem:[#allocation4 + $0x1a] sm:$0xff] }
 0x3f6   : > { %v15107_v58 = vpack.c.bf16 %v6484_v1, %v6483_v59  ;;  %6459 = vst.msk [vmem:[#allocation4 + $0x181] sm:$0xff] %vm390_vm5, %v6426_v48  ;;  %v6424_v18 = vmax.f32 %v6392_v19, 0.0  ;;  %v6395_v60 = vadd.f32 %v6363_v63, %v6331_v15  ;;  %v6329_v12 = vadd.f32 %v6288_v57, %v6023_v10  ;;  %v6545_v51 = vld [vmem:[#allocation4 + $0x151] sm:$0xff]  ;;  %v7043_v1 = vld [vmem:[#allocation4 + $0x22] sm:$0xff]  ;;  %v7045_v48 = vld [vmem:[#allocation4 + $0x3a] sm:$0xff] }
 0x3f7   : > { %v6543_v2 = vld [vmem:[#allocation4 + $0x139] sm:$0xff]  ;;  %v6489_v0 = vld [vmem:[#allocation4 + $0x150] sm:$0xff]  ;;  %v15152_v19 = vpack.c.bf16 %v7043_v1, %v7042_v40  ;;  %v15154_v15 = vpack.c.bf16 %v7045_v48, %v7044_v3 }
 0x3f8   : > { %11573 = vmatmul.mubr.msk.bf16.gmra.mxu0 %vm390_vm5, %v15102_v47  ;;  %6457 = vst.msk [vmem:[#allocation4 + $0x169] sm:$0xff] %vm390_vm5, %v6424_v18  ;;  %v6427_v56 = vmax.f32 %v6395_v60, 0.0  ;;  %v6393_v23 = vadd.f32 %v6361_v39, %v6329_v12  ;;  %v6487_v24 = vld [vmem:[#allocation4 + $0x138] sm:$0xff]  ;;  %v7041_v35 = vld [vmem:[#allocation4 + $0xa] sm:$0xff] }
 0x3f9   : > { %11576 = vmatprep.mubr.msk.bf16.mxu0 %vm390_vm5, %v15109_v26  ;;  %v6546_v9 = vld [vmem:[#allocation4 + $0x159] sm:$0xff]  ;;  %v7072_v27 = vpack.c.bf16 %v7041_v35, %v7040_v61  ;;  %v12057_v59 = vld [vmem:[%s16135_s5 + $0x90] sm:$0xff]   ;;  %v12058_v39 = vld [vmem:[%s16135_s5 + $0x88] sm:$0xff]  }
 0x3fa   : > { %11613 = vmatmul.mubr.msk.bf16.gmra.mxu1 %vm390_vm5, %v15107_v58  ;;  %6460 = vst.msk [vmem:[#allocation4 + $0x189] sm:$0xff] %vm390_vm5, %v6427_v56  ;;  %v6425_v37 = vmax.f32 %v6393_v23, 0.0  ;;  %v6490_v31 = vld [vmem:[#allocation4 + $0x158] sm:$0xff]  ;;  %v15129_v54 = vpack.c.bf16 %v6546_v9, %v6545_v51  ;;  %v12061_v50 = vld [vmem:[%s16135_s5 + $0xb0] sm:$0xff]   ;;  %v7051_v56 = vld [vmem:[#allocation4 + $0x82] sm:$0xff] }
 0x3fb   : > { %11616 = vmatprep.mubr.msk.bf16.mxu1 %vm390_vm5, %v15114_v6  ;;  %v6544_v14 = vld [vmem:[#allocation4 + $0x141] sm:$0xff]  ;;  %v15133_v62 = vpack.c.bf16 %v6490_v31, %v6489_v0  ;;  %v7047_v57 = vld [vmem:[#allocation4 + $0x52] sm:$0xff]  ;;  %v7049_v18 = vld [vmem:[#allocation4 + $0x6a] sm:$0xff] }
 0x3fc   : > { %v6488_v30 = vld [vmem:[#allocation4 + $0x140] sm:$0xff]  ;;  %6458 = vst.msk [vmem:[#allocation4 + $0x171] sm:$0xff] %vm390_vm5, %v6425_v37  ;;  %v15125_v16 = vpack.c.bf16 %v6544_v14, %v6543_v2  ;;  %v15199_v23 = vld [vmem:[%s16135_s5 + $0xd8] sm:$0xff]   ;;  %v7054_v9 = vld [vmem:[#allocation4 + $0xaa] sm:$0xff] }
 0x3fd   : > { %v15127_v49 = vpack.c.bf16 %v6488_v30, %v6487_v24  ;;  %v7050_v12 = vld [vmem:[#allocation4 + $0x7a] sm:$0xff]  ;;  %v7052_v37 = vld [vmem:[#allocation4 + $0x92] sm:$0xff]  ;;  %v7056_v30 = vld [vmem:[#allocation4 + $0xc2] sm:$0xff] }
 0x3fe   : > { %v7053_v2 = vld [vmem:[#allocation4 + $0x9a] sm:$0xff]  ;;  %v15206_v24 = vpack.c.bf16 %v7051_v56, %v7050_v12  ;;  %v7055_v14 = vld [vmem:[#allocation4 + $0xb2] sm:$0xff]  ;;  %v7057_v31 = vld [vmem:[#allocation4 + $0xca] sm:$0xff] }
 0x3ff   : > { %v6547_v41 = vld [vmem:[#allocation4 + $0x169] sm:$0xff]  ;;  %v15220_v51 = vpack.c.bf16 %v7055_v14, %v7054_v9  ;;  %v15222_v0 = vpack.c.bf16 %v7057_v31, %v7056_v30  ;;  %v7060_v61 = vld [vmem:[#allocation4 + $0xf2] sm:$0xff]  ;;  %v7061_v35 = vld [vmem:[#allocation4 + $0xfa] sm:$0xff] }
 0x400   : > { %11577 = vmatmul.mubr.msk.bf16.gmra.mxu0 %vm390_vm5, %v15125_v16  ;;  %v6491_v63 = vld [vmem:[#allocation4 + $0x168] sm:$0xff]  ;;  %v7068_v1 = vld [vmem:[#allocation4 + $0x152] sm:$0xff]  ;;  %v7069_v3 = vld [vmem:[#allocation4 + $0x15a] sm:$0xff] }
 0x401   : > { %11580 = vmatprep.mubr.msk.bf16.mxu0 %vm390_vm5, %v15129_v54  ;;  %v8333_v12 = vld [vmem:[#allocation4 + $0x60] sm:$0xff] }
 0x402   : > { %11617 = vmatmul.mubr.msk.bf16.gmra.mxu1 %vm390_vm5, %v15127_v49  ;;  %v8336_v31 = vld [vmem:[#allocation4 + $0x80] sm:$0xff] }
 0x403   : > { %11620 = vmatprep.mubr.msk.bf16.mxu1 %vm390_vm5, %v15133_v62  ;;  %v6548_v34 = vld [vmem:[#allocation4 + $0x171] sm:$0xff] }
 0x404   : > { %v6492_v52 = vld [vmem:[#allocation4 + $0x170] sm:$0xff]  ;;  %v15141_v10 = vpack.c.bf16 %v6548_v34, %v6547_v41  ;;  %v15234_v34 = vpack.c.bf16 %v7061_v35, %v7060_v61  ;;  %v8338_v61 = vld [vmem:[#allocation4 + $0x98] sm:$0xff] }
 0x405   : > { %v15143_v44 = vpack.c.bf16 %v6492_v52, %v6491_v63  ;;  %v7064_v63 = vld [vmem:[#allocation4 + $0x122] sm:$0xff]  ;;  %v7065_v52 = vld [vmem:[#allocation4 + $0x12a] sm:$0xff] }
 0x406   : > { %v15246_v40 = vpack.c.bf16 %v7065_v52, %v7064_v63  ;;  %v8657_v52 = vld [vmem:[#allocation4 + $0x79] sm:$0xff] }
 0x408   : > { %11581 = vmatmul.mubr.msk.bf16.gmra.mxu0 %vm390_vm5, %v15141_v10 }
 0x409   : > { %11632 = vmatprep.mubr.msk.bf16.mxu0 %vm390_vm5, %v7072_v27 }
 0x40a   : > { %11621 = vmatmul.mubr.msk.bf16.gmra.mxu1 %vm390_vm5, %v15143_v44 }
 0x40b   : > { %11672 = vmatprep.mubr.msk.bf16.mxu1 %vm390_vm5, %v14828_v36  ;;  %v7046_v36 = vld [vmem:[#allocation4 + $0x4a] sm:$0xff] }
 0x40c   : > { %v15178_v60 = vpack.c.bf16 %v7047_v57, %v7046_v36  ;;  %v7393_v36 = vld [vmem:[#allocation4 + $0x188] sm:$0xff]  ;;  %v7392_v57 = vld [vmem:[#allocation4 + $0x180] sm:$0xff] }
 0x410   : > { %11633 = vmatmul.mubr.msk.bf16.vlgmr.msra.gmra.mxu0 %vm390_vm5, %v15152_v19 }
 0x411   : > { %11636 = vmatprep.mubr.msk.bf16.mxu0 %vm390_vm5, %v15154_v15  ;;  %11705 = vmatpush3.bf16.msra.mxu0 %v14945_v25  ;;  %v12059_v25 = vld [vmem:[%s16135_s5 + $0x80] sm:$0xff]  }
 0x412   : > { %11673 = vmatmul.mubr.msk.bf16.vlgmr.msra.gmra.mxu1 %vm390_vm5, %v14840_v42  ;;  %11706 = vmatprep.subr.bf16.mxu0 %v12057_v59  ;;  %v12062_v42 = vld [vmem:[%s16135_s5 + $0xa8] sm:$0xff]  }
 0x413   : > { %11676 = vmatprep.mubr.msk.bf16.mxu1 %vm390_vm5, %v14896_v20  ;;  %11745 = vmatpush3.bf16.msra.mxu1 %v14954_v33  ;;  %v15180_v20 = vpack.c.bf16 %v7049_v18, %v7048_v5  ;;  %v12063_v33 = vld [vmem:[%s16135_s5 + $0xa0] sm:$0xff]   ;;  %v8654_v18 = vld [vmem:[#allocation4 + $0x51] sm:$0xff] }
 0x414   : > { %11746 = vmatprep.subr.bf16.mxu1 %v12061_v50 }
 0x415   : > { %11707 = vmatpush3.bf16.msra.mxu0 %v12057_v59  ;;  %v7086_v59 = vpack.c.bf16 %v7069_v3, %v7068_v1  ;;  %v8659_v1 = vld [vmem:[#allocation4 + $0x91] sm:$0xff]  ;;  %v12075_v3 = vld [vmem:[%s16135_s5 + $0x100] sm:$0xff]  }
 0x416   : > { %11708 = vmatprep.subr.bf16.mxu0 %v12058_v39 }
 0x417   : > { %11747 = vmatpush3.bf16.msra.mxu1 %v12061_v50  ;;  %v7071_v50 = vld [vmem:[#allocation4 + $0x172] sm:$0xff] }
 0x418   : > { %11637 = vmatmul.mubr.msk.bf16.gmra.mxu0 %vm390_vm5, %v15178_v60  ;;  %11748 = vmatprep.subr.bf16.mxu1 %v12062_v42 }
 0x419   : > { %11640 = vmatprep.mubr.msk.bf16.mxu0 %vm390_vm5, %v15180_v20  ;;  %11709 = vmatpush3.bf16.msra.mxu0 %v12058_v39  ;;  %v15262_v39 = vpack.c.bf16 %v7393_v36, %v7392_v57 }
 0x41a   : > { %11677 = vmatmul.mubr.msk.bf16.gmra.mxu1 %vm390_vm5, %v14908_v43  ;;  %11710 = vmatprep.subr.bf16.mxu0 %v12059_v25  ;;  %v15204_v43 = vld [vmem:[%s16135_s5 + $0xf8] sm:$0xff]  }
 0x41b   : > { %11680 = vmatprep.mubr.msk.bf16.mxu1 %vm390_vm5, %v14967_v17  ;;  %11749 = vmatpush3.bf16.msra.mxu1 %v12062_v42  ;;  %v15208_v17 = vpack.c.bf16 %v7053_v2, %v7052_v37  ;;  %v8334_v42 = vld [vmem:[#allocation4 + $0x68] sm:$0xff]  ;;  %v12073_v2 = vld [vmem:[%s16135_s5 + $0x110] sm:$0xff]  }
 0x41c   : > { %11750 = vmatprep.subr.bf16.mxu1 %v12063_v33  ;;  %v8655_v37 = vld [vmem:[#allocation4 + $0x61] sm:$0xff] }
 0x41d   : > { %11711 = vmatpush3.bf16.msra.mxu0 %v12059_v25 }
 0x41e   : > { %11784 = vmatprep.subr.bf16.mxu0 %v15199_v23 }
 0x41f   : > { %11751 = vmatpush3.bf16.msra.mxu1 %v12063_v33  ;;  %v8653_v33 = vld [vmem:[#allocation4 + $0x49] sm:$0xff] }
 0x420   : > { %11641 = vmatmul.mubr.msk.bf16.gmra.mxu0 %vm390_vm5, %v15206_v24  ;;  %11824 = vmatprep.subr.bf16.mxu1 %v15204_v43  ;;  %v8684_v56 = vpack.c.bf16 %v8654_v18, %v8653_v33 }
 0x421   : > { %11644 = vmatprep.mubr.msk.bf16.mxu0 %vm390_vm5, %v15208_v17 }
 0x422   : > { %11681 = vmatmul.mubr.msk.bf16.gmra.mxu1 %vm390_vm5, %v14977_v29  ;;  %v7058_v29 = vld [vmem:[#allocation4 + $0xda] sm:$0xff] }
 0x423   : > { %11684 = vmatprep.mubr.msk.bf16.mxu1 %vm390_vm5, %v15026_v21  ;;  %v7059_v21 = vld [vmem:[#allocation4 + $0xe2] sm:$0xff] }
 0x424   : > { %v15232_v41 = vpack.c.bf16 %v7059_v21, %v7058_v29  ;;  %v8658_v21 = vld [vmem:[#allocation4 + $0x81] sm:$0xff] }
 0x428   : > { %11645 = vmatmul.mubr.msk.bf16.gmra.mxu0 %vm390_vm5, %v15220_v51 }
 0x429   : > { %11648 = vmatprep.mubr.msk.bf16.mxu0 %vm390_vm5, %v15222_v0 }
 0x42a   : > { %11685 = vmatmul.mubr.msk.bf16.gmra.mxu1 %vm390_vm5, %v15033_v38  ;;  %v7062_v38 = vld [vmem:[#allocation4 + $0x10a] sm:$0xff] }
 0x42b   : > { %11688 = vmatprep.mubr.msk.bf16.mxu1 %vm390_vm5, %v15074_v7  ;;  %v7063_v7 = vld [vmem:[#allocation4 + $0x112] sm:$0xff] }
 0x42c   : > { %v15244_v27 = vpack.c.bf16 %v7063_v7, %v7062_v38 }
 0x430   : > { %11649 = vmatmul.mubr.msk.bf16.gmra.mxu0 %vm390_vm5, %v15232_v41 }
 0x431   : > { %11652 = vmatprep.mubr.msk.bf16.mxu0 %vm390_vm5, %v15234_v34 }
 0x432   : > { %11689 = vmatmul.mubr.msk.bf16.gmra.mxu1 %vm390_vm5, %v15081_v11  ;;  %v7066_v11 = vld [vmem:[#allocation4 + $0x13a] sm:$0xff] }
 0x433   : > { %11692 = vmatprep.mubr.msk.bf16.mxu1 %vm390_vm5, %v15107_v58  ;;  %v7067_v58 = vld [vmem:[#allocation4 + $0x142] sm:$0xff] }
 0x434   : > { %v7085_v48 = vpack.c.bf16 %v7067_v58, %v7066_v11  ;;  %v8686_v11 = vpack.c.bf16 %v8658_v21, %v8657_v52 }
 0x438   : > { %11653 = vmatmul.mubr.msk.bf16.gmra.mxu0 %vm390_vm5, %v15244_v27 }
 0x439   : > { %11656 = vmatprep.mubr.msk.bf16.mxu0 %vm390_vm5, %v15246_v40 }
 0x43a   : > { %11693 = vmatmul.mubr.msk.bf16.gmra.mxu1 %vm390_vm5, %v15114_v6  ;;  %v7070_v6 = vld [vmem:[#allocation4 + $0x16a] sm:$0xff] }
 0x43b   : > { %11696 = vmatprep.mubr.msk.bf16.mxu1 %vm390_vm5, %v15127_v49  ;;  %v7087_v49 = vpack.c.bf16 %v7071_v50, %v7070_v6 }
 0x440   : > { %11657 = vmatmul.mubr.msk.bf16.gmra.mxu0 %vm390_vm5, %v7085_v48 }
 0x441   : > { %11660 = vmatprep.mubr.msk.bf16.mxu0 %vm390_vm5, %v7086_v59 }
 0x442   : > { %11697 = vmatmul.mubr.msk.bf16.gmra.mxu1 %vm390_vm5, %v15133_v62  ;;  %v12065_v62 = vld [vmem:[%s16135_s5 + $0xd0] sm:$0xff]  }
 0x443   : > { %11700 = vmatprep.mubr.msk.bf16.mxu1 %vm390_vm5, %v15143_v44  ;;  %v12069_v44 = vld [vmem:[%s16135_s5 + $0xf0] sm:$0xff]  }
 0x448   : > { %11661 = vmatmul.mubr.msk.bf16.gmra.mxu0 %vm390_vm5, %v7087_v49 }
 0x449   : > { %11712 = vmatprep.mubr.msk.bf16.mxu0 %vm390_vm5, %v14821_v13  ;;  %v12066_v13 = vld [vmem:[%s16135_s5 + $0xc8] sm:$0xff]  }
 0x44a   : > { %11701 = vmatmul.mubr.msk.bf16.gmra.mxu1 %vm390_vm5, %v15262_v39 }
 0x44b   : > { %11752 = vmatprep.mubr.msk.bf16.mxu1 %vm390_vm5, %v15152_v19  ;;  %v12071_v19 = vld [vmem:[%s16135_s5 + $0xe0] sm:$0xff]  }
 0x450   : > { %11713 = vmatmul.mubr.msk.bf16.vlgmr.msra.gmra.mxu0 %vm390_vm5, %v14830_v46  ;;  %v12070_v46 = vld [vmem:[%s16135_s5 + $0xe8] sm:$0xff]  }
 0x451   : > { %11716 = vmatprep.mubr.msk.bf16.mxu0 %vm390_vm5, %v14890_v53  ;;  %11785 = vmatpush3.bf16.msra.mxu0 %v15199_v23  ;;  %v12067_v53 = vld [vmem:[%s16135_s5 + $0xc0] sm:$0xff]   ;;  %v8363_v23 = vpack.c.bf16 %v8334_v42, %v8333_v12 }
 0x452   : > { %11753 = vmatmul.mubr.msk.bf16.vlgmr.msra.gmra.mxu1 %vm390_vm5, %v15154_v15  ;;  %11786 = vmatprep.subr.bf16.mxu0 %v12065_v62  ;;  %v8344_v12 = vld [vmem:[#allocation4 + $0xe0] sm:$0xff] }
 0x453   : > { %11756 = vmatprep.mubr.msk.bf16.mxu1 %vm390_vm5, %v15178_v60  ;;  %11825 = vmatpush3.bf16.msra.mxu1 %v15204_v43  ;;  %v8331_v60 = vld [vmem:[#allocation4 + $0x48] sm:$0xff] }
 0x454   : > { %11826 = vmatprep.subr.bf16.mxu1 %v12069_v44 }
 0x455   : > { %11787 = vmatpush3.bf16.msra.mxu0 %v12065_v62  ;;  %v8340_v62 = vld [vmem:[#allocation4 + $0xb0] sm:$0xff] }
 0x456   : > { %11788 = vmatprep.subr.bf16.mxu0 %v12066_v13 }
 0x457   : > { %11827 = vmatpush3.bf16.msra.mxu1 %v12069_v44 }
 0x458   : > { %11717 = vmatmul.mubr.msk.bf16.gmra.mxu0 %vm390_vm5, %v14898_v28  ;;  %11828 = vmatprep.subr.bf16.mxu1 %v12070_v46  ;;  %v12072_v28 = vld [vmem:[%s16135_s5 + $0x118] sm:$0xff]  }
 0x459   : > { %11720 = vmatprep.mubr.msk.bf16.mxu0 %vm390_vm5, %v14961_v55  ;;  %11789 = vmatpush3.bf16.msra.mxu0 %v12066_v13  ;;  %v7715_v55 = vld [vmem:[#allocation4 + $0x189] sm:$0xff] }
 0x45a   : > { %11757 = vmatmul.mubr.msk.bf16.gmra.mxu1 %vm390_vm5, %v15180_v20  ;;  %11790 = vmatprep.subr.bf16.mxu0 %v12067_v53  ;;  %v8656_v20 = vld [vmem:[#allocation4 + $0x69] sm:$0xff] }
 0x45b   : > { %11760 = vmatprep.mubr.msk.bf16.mxu1 %vm390_vm5, %v15206_v24  ;;  %11829 = vmatpush3.bf16.msra.mxu1 %v12070_v46  ;;  %v8685_v24 = vpack.c.bf16 %v8656_v20, %v8655_v37  ;;  %v8662_v46 = vld [vmem:[#allocation4 + $0xb1] sm:$0xff]  ;;  %v8666_v37 = vld [vmem:[#allocation4 + $0xe1] sm:$0xff] }
 0x45c   : > { %11830 = vmatprep.subr.bf16.mxu1 %v12071_v19 }
 0x45d   : > { %11791 = vmatpush3.bf16.msra.mxu0 %v12067_v53  ;;  %v8342_v53 = vld [vmem:[#allocation4 + $0xc8] sm:$0xff] }
 0x45e   : > { %11864 = vmatprep.subr.bf16.mxu0 %v12072_v28 }
 0x45f   : > { %11831 = vmatpush3.bf16.msra.mxu1 %v12071_v19 }
 0x460   : > { %11721 = vmatmul.mubr.msk.bf16.gmra.mxu0 %vm390_vm5, %v14969_v45  ;;  %v8036_v45 = vld [vmem:[#allocation4 + $0x182] sm:$0xff] }
 0x461   : > { %11724 = vmatprep.mubr.msk.bf16.mxu0 %vm390_vm5, %v15019_v32  ;;  %v8037_v32 = vld [vmem:[#allocation4 + $0x18a] sm:$0xff] }
 0x462   : > { %11761 = vmatmul.mubr.msk.bf16.gmra.mxu1 %vm390_vm5, %v15208_v17 }
 0x463   : > { %11764 = vmatprep.mubr.msk.bf16.mxu1 %vm390_vm5, %v15220_v51  ;;  %v12074_v51 = vld [vmem:[%s16135_s5 + $0x108] sm:$0xff]  }
 0x468   : > { %11725 = vmatmul.mubr.msk.bf16.gmra.mxu0 %vm390_vm5, %v15028_v8  ;;  %v8330_v8 = vld [vmem:[#allocation4 + $0x38] sm:$0xff] }
 0x469   : > { %11728 = vmatprep.mubr.msk.bf16.mxu0 %vm390_vm5, %v15067_v22  ;;  %v7714_v22 = vld [vmem:[#allocation4 + $0x181] sm:$0xff] }
 0x46a   : > { %11765 = vmatmul.mubr.msk.bf16.gmra.mxu1 %vm390_vm5, %v15222_v0 }
 0x46b   : > { %11768 = vmatprep.mubr.msk.bf16.mxu1 %vm390_vm5, %v15232_v41  ;;  %v8335_v41 = vld [vmem:[#allocation4 + $0x78] sm:$0xff] }
 0x46c   : > { %v8364_v63 = vpack.c.bf16 %v8336_v31, %v8335_v41  ;;  %v8667_v41 = vld [vmem:[#allocation4 + $0xf1] sm:$0xff] }
 0x470   : > { %11729 = vmatmul.mubr.msk.bf16.gmra.mxu0 %vm390_vm5, %v15076_v4  ;;  %v8652_v4 = vld [vmem:[#allocation4 + $0x39] sm:$0xff] }
 0x471   : > { %11732 = vmatprep.mubr.msk.bf16.mxu0 %vm390_vm5, %v15102_v47  ;;  %v15347_v47 = vpack.c.bf16 %v7715_v55, %v7714_v22  ;;  %v8664_v55 = vld [vmem:[#allocation4 + $0xc9] sm:$0xff] }
 0x472   : > { %11769 = vmatmul.mubr.msk.bf16.gmra.mxu1 %vm390_vm5, %v15234_v34  ;;  %v8660_v34 = vld [vmem:[#allocation4 + $0x99] sm:$0xff]  ;;  %v8661_v22 = vld [vmem:[#allocation4 + $0xa9] sm:$0xff] }
 0x473   : > { %11772 = vmatprep.mubr.msk.bf16.mxu1 %vm390_vm5, %v15244_v27  ;;  %v8337_v27 = vld [vmem:[#allocation4 + $0x90] sm:$0xff]  ;;  %v8687_v6 = vpack.c.bf16 %v8660_v34, %v8659_v1 }
 0x474   : > { %v8365_v58 = vpack.c.bf16 %v8338_v61, %v8337_v27 }
 0x478   : > { %11733 = vmatmul.mubr.msk.bf16.gmra.mxu0 %vm390_vm5, %v15109_v26  ;;  %v8329_v26 = vld [vmem:[#allocation4 + $0x30] sm:$0xff] }
 0x479   : > { %11736 = vmatprep.mubr.msk.bf16.mxu0 %vm390_vm5, %v15125_v16  ;;  %v15349_v16 = vpack.c.bf16 %v8037_v32, %v8036_v45  ;;  %v8361_v15 = vpack.c.bf16 %v8330_v8, %v8329_v26 }
 0x47a   : > { %11773 = vmatmul.mubr.msk.bf16.gmra.mxu1 %vm390_vm5, %v15246_v40 }
 0x47b   : > { %11776 = vmatprep.mubr.msk.bf16.mxu1 %vm390_vm5, %v7085_v48 }
 0x480   : > { %11737 = vmatmul.mubr.msk.bf16.gmra.mxu0 %vm390_vm5, %v15129_v54  ;;  %v8651_v54 = vld [vmem:[#allocation4 + $0x31] sm:$0xff] }
 0x481   : > { %11740 = vmatprep.mubr.msk.bf16.mxu0 %vm390_vm5, %v15141_v10  ;;  %v8683_v5 = vpack.c.bf16 %v8652_v4, %v8651_v54  ;;  %v8332_v10 = vld [vmem:[#allocation4 + $0x50] sm:$0xff]  ;;  %v8341_v4 = vld [vmem:[#allocation4 + $0xc0] sm:$0xff] }
 0x482   : > { %11777 = vmatmul.mubr.msk.bf16.gmra.mxu1 %vm390_vm5, %v7086_v59  ;;  %v8362_v25 = vpack.c.bf16 %v8332_v10, %v8331_v60  ;;  %v8367_v54 = vpack.c.bf16 %v8342_v53, %v8341_v4  ;;  %v8669_v53 = vld [vmem:[#allocation4 + $0x109] sm:$0xff] }
 0x483   : > { %11780 = vmatprep.mubr.msk.bf16.mxu1 %vm390_vm5, %v7087_v49 }
 0x488   : > { %11741 = vmatmul.mubr.msk.bf16.gmra.mxu0 %vm390_vm5, %v15347_v47 }
 0x489   : > { %11792 = vmatprep.mubr.msk.bf16.mxu0 %vm390_vm5, %v8361_v15  ;;  %v8688_v15 = vpack.c.bf16 %v8662_v46, %v8661_v22 }
 0x48a   : > { %11781 = vmatmul.mubr.msk.bf16.gmra.mxu1 %vm390_vm5, %v15349_v16 }
 0x48b   : > { %11832 = vmatprep.mubr.msk.bf16.mxu1 %vm390_vm5, %v8683_v5  ;;  %v8663_v5 = vld [vmem:[#allocation4 + $0xc1] sm:$0xff] }
 0x48c   : > { %v8689_v42 = vpack.c.bf16 %v8664_v55, %v8663_v5 }
 0x48e   : > { %v11554_v43 = vpop.f32.mrf.mxu0 }
 0x48f   : > { %v11594_v17 = vpop.f32.mrf.mxu1 }
 0x490   : > { %11793 = vmatmul.mubr.msk.bf16.vlgmr.msra.gmra.mxu0 %vm390_vm5, %v8362_v25  ;;  %v15363_v9 = vadd.f32 %v11594_v17, %v11554_v43  ;;  %v6680_v14 = vpop.f32.mrf.mxu0  ;;  %v8668_v17 = vld [vmem:[#allocation4 + $0xf9] sm:$0xff] }
 0x491   : > { %11796 = vmatprep.mubr.msk.bf16.mxu0 %vm390_vm5, %v8363_v23  ;;  %11865 = vmatpush3.bf16.msra.mxu0 %v12072_v28  ;;  %v6913_v30 = vpop.f32.mrf.mxu1  ;;  %v8339_v28 = vld [vmem:[#allocation4 + $0xa8] sm:$0xff] }
 0x492   : > { %11833 = vmatmul.mubr.msk.bf16.vlgmr.msra.gmra.mxu1 %vm390_vm5, %v8684_v56  ;;  %11866 = vmatprep.subr.bf16.mxu0 %v12073_v2  ;;  %v15369_v0 = vadd.f32 %v6913_v30, %v6680_v14  ;;  %v11555_v29 = vpop.f32.mrf.mxu0  ;;  %v8366_v8 = vpack.c.bf16 %v8340_v62, %v8339_v28 }
 0x493   : > { %11836 = vmatprep.mubr.msk.bf16.mxu1 %vm390_vm5, %v8685_v24  ;;  %v11595_v35 = vpop.f32.mrf.mxu1  ;;  %v8343_v24 = vld [vmem:[#allocation4 + $0xd8] sm:$0xff] }
 0x494   : > { %v15371_v38 = vadd.f32 %v11595_v35, %v11555_v29  ;;  %v6683_v7 = vpop.f32.mrf.mxu0  ;;  %v8368_v31 = vpack.c.bf16 %v8344_v12, %v8343_v24  ;;  %v8345_v29 = vld [vmem:[#allocation4 + $0xf0] sm:$0xff]  ;;  %v8354_v12 = vld [vmem:[#allocation4 + $0x158] sm:$0xff] }
 0x495   : > { %11867 = vmatpush3.bf16.msra.mxu0 %v12073_v2  ;;  %v6916_v40 = vpop.f32.mrf.mxu1  ;;  %v8346_v2 = vld [vmem:[#allocation4 + $0xf8] sm:$0xff] }
 0x496   : > { %11868 = vmatprep.subr.bf16.mxu0 %v12074_v51  ;;  %v15376_v48 = vadd.f32 %v6916_v40, %v6683_v7  ;;  %v11558_v59 = vpop.f32.mrf.mxu0  ;;  %v8369_v35 = vpack.c.bf16 %v8346_v2, %v8345_v29  ;;  %v8676_v2 = vld [vmem:[#allocation4 + $0x159] sm:$0xff] }
 0x497   : > { %v11598_v50 = vpop.f32.mrf.mxu1 }
 0x498   : > { %11797 = vmatmul.mubr.msk.bf16.gmra.mxu0 %vm390_vm5, %v8364_v63  ;;  %v15381_v36 = vadd.f32 %v11598_v50, %v11558_v59  ;;  %v6696_v49 = vpop.f32.mrf.mxu0  ;;  %v8691_v63 = vpack.c.bf16 %v8668_v17, %v8667_v41  ;;  %v8670_v59 = vld [vmem:[#allocation4 + $0x111] sm:$0xff] }
 0x499   : > { %11800 = vmatprep.mubr.msk.bf16.mxu0 %vm390_vm5, %v8365_v58  ;;  %11869 = vmatpush3.bf16.msra.mxu0 %v12074_v51  ;;  %v6929_v57 = vpop.f32.mrf.mxu1  ;;  %v8665_v51 = vld [vmem:[#allocation4 + $0xd9] sm:$0xff]  ;;  %v8348_v58 = vld [vmem:[#allocation4 + $0x110] sm:$0xff]  ;;  %v8692_v55 = vpack.c.bf16 %v8670_v59, %v8669_v53 }
 0x49a   : > { %11837 = vmatmul.mubr.msk.bf16.gmra.mxu1 %vm390_vm5, %v8686_v11  ;;  %11870 = vmatprep.subr.bf16.mxu0 %v12075_v3  ;;  %v15384_v44 = vadd.f32 %v6929_v57, %v6696_v49  ;;  %v11559_v13 = vpop.f32.mrf.mxu0  ;;  %v8690_v61 = vpack.c.bf16 %v8666_v37, %v8665_v51  ;;  %v8347_v49 = vld [vmem:[#allocation4 + $0x108] sm:$0xff]  ;;  %v8351_v37 = vld [vmem:[#allocation4 + $0x138] sm:$0xff] }
 0x49b   : > { %11840 = vmatprep.mubr.msk.bf16.mxu1 %vm390_vm5, %v8687_v6  ;;  %v11599_v19 = vpop.f32.mrf.mxu1  ;;  %v8350_v6 = vld [vmem:[#allocation4 + $0x128] sm:$0xff]  ;;  %v8370_v46 = vpack.c.bf16 %v8348_v58, %v8347_v49  ;;  %v8356_v58 = vld [vmem:[#allocation4 + $0x170] sm:$0xff] }
 0x49c   : > { %v15386_v45 = vadd.f32 %v11599_v19, %v11559_v13  ;;  %v6699_v32 = vpop.f32.mrf.mxu0  ;;  %v8672_v57 = vld [vmem:[#allocation4 + $0x129] sm:$0xff]  ;;  %v8349_v19 = vld [vmem:[#allocation4 + $0x120] sm:$0xff] }
 0x49d   : > { %11871 = vmatpush3.bf16.msra.mxu0 %v12075_v3  ;;  %v6932_v26 = vpop.f32.mrf.mxu1  ;;  %v8355_v49 = vld [vmem:[#allocation4 + $0x168] sm:$0xff] }
 0x49e   : > { %v15388_v10 = vadd.f32 %v6932_v26, %v6699_v32  ;;  %v11562_v18 = vpop.f32.mrf.mxu0  ;;  %v8371_v32 = vpack.c.bf16 %v8350_v6, %v8349_v19  ;;  %v8678_v6 = vld [vmem:[#allocation4 + $0x171] sm:$0xff]  ;;  %v8677_v53 = vld [vmem:[#allocation4 + $0x169] sm:$0xff] }
 0x4a0   : > { %11801 = vmatmul.mubr.msk.bf16.gmra.mxu0 %vm390_vm5, %v8366_v8  ;;  %v6712_v25 = vpop.f32.mrf.mxu0  ;;  %v8671_v8 = vld [vmem:[#allocation4 + $0x121] sm:$0xff] }
 0x4a1   : > { %11804 = vmatprep.mubr.msk.bf16.mxu0 %vm390_vm5, %v8367_v54  ;;  %v8693_v26 = vpack.c.bf16 %v8672_v57, %v8671_v8 }
 0x4a2   : > { %v11602_v60 = vpop.f32.mrf.mxu1  ;;  %11841 = vmatmul.mubr.msk.bf16.gmra.mxu1 %vm390_vm5, %v8688_v15  ;;  %v11563_v23 = vpop.f32.mrf.mxu0 }
 0x4a3   : > { %v15393_v20 = vadd.f32 %v11602_v60, %v11562_v18  ;;  %11844 = vmatprep.mubr.msk.bf16.mxu1 %vm390_vm5, %v8689_v42  ;;  %v8352_v42 = vld [vmem:[#allocation4 + $0x140] sm:$0xff] }
 0x4a4   : > { %v6945_v33 = vpop.f32.mrf.mxu1  ;;  %v6715_v30 = vpop.f32.mrf.mxu0  ;;  %v8372_v17 = vpack.c.bf16 %v8352_v42, %v8351_v37  ;;  %v8682_v42 = vld [vmem:[#allocation4 + $0x1a1] sm:$0xff]  ;;  %v8973_v37 = vld [vmem:[#allocation4 + $0x32] sm:$0xff] }
 0x4a5   : > { %v15396_v56 = vadd.f32 %v6945_v33, %v6712_v25  ;;  %v8674_v33 = vld [vmem:[#allocation4 + $0x141] sm:$0xff] }
 0x4a6   : > { %v11603_v43 = vpop.f32.mrf.mxu1 }
 0x4a7   : > { %v15398_v14 = vadd.f32 %v11603_v43, %v11563_v23 }
 0x4a8   : > { %v6948_v21 = vpop.f32.mrf.mxu1  ;;  %v11566_v7 = vpop.f32.mrf.mxu0  ;;  %11805 = vmatmul.mubr.msk.bf16.gmra.mxu0 %vm390_vm5, %v8368_v31  ;;  %v8353_v31 = vld [vmem:[#allocation4 + $0x150] sm:$0xff] }
 0x4a9   : > { %v15400_v34 = vadd.f32 %v6948_v21, %v6715_v30  ;;  %11808 = vmatprep.mubr.msk.bf16.mxu0 %vm390_vm5, %v8369_v35  ;;  %v8673_v30 = vld [vmem:[#allocation4 + $0x139] sm:$0xff]  ;;  %v8373_v21 = vpack.c.bf16 %v8354_v12, %v8353_v31 }
 0x4aa   : > { %v11606_v52 = vpop.f32.mrf.mxu1  ;;  %11845 = vmatmul.mubr.msk.bf16.gmra.mxu1 %vm390_vm5, %v8690_v61  ;;  %v6728_v40 = vpop.f32.mrf.mxu0  ;;  %v8694_v29 = vpack.c.bf16 %v8674_v33, %v8673_v30  ;;  %v8675_v61 = vld [vmem:[#allocation4 + $0x151] sm:$0xff] }
 0x4ab   : > { %v15405_v27 = vadd.f32 %v11606_v52, %v11566_v7  ;;  %11848 = vmatprep.mubr.msk.bf16.mxu1 %vm390_vm5, %v8691_v63  ;;  %v8695_v7 = vpack.c.bf16 %v8676_v2, %v8675_v61  ;;  %v8974_v2 = vld [vmem:[#allocation4 + $0x3a] sm:$0xff] }
 0x4ac   : > { %v6961_v11 = vpop.f32.mrf.mxu1  ;;  %v11567_v3 = vpop.f32.mrf.mxu0 }
 0x4ad   : > { %v15408_v1 = vadd.f32 %v6961_v11, %v6728_v40 }
 0x4ae   : > { %v11607_v50 = vpop.f32.mrf.mxu1  ;;  %v6731_v13 = vpop.f32.mrf.mxu0 }
 0x4af   : > { %v15410_v62 = vadd.f32 %v11607_v50, %v11567_v3 }
 0x4b0   : > { %v6964_v28 = vpop.f32.mrf.mxu1  ;;  %v11570_v4 = vpop.f32.mrf.mxu0  ;;  %11809 = vmatmul.mubr.msk.bf16.gmra.mxu0 %vm390_vm5, %v8370_v46  ;;  %v8374_v46 = vpack.c.bf16 %v8356_v58, %v8355_v49 }
 0x4b1   : > { %v15412_v22 = vadd.f32 %v6964_v28, %v6731_v13  ;;  %11812 = vmatprep.mubr.msk.bf16.mxu0 %vm390_vm5, %v8371_v32  ;;  %v8696_v28 = vpack.c.bf16 %v8678_v6, %v8677_v53  ;;  %v8978_v6 = vld [vmem:[#allocation4 + $0x6a] sm:$0xff] }
 0x4b2   : > { %v11610_v15 = vpop.f32.mrf.mxu1  ;;  %11849 = vmatmul.mubr.msk.bf16.gmra.mxu1 %vm390_vm5, %v8692_v55  ;;  %v6744_v5 = vpop.f32.mrf.mxu0 }
 0x4b3   : > { %v15417_v54 = vadd.f32 %v11610_v15, %v11570_v4  ;;  %11852 = vmatprep.mubr.msk.bf16.mxu1 %vm390_vm5, %v8693_v26  ;;  %v8359_v4 = vld [vmem:[#allocation4 + $0x198] sm:$0xff]  ;;  %v8360_v26 = vld [vmem:[#allocation4 + $0x1a0] sm:$0xff] }
 0x4b4   : > { %v6977_v18 = vpop.f32.mrf.mxu1  ;;  %v11571_v25 = vpop.f32.mrf.mxu0 }
 0x4b5   : > { %v15420_v60 = vadd.f32 %v6977_v18, %v6744_v5  ;;  %v8681_v18 = vld [vmem:[#allocation4 + $0x199] sm:$0xff] }
 0x4b6   : > { %v11611_v23 = vpop.f32.mrf.mxu1  ;;  %v6747_v24 = vpop.f32.mrf.mxu0 }
 0x4b7   : > { %v15422_v43 = vadd.f32 %v11611_v23, %v11571_v25  ;;  %v8376_v23 = vpack.c.bf16 %v8360_v26, %v8359_v4 }
 0x4b8   : > { %v6980_v51 = vpop.f32.mrf.mxu1  ;;  %v11574_v41 = vpop.f32.mrf.mxu0  ;;  %11813 = vmatmul.mubr.msk.bf16.gmra.mxu0 %vm390_vm5, %v8372_v17  ;;  %v8698_v17 = vpack.c.bf16 %v8682_v42, %v8681_v18 }
 0x4b9   : > { %v15424_v35 = vadd.f32 %v6980_v51, %v6747_v24  ;;  %11816 = vmatprep.mubr.msk.bf16.mxu0 %vm390_vm5, %v8373_v21  ;;  %v9005_v51 = vpack.c.bf16 %v8974_v2, %v8973_v37  ;;  %v8981_v37 = vld [vmem:[#allocation4 + $0x92] sm:$0xff]  ;;  %v8982_v2 = vld [vmem:[#allocation4 + $0x9a] sm:$0xff] }
 0x4ba   : > { %v11614_v63 = vpop.f32.mrf.mxu1  ;;  %11853 = vmatmul.mubr.msk.bf16.gmra.mxu1 %vm390_vm5, %v8694_v29  ;;  %v6760_v40 = vpop.f32.mrf.mxu0 }
 0x4bb   : > { %v15429_v52 = vadd.f32 %v11614_v63, %v11574_v41  ;;  %11856 = vmatprep.mubr.msk.bf16.mxu1 %vm390_vm5, %v8695_v7  ;;  %v8975_v63 = vld [vmem:[#allocation4 + $0x4a] sm:$0xff] }
 0x4bc   : > { %v6993_v11 = vpop.f32.mrf.mxu1  ;;  %v11575_v59 = vpop.f32.mrf.mxu0 }
 0x4bd   : > { %v15432_v3 = vadd.f32 %v6993_v11, %v6760_v40  ;;  %v8976_v40 = vld [vmem:[#allocation4 + $0x52] sm:$0xff] }
 0x4be   : > { %v11615_v50 = vpop.f32.mrf.mxu1  ;;  %v6763_v13 = vpop.f32.mrf.mxu0 }
 0x4bf   : > { %v15434_v57 = vadd.f32 %v11615_v50, %v11575_v59  ;;  %v8977_v59 = vld [vmem:[#allocation4 + $0x62] sm:$0xff] }
 0x4c0   : > { %v6996_v19 = vpop.f32.mrf.mxu1  ;;  %v11578_v32 = vpop.f32.mrf.mxu0  ;;  %11817 = vmatmul.mubr.msk.bf16.gmra.mxu0 %vm390_vm5, %v8374_v46  ;;  %v9006_v46 = vpack.c.bf16 %v8976_v40, %v8975_v63 }
 0x4c1   : > { %v15436_v55 = vadd.f32 %v6996_v19, %v6763_v13  ;;  %11820 = vmatprep.mubr.msk.bf16.mxu0 %vm390_vm5, %v15262_v39  ;;  %v9007_v19 = vpack.c.bf16 %v8978_v6, %v8977_v59 }
 0x4c2   : > { %v11618_v8 = vpop.f32.mrf.mxu1  ;;  %11857 = vmatmul.mubr.msk.bf16.gmra.mxu1 %vm390_vm5, %v8696_v28  ;;  %v6776_v5 = vpop.f32.mrf.mxu0 }
 0x4c3   : > { %v15442_v15 = vadd.f32 %v11618_v8, %v11578_v32  ;;  %11860 = vmatprep.mubr.msk.bf16.mxu1 %vm390_vm5, %v15347_v47 }
 0x4c4   : > { %v7009_v25 = vpop.f32.mrf.mxu1  ;;  %v11579_v12 = vpop.f32.mrf.mxu0 }
 0x4c5   : > { %v15446_v33 = vadd.f32 %v7009_v25, %v6776_v5  ;;  %v8979_v25 = vld [vmem:[#allocation4 + $0x7a] sm:$0xff] }
 0x4c6   : > { %v11619_v24 = vpop.f32.mrf.mxu1  ;;  %v6779_v30 = vpop.f32.mrf.mxu0 }
 0x4c7   : > { %v15448_v39 = vadd.f32 %v11619_v24, %v11579_v12  ;;  %v8980_v12 = vld [vmem:[#allocation4 + $0x82] sm:$0xff] }
 0x4c8   : > { %v7012_v31 = vpop.f32.mrf.mxu1  ;;  %v11582_v47 = vpop.f32.mrf.mxu0  ;;  %11821 = vmatmul.mubr.msk.bf16.gmra.mxu0 %vm390_vm5, %v8376_v23 }
 0x4c9   : > { %v15450_v29 = vadd.f32 %v7012_v31, %v6779_v30  ;;  %11872 = vmatprep.mubr.msk.bf16.mxu0 %vm390_vm5, %v9005_v51  ;;  %v9008_v31 = vpack.c.bf16 %v8980_v12, %v8979_v25 }
 0x4ca   : > { %v11622_v21 = vpop.f32.mrf.mxu1  ;;  %11861 = vmatmul.mubr.msk.bf16.gmra.mxu1 %vm390_vm5, %v8698_v17  ;;  %v6792_v41 = vpop.f32.mrf.mxu0 }
 0x4cb   : > { %v15455_v61 = vadd.f32 %v11622_v21, %v11582_v47 }
 0x4cc   : > { %v7025_v7 = vpop.f32.mrf.mxu1  ;;  %v11583_v58 = vpop.f32.mrf.mxu0 }
 0x4cd   : > { %v15457_v11 = vadd.f32 %v7025_v7, %v6792_v41  ;;  %v9009_v41 = vpack.c.bf16 %v8982_v2, %v8981_v37 }
 0x4ce   : > { %v11623_v50 = vpop.f32.mrf.mxu1  ;;  %v6795_v13 = vpop.f32.mrf.mxu0 }
 0x4cf   : > { %v15459_v49 = vadd.f32 %v11623_v50, %v11583_v58  ;;  %v8983_v50 = vld [vmem:[#allocation4 + $0xaa] sm:$0xff] }
 0x4d0   : > { %v7028_v53 = vpop.f32.mrf.mxu1  ;;  %v11634_v32 = vpop.f32.mrf.mxu0  ;;  %11873 = vmatmul.mubr.msk.bf16.vlgmr.msra.gmra.mxu0 %vm390_vm5, %v9006_v46  ;;  %v8985_v46 = vld [vmem:[#allocation4 + $0xc2] sm:$0xff] }
 0x4d1   : > { %v15461_v28 = vadd.f32 %v7028_v53, %v6795_v13  ;;  %v7332_v8 = vadd.f32 %v11634_v32, %v15363_v9  ;;  %11876 = vmatprep.mubr.msk.bf16.mxu0 %vm390_vm5, %v9007_v19  ;;  %v8986_v53 = vld [vmem:[#allocation4 + $0xca] sm:$0xff] }
 0x4d2   : > { %v11674_v4 = vpop.f32.mrf.mxu1  ;;  %v7203_v26 = vpop.f32.mrf.mxu0  ;;  %v9011_v25 = vpack.c.bf16 %v8986_v53, %v8985_v46 }
 0x4d3   : > { %v15466_v5 = vadd.f32 %v11674_v4, %v7332_v8  ;;  %v7330_v18 = vadd.f32 %v7203_v26, %v15369_v0 }
 0x4d4   : > { %v7525_v42 = vpop.f32.mrf.mxu1  ;;  %v11635_v23 = vpop.f32.mrf.mxu0 }
 0x4d5   : > { %v15469_v24 = vadd.f32 %v7525_v42, %v7330_v18  ;;  %v7333_v17 = vadd.f32 %v11635_v23, %v15371_v38 }
 0x4d6   : > { %v11675_v30 = vpop.f32.mrf.mxu1  ;;  %v7206_v9 = vpop.f32.mrf.mxu0 }
 0x4d7   : > { %v15472_v51 = vadd.f32 %v11675_v30, %v7333_v17  ;;  %v7331_v47 = vadd.f32 %v7206_v9, %v15376_v48  ;;  %v8984_v48 = vld [vmem:[#allocation4 + $0xb2] sm:$0xff]  ;;  %v8987_v9 = vld [vmem:[#allocation4 + $0xda] sm:$0xff] }
 0x4d8   : > { %v7528_v21 = vpop.f32.mrf.mxu1  ;;  %v11638_v0 = vpop.f32.mrf.mxu0  ;;  %11877 = vmatmul.mubr.msk.bf16.gmra.mxu0 %vm390_vm5, %v9008_v31  ;;  %v9010_v4 = vpack.c.bf16 %v8984_v48, %v8983_v50 }
 0x4d9   : > { %v15476_v7 = vadd.f32 %v7528_v21, %v7331_v47  ;;  %v7336_v63 = vadd.f32 %v11638_v0, %v15381_v36  ;;  %11880 = vmatprep.mubr.msk.bf16.mxu0 %vm390_vm5, %v9009_v41  ;;  %v8989_v47 = vld [vmem:[#allocation4 + $0xf2] sm:$0xff]  ;;  %v8990_v21 = vld [vmem:[#allocation4 + $0xfa] sm:$0xff] }
 0x4da   : > { %v11678_v40 = vpop.f32.mrf.mxu1  ;;  %v7219_v38 = vpop.f32.mrf.mxu0  ;;  %v9013_v50 = vpack.c.bf16 %v8990_v21, %v8989_v47 }
 0x4db   : > { %v15480_v58 = vadd.f32 %v11678_v40, %v7336_v63  ;;  %v7334_v59 = vadd.f32 %v7219_v38, %v15384_v44 }
 0x4dc   : > { %v7541_v6 = vpop.f32.mrf.mxu1  ;;  %v11639_v13 = vpop.f32.mrf.mxu0 }
 0x4dd   : > { %v15483_v19 = vadd.f32 %v7541_v6, %v7334_v59  ;;  %v7337_v32 = vadd.f32 %v11639_v13, %v15386_v45 }
 0x4de   : > { %v11679_v8 = vpop.f32.mrf.mxu1  ;;  %v7222_v36 = vpop.f32.mrf.mxu0 }
 0x4df   : > { %v15486_v26 = vadd.f32 %v11679_v8, %v7337_v32  ;;  %v7335_v18 = vadd.f32 %v7222_v36, %v15388_v10  ;;  %v8988_v10 = vld [vmem:[#allocation4 + $0xe2] sm:$0xff]  ;;  %v8991_v36 = vld [vmem:[#allocation4 + $0x10a] sm:$0xff] }
 0x4e0   : > { %v7544_v42 = vpop.f32.mrf.mxu1  ;;  %v11642_v44 = vpop.f32.mrf.mxu0  ;;  %11881 = vmatmul.mubr.msk.bf16.gmra.mxu0 %vm390_vm5, %v9010_v4  ;;  %v9012_v40 = vpack.c.bf16 %v8988_v10, %v8987_v9 }
 0x4e1   : > { %v15490_v12 = vadd.f32 %v7544_v42, %v7335_v18  ;;  %v7340_v23 = vadd.f32 %v11642_v44, %v15393_v20  ;;  %11884 = vmatprep.mubr.msk.bf16.mxu0 %vm390_vm5, %v9011_v25  ;;  %v8993_v18 = vld [vmem:[#allocation4 + $0x122] sm:$0xff]  ;;  %v8994_v42 = vld [vmem:[#allocation4 + $0x12a] sm:$0xff] }
 0x4e2   : > { %v11682_v37 = vpop.f32.mrf.mxu1  ;;  %v7235_v45 = vpop.f32.mrf.mxu0  ;;  %v9015_v9 = vpack.c.bf16 %v8994_v42, %v8993_v18 }
 0x4e3   : > { %v15494_v2 = vadd.f32 %v11682_v37, %v7340_v23  ;;  %v7338_v17 = vadd.f32 %v7235_v45, %v15396_v56 }
 0x4e4   : > { %v7557_v30 = vpop.f32.mrf.mxu1  ;;  %v11643_v31 = vpop.f32.mrf.mxu0 }
 0x4e5   : > { %v15497_v41 = vadd.f32 %v7557_v30, %v7338_v17  ;;  %v7341_v0 = vadd.f32 %v11643_v31, %v15398_v14 }
 0x4e6   : > { %v11683_v63 = vpop.f32.mrf.mxu1  ;;  %v7238_v20 = vpop.f32.mrf.mxu0 }
 0x4e7   : > { %v15500_v38 = vadd.f32 %v11683_v63, %v7341_v0  ;;  %v7339_v59 = vadd.f32 %v7238_v20, %v15400_v34  ;;  %v8992_v34 = vld [vmem:[#allocation4 + $0x112] sm:$0xff]  ;;  %v8995_v20 = vld [vmem:[#allocation4 + $0x13a] sm:$0xff] }
 0x4e8   : > { %v7560_v6 = vpop.f32.mrf.mxu1  ;;  %v11646_v56 = vpop.f32.mrf.mxu0  ;;  %11885 = vmatmul.mubr.msk.bf16.gmra.mxu0 %vm390_vm5, %v9012_v40  ;;  %v9014_v37 = vpack.c.bf16 %v8992_v34, %v8991_v36 }
 0x4e9   : > { %v15504_v48 = vadd.f32 %v7560_v6, %v7339_v59  ;;  %v7344_v13 = vadd.f32 %v11646_v56, %v15405_v27  ;;  %11888 = vmatprep.mubr.msk.bf16.mxu0 %vm390_vm5, %v9013_v50  ;;  %v8997_v59 = vld [vmem:[#allocation4 + $0x152] sm:$0xff]  ;;  %v8998_v6 = vld [vmem:[#allocation4 + $0x15a] sm:$0xff] }
 0x4ea   : > { %v11686_v46 = vpop.f32.mrf.mxu1  ;;  %v7251_v14 = vpop.f32.mrf.mxu0  ;;  %v9017_v36 = vpack.c.bf16 %v8998_v6, %v8997_v59 }
 0x4eb   : > { %v15508_v53 = vadd.f32 %v11686_v46, %v7344_v13  ;;  %v7342_v32 = vadd.f32 %v7251_v14, %v15408_v1 }
 0x4ec   : > { %v7573_v8 = vpop.f32.mrf.mxu1  ;;  %v11647_v4 = vpop.f32.mrf.mxu0 }
 0x4ed   : > { %v15511_v25 = vadd.f32 %v7573_v8, %v7342_v32  ;;  %v7345_v44 = vadd.f32 %v11647_v4, %v15410_v62 }
 0x4ee   : > { %v11687_v23 = vpop.f32.mrf.mxu1  ;;  %v7254_v27 = vpop.f32.mrf.mxu0 }
 0x4ef   : > { %v15514_v45 = vadd.f32 %v11687_v23, %v7345_v44  ;;  %v7343_v17 = vadd.f32 %v7254_v27, %v15412_v22  ;;  %v8996_v22 = vld [vmem:[#allocation4 + $0x142] sm:$0xff]  ;;  %v8999_v27 = vld [vmem:[#allocation4 + $0x16a] sm:$0xff] }
 0x4f0   : > { %v7576_v30 = vpop.f32.mrf.mxu1  ;;  %v11650_v1 = vpop.f32.mrf.mxu0  ;;  %11889 = vmatmul.mubr.msk.bf16.gmra.mxu0 %vm390_vm5, %v9014_v37  ;;  %v9016_v46 = vpack.c.bf16 %v8996_v22, %v8995_v20  ;;  %v9004_v22 = vld [vmem:[#allocation4 + $0x1a2] sm:$0xff] }
 0x4f1   : > { %v15518_v10 = vadd.f32 %v7576_v30, %v7343_v17  ;;  %v7348_v31 = vadd.f32 %v11650_v1, %v15417_v54  ;;  %11892 = vmatprep.mubr.msk.bf16.mxu0 %vm390_vm5, %v9015_v9 }
 0x4f2   : > { %v11690_v47 = vpop.f32.mrf.mxu1  ;;  %v7267_v62 = vpop.f32.mrf.mxu0 }
 0x4f3   : > { %v15522_v21 = vadd.f32 %v11690_v47, %v7348_v31  ;;  %v7346_v0 = vadd.f32 %v7267_v62, %v15420_v60 }
 0x4f4   : > { %v7589_v63 = vpop.f32.mrf.mxu1  ;;  %v11651_v40 = vpop.f32.mrf.mxu0 }
 0x4f5   : > { %v15525_v50 = vadd.f32 %v7589_v63, %v7346_v0  ;;  %v7349_v56 = vadd.f32 %v11651_v40, %v15422_v43 }
 0x4f6   : > { %v11691_v13 = vpop.f32.mrf.mxu1  ;;  %v7270_v54 = vpop.f32.mrf.mxu0 }
 0x4f7   : > { %v15528_v14 = vadd.f32 %v11691_v13, %v7349_v56  ;;  %v7347_v32 = vadd.f32 %v7270_v54, %v15424_v35  ;;  %v9000_v35 = vld [vmem:[#allocation4 + $0x172] sm:$0xff] }
 0x4f8   : > { %v7592_v8 = vpop.f32.mrf.mxu1  ;;  %v11654_v60 = vpop.f32.mrf.mxu0  ;;  %11893 = vmatmul.mubr.msk.bf16.gmra.mxu0 %vm390_vm5, %v9016_v46  ;;  %v9018_v31 = vpack.c.bf16 %v9000_v35, %v8999_v27 }
 0x4f9   : > { %v15532_v34 = vadd.f32 %v7592_v8, %v7347_v32  ;;  %v7352_v4 = vadd.f32 %v11654_v60, %v15429_v52  ;;  %11896 = vmatprep.mubr.msk.bf16.mxu0 %vm390_vm5, %v9017_v36 }
 0x4fa   : > { %v11694_v18 = vpop.f32.mrf.mxu1  ;;  %v7283_v43 = vpop.f32.mrf.mxu0 }
 0x4fb   : > { %v15536_v42 = vadd.f32 %v11694_v18, %v7352_v4  ;;  %v7350_v44 = vadd.f32 %v7283_v43, %v15432_v3 }
 0x4fc   : > { %v7605_v23 = vpop.f32.mrf.mxu1  ;;  %v11655_v37 = vpop.f32.mrf.mxu0 }
 0x4fd   : > { %v15539_v17 = vadd.f32 %v7605_v23, %v7350_v44  ;;  %v7353_v30 = vadd.f32 %v11655_v37, %v15434_v57  ;;  %v9003_v57 = vld [vmem:[#allocation4 + $0x19a] sm:$0xff] }
 0x4fe   : > { %v11695_v9 = vpop.f32.mrf.mxu1  ;;  %v7286_v1 = vpop.f32.mrf.mxu0  ;;  %v9020_v13 = vpack.c.bf16 %v9004_v22, %v9003_v57 }
 0x4ff   : > { %v15542_v52 = vadd.f32 %v11695_v9, %v7353_v30  ;;  %v7351_v47 = vadd.f32 %v7286_v1, %v15436_v55 }
 0x500   : > { %v7608_v62 = vpop.f32.mrf.mxu1  ;;  %v11658_v0 = vpop.f32.mrf.mxu0  ;;  %11897 = vmatmul.mubr.msk.bf16.gmra.mxu0 %vm390_vm5, %v9018_v31 }
 0x501   : > { %v15546_v3 = vadd.f32 %v7608_v62, %v7351_v47  ;;  %v7356_v63 = vadd.f32 %v11658_v0, %v15442_v15  ;;  %11900 = vmatprep.mubr.msk.bf16.mxu0 %vm390_vm5, %v15349_v16 }
 0x502   : > { %v11698_v20 = vpop.f32.mrf.mxu1  ;;  %v7299_v40 = vpop.f32.mrf.mxu0 }
 0x503   : > { %v15551_v59 = vadd.f32 %v11698_v20, %v7356_v63  ;;  %v7354_v6 = vadd.f32 %v7299_v40, %v15446_v33 }
 0x504   : > { %v7621_v55 = vpop.f32.mrf.mxu1  ;;  %v11659_v56 = vpop.f32.mrf.mxu0 }
 0x505   : > { %v15554_v54 = vadd.f32 %v7621_v55, %v7354_v6  ;;  %v7357_v46 = vadd.f32 %v11659_v56, %v15448_v39 }
 0x506   : > { %v11699_v32 = vpop.f32.mrf.mxu1  ;;  %v7302_v15 = vpop.f32.mrf.mxu0 }
 0x507   : > { %v15557_v8 = vadd.f32 %v11699_v32, %v7357_v46  ;;  %v7355_v16 = vadd.f32 %v7302_v15, %v15450_v29 }
 0x508   : > { %v7624_v36 = vpop.f32.mrf.mxu1  ;;  %v11662_v60 = vpop.f32.mrf.mxu0  ;;  %11901 = vmatmul.mubr.msk.bf16.gmra.mxu0 %vm390_vm5, %v9020_v13 }
 0x509   : > { %v15561_v4 = vadd.f32 %v7624_v36, %v7355_v16  ;;  %v7360_v33 = vadd.f32 %v11662_v60, %v15455_v61 }
 0x50a   : > { %v11702_v18 = vpop.f32.mrf.mxu1  ;;  %v7315_v43 = vpop.f32.mrf.mxu0 }
 0x50b   : > { %v15564_v44 = vadd.f32 %v11702_v18, %v7360_v33  ;;  %v7358_v39 = vadd.f32 %v7315_v43, %v15457_v11 }
 0x50c   : > { %v7637_v23 = vpop.f32.mrf.mxu1  ;;  %v11663_v27 = vpop.f32.mrf.mxu0 }
 0x50d   : > { %v15567_v35 = vadd.f32 %v7637_v23, %v7358_v39  ;;  %v7361_v29 = vadd.f32 %v11663_v27, %v15459_v49 }
 0x50e   : > { %v11703_v37 = vpop.f32.mrf.mxu1  ;;  %v7318_v30 = vpop.f32.mrf.mxu0 }
 0x50f   : > { %v15570_v9 = vadd.f32 %v11703_v37, %v7361_v29  ;;  %v7359_v1 = vadd.f32 %v7318_v30, %v15461_v28 }
 0x510   : > { %v7640_v31 = vpop.f32.mrf.mxu1  ;;  %v11714_v61 = vpop.f32.mrf.mxu0 }
 0x511   : > { %v15573_v47 = vadd.f32 %v7640_v31, %v7359_v1  ;;  %v15576_v62 = vadd.f32 %v11714_v61, %v15466_v5 }
 0x512   : > { %v15578_v11 = vpop.f32.mrf.mxu1  ;;  %v7847_v0 = vpop.f32.mrf.mxu0 }
 0x513   : > { %v15581_v63 = vadd.f32 %v7847_v0, %v15469_v24 }
 0x514   : > { %v15583_v49 = vpop.f32.mrf.mxu1  ;;  %v11715_v20 = vpop.f32.mrf.mxu0 }
 0x515   : > { %v15586_v57 = vadd.f32 %v11715_v20, %v15472_v51 }
 0x516   : > { %v15588_v28 = vpop.f32.mrf.mxu1  ;;  %v7850_v22 = vpop.f32.mrf.mxu0 }
 0x517   : > { %v15591_v40 = vadd.f32 %v7850_v22, %v15476_v7 }
 0x518   : > { %v15593_v5 = vpop.f32.mrf.mxu1  ;;  %v11718_v6 = vpop.f32.mrf.mxu0 }
 0x519   : > { %v15596_v55 = vadd.f32 %v11718_v6, %v15480_v58 }
 0x51a   : > { %v15598_v24 = vpop.f32.mrf.mxu1  ;;  %v7863_v56 = vpop.f32.mrf.mxu0 }
 0x51b   : > { %v15601_v13 = vadd.f32 %v7863_v56, %v15483_v19 }
 0x51c   : > { %v15603_v51 = vpop.f32.mrf.mxu1  ;;  %v11719_v46 = vpop.f32.mrf.mxu0 }
 0x51d   : > { %v15606_v32 = vadd.f32 %v11719_v46, %v15486_v26 }
 0x51e   : > { %v15608_v7 = vpop.f32.mrf.mxu1  ;;  %v7866_v15 = vpop.f32.mrf.mxu0 }
 0x51f   : > { %v15611_v16 = vadd.f32 %v7866_v15, %v15490_v12 }
 0x520   : > { %v15613_v58 = vpop.f32.mrf.mxu1  ;;  %v11722_v36 = vpop.f32.mrf.mxu0 }
 0x521   : > { %v15616_v60 = vadd.f32 %v11722_v36, %v15494_v2 }
 0x522   : > { %v15618_v19 = vpop.f32.mrf.mxu1  ;;  %v7879_v33 = vpop.f32.mrf.mxu0 }
 0x523   : > { %v15621_v18 = vadd.f32 %v7879_v33, %v15497_v41 }
 0x524   : > { %v15623_v26 = vpop.f32.mrf.mxu1  ;;  %v11723_v43 = vpop.f32.mrf.mxu0 }
 0x525   : > { %v15626_v39 = vadd.f32 %v11723_v43, %v15500_v38 }
 0x526   : > { %v15628_v12 = vpop.f32.mrf.mxu1  ;;  %v7882_v23 = vpop.f32.mrf.mxu0 }
 0x527   : > { %v15631_v27 = vadd.f32 %v7882_v23, %v15504_v48 }
 0x528   : > { %v15633_v2 = vpop.f32.mrf.mxu1  ;;  %v11726_v29 = vpop.f32.mrf.mxu0 }
 0x529   : > { %v15636_v37 = vadd.f32 %v11726_v29, %v15508_v53 }
 0x52a   : > { %v15638_v41 = vpop.f32.mrf.mxu1  ;;  %v7895_v30 = vpop.f32.mrf.mxu0 }
 0x52b   : > { %v15641_v1 = vadd.f32 %v7895_v30, %v15511_v25 }
 0x52c   : > { %v15643_v38 = vpop.f32.mrf.mxu1  ;;  %v11727_v31 = vpop.f32.mrf.mxu0 }
 0x52d   : > { %v15646_v61 = vadd.f32 %v11727_v31, %v15514_v45 }
 0x52e   : > { %v15648_v48 = vpop.f32.mrf.mxu1  ;;  %v7898_v0 = vpop.f32.mrf.mxu0 }
 0x52f   : > { %v15651_v20 = vadd.f32 %v7898_v0, %v15518_v10 }
 0x530   : > { %v15653_v53 = vpop.f32.mrf.mxu1  ;;  %v11730_v22 = vpop.f32.mrf.mxu0 }
 0x531   : > { %16437 = vst [vmem:[#allocation40_spill] sm:$0xff] %v15651_v20  ;;  %16438 = vst [vmem:[#allocation43_spill] sm:$0xff] %v15653_v53  ;;  %v15656_v6 = vadd.f32 %v11730_v22, %v15522_v21 }
 0x532   : > { %v15658_v25 = vpop.f32.mrf.mxu1  ;;  %v7911_v56 = vpop.f32.mrf.mxu0 }
 0x533   : > { %16439 = vst [vmem:[#allocation9_spill] sm:$0xff] %v15656_v6  ;;  %16440 = vst [vmem:[#allocation8_spill] sm:$0xff] %v15658_v25  ;;  %v15661_v46 = vadd.f32 %v7911_v56, %v15525_v50 }
 0x534   : > { %v15663_v45 = vpop.f32.mrf.mxu1  ;;  %v11731_v15 = vpop.f32.mrf.mxu0 }
 0x535   : > { %16441 = vst [vmem:[#allocation11_spill] sm:$0xff] %v15661_v46  ;;  %16442 = vst [vmem:[#allocation41_spill] sm:$0xff] %v15663_v45  ;;  %v15666_v36 = vadd.f32 %v11731_v15, %v15528_v14 }
 0x536   : > { %v15668_v10 = vpop.f32.mrf.mxu1  ;;  %v7914_v33 = vpop.f32.mrf.mxu0 }
 0x537   : > { %16443 = vst [vmem:[#allocation13_spill] sm:$0xff] %v15666_v36  ;;  %16444 = vst [vmem:[#allocation36_spill] sm:$0xff] %v15668_v10  ;;  %v15671_v43 = vadd.f32 %v7914_v33, %v15532_v34 }
 0x538   : > { %v15673_v21 = vpop.f32.mrf.mxu1  ;;  %v11734_v23 = vpop.f32.mrf.mxu0 }
 0x539   : > { %16445 = vst [vmem:[#allocation15_spill] sm:$0xff] %v15671_v43  ;;  %16446 = vst [vmem:[#allocation70_spill] sm:$0xff] %v15673_v21  ;;  %v15676_v29 = vadd.f32 %v11734_v23, %v15536_v42 }
 0x53a   : > { %v15678_v50 = vpop.f32.mrf.mxu1  ;;  %v7927_v30 = vpop.f32.mrf.mxu0 }
 0x53b   : > { %16447 = vst [vmem:[#allocation67_spill] sm:$0xff] %v15676_v29  ;;  %16448 = vst [vmem:[#allocation39_spill] sm:$0xff] %v15678_v50  ;;  %v15681_v31 = vadd.f32 %v7927_v30, %v15539_v17 }
 0x53c   : > { %v15683_v14 = vpop.f32.mrf.mxu1  ;;  %v11735_v0 = vpop.f32.mrf.mxu0 }
 0x53d   : > { %16449 = vst [vmem:[#allocation12_spill] sm:$0xff] %v15681_v31  ;;  %16450 = vst [vmem:[#allocation18_spill] sm:$0xff] %v15683_v14  ;;  %v15686_v22 = vadd.f32 %v11735_v0, %v15542_v52 }
 0x53e   : > { %v15688_v34 = vpop.f32.mrf.mxu1  ;;  %v7930_v56 = vpop.f32.mrf.mxu0 }
 0x53f   : > { %16451 = vst [vmem:[#allocation45_spill] sm:$0xff] %v15686_v22  ;;  %16452 = vst [vmem:[#allocation31_spill] sm:$0xff] %v15688_v34  ;;  %v15691_v15 = vadd.f32 %v7930_v56, %v15546_v3 }
 0x540   : > { %v15693_v42 = vpop.f32.mrf.mxu1  ;;  %v11738_v33 = vpop.f32.mrf.mxu0 }
 0x541   : > { %16453 = vst [vmem:[#allocation72_spill] sm:$0xff] %v15691_v15  ;;  %16454 = vst [vmem:[#allocation16_spill] sm:$0xff] %v15693_v42  ;;  %v15696_v23 = vadd.f32 %v11738_v33, %v15551_v59 }
 0x542   : > { %v15698_v17 = vpop.f32.mrf.mxu1  ;;  %v7943_v30 = vpop.f32.mrf.mxu0 }
 0x543   : > { %16455 = vst [vmem:[#allocation42_spill] sm:$0xff] %v15696_v23  ;;  %16456 = vst [vmem:[#allocation22_spill] sm:$0xff] %v15698_v17  ;;  %v15701_v14 = vadd.f32 %v7943_v30, %v15554_v54 }
 0x544   : > { %v15703_v52 = vpop.f32.mrf.mxu1  ;;  %v11739_v0 = vpop.f32.mrf.mxu0 }
 0x545   : > { %16457 = vst [vmem:[#allocation47_spill] sm:$0xff] %v15701_v14  ;;  %16458 = vst [vmem:[#allocation46_spill] sm:$0xff] %v15703_v52  ;;  %v15706_v34 = vadd.f32 %v11739_v0, %v15557_v8 }
 0x546   : > { %v15708_v3 = vpop.f32.mrf.mxu1  ;;  %v7946_v56 = vpop.f32.mrf.mxu0 }
 0x547   : > { %16459 = vst [vmem:[#allocation69_spill] sm:$0xff] %v15706_v34  ;;  %16460 = vst [vmem:[#allocation75_spill] sm:$0xff] %v15708_v3  ;;  %v15711_v42 = vadd.f32 %v7946_v56, %v15561_v4 }
 0x548   : > { %v15713_v59 = vpop.f32.mrf.mxu1  ;;  %v11742_v33 = vpop.f32.mrf.mxu0 }
 0x549   : > { %16461 = vst [vmem:[#allocation35_spill] sm:$0xff] %v15711_v42  ;;  %16462 = vst [vmem:[#allocation14_spill] sm:$0xff] %v15713_v59  ;;  %v15716_v17 = vadd.f32 %v11742_v33, %v15564_v44 }
 0x54a   : > { %v15718_v54 = vpop.f32.mrf.mxu1  ;;  %v7959_v30 = vpop.f32.mrf.mxu0 }
 0x54b   : > { %16463 = vst [vmem:[#allocation50_spill] sm:$0xff] %v15716_v17  ;;  %16464 = vst [vmem:[#allocation33_spill] sm:$0xff] %v15718_v54  ;;  %v15721_v52 = vadd.f32 %v7959_v30, %v15567_v35 }
 0x54c   : > { %v15723_v8 = vpop.f32.mrf.mxu1  ;;  %v11743_v0 = vpop.f32.mrf.mxu0 }
 0x54d   : > { %16465 = vst [vmem:[#allocation80_spill] sm:$0xff] %v15721_v52  ;;  %16466 = vst [vmem:[#allocation66_spill] sm:$0xff] %v15723_v8  ;;  %v15726_v3 = vadd.f32 %v11743_v0, %v15570_v9 }
 0x54e   : > { %v15728_v4 = vpop.f32.mrf.mxu1  ;;  %v7962_v56 = vpop.f32.mrf.mxu0 }
 0x54f   : > { %16467 = vst [vmem:[#allocation17_spill] sm:$0xff] %v15726_v3  ;;  %16468 = vst [vmem:[#allocation68_spill] sm:$0xff] %v15728_v4  ;;  %v15731_v59 = vadd.f32 %v7962_v56, %v15573_v47 }
 0x550   : > { %v15733_v44 = vpop.f32.mrf.mxu1  ;;  %v11794_v33 = vpop.f32.mrf.mxu0 }
 0x551   : > { %16469 = vst [vmem:[#allocation34_spill] sm:$0xff] %v15731_v59  ;;  %16470 = vst [vmem:[#allocation83_spill] sm:$0xff] %v15733_v44 }
 0x552   : > { %v11834_v54 = vpop.f32.mrf.mxu1  ;;  %v8492_v17 = vpop.f32.mrf.mxu0 }
 0x554   : > { %v8814_v42 = vpop.f32.mrf.mxu1  ;;  %v11795_v35 = vpop.f32.mrf.mxu0 }
 0x556   : > { %v8495_v30 = vpop.f32.mrf.mxu0  ;;  %v11835_v52 = vpop.f32.mrf.mxu1 }
 0x558   : > { %v11798_v8 = vpop.f32.mrf.mxu0  ;;  %v15737_v9 = vpop.f32.mrf.mxu1 }
 0x55a   : > { %v15735_v34 = vpop.f32.mrf.mxu0  ;;  %v15743_v47 = vpop.f32.mrf.mxu1 }
 0x55c   : > { %v15739_v0 = vpop.f32.mrf.mxu0  ;;  %v15749_v59 = vpop.f32.mrf.mxu1 }
 0x55e   : > { %v15741_v4 = vpop.f32.mrf.mxu0  ;;  %v15755_v23 = vpop.f32.mrf.mxu1 }
 0x560   : > { %v15745_v56 = vpop.f32.mrf.mxu0  ;;  %v15761_v31 = vpop.f32.mrf.mxu1 }
 0x562   : > { %v15747_v44 = vpop.f32.mrf.mxu0  ;;  %v15767_v21 = vpop.f32.mrf.mxu1 }
 0x564   : > { %v15751_v3 = vpop.f32.mrf.mxu0  ;;  %v15773_v36 = vpop.f32.mrf.mxu1 }
 0x566   : > { %v15753_v14 = vpop.f32.mrf.mxu0  ;;  %v15779_v25 = vpop.f32.mrf.mxu1 }
 0x568   : > { %v15757_v15 = vpop.f32.mrf.mxu0 }
 0x56a   : > { %v15759_v22 = vpop.f32.mrf.mxu0 }
 0x56b   : > { %16471 = vst [vmem:[#allocation44_spill] sm:$0xff] %v15759_v22 }
 0x56c   : > { %v15763_v50 = vpop.f32.mrf.mxu0 }
 0x56d   : > { %16472 = vst [vmem:[#allocation19_spill] sm:$0xff] %v15763_v50  ;;  %v15785_v50 = vpop.f32.mrf.mxu1 }
 0x56e   : > { %v15765_v29 = vpop.f32.mrf.mxu0  ;;  %16480 = vst [vmem:[#allocation53_spill] sm:$0xff] %v15785_v50 }
 0x56f   : > { %16473 = vst [vmem:[#allocation48_spill] sm:$0xff] %v15765_v29 }
 0x570   : > { %v15769_v43 = vpop.f32.mrf.mxu0 }
 0x571   : > { %16474 = vst [vmem:[#allocation51_spill] sm:$0xff] %v15769_v43 }
 0x572   : > { %v15771_v10 = vpop.f32.mrf.mxu0 }
 0x573   : > { %16475 = vst [vmem:[#allocation49_spill] sm:$0xff] %v15771_v10  ;;  %v15791_v10 = vpop.f32.mrf.mxu1 }
 0x574   : > { %v15775_v45 = vpop.f32.mrf.mxu0  ;;  %16483 = vst [vmem:[#allocation52_spill] sm:$0xff] %v15791_v10 }
 0x575   : > { %16476 = vst [vmem:[#allocation20_spill] sm:$0xff] %v15775_v45 }
 0x576   : > { %v15777_v46 = vpop.f32.mrf.mxu0 }
 0x577   : > { %16477 = vst [vmem:[#allocation30_spill] sm:$0xff] %v15777_v46  ;;  %v15797_v46 = vpop.f32.mrf.mxu1 }
 0x578   : > { %v15781_v6 = vpop.f32.mrf.mxu0  ;;  %16486 = vst [vmem:[#allocation37_spill] sm:$0xff] %v15797_v46 }
 0x579   : > { %16478 = vst [vmem:[#allocation86_spill] sm:$0xff] %v15781_v6 }
 0x57a   : > { %v15783_v53 = vpop.f32.mrf.mxu0 }
 0x57b   : > { %16479 = vst [vmem:[#allocation21_spill] sm:$0xff] %v15783_v53  ;;  %v15803_v53 = vpop.f32.mrf.mxu1 }
 0x57c   : > { %v15787_v29 = vpop.f32.mrf.mxu0  ;;  %16489 = vst [vmem:[#allocation27_spill] sm:$0xff] %v15803_v53 }
 0x57d   : > { %16481 = vst [vmem:[#allocation71_spill] sm:$0xff] %v15787_v29  ;;  %v15813_v10 = vpop.f32.mrf.mxu1 }
 0x57e   : > { %v15789_v43 = vpop.f32.mrf.mxu0 }
 0x57f   : > { %16482 = vst [vmem:[#allocation73_spill] sm:$0xff] %v15789_v43  ;;  %v8298_v43 = vadd.f32 %v15578_v11, %v15576_v62  ;;  %v8297_v62 = vadd.f32 %v15593_v5, %v15591_v40  ;;  %v8300_v40 = vadd.f32 %v15603_v51, %v15601_v13 }
 0x580   : > { %v15793_v20 = vpop.f32.mrf.mxu0 }
 0x581   : > { %16484 = vst [vmem:[#allocation74_spill] sm:$0xff] %v15793_v20  ;;  %v8296_v20 = vadd.f32 %v15583_v49, %v15581_v63  ;;  %v15826_v63 = vpop.f32.mrf.mxu1  ;;  %v8623_v51 = vadd.f32 %v15735_v34, %v8300_v40 }
 0x582   : > { %v15795_v45 = vpop.f32.mrf.mxu0 }
 0x583   : > { %16485 = vst [vmem:[#allocation76_spill] sm:$0xff] %v15795_v45  ;;  %v8621_v45 = vadd.f32 %v11794_v33, %v8298_v43  ;;  %v9297_v43 = vld [vmem:[%s16136_s6 + $0x10] sm:$0xff] }
 0x584   : > { %v15799_v22 = vpop.f32.mrf.mxu0 }
 0x585   : > { %16487 = vst [vmem:[#allocation10_spill] sm:$0xff] %v15799_v22  ;;  %v8619_v22 = vadd.f32 %v8492_v17, %v8296_v20  ;;  %v8943_v11 = vadd.f32 %v11834_v54, %v8621_v45  ;;  %v8620_v20 = vadd.f32 %v8495_v30, %v8297_v62 }
 0x586   : > { %v15801_v6 = vpop.f32.mrf.mxu0 }
 0x587   : > { %16488 = vst [vmem:[#allocation55_spill] sm:$0xff] %v15801_v6  ;;  %v8299_v6 = vadd.f32 %v15588_v28, %v15586_v57  ;;  %v8302_v57 = vadd.f32 %v15598_v24, %v15596_v55  ;;  %v8941_v28 = vadd.f32 %v8814_v42, %v8619_v22  ;;  %v9298_v24 = vld [vmem:[%s16136_s6 + $0x18] sm:$0xff]  ;;  %v8942_v13 = vadd.f32 %v15737_v9, %v8620_v20  ;;  %v9296_v42 = vld [vmem:[%s16136_s6 + $0x8] sm:$0xff] }
 0x588   : > { %v15805_v50 = vpop.f32.mrf.mxu0  ;;  %v8306_v9 = vadd.f32 %v15618_v19, %v15616_v60  ;;  %v9299_v60 = vld [vmem:[%s16136_s6 + $0x20] sm:$0xff] }
 0x589   : > { %v8625_v54 = vadd.f32 %v11798_v8, %v8302_v57 }
 0x58a   : > { %v15809_v29 = vpop.f32.mrf.mxu0  ;;  %v8629_v57 = vadd.f32 %v15745_v56, %v8306_v9 }
 0x58b   : > { %16490 = vst [vmem:[#allocation23_spill] sm:$0xff] %v15809_v29  ;;  %v8622_v29 = vadd.f32 %v11795_v35, %v8299_v6  ;;  %v9295_v6 = vld [vmem:[%s16136_s6] sm:$0xff] }
 0x58c   : > { %v15815_v46 = vpop.f32.mrf.mxu0 }
 0x58d   : > { %16491 = vst [vmem:[#allocation54_spill] sm:$0xff] %v15815_v46  ;;  %v8944_v45 = vadd.f32 %v11835_v52, %v8622_v29  ;;  %v15840_v46 = vpop.f32.mrf.mxu1  ;;  %v8947_v52 = vadd.f32 %v15743_v47, %v8625_v54  ;;  %v8310_v54 = vadd.f32 %v15638_v41, %v15636_v37  ;;  %v9303_v37 = vld [vmem:[%s16136_s6 + $0x40] sm:$0xff] }
 0x58e   : > { %v15820_v53 = vpop.f32.mrf.mxu0 }
 0x58f   : > { %16492 = vst [vmem:[#allocation77_spill] sm:$0xff] %v15820_v53  ;;  %v8303_v53 = vadd.f32 %v15608_v7, %v15606_v32  ;;  %v8301_v32 = vadd.f32 %v15613_v58, %v15611_v16  ;;  %v15860_v62 = vpop.f32.mrf.mxu1  ;;  %v9301_v16 = vld [vmem:[%s16136_s6 + $0x30] sm:$0xff]  ;;  %v8945_v58 = vadd.f32 %v15749_v59, %v8623_v51  ;;  %v8633_v51 = vadd.f32 %v15757_v15, %v8310_v54 }
 0x590   : > { %v11874_v49 = vpop.f32.mrf.mxu0 }
 0x591   : > { %v9265_v17 = vadd.f32 %v11874_v49, %v8943_v11  ;;  %v8626_v34 = vadd.f32 %v15739_v0, %v8303_v53  ;;  %v8624_v47 = vadd.f32 %v15741_v4, %v8301_v32  ;;  %v8304_v49 = vadd.f32 %v15623_v26, %v15621_v18  ;;  %v15878_v20 = vpop.f32.mrf.mxu1  ;;  %v9302_v18 = vld [vmem:[%s16136_s6 + $0x38] sm:$0xff] }
 0x592   : > { %v9136_v5 = vpop.f32.mrf.mxu0 }
 0x593   : > { %v9329_v33 = vadd.f32 %v9297_v43, %v9265_v17  ;;  %v9263_v35 = vadd.f32 %v9136_v5, %v8941_v28  ;;  %v8948_v19 = vadd.f32 %v15755_v23, %v8626_v34  ;;  %v8307_v28 = vadd.f32 %v15628_v12, %v15626_v39  ;;  %v9300_v39 = vld [vmem:[%s16136_s6 + $0x28] sm:$0xff]  ;;  %v16495_v34 = vld [vmem:[#allocation40_spill] sm:$0xff] }
 0x594   : > { %v11875_v55 = vpop.f32.mrf.mxu0  ;;  %v8946_v26 = vadd.f32 %v15761_v31, %v8624_v47  ;;  %v8627_v23 = vadd.f32 %v15747_v44, %v8304_v49  ;;  %v8305_v5 = vadd.f32 %v15633_v2, %v15631_v27  ;;  %v8951_v12 = vadd.f32 %v15767_v21, %v8629_v57  ;;  %v9305_v27 = vld [vmem:[%s16136_s6 + $0x50] sm:$0xff] }
 0x595   : > { %9361 = vst [vmem:[%s15847_s23 + $0x10] sm:$0xff] %v9329_v33  ;;  %v9327_v29 = vadd.f32 %v9295_v6, %v9263_v35  ;;  %v9266_v22 = vadd.f32 %v11875_v55, %v8944_v45  ;;  %v8630_v45 = vadd.f32 %v15751_v3, %v8307_v28  ;;  %v15896_v33 = vpop.f32.mrf.mxu1  ;;  %v16500_v49 = vld [vmem:[#allocation8_spill] sm:$0xff] }
 0x596   : > { %v9139_v7 = vpop.f32.mrf.mxu0  ;;  %v8949_v2 = vadd.f32 %v15773_v36, %v8627_v23  ;;  %v8628_v21 = vadd.f32 %v15753_v14, %v8305_v5  ;;  %v9309_v57 = vld [vmem:[%s16136_s6 + $0x70] sm:$0xff]  ;;  %v16503_v23 = vld [vmem:[#allocation11_spill] sm:$0xff] }
 0x597   : > { %9359 = vst [vmem:[%s15847_s23] sm:$0xff] %v9327_v29  ;;  %v9330_v8 = vadd.f32 %v9298_v24, %v9266_v22  ;;  %v9264_v30 = vadd.f32 %v9139_v7, %v8942_v13  ;;  %v8308_v24 = vadd.f32 %v15643_v38, %v15641_v1  ;;  %v8952_v41 = vadd.f32 %v15779_v25, %v8630_v45  ;;  %v15914_v22 = vpop.f32.mrf.mxu1  ;;  %v9306_v1 = vld [vmem:[%s16136_s6 + $0x58] sm:$0xff]  ;;  %v16502_v28 = vld [vmem:[#allocation48_spill] sm:$0xff]  ;;  %v16506_v45 = vld [vmem:[#allocation51_spill] sm:$0xff] }
 0x598   : > { %v11878_v11 = vpop.f32.mrf.mxu0  ;;  %v8311_v29 = vadd.f32 %v15648_v48, %v15646_v61  ;;  %v16493_v38 = vld [vmem:[#allocation53_spill] sm:$0xff]  ;;  %v9304_v61 = vld [vmem:[%s16136_s6 + $0x48] sm:$0xff]  ;;  %v16497_v48 = vld [vmem:[#allocation52_spill] sm:$0xff] }
 0x599   : > { %9362 = vst [vmem:[%s15847_s23 + $0x18] sm:$0xff] %v9330_v8  ;;  %v9328_v53 = vadd.f32 %v9296_v42, %v9264_v30  ;;  %v9269_v0 = vadd.f32 %v11878_v11, %v8947_v52  ;;  %v8950_v7 = vadd.f32 %v16493_v38, %v8628_v21  ;;  %v16494_v42 = vld [vmem:[#allocation44_spill] sm:$0xff]  ;;  %v16496_v8 = vld [vmem:[#allocation43_spill] sm:$0xff]  ;;  %v8955_v11 = vadd.f32 %v16497_v48, %v8633_v51  ;;  %v16515_v48 = vld [vmem:[#allocation30_spill] sm:$0xff] }
 0x59a   : > { %v9152_v43 = vpop.f32.mrf.mxu0  ;;  %v8631_v25 = vadd.f32 %v16494_v42, %v8308_v24  ;;  %v8309_v30 = vadd.f32 %v16496_v8, %v16495_v34 }
 0x59b   : > { %9360 = vst [vmem:[%s15847_s23 + $0x8] sm:$0xff] %v9328_v53  ;;  %v9333_v59 = vadd.f32 %v9301_v16, %v9269_v0  ;;  %v9267_v4 = vadd.f32 %v9152_v43, %v8945_v58  ;;  %v16498_v16 = vld [vmem:[#allocation19_spill] sm:$0xff]  ;;  %v16499_v0 = vld [vmem:[#allocation9_spill] sm:$0xff] }
 0x59c   : > { %v11879_v17 = vpop.f32.mrf.mxu0  ;;  %v8634_v58 = vadd.f32 %v16498_v16, %v8311_v29  ;;  %v8314_v43 = vadd.f32 %v16500_v49, %v16499_v0  ;;  %v9311_v49 = vld [vmem:[%s16136_s6 + $0x80] sm:$0xff] }
 0x59d   : > { %9365 = vst [vmem:[%s15847_s23 + $0x30] sm:$0xff] %v9333_v59  ;;  %v9331_v56 = vadd.f32 %v9299_v60, %v9267_v4  ;;  %v9270_v40 = vadd.f32 %v11879_v17, %v8948_v19  ;;  %v15932_v60 = vpop.f32.mrf.mxu1  ;;  %v16501_v59 = vld [vmem:[#allocation37_spill] sm:$0xff]  ;;  %v8632_v17 = vadd.f32 %v16502_v28, %v8309_v30  ;;  %v16520_v28 = vld [vmem:[#allocation31_spill] sm:$0xff] }
 0x59e   : > { %v9155_v6 = vpop.f32.mrf.mxu0  ;;  %v8953_v4 = vadd.f32 %v16501_v59, %v8631_v25 }
 0x59f   : > { %9363 = vst [vmem:[%s15847_s23 + $0x20] sm:$0xff] %v9331_v56  ;;  %v9334_v31 = vadd.f32 %v9302_v18, %v9270_v40  ;;  %v9268_v44 = vadd.f32 %v9155_v6, %v8946_v26  ;;  %v16504_v56 = vld [vmem:[#allocation41_spill] sm:$0xff]  ;;  %v9307_v6 = vld [vmem:[%s16136_s6 + $0x60] sm:$0xff]  ;;  %v15950_v21 = vpop.f32.mrf.mxu1  ;;  %v8954_v24 = vadd.f32 %v15813_v10, %v8632_v17 }
 0x5a0   : > { %v11882_v35 = vpop.f32.mrf.mxu0  ;;  %v8312_v40 = vadd.f32 %v16504_v56, %v16503_v23  ;;  %v9314_v23 = vld [vmem:[%s16136_s6 + $0x98] sm:$0xff] }
 0x5a1   : > { %9366 = vst [vmem:[%s15847_s23 + $0x38] sm:$0xff] %v9334_v31  ;;  %v9332_v3 = vadd.f32 %v9300_v39, %v9268_v44  ;;  %v9273_v55 = vadd.f32 %v11882_v35, %v8951_v12  ;;  %v16505_v39 = vld [vmem:[#allocation27_spill] sm:$0xff]  ;;  %v8637_v31 = vadd.f32 %v16506_v45, %v8314_v43  ;;  %v16507_v35 = vld [vmem:[#allocation13_spill] sm:$0xff]  ;;  %v15968_v8 = vpop.f32.mrf.mxu1 }
 0x5a2   : > { %v9168_v13 = vpop.f32.mrf.mxu0  ;;  %v8956_v12 = vadd.f32 %v16505_v39, %v8634_v58  ;;  %v16516_v58 = vld [vmem:[#allocation12_spill] sm:$0xff] }
 0x5a3   : > { %9364 = vst [vmem:[%s15847_s23 + $0x28] sm:$0xff] %v9332_v3  ;;  %v9337_v36 = vadd.f32 %v9305_v27, %v9273_v55  ;;  %v9271_v14 = vadd.f32 %v9168_v13, %v8949_v2  ;;  %v16508_v27 = vld [vmem:[#allocation36_spill] sm:$0xff]  ;;  %v9310_v55 = vld [vmem:[%s16136_s6 + $0x78] sm:$0xff]  ;;  %v8959_v38 = vadd.f32 %v15826_v63, %v8637_v31 }
 0x5a4   : > { %v11883_v32 = vpop.f32.mrf.mxu0  ;;  %v8315_v2 = vadd.f32 %v16508_v27, %v16507_v35  ;;  %v16509_v13 = vld [vmem:[#allocation49_spill] sm:$0xff]  ;;  %v16522_v39 = vld [vmem:[#allocation72_spill] sm:$0xff]  ;;  %v16524_v35 = vld [vmem:[#allocation71_spill] sm:$0xff] }
 0x5a5   : > { %9369 = vst [vmem:[%s15847_s23 + $0x50] sm:$0xff] %v9337_v36  ;;  %v9335_v15 = vadd.f32 %v9303_v37, %v9271_v14  ;;  %v9274_v52 = vadd.f32 %v11883_v32, %v8952_v41  ;;  %v8635_v37 = vadd.f32 %v16509_v13, %v8312_v40  ;;  %v16510_v36 = vld [vmem:[#allocation15_spill] sm:$0xff]  ;;  %v16511_v14 = vld [vmem:[#allocation70_spill] sm:$0xff]  ;;  %v16521_v40 = vld [vmem:[#allocation21_spill] sm:$0xff] }
 0x5a6   : > { %v9171_v9 = vpop.f32.mrf.mxu0  ;;  %v8313_v29 = vadd.f32 %v16511_v14, %v16510_v36  ;;  %v16527_v36 = vld [vmem:[#allocation73_spill] sm:$0xff] }
 0x5a7   : > { %9367 = vst [vmem:[%s15847_s23 + $0x40] sm:$0xff] %v9335_v15  ;;  %v9338_v47 = vadd.f32 %v9306_v1, %v9274_v52  ;;  %v9272_v53 = vadd.f32 %v9171_v9, %v8950_v7  ;;  %v9308_v1 = vld [vmem:[%s16136_s6 + $0x68] sm:$0xff]  ;;  %v16512_v7 = vld [vmem:[#allocation20_spill] sm:$0xff] }
 0x5a8   : > { %v11886_v19 = vpop.f32.mrf.mxu0  ;;  %v8638_v42 = vadd.f32 %v16512_v7, %v8315_v2  ;;  %v16513_v15 = vld [vmem:[#allocation67_spill] sm:$0xff]  ;;  %v9313_v9 = vld [vmem:[%s16136_s6 + $0x90] sm:$0xff]  ;;  %v8636_v63 = vadd.f32 %v16515_v48, %v8313_v29 }
 0x5a9   : > { %9370 = vst [vmem:[%s15847_s23 + $0x58] sm:$0xff] %v9338_v47  ;;  %v9336_v18 = vadd.f32 %v9304_v61, %v9272_v53  ;;  %v9277_v26 = vadd.f32 %v11886_v19, %v8955_v11  ;;  %v16514_v52 = vld [vmem:[#allocation39_spill] sm:$0xff]  ;;  %v8957_v61 = vadd.f32 %v15840_v46, %v8635_v37  ;;  %v16517_v47 = vld [vmem:[#allocation18_spill] sm:$0xff] }
 0x5aa   : > { %v9184_v5 = vpop.f32.mrf.mxu0  ;;  %v8318_v34 = vadd.f32 %v16514_v52, %v16513_v15  ;;  %v8316_v53 = vadd.f32 %v16517_v47, %v16516_v58  ;;  %v8960_v43 = vadd.f32 %v15860_v62, %v8638_v42  ;;  %v16518_v19 = vld [vmem:[#allocation86_spill] sm:$0xff]  ;;  %v8958_v56 = vadd.f32 %v15878_v20, %v8636_v63  ;;  %v9318_v63 = vld [vmem:[%s16136_s6 + $0xb8] sm:$0xff] }
 0x5ab   : > { %9368 = vst [vmem:[%s15847_s23 + $0x48] sm:$0xff] %v9336_v18  ;;  %v9341_v44 = vadd.f32 %v9309_v57, %v9277_v26  ;;  %v9275_v54 = vadd.f32 %v9184_v5, %v8953_v4  ;;  %v16519_v4 = vld [vmem:[#allocation45_spill] sm:$0xff]  ;;  %v8910_v18 = vpop.f32.mrf.mxu1  ;;  %v9315_v42 = vld [vmem:[%s16136_s6 + $0xa0] sm:$0xff] }
 0x5ac   : > { %v11887_v3 = vpop.f32.mrf.mxu0  ;;  %v8641_v57 = vadd.f32 %v16518_v19, %v8318_v34  ;;  %v8319_v17 = vadd.f32 %v16520_v28, %v16519_v4  ;;  %v8639_v5 = vadd.f32 %v16521_v40, %v8316_v53  ;;  %v16531_v34 = vld [vmem:[#allocation69_spill] sm:$0xff]  ;;  %v16534_v53 = vld [vmem:[#allocation35_spill] sm:$0xff]  ;;  %v9321_v40 = vld [vmem:[%s16136_s6 + $0xd0] sm:$0xff] }
 0x5ad   : > { %9373 = vst [vmem:[%s15847_s23 + $0x70] sm:$0xff] %v9341_v44  ;;  %v9339_v41 = vadd.f32 %v9307_v6, %v9275_v54  ;;  %v9278_v51 = vadd.f32 %v11887_v3, %v8956_v12  ;;  %v16523_v12 = vld [vmem:[#allocation16_spill] sm:$0xff]  ;;  %v9312_v44 = vld [vmem:[%s16136_s6 + $0x88] sm:$0xff]  ;;  %v16525_v3 = vld [vmem:[#allocation42_spill] sm:$0xff]  ;;  %v11859_v13 = vpop.f32.mrf.mxu1 }
 0x5ae   : > { %v9187_v32 = vpop.f32.mrf.mxu0  ;;  %v8317_v45 = vadd.f32 %v16523_v12, %v16522_v39  ;;  %v8963_v54 = vadd.f32 %v15896_v33, %v8641_v57  ;;  %v8642_v27 = vadd.f32 %v16524_v35, %v8319_v17  ;;  %v9316_v57 = vld [vmem:[%s16136_s6 + $0xa8] sm:$0xff]  ;;  %v16537_v17 = vld [vmem:[#allocation50_spill] sm:$0xff]  ;;  %v16540_v12 = vld [vmem:[#allocation80_spill] sm:$0xff] }
 0x5af   : > { %9371 = vst [vmem:[%s15847_s23 + $0x60] sm:$0xff] %v9339_v41  ;;  %v9342_v10 = vadd.f32 %v9310_v55, %v9278_v51  ;;  %v9276_v25 = vadd.f32 %v9187_v32, %v8954_v24  ;;  %v16526_v55 = vld [vmem:[#allocation22_spill] sm:$0xff]  ;;  %v9317_v41 = vld [vmem:[%s16136_s6 + $0xb0] sm:$0xff]  ;;  %v8961_v51 = vadd.f32 %v15914_v22, %v8639_v5  ;;  %v16528_v32 = vld [vmem:[#allocation47_spill] sm:$0xff] }
 0x5b0   : > { %v11890_v30 = vpop.f32.mrf.mxu0  ;;  %v8322_v24 = vadd.f32 %v16526_v55, %v16525_v3  ;;  %v8640_v14 = vadd.f32 %v16527_v36, %v8317_v45  ;;  %v16541_v45 = vld [vmem:[#allocation66_spill] sm:$0xff]  ;;  %v16542_v3 = vld [vmem:[#allocation17_spill] sm:$0xff]  ;;  %v16543_v55 = vld [vmem:[#allocation68_spill] sm:$0xff] }
 0x5b1   : > { %9374 = vst [vmem:[%s15847_s23 + $0x78] sm:$0xff] %v9342_v10  ;;  %v9340_v11 = vadd.f32 %v9308_v1, %v9276_v25  ;;  %v9281_v16 = vadd.f32 %v11890_v30, %v8959_v38  ;;  %v16529_v1 = vld [vmem:[#allocation46_spill] sm:$0xff]  ;;  %v8964_v10 = vadd.f32 %v15932_v60, %v8642_v27  ;;  %v16532_v30 = vld [vmem:[#allocation75_spill] sm:$0xff] }
 0x5b2   : > { %v9200_v0 = vpop.f32.mrf.mxu0  ;;  %v8320_v38 = vadd.f32 %v16529_v1, %v16528_v32  ;;  %v16530_v25 = vld [vmem:[#allocation74_spill] sm:$0xff]  ;;  %v16544_v36 = vld [vmem:[#allocation23_spill] sm:$0xff] }
 0x5b3   : > { %9372 = vst [vmem:[%s15847_s23 + $0x68] sm:$0xff] %v9340_v11  ;;  %v9345_v46 = vadd.f32 %v9313_v9, %v9281_v16  ;;  %v9279_v59 = vadd.f32 %v9200_v0, %v8957_v61  ;;  %v8645_v15 = vadd.f32 %v16530_v25, %v8322_v24  ;;  %v8323_v9 = vadd.f32 %v16532_v30, %v16531_v34  ;;  %v8913_v61 = vpop.f32.mrf.mxu1  ;;  %v16533_v16 = vld [vmem:[#allocation76_spill] sm:$0xff]  ;;  %v16535_v0 = vld [vmem:[#allocation14_spill] sm:$0xff] }
 0x5b4   : > { %v11891_v26 = vpop.f32.mrf.mxu0  ;;  %v8962_v11 = vadd.f32 %v15950_v21, %v8640_v14  ;;  %v8643_v58 = vadd.f32 %v16533_v16, %v8320_v38  ;;  %v9319_v35 = vld [vmem:[%s16136_s6 + $0xc0] sm:$0xff]  ;;  %v8327_v24 = vadd.f32 %v16543_v55, %v16542_v3  ;;  %v9325_v34 = vld [vmem:[%s16136_s6 + $0xf0] sm:$0xff] }
 0x5b5   : > { %9377 = vst [vmem:[%s15847_s23 + $0x90] sm:$0xff] %v9345_v46  ;;  %v9343_v62 = vadd.f32 %v9311_v49, %v9279_v59  ;;  %v9282_v6 = vadd.f32 %v11891_v26, %v8960_v43  ;;  %v8321_v49 = vadd.f32 %v16535_v0, %v16534_v53  ;;  %v11862_v43 = vpop.f32.mrf.mxu1  ;;  %v8967_v46 = vadd.f32 %v15968_v8, %v8645_v15  ;;  %v16536_v59 = vld [vmem:[#allocation10_spill] sm:$0xff]  ;;  %v16538_v26 = vld [vmem:[#allocation33_spill] sm:$0xff] }
 0x5b6   : > { %v9203_v31 = vpop.f32.mrf.mxu0  ;;  %v8646_v4 = vadd.f32 %v16536_v59, %v8323_v9  ;;  %v8965_v5 = vadd.f32 %v8910_v18, %v8643_v58  ;;  %v16548_v9 = vld [vmem:[#allocation77_spill] sm:$0xff]  ;;  %v9323_v58 = vld [vmem:[%s16136_s6 + $0xe0] sm:$0xff]  ;;  %v9324_v59 = vld [vmem:[%s16136_s6 + $0xe8] sm:$0xff] }
 0x5b7   : > { %9375 = vst [vmem:[%s15847_s23 + $0x80] sm:$0xff] %v9343_v62  ;;  %v9346_v20 = vadd.f32 %v9314_v23, %v9282_v6  ;;  %v9280_v2 = vadd.f32 %v9203_v31, %v8958_v56  ;;  %v8326_v23 = vadd.f32 %v16538_v26, %v16537_v17  ;;  %v16539_v62 = vld [vmem:[#allocation55_spill] sm:$0xff]  ;;  %v8324_v31 = vadd.f32 %v16541_v45, %v16540_v12 }
 0x5b8   : > { %v11894_v37 = vpop.f32.mrf.mxu0  ;;  %v8644_v6 = vadd.f32 %v16539_v62, %v8321_v49  ;;  %v8968_v27 = vadd.f32 %v11859_v13, %v8646_v4  ;;  %v9326_v49 = vld [vmem:[%s16136_s6 + $0xf8] sm:$0xff] }
 0x5b9   : > { %9378 = vst [vmem:[%s15847_s23 + $0x98] sm:$0xff] %v9346_v20  ;;  %v9344_v33 = vadd.f32 %v9312_v44, %v9280_v2  ;;  %v9285_v29 = vadd.f32 %v11894_v37, %v8963_v54  ;;  %v8926_v44 = vpop.f32.mrf.mxu1  ;;  %v8649_v20 = vadd.f32 %v15805_v50, %v8326_v23  ;;  %v8647_v14 = vadd.f32 %v16544_v36, %v8324_v31  ;;  %v16545_v50 = vld [vmem:[#allocation34_spill] sm:$0xff] }
 0x5ba   : > { %v9216_v7 = vpop.f32.mrf.mxu0 }
 0x5bb   : > { %9376 = vst [vmem:[%s15847_s23 + $0x88] sm:$0xff] %v9344_v33  ;;  %v9349_v22 = vadd.f32 %v9317_v41, %v9285_v29  ;;  %v9283_v52 = vadd.f32 %v9216_v7, %v8961_v51  ;;  %v9322_v41 = vld [vmem:[%s16136_s6 + $0xd8] sm:$0xff]  ;;  %v8966_v51 = vadd.f32 %v8913_v61, %v8644_v6  ;;  %v16546_v29 = vld [vmem:[#allocation83_spill] sm:$0xff]  ;;  %v11863_v1 = vpop.f32.mrf.mxu1  ;;  %v8969_v30 = vadd.f32 %v8926_v44, %v8647_v14 }
 0x5bc   : > { %v11895_v48 = vpop.f32.mrf.mxu0  ;;  %v8325_v32 = vadd.f32 %v16546_v29, %v16545_v50  ;;  %v9320_v7 = vld [vmem:[%s16136_s6 + $0xc8] sm:$0xff] }
 0x5bd   : > { %9381 = vst [vmem:[%s15847_s23 + $0xb0] sm:$0xff] %v9349_v22  ;;  %v9347_v60 = vadd.f32 %v9315_v42, %v9283_v52  ;;  %v9286_v47 = vadd.f32 %v11895_v48, %v8964_v10  ;;  %v8971_v42 = vadd.f32 %v11862_v43, %v8649_v20  ;;  %v16547_v10 = vld [vmem:[#allocation54_spill] sm:$0xff] }
 0x5be   : > { %v9219_v19 = vpop.f32.mrf.mxu0  ;;  %v8650_v25 = vadd.f32 %v16547_v10, %v8327_v24  ;;  %v8648_v61 = vadd.f32 %v16548_v9, %v8325_v32 }
 0x5bf   : > { %9379 = vst [vmem:[%s15847_s23 + $0xa0] sm:$0xff] %v9347_v60  ;;  %v9350_v21 = vadd.f32 %v9318_v63, %v9286_v47  ;;  %v9284_v28 = vadd.f32 %v9219_v19, %v8962_v11  ;;  %v8929_v11 = vpop.f32.mrf.mxu1 }
 0x5c0   : > { %v11898_v56 = vpop.f32.mrf.mxu0  ;;  %v8972_v60 = vadd.f32 %v11863_v1, %v8650_v25  ;;  %v8970_v43 = vadd.f32 %v8929_v11, %v8648_v61 }
 0x5c1   : > { %9382 = vst [vmem:[%s15847_s23 + $0xb8] sm:$0xff] %v9350_v21  ;;  %v9348_v39 = vadd.f32 %v9316_v57, %v9284_v28  ;;  %v9289_v8 = vadd.f32 %v11898_v56, %v8967_v46 }
 0x5c2   : > { %v9232_v54 = vpop.f32.mrf.mxu0 }
 0x5c3   : > { %9380 = vst [vmem:[%s15847_s23 + $0xa8] sm:$0xff] %v9348_v39  ;;  %v9353_v18 = vadd.f32 %v9321_v40, %v9289_v8  ;;  %v9287_v2 = vadd.f32 %v9232_v54, %v8965_v5 }
 0x5c4   : > { %v11899_v37 = vpop.f32.mrf.mxu0 }
 0x5c5   : > { %9385 = vst [vmem:[%s15847_s23 + $0xd0] sm:$0xff] %v9353_v18  ;;  %v9351_v13 = vadd.f32 %v9319_v35, %v9287_v2  ;;  %v9290_v33 = vadd.f32 %v11899_v37, %v8968_v27 }
 0x5c6   : > { %v9235_v38 = vpop.f32.mrf.mxu0 }
 0x5c7   : > { %9383 = vst [vmem:[%s15847_s23 + $0xc0] sm:$0xff] %v9351_v13  ;;  %v9354_v15 = vadd.f32 %v9322_v41, %v9290_v33  ;;  %v9288_v22 = vadd.f32 %v9235_v38, %v8966_v51 }
 0x5c8   : > { %v11902_v52 = vpop.f32.mrf.mxu0 }
 0x5c9   : > { %9386 = vst [vmem:[%s15847_s23 + $0xd8] sm:$0xff] %v9354_v15  ;;  %v9352_v48 = vadd.f32 %v9320_v7, %v9288_v22  ;;  %v9293_v63 = vadd.f32 %v11902_v52, %v8971_v42 }
 0x5ca   : > { %v9248_v16 = vpop.f32.mrf.mxu0 }
 0x5cb   : > { %9384 = vst [vmem:[%s15847_s23 + $0xc8] sm:$0xff] %v9352_v48  ;;  %v9357_v47 = vadd.f32 %v9325_v34, %v9293_v63  ;;  %v9291_v53 = vadd.f32 %v9248_v16, %v8969_v30 }
 0x5cc   : > { %v11903_v0 = vpop.f32.mrf.mxu0 }
 0x5cd   : > { %9389 = vst [vmem:[%s15847_s23 + $0xf0] sm:$0xff] %v9357_v47  ;;  %v9355_v19 = vadd.f32 %v9323_v58, %v9291_v53  ;;  %v9294_v57 = vadd.f32 %v11903_v0, %v8972_v60 }
 0x5ce   : > { %v9251_v46 = vpop.f32.mrf.mxu0 }
 0x5cf   : > { %9387 = vst [vmem:[%s15847_s23 + $0xe0] sm:$0xff] %v9355_v19  ;;  %v9358_v4 = vadd.f32 %v9326_v49, %v9294_v57  ;;  %v9292_v21 = vadd.f32 %v9251_v46, %v8970_v43 }
 0x5d1   : > { %9390 = vst [vmem:[%s15847_s23 + $0xf8] sm:$0xff] %v9358_v4  ;;  %v9356_v28 = vadd.f32 %v9324_v59, %v9292_v21 }
 0x5d3   : > { %9388 = vst [vmem:[%s15847_s23 + $0xe8] sm:$0xff] %v9356_v28 }
 0x5d4   : > { %12089 = shalt.err (!%p12086_p3)
}
 0x5d5   : > { %s12090_s13 = scalar_lea.hbm %s16082_s9, 4096  ;;  %s12094_s19 = scalar_lea.hbm %s16137_s7, 8192 }
 0x5d6   : > { %p12091_p4 = scmp.ne.s32.totalorder %s16082_s9, %s12090_s13  ;;  %p12095_p9 = scmp.lt.s32.totalorder %s16082_s9, %s16137_s7 }
 0x5d7   : > { %p12096_p10 = scmp.lt.s32.totalorder %s12094_s19, %s12090_s13 }
 0x5d8   : > { %p12092_p7 = pnand %p12091_p4, %p12220_p5 }
 0x5d9   : > { %p12097_p11 = por %p12096_p10, %p12095_p9 }
 0x5da   : > { %p12093_p8 = pneg %p12092_p7 }
 0x5dc   : > { %p12098_p12 = pnand %p12097_p11, %p12093_p8 }
 0x5de   : > { %12101 = shalt.err (!%p12098_p12)
}
 0x5df   : > { %s12140_s29 = smov 128   ;;  %s12141_s8 = smov 8  }
 0x5e0   : > { %11926 = dma.vmem_to_hbm [thread:$0]  (%p12220_p5), %s16084_s20, 4096, %s16082_s9, %s16090_s28, %s12140_s29, %s12140_s29, %s12141_s8  }
 0x5e1 PF: > { %p11932_p13 = scmp.ge.s32.totalorder %s12136_s27, 2  ;;  %s9420_s14 = sand.u32 1, %s12124_s24  }
 0x5e2   : > { %s9421_s15 = scalar_lea.sflag [#allocation6], %s9420_s14 }
 0x5e3   : > { %p11929_p0 = pnand %p11932_p13, %p12224_p6 }
 0x5e5   : > { %p11930_p1 = pneg %p11929_p0 }
 0x5e7   : > { %12119 = dma.done.wait (%p11930_p1), %s9421_s15, 4096  }
 0x5e8   : > { %12121 = vsyncadd (%p11930_p1), %s9421_s15, 4294963200  ;;  %p17_p2 = scmp.ge.s32.totalorder %s12207_s30, 4   ;;  %s16549_s24 = smov %s12128_s25 }
 0x5e9   : > { %s16550_s25 = smov %s12132_s26  ;;  %s16551_s26 = smov %s12218_s10 }
 0x5ea   : > { %s16552_s27 = smov %s12207_s30  ;;  %19 = sbr.rel (!%p17_p2) target bundleno = 3 (0x3), region = 113 }
 0x5ef   :  { %9426 = vsyncpa [#allocation6], 1 }
 0x5f0   :  { %9428 = vsyncpa [#allocation6 + $0x1], 1 }

</bundles_post_ra>
